<compile_context>
chip_gen: v7x
topology: tpu7x:2x2x1
jax: 0.10.0
libtpu: 0.0.40
codegen_flags: <defaults>
</compile_context>

<pallas_src>
import functools
import math

import jax
import jax.numpy as jnp
from jax.experimental import pallas as pl
from jax.experimental.pallas import tpu as pltpu


# --------------------------------------------------------------------------
# configuration
# --------------------------------------------------------------------------
# Scaled-down DMDAE (same structure as the PyTorch module).  The original
# full-size configuration is
#   ENC = [(1,64),(64,128),(128,256),(256,512),(512,512),(512,512),(512,512)]
#   DEC = [(512,512),(512,512),(512,512),(512,256),(256,128),(128,64),(64,1)]
#   FCL1=[(512*3*6,3)]  FCL2=[(3,1024),(1024,3)]
#   FCL3=[(3,1000),(1000,4096),(4096,512*3*6)]  input 1x384x768,
# which this code also supports unchanged.
BOT_H, BOT_W = 3, 6
ENC = [(1, 16), (16, 32), (32, 32)]
DEC = [(32, 32), (32, 16), (16, 1)]
FCL1 = [(ENC[-1][1] * BOT_H * BOT_W, 3)]
FCL2 = [(3, 64), (64, 3)]
FCL3 = [(3, 64), (64, 128), (128, DEC[0][0] * BOT_H * BOT_W)]

_VMEM_LIMIT = 48 * 1024 * 1024  # fits v5e/v6e/v7x scoped/physical budgets


# --------------------------------------------------------------------------
# in-kernel math
# --------------------------------------------------------------------------
def _erf_f32(z):
    # float32-accurate erf (Abramowitz & Stegun 7.1.26, |err| <= 1.5e-7);
    # reproduces the exact (erf-based) nn.GELU without relying on a Mosaic
    # erf lowering.
    a1, a2, a3, a4, a5 = (0.254829592, -0.284496736, 1.421413741,
                          -1.453152027, 1.061405429)
    p = 0.3275911
    s = jnp.where(z >= 0.0, 1.0, -1.0)
    za = jnp.abs(z)
    t = 1.0 / (1.0 + p * za)
    poly = ((((a5 * t + a4) * t + a3) * t + a2) * t + a1) * t
    return s * (1.0 - poly * jnp.exp(-za * za))


def _gelu(x):
    return 0.5 * x * (1.0 + _erf_f32(x * 0.7071067811865476))


# --------------------------------------------------------------------------
# fused 3x3 conv (+ optional GELU, + optional fused row-direction maxpool)
# --------------------------------------------------------------------------
def _conv_row_kernel(*refs, W, C, Cout, CoutP, apply_gelu, pool_h):
    """One grid step = one output row (or one pooled output row).

    refs = n_rows x input-row refs [(W+2, C)], weight ref [(9*C, CoutP)],
           bias ref [(1, CoutP)], output ref [(W, Cout)].
    """
    n_rows = 4 if pool_h else 3
    rows = refs[:n_rows]
    w_ref, b_ref, o_ref = refs[n_rows], refs[n_rows + 1], refs[n_rows + 2]
    bias = b_ref[...]  # [1, CoutP]

    def conv_row(top):
        acc = None
        for ky in range(3):
            src = rows[top + ky]
            for kx in range(3):
                lhs = src[pl.ds(kx, W), :]                       # [W, C]
                wt = w_ref[pl.ds((ky * 3 + kx) * C, C), :]       # [C, CoutP]
                if C == 1:
                    # Cin = 1: a K=1 matmul wastes the MXU; do the outer
                    # product on the VPU instead (review item).
                    term = lhs * wt
                else:
                    term = jnp.dot(lhs, wt,
                                   preferred_element_type=jnp.float32)
                acc = term if acc is None else acc + term
        acc = acc + bias
        return _gelu(acc) if apply_gelu else acc

    out = conv_row(0)
    if pool_h:
        # fused MaxPool2d(2) row direction: max of the two conv rows.
        out = jnp.maximum(out, conv_row(1))
    if CoutP != Cout:
        # lane-dense compute, but only the real channels are written to HBM.
        out = out[:, :Cout]
    o_ref[...] = out.astype(o_ref.dtype)


def conv3x3(x_pad, w_mat, b, *, apply_gelu, pool_h):
    """3x3 conv, stride 1, over a replicate-padded NHWC input.

    x_pad : [B, H+2, W+2, C]  (already padded)
    w_mat : [9*C, Cout]  rows ordered (ky, kx, cin)
    b     : [1, Cout]
    returns [B, H, W, Cout]        if not pool_h
            [B, H//2, W, Cout]     if pool_h  (rows already max-pooled by 2)
    """
    B, Hp2, Wp2, C = x_pad.shape
    H, W = Hp2 - 2, Wp2 - 2
    Cout = w_mat.shape[1]

    # Lane-dense accumulator for the 1-channel final conv: the MXU pads N to
    # 128 internally anyway, and the kernel slices the real column before the
    # store, so this removes 1/128-lane masked work at zero HBM cost.
    CoutP = Cout if Cout >= 8 else 128
    if CoutP != Cout:
        w_mat = jnp.pad(w_mat, ((0, 0), (0, CoutP - Cout)))
        b = jnp.pad(b, ((0, 0), (0, CoutP - Cout)))

    n_rows = 4 if pool_h else 3
    stride = 2 if pool_h else 1
    out_h = H // 2 if pool_h else H

    def _row_spec(k):
        return pl.BlockSpec(
            (None, None, Wp2, C),
            lambda bi, r, k=k: (bi, stride * r + k, 0, 0))

    in_specs = [_row_spec(k) for k in range(n_rows)]
    in_specs += [
        pl.BlockSpec((9 * C, CoutP), lambda bi, r: (0, 0)),   # resident weight
        pl.BlockSpec((1, CoutP), lambda bi, r: (0, 0)),       # resident bias
    ]

    kernel = functools.partial(
        _conv_row_kernel, W=W, C=C, Cout=Cout, CoutP=CoutP,
        apply_gelu=apply_gelu, pool_h=pool_h)

    return pl.pallas_call(
        kernel,
        out_shape=jax.ShapeDtypeStruct((B, out_h, W, Cout), jnp.float32),
        grid=(B, out_h),
        in_specs=in_specs,
        out_specs=pl.BlockSpec((None, None, W, Cout),
                               lambda bi, r: (bi, r, 0, 0)),
        compiler_params=pltpu.CompilerParams(
            dimension_semantics=("parallel", "parallel"),
            vmem_limit_bytes=_VMEM_LIMIT),
    )(*([x_pad] * n_rows), w_mat, b)


# --------------------------------------------------------------------------
# fused matmul + bias (+ GELU) for the FC heads
# --------------------------------------------------------------------------
def _pick_tile(d, cands=(1024, 768, 512, 384, 256, 128)):
    if d <= 1024:
        return d
    for c in cands:
        if d % c == 0:
            return c
    return d


def _mm_kernel(x_ref, w_ref, b_ref, o_ref, acc_ref, *, apply_gelu):
    k = pl.program_id(2)

    @pl.when(k == 0)
    def _():
        acc_ref[...] = jnp.zeros_like(acc_ref)

    acc_ref[...] += jnp.dot(x_ref[...], w_ref[...],
                            preferred_element_type=jnp.float32)

    @pl.when(k == pl.num_programs(2) - 1)
    def _():
        r = acc_ref[...] + b_ref[...]
        if apply_gelu:
            r = _gelu(r)
        o_ref[...] = r.astype(o_ref.dtype)


def matmul_bias_act(x, w, b, apply_gelu):
    """y = gelu?(x @ w + b);  x:[M,K], w:[K,N], b:[1,N] -> [M,N] (f32)."""
    M, K = x.shape
    K2, N = w.shape
    assert K == K2 and b.shape == (1, N)
    tm, tn, tk = _pick_tile(M), _pick_tile(N), _pick_tile(K)
    grid = (M // tm, N // tn, K // tk)
    return pl.pallas_call(
        functools.partial(_mm_kernel, apply_gelu=apply_gelu),
        out_shape=jax.ShapeDtypeStruct((M, N), jnp.float32),
        grid=grid,
        in_specs=[
            pl.BlockSpec((tm, tk), lambda i, j, k: (i, k)),
            pl.BlockSpec((tk, tn), lambda i, j, k: (k, j)),
            pl.BlockSpec((1, tn), lambda i, j, k: (0, j)),
        ],
        out_specs=pl.BlockSpec((tm, tn), lambda i, j, k: (i, j)),
        scratch_shapes=[pltpu.VMEM((tm, tn), jnp.float32)],
        compiler_params=pltpu.CompilerParams(
            dimension_semantics=("parallel", "parallel", "arbitrary"),
            vmem_limit_bytes=_VMEM_LIMIT),
    )(x, w, b)


def linear(x, wb, apply_gelu):
    w, b = wb
    N = w.shape[1]
    NP = N if N >= 128 else 128  # lane-dense stores for the tiny N=3/N=64 heads
    if NP != N:
        w = jnp.pad(w, ((0, 0), (0, NP - N)))
        b = jnp.pad(b, ((0, 0), (0, NP - N)))
    y = matmul_bias_act(x, w, b, apply_gelu)
    return y[:, :N] if NP != N else y


# --------------------------------------------------------------------------
# parameters
# --------------------------------------------------------------------------
def _conv_params(key, cin, cout):
    k1, k2 = jax.random.split(key)
    std = 1.0 / math.sqrt(cin * 9)
    w = jax.random.normal(k1, (cout, cin, 3, 3), jnp.float32) * std  # torch layout
    bias = jax.random.normal(k2, (cout,), jnp.float32) * std
    # matmul rhs layout: row index = (ky*3 + kx)*Cin + cin, col = cout
    w_mat = jnp.transpose(w, (2, 3, 1, 0)).reshape(9 * cin, cout)
    return w_mat, bias.reshape(1, cout)


def _linear_params(key, fin, fout):
    k1, k2 = jax.random.split(key)
    std = 1.0 / math.sqrt(fin)
    w = jax.random.normal(k1, (fout, fin), jnp.float32) * std  # torch layout
    bias = jax.random.normal(k2, (fout,), jnp.float32) * std
    return jnp.transpose(w), bias.reshape(1, fout)


def init_params(key):
    groups = [("enc", ENC, _conv_params), ("dec", DEC, _conv_params),
              ("fcl1", FCL1, _linear_params), ("fcl2", FCL2, _linear_params),
              ("fcl3", FCL3, _linear_params)]
    total = sum(len(cfg) for _, cfg, _ in groups)
    keys = jax.random.split(key, total)
    params, i = {}, 0
    for name, cfg, fn in groups:
        lst = []
        for a, c in cfg:
            lst.append(fn(keys[i], a, c))
            i += 1
        params[name] = lst
    return params


# --------------------------------------------------------------------------
# model
# --------------------------------------------------------------------------
def _upsample2_pad(x):
    """Nearest 2x upsample fused with replicate padding (one XLA gather).

    [B, H, W, C] -> [B, 2H+2, 2W+2, C], ready to feed conv3x3 directly.
    """
    B, H, W, C = x.shape
    ih = jnp.clip((jnp.arange(2 * H + 2) - 1) // 2, 0, H - 1)
    iw = jnp.clip((jnp.arange(2 * W + 2) - 1) // 2, 0, W - 1)
    return x[:, ih[:, None], iw[None, :], :]


def encoder(params, x_nchw):
    x = jnp.transpose(x_nchw, (0, 2, 3, 1))  # NCHW -> NHWC
    for w_mat, b in params["enc"]:
        xp = jnp.pad(x, ((0, 0), (1, 1), (1, 1), (0, 0)), mode="edge")
        # conv + GELU + MaxPool2d row direction fused in one kernel.
        y = conv3x3(xp, w_mat, b, apply_gelu=True, pool_h=True)
        # W direction of MaxPool2d(2) as a cheap XLA strided max.
        # TODO(synk): fold this into the conv epilogue with a strided VMEM read
        # (ref[pl.ds(0, W//2, 2)]) once validated on all target generations.
        x = jnp.maximum(y[:, :, 0::2, :], y[:, :, 1::2, :])
    B = x.shape[0]
    # match PyTorch .view(batch, -1) on the NCHW tensor
    return jnp.transpose(x, (0, 3, 1, 2)).reshape(B, -1)


def decoder(params, z):
    """z: [B, Cb*BOT_H*BOT_W] (NCHW flattening) -> [B, 1, H, W] NCHW."""
    B = z.shape[0]
    x = jnp.transpose(z.reshape(B, DEC[0][0], BOT_H, BOT_W), (0, 2, 3, 1))
    n = len(params["dec"])
    for i, (w_mat, b) in enumerate(params["dec"]):
        xp = _upsample2_pad(x)                                  # fused upsample+pad
        x = conv3x3(xp, w_mat, b, apply_gelu=(i < n - 1), pool_h=False)
    return jnp.transpose(x, (0, 3, 1, 2))                       # NHWC -> NCHW


def fcl1(params, x):
    return linear(x, params["fcl1"][0], apply_gelu=False)


def fcl2(params, x):
    h = linear(x, params["fcl2"][0], apply_gelu=True)
    return linear(h, params["fcl2"][1], apply_gelu=False)


def fcl3(params, x):
    h = linear(x, params["fcl3"][0], apply_gelu=True)
    h = linear(h, params["fcl3"][1], apply_gelu=True)
    return linear(h, params["fcl3"][2], apply_gelu=False)


def forward(params, x, x_shift):
    B = x.shape[0]
    # Batch the two encoder passes (x, x_shift) and the two fcl3+decoder passes
    # (r1, r2): halves weight re-reads and doubles the useful MXU rows on the
    # tiny-M stages (perf-review item).
    feats = encoder(params, jnp.concatenate([x, x_shift], axis=0))   # [2B, F]
    r_both = fcl1(params, feats)                                     # [2B, 3]
    r1, r2_from_shift = r_both[:B], r_both[B:]
    r2 = fcl2(params, r1)                                            # [B, 3]
    z = fcl3(params, jnp.concatenate([r1, r2], axis=0))              # [2B, F]
    recon = decoder(params, z)                                       # [2B,1,H,W]
    x_reconst_1, x_reconst_2 = recon[:B], recon[B:]
    return x_reconst_1, x_reconst_2, r2, r2_from_shift


# --------------------------------------------------------------------------
# main
# --------------------------------------------------------------------------
if __name__ == "__main__":
    key = jax.random.PRNGKey(0)
    kp, kx, ks = jax.random.split(key, 3)
    params = init_params(kp)

    # Input spatial size is pinned by the architecture: len(ENC) poolings must
    # map (H, W) -> (BOT_H, BOT_W) to feed fcl1.
    B = 1
    H_IN = BOT_H * (2 ** len(ENC))
    W_IN = BOT_W * (2 ** len(ENC))
    x = jax.random.normal(kx, (B, 1, H_IN, W_IN), jnp.float32)
    x_shift = jax.random.normal(ks, (B, 1, H_IN, W_IN), jnp.float32)

    fwd = jax.jit(forward)
    outs = jax.block_until_ready(fwd(params, x, x_shift))
    x_rec1, x_rec2, r2, r2_from_shift = outs

    assert x_rec1.shape == (B, 1, H_IN, W_IN)
    assert x_rec2.shape == (B, 1, H_IN, W_IN)
    assert r2.shape == (B, 3)
    assert r2_from_shift.shape == (B, 3)
    assert all(bool(jnp.all(jnp.isfinite(o))) for o in outs)

    print("KERNEL_OK")
</pallas_src>

<mosaic_0001>
module attributes {stable_mosaic.version = 11 : i64} {
  func.func @_conv_row_kernel(%arg0: i32, %arg1: i32, %arg2: memref<1x1x50x1xf32, #tpu.memory_space<vmem>>, %arg3: memref<1x1x50x1xf32, #tpu.memory_space<vmem>>, %arg4: memref<1x1x50x1xf32, #tpu.memory_space<vmem>>, %arg5: memref<1x1x50x1xf32, #tpu.memory_space<vmem>>, %arg6: memref<9x16xf32, #tpu.memory_space<vmem>>, %arg7: memref<1x16xf32, #tpu.memory_space<vmem>>, %arg8: memref<1x1x48x16xf32, #tpu.memory_space<vmem>>) attributes {dimension_semantics = [#tpu.dimension_semantics<parallel>, #tpu.dimension_semantics<parallel>], iteration_bounds = array<i64: 2, 12>, scalar_prefetch = 0 : i64, scratch_operands = 0 : i64, tpu.core_type = #tpu.core_type<tc>, window_params = [{transform_indices = @transform_0, window_bounds = array<i64: 1, 1, 50, 1>}, {transform_indices = @transform_1, window_bounds = array<i64: 1, 1, 50, 1>}, {transform_indices = @transform_2, window_bounds = array<i64: 1, 1, 50, 1>}, {transform_indices = @transform_3, window_bounds = array<i64: 1, 1, 50, 1>}, {pipeline_mode = #tpu.pipeline_mode<synchronous>, transform_indices = @transform_4, window_bounds = array<i64: 9, 16>}, {pipeline_mode = #tpu.pipeline_mode<synchronous>, transform_indices = @transform_5, window_bounds = array<i64: 1, 16>}, {transform_indices = @transform_6, window_bounds = array<i64: 1, 1, 48, 16>}]} {
    %c0 = arith.constant 0 : index
    %c0_0 = arith.constant 0 : index
    %0 = vector.load %arg7[%c0, %c0_0] : memref<1x16xf32, #tpu.memory_space<vmem>>, vector<1x16xf32>
    %c0_1 = arith.constant 0 : index
    %c0_2 = arith.constant 0 : index
    %c0_3 = arith.constant 0 : index
    %c0_4 = arith.constant 0 : index
    %1 = vector.load %arg2[%c0_1, %c0_2, %c0_3, %c0_4] : memref<1x1x50x1xf32, #tpu.memory_space<vmem>>, vector<1x1x48x1xf32>
    %2 = vector.shape_cast %1 : vector<1x1x48x1xf32> to vector<48x1xf32>
    %c0_5 = arith.constant 0 : index
    %c0_6 = arith.constant 0 : index
    %3 = vector.load %arg6[%c0_5, %c0_6] : memref<9x16xf32, #tpu.memory_space<vmem>>, vector<1x16xf32>
    %4 = vector.broadcast %2 : vector<48x1xf32> to vector<48x16xf32>
    %5 = vector.broadcast %3 : vector<1x16xf32> to vector<48x16xf32>
    %6 = arith.mulf %4, %5 : vector<48x16xf32>
    %c0_7 = arith.constant 0 : index
    %c0_8 = arith.constant 0 : index
    %c1 = arith.constant 1 : index
    %c0_9 = arith.constant 0 : index
    %7 = vector.load %arg2[%c0_7, %c0_8, %c1, %c0_9] : memref<1x1x50x1xf32, #tpu.memory_space<vmem>>, vector<1x1x48x1xf32>
    %8 = vector.shape_cast %7 : vector<1x1x48x1xf32> to vector<48x1xf32>
    %c1_10 = arith.constant 1 : index
    %c0_11 = arith.constant 0 : index
    %9 = vector.load %arg6[%c1_10, %c0_11] : memref<9x16xf32, #tpu.memory_space<vmem>>, vector<1x16xf32>
    %10 = vector.broadcast %8 : vector<48x1xf32> to vector<48x16xf32>
    %11 = vector.broadcast %9 : vector<1x16xf32> to vector<48x16xf32>
    %12 = arith.mulf %10, %11 : vector<48x16xf32>
    %13 = arith.addf %6, %12 : vector<48x16xf32>
    %c0_12 = arith.constant 0 : index
    %c0_13 = arith.constant 0 : index
    %c2 = arith.constant 2 : index
    %c0_14 = arith.constant 0 : index
    %14 = vector.load %arg2[%c0_12, %c0_13, %c2, %c0_14] : memref<1x1x50x1xf32, #tpu.memory_space<vmem>>, vector<1x1x48x1xf32>
    %15 = vector.shape_cast %14 : vector<1x1x48x1xf32> to vector<48x1xf32>
    %c2_15 = arith.constant 2 : index
    %c0_16 = arith.constant 0 : index
    %16 = vector.load %arg6[%c2_15, %c0_16] : memref<9x16xf32, #tpu.memory_space<vmem>>, vector<1x16xf32>
    %17 = vector.broadcast %15 : vector<48x1xf32> to vector<48x16xf32>
    %18 = vector.broadcast %16 : vector<1x16xf32> to vector<48x16xf32>
    %19 = arith.mulf %17, %18 : vector<48x16xf32>
    %20 = arith.addf %13, %19 : vector<48x16xf32>
    %c0_17 = arith.constant 0 : index
    %c0_18 = arith.constant 0 : index
    %c0_19 = arith.constant 0 : index
    %c0_20 = arith.constant 0 : index
    %21 = vector.load %arg3[%c0_17, %c0_18, %c0_19, %c0_20] : memref<1x1x50x1xf32, #tpu.memory_space<vmem>>, vector<1x1x48x1xf32>
    %22 = vector.shape_cast %21 : vector<1x1x48x1xf32> to vector<48x1xf32>
    %c3 = arith.constant 3 : index
    %c0_21 = arith.constant 0 : index
    %23 = vector.load %arg6[%c3, %c0_21] : memref<9x16xf32, #tpu.memory_space<vmem>>, vector<1x16xf32>
    %24 = vector.broadcast %22 : vector<48x1xf32> to vector<48x16xf32>
    %25 = vector.broadcast %23 : vector<1x16xf32> to vector<48x16xf32>
    %26 = arith.mulf %24, %25 : vector<48x16xf32>
    %27 = arith.addf %20, %26 : vector<48x16xf32>
    %c0_22 = arith.constant 0 : index
    %c0_23 = arith.constant 0 : index
    %c1_24 = arith.constant 1 : index
    %c0_25 = arith.constant 0 : index
    %28 = vector.load %arg3[%c0_22, %c0_23, %c1_24, %c0_25] : memref<1x1x50x1xf32, #tpu.memory_space<vmem>>, vector<1x1x48x1xf32>
    %29 = vector.shape_cast %28 : vector<1x1x48x1xf32> to vector<48x1xf32>
    %c4 = arith.constant 4 : index
    %c0_26 = arith.constant 0 : index
    %30 = vector.load %arg6[%c4, %c0_26] : memref<9x16xf32, #tpu.memory_space<vmem>>, vector<1x16xf32>
    %31 = vector.broadcast %29 : vector<48x1xf32> to vector<48x16xf32>
    %32 = vector.broadcast %30 : vector<1x16xf32> to vector<48x16xf32>
    %33 = arith.mulf %31, %32 : vector<48x16xf32>
    %34 = arith.addf %27, %33 : vector<48x16xf32>
    %c0_27 = arith.constant 0 : index
    %c0_28 = arith.constant 0 : index
    %c2_29 = arith.constant 2 : index
    %c0_30 = arith.constant 0 : index
    %35 = vector.load %arg3[%c0_27, %c0_28, %c2_29, %c0_30] : memref<1x1x50x1xf32, #tpu.memory_space<vmem>>, vector<1x1x48x1xf32>
    %36 = vector.shape_cast %35 : vector<1x1x48x1xf32> to vector<48x1xf32>
    %c5 = arith.constant 5 : index
    %c0_31 = arith.constant 0 : index
    %37 = vector.load %arg6[%c5, %c0_31] : memref<9x16xf32, #tpu.memory_space<vmem>>, vector<1x16xf32>
    %38 = vector.broadcast %36 : vector<48x1xf32> to vector<48x16xf32>
    %39 = vector.broadcast %37 : vector<1x16xf32> to vector<48x16xf32>
    %40 = arith.mulf %38, %39 : vector<48x16xf32>
    %41 = arith.addf %34, %40 : vector<48x16xf32>
    %c0_32 = arith.constant 0 : index
    %c0_33 = arith.constant 0 : index
    %c0_34 = arith.constant 0 : index
    %c0_35 = arith.constant 0 : index
    %42 = vector.load %arg4[%c0_32, %c0_33, %c0_34, %c0_35] : memref<1x1x50x1xf32, #tpu.memory_space<vmem>>, vector<1x1x48x1xf32>
    %43 = vector.shape_cast %42 : vector<1x1x48x1xf32> to vector<48x1xf32>
    %c6 = arith.constant 6 : index
    %c0_36 = arith.constant 0 : index
    %44 = vector.load %arg6[%c6, %c0_36] : memref<9x16xf32, #tpu.memory_space<vmem>>, vector<1x16xf32>
    %45 = vector.broadcast %43 : vector<48x1xf32> to vector<48x16xf32>
    %46 = vector.broadcast %44 : vector<1x16xf32> to vector<48x16xf32>
    %47 = arith.mulf %45, %46 : vector<48x16xf32>
    %48 = arith.addf %41, %47 : vector<48x16xf32>
    %c0_37 = arith.constant 0 : index
    %c0_38 = arith.constant 0 : index
    %c1_39 = arith.constant 1 : index
    %c0_40 = arith.constant 0 : index
    %49 = vector.load %arg4[%c0_37, %c0_38, %c1_39, %c0_40] : memref<1x1x50x1xf32, #tpu.memory_space<vmem>>, vector<1x1x48x1xf32>
    %50 = vector.shape_cast %49 : vector<1x1x48x1xf32> to vector<48x1xf32>
    %c7 = arith.constant 7 : index
    %c0_41 = arith.constant 0 : index
    %51 = vector.load %arg6[%c7, %c0_41] : memref<9x16xf32, #tpu.memory_space<vmem>>, vector<1x16xf32>
    %52 = vector.broadcast %50 : vector<48x1xf32> to vector<48x16xf32>
    %53 = vector.broadcast %51 : vector<1x16xf32> to vector<48x16xf32>
    %54 = arith.mulf %52, %53 : vector<48x16xf32>
    %55 = arith.addf %48, %54 : vector<48x16xf32>
    %c0_42 = arith.constant 0 : index
    %c0_43 = arith.constant 0 : index
    %c2_44 = arith.constant 2 : index
    %c0_45 = arith.constant 0 : index
    %56 = vector.load %arg4[%c0_42, %c0_43, %c2_44, %c0_45] : memref<1x1x50x1xf32, #tpu.memory_space<vmem>>, vector<1x1x48x1xf32>
    %57 = vector.shape_cast %56 : vector<1x1x48x1xf32> to vector<48x1xf32>
    %c8 = arith.constant 8 : index
    %c0_46 = arith.constant 0 : index
    %58 = vector.load %arg6[%c8, %c0_46] : memref<9x16xf32, #tpu.memory_space<vmem>>, vector<1x16xf32>
    %59 = vector.broadcast %57 : vector<48x1xf32> to vector<48x16xf32>
    %60 = vector.broadcast %58 : vector<1x16xf32> to vector<48x16xf32>
    %61 = arith.mulf %59, %60 : vector<48x16xf32>
    %62 = arith.addf %55, %61 : vector<48x16xf32>
    %63 = vector.broadcast %0 : vector<1x16xf32> to vector<48x16xf32>
    %64 = arith.addf %62, %63 : vector<48x16xf32>
    %cst = arith.constant 5.000000e-01 : f32
    %65 = vector.broadcast %cst : f32 to vector<48x16xf32>
    %66 = arith.mulf %65, %64 : vector<48x16xf32>
    %cst_47 = arith.constant 0.707106769 : f32
    %67 = vector.broadcast %cst_47 : f32 to vector<48x16xf32>
    %68 = arith.mulf %64, %67 : vector<48x16xf32>
    %cst_48 = arith.constant 0.000000e+00 : f32
    %69 = vector.broadcast %cst_48 : f32 to vector<48x16xf32>
    %70 = arith.cmpf oge, %68, %69 : vector<48x16xf32>
    %cst_49 = arith.constant 1.000000e+00 : f32
    %cst_50 = arith.constant -1.000000e+00 : f32
    %71 = vector.broadcast %cst_49 : f32 to vector<48x16xf32>
    %72 = vector.broadcast %cst_50 : f32 to vector<48x16xf32>
    %73 = arith.select %70, %71, %72 : vector<48x16xi1>, vector<48x16xf32>
    %74 = math.absf %68 : vector<48x16xf32>
    %cst_51 = arith.constant 0.327591091 : f32
    %75 = vector.broadcast %cst_51 : f32 to vector<48x16xf32>
    %76 = arith.mulf %75, %74 : vector<48x16xf32>
    %cst_52 = arith.constant 1.000000e+00 : f32
    %77 = vector.broadcast %cst_52 : f32 to vector<48x16xf32>
    %78 = arith.addf %77, %76 : vector<48x16xf32>
    %cst_53 = arith.constant 1.000000e+00 : f32
    %79 = vector.broadcast %cst_53 : f32 to vector<48x16xf32>
    %80 = arith.divf %79, %78 : vector<48x16xf32>
    %cst_54 = arith.constant 1.06140542 : f32
    %81 = vector.broadcast %cst_54 : f32 to vector<48x16xf32>
    %82 = arith.mulf %81, %80 : vector<48x16xf32>
    %cst_55 = arith.constant -1.45315206 : f32
    %83 = vector.broadcast %cst_55 : f32 to vector<48x16xf32>
    %84 = arith.addf %82, %83 : vector<48x16xf32>
    %85 = arith.mulf %84, %80 : vector<48x16xf32>
    %cst_56 = arith.constant 1.42141378 : f32
    %86 = vector.broadcast %cst_56 : f32 to vector<48x16xf32>
    %87 = arith.addf %85, %86 : vector<48x16xf32>
    %88 = arith.mulf %87, %80 : vector<48x16xf32>
    %cst_57 = arith.constant -0.284496725 : f32
    %89 = vector.broadcast %cst_57 : f32 to vector<48x16xf32>
    %90 = arith.addf %88, %89 : vector<48x16xf32>
    %91 = arith.mulf %90, %80 : vector<48x16xf32>
    %cst_58 = arith.constant 0.254829586 : f32
    %92 = vector.broadcast %cst_58 : f32 to vector<48x16xf32>
    %93 = arith.addf %91, %92 : vector<48x16xf32>
    %94 = arith.mulf %93, %80 : vector<48x16xf32>
    %cst_59 = arith.constant 0.000000e+00 : f32
    %95 = vector.broadcast %cst_59 : f32 to vector<48x16xf32>
    %96 = arith.subf %95, %74 : vector<48x16xf32>
    %97 = arith.mulf %96, %74 : vector<48x16xf32>
    %98 = math.exp %97 : vector<48x16xf32>
    %99 = arith.mulf %94, %98 : vector<48x16xf32>
    %cst_60 = arith.constant 1.000000e+00 : f32
    %100 = vector.broadcast %cst_60 : f32 to vector<48x16xf32>
    %101 = arith.subf %100, %99 : vector<48x16xf32>
    %102 = arith.mulf %73, %101 : vector<48x16xf32>
    %cst_61 = arith.constant 1.000000e+00 : f32
    %103 = vector.broadcast %cst_61 : f32 to vector<48x16xf32>
    %104 = arith.addf %103, %102 : vector<48x16xf32>
    %105 = arith.mulf %66, %104 : vector<48x16xf32>
    %c0_62 = arith.constant 0 : index
    %c0_63 = arith.constant 0 : index
    %c0_64 = arith.constant 0 : index
    %c0_65 = arith.constant 0 : index
    %106 = vector.load %arg3[%c0_62, %c0_63, %c0_64, %c0_65] : memref<1x1x50x1xf32, #tpu.memory_space<vmem>>, vector<1x1x48x1xf32>
    %107 = vector.shape_cast %106 : vector<1x1x48x1xf32> to vector<48x1xf32>
    %c0_66 = arith.constant 0 : index
    %c0_67 = arith.constant 0 : index
    %108 = vector.load %arg6[%c0_66, %c0_67] : memref<9x16xf32, #tpu.memory_space<vmem>>, vector<1x16xf32>
    %109 = vector.broadcast %107 : vector<48x1xf32> to vector<48x16xf32>
    %110 = vector.broadcast %108 : vector<1x16xf32> to vector<48x16xf32>
    %111 = arith.mulf %109, %110 : vector<48x16xf32>
    %c0_68 = arith.constant 0 : index
    %c0_69 = arith.constant 0 : index
    %c1_70 = arith.constant 1 : index
    %c0_71 = arith.constant 0 : index
    %112 = vector.load %arg3[%c0_68, %c0_69, %c1_70, %c0_71] : memref<1x1x50x1xf32, #tpu.memory_space<vmem>>, vector<1x1x48x1xf32>
    %113 = vector.shape_cast %112 : vector<1x1x48x1xf32> to vector<48x1xf32>
    %c1_72 = arith.constant 1 : index
    %c0_73 = arith.constant 0 : index
    %114 = vector.load %arg6[%c1_72, %c0_73] : memref<9x16xf32, #tpu.memory_space<vmem>>, vector<1x16xf32>
    %115 = vector.broadcast %113 : vector<48x1xf32> to vector<48x16xf32>
    %116 = vector.broadcast %114 : vector<1x16xf32> to vector<48x16xf32>
    %117 = arith.mulf %115, %116 : vector<48x16xf32>
    %118 = arith.addf %111, %117 : vector<48x16xf32>
    %c0_74 = arith.constant 0 : index
    %c0_75 = arith.constant 0 : index
    %c2_76 = arith.constant 2 : index
    %c0_77 = arith.constant 0 : index
    %119 = vector.load %arg3[%c0_74, %c0_75, %c2_76, %c0_77] : memref<1x1x50x1xf32, #tpu.memory_space<vmem>>, vector<1x1x48x1xf32>
    %120 = vector.shape_cast %119 : vector<1x1x48x1xf32> to vector<48x1xf32>
    %c2_78 = arith.constant 2 : index
    %c0_79 = arith.constant 0 : index
    %121 = vector.load %arg6[%c2_78, %c0_79] : memref<9x16xf32, #tpu.memory_space<vmem>>, vector<1x16xf32>
    %122 = vector.broadcast %120 : vector<48x1xf32> to vector<48x16xf32>
    %123 = vector.broadcast %121 : vector<1x16xf32> to vector<48x16xf32>
    %124 = arith.mulf %122, %123 : vector<48x16xf32>
    %125 = arith.addf %118, %124 : vector<48x16xf32>
    %c0_80 = arith.constant 0 : index
    %c0_81 = arith.constant 0 : index
    %c0_82 = arith.constant 0 : index
    %c0_83 = arith.constant 0 : index
    %126 = vector.load %arg4[%c0_80, %c0_81, %c0_82, %c0_83] : memref<1x1x50x1xf32, #tpu.memory_space<vmem>>, vector<1x1x48x1xf32>
    %127 = vector.shape_cast %126 : vector<1x1x48x1xf32> to vector<48x1xf32>
    %c3_84 = arith.constant 3 : index
    %c0_85 = arith.constant 0 : index
    %128 = vector.load %arg6[%c3_84, %c0_85] : memref<9x16xf32, #tpu.memory_space<vmem>>, vector<1x16xf32>
    %129 = vector.broadcast %127 : vector<48x1xf32> to vector<48x16xf32>
    %130 = vector.broadcast %128 : vector<1x16xf32> to vector<48x16xf32>
    %131 = arith.mulf %129, %130 : vector<48x16xf32>
    %132 = arith.addf %125, %131 : vector<48x16xf32>
    %c0_86 = arith.constant 0 : index
    %c0_87 = arith.constant 0 : index
    %c1_88 = arith.constant 1 : index
    %c0_89 = arith.constant 0 : index
    %133 = vector.load %arg4[%c0_86, %c0_87, %c1_88, %c0_89] : memref<1x1x50x1xf32, #tpu.memory_space<vmem>>, vector<1x1x48x1xf32>
    %134 = vector.shape_cast %133 : vector<1x1x48x1xf32> to vector<48x1xf32>
    %c4_90 = arith.constant 4 : index
    %c0_91 = arith.constant 0 : index
    %135 = vector.load %arg6[%c4_90, %c0_91] : memref<9x16xf32, #tpu.memory_space<vmem>>, vector<1x16xf32>
    %136 = vector.broadcast %134 : vector<48x1xf32> to vector<48x16xf32>
    %137 = vector.broadcast %135 : vector<1x16xf32> to vector<48x16xf32>
    %138 = arith.mulf %136, %137 : vector<48x16xf32>
    %139 = arith.addf %132, %138 : vector<48x16xf32>
    %c0_92 = arith.constant 0 : index
    %c0_93 = arith.constant 0 : index
    %c2_94 = arith.constant 2 : index
    %c0_95 = arith.constant 0 : index
    %140 = vector.load %arg4[%c0_92, %c0_93, %c2_94, %c0_95] : memref<1x1x50x1xf32, #tpu.memory_space<vmem>>, vector<1x1x48x1xf32>
    %141 = vector.shape_cast %140 : vector<1x1x48x1xf32> to vector<48x1xf32>
    %c5_96 = arith.constant 5 : index
    %c0_97 = arith.constant 0 : index
    %142 = vector.load %arg6[%c5_96, %c0_97] : memref<9x16xf32, #tpu.memory_space<vmem>>, vector<1x16xf32>
    %143 = vector.broadcast %141 : vector<48x1xf32> to vector<48x16xf32>
    %144 = vector.broadcast %142 : vector<1x16xf32> to vector<48x16xf32>
    %145 = arith.mulf %143, %144 : vector<48x16xf32>
    %146 = arith.addf %139, %145 : vector<48x16xf32>
    %c0_98 = arith.constant 0 : index
    %c0_99 = arith.constant 0 : index
    %c0_100 = arith.constant 0 : index
    %c0_101 = arith.constant 0 : index
    %147 = vector.load %arg5[%c0_98, %c0_99, %c0_100, %c0_101] : memref<1x1x50x1xf32, #tpu.memory_space<vmem>>, vector<1x1x48x1xf32>
    %148 = vector.shape_cast %147 : vector<1x1x48x1xf32> to vector<48x1xf32>
    %c6_102 = arith.constant 6 : index
    %c0_103 = arith.constant 0 : index
    %149 = vector.load %arg6[%c6_102, %c0_103] : memref<9x16xf32, #tpu.memory_space<vmem>>, vector<1x16xf32>
    %150 = vector.broadcast %148 : vector<48x1xf32> to vector<48x16xf32>
    %151 = vector.broadcast %149 : vector<1x16xf32> to vector<48x16xf32>
    %152 = arith.mulf %150, %151 : vector<48x16xf32>
    %153 = arith.addf %146, %152 : vector<48x16xf32>
    %c0_104 = arith.constant 0 : index
    %c0_105 = arith.constant 0 : index
    %c1_106 = arith.constant 1 : index
    %c0_107 = arith.constant 0 : index
    %154 = vector.load %arg5[%c0_104, %c0_105, %c1_106, %c0_107] : memref<1x1x50x1xf32, #tpu.memory_space<vmem>>, vector<1x1x48x1xf32>
    %155 = vector.shape_cast %154 : vector<1x1x48x1xf32> to vector<48x1xf32>
    %c7_108 = arith.constant 7 : index
    %c0_109 = arith.constant 0 : index
    %156 = vector.load %arg6[%c7_108, %c0_109] : memref<9x16xf32, #tpu.memory_space<vmem>>, vector<1x16xf32>
    %157 = vector.broadcast %155 : vector<48x1xf32> to vector<48x16xf32>
    %158 = vector.broadcast %156 : vector<1x16xf32> to vector<48x16xf32>
    %159 = arith.mulf %157, %158 : vector<48x16xf32>
    %160 = arith.addf %153, %159 : vector<48x16xf32>
    %c0_110 = arith.constant 0 : index
    %c0_111 = arith.constant 0 : index
    %c2_112 = arith.constant 2 : index
    %c0_113 = arith.constant 0 : index
    %161 = vector.load %arg5[%c0_110, %c0_111, %c2_112, %c0_113] : memref<1x1x50x1xf32, #tpu.memory_space<vmem>>, vector<1x1x48x1xf32>
    %162 = vector.shape_cast %161 : vector<1x1x48x1xf32> to vector<48x1xf32>
    %c8_114 = arith.constant 8 : index
    %c0_115 = arith.constant 0 : index
    %163 = vector.load %arg6[%c8_114, %c0_115] : memref<9x16xf32, #tpu.memory_space<vmem>>, vector<1x16xf32>
    %164 = vector.broadcast %162 : vector<48x1xf32> to vector<48x16xf32>
    %165 = vector.broadcast %163 : vector<1x16xf32> to vector<48x16xf32>
    %166 = arith.mulf %164, %165 : vector<48x16xf32>
    %167 = arith.addf %160, %166 : vector<48x16xf32>
    %168 = vector.broadcast %0 : vector<1x16xf32> to vector<48x16xf32>
    %169 = arith.addf %167, %168 : vector<48x16xf32>
    %cst_116 = arith.constant 5.000000e-01 : f32
    %170 = vector.broadcast %cst_116 : f32 to vector<48x16xf32>
    %171 = arith.mulf %170, %169 : vector<48x16xf32>
    %cst_117 = arith.constant 0.707106769 : f32
    %172 = vector.broadcast %cst_117 : f32 to vector<48x16xf32>
    %173 = arith.mulf %169, %172 : vector<48x16xf32>
    %cst_118 = arith.constant 0.000000e+00 : f32
    %174 = vector.broadcast %cst_118 : f32 to vector<48x16xf32>
    %175 = arith.cmpf oge, %173, %174 : vector<48x16xf32>
    %cst_119 = arith.constant 1.000000e+00 : f32
    %cst_120 = arith.constant -1.000000e+00 : f32
    %176 = vector.broadcast %cst_119 : f32 to vector<48x16xf32>
    %177 = vector.broadcast %cst_120 : f32 to vector<48x16xf32>
    %178 = arith.select %175, %176, %177 : vector<48x16xi1>, vector<48x16xf32>
    %179 = math.absf %173 : vector<48x16xf32>
    %cst_121 = arith.constant 0.327591091 : f32
    %180 = vector.broadcast %cst_121 : f32 to vector<48x16xf32>
    %181 = arith.mulf %180, %179 : vector<48x16xf32>
    %cst_122 = arith.constant 1.000000e+00 : f32
    %182 = vector.broadcast %cst_122 : f32 to vector<48x16xf32>
    %183 = arith.addf %182, %181 : vector<48x16xf32>
    %cst_123 = arith.constant 1.000000e+00 : f32
    %184 = vector.broadcast %cst_123 : f32 to vector<48x16xf32>
    %185 = arith.divf %184, %183 : vector<48x16xf32>
    %cst_124 = arith.constant 1.06140542 : f32
    %186 = vector.broadcast %cst_124 : f32 to vector<48x16xf32>
    %187 = arith.mulf %186, %185 : vector<48x16xf32>
    %cst_125 = arith.constant -1.45315206 : f32
    %188 = vector.broadcast %cst_125 : f32 to vector<48x16xf32>
    %189 = arith.addf %187, %188 : vector<48x16xf32>
    %190 = arith.mulf %189, %185 : vector<48x16xf32>
    %cst_126 = arith.constant 1.42141378 : f32
    %191 = vector.broadcast %cst_126 : f32 to vector<48x16xf32>
    %192 = arith.addf %190, %191 : vector<48x16xf32>
    %193 = arith.mulf %192, %185 : vector<48x16xf32>
    %cst_127 = arith.constant -0.284496725 : f32
    %194 = vector.broadcast %cst_127 : f32 to vector<48x16xf32>
    %195 = arith.addf %193, %194 : vector<48x16xf32>
    %196 = arith.mulf %195, %185 : vector<48x16xf32>
    %cst_128 = arith.constant 0.254829586 : f32
    %197 = vector.broadcast %cst_128 : f32 to vector<48x16xf32>
    %198 = arith.addf %196, %197 : vector<48x16xf32>
    %199 = arith.mulf %198, %185 : vector<48x16xf32>
    %cst_129 = arith.constant 0.000000e+00 : f32
    %200 = vector.broadcast %cst_129 : f32 to vector<48x16xf32>
    %201 = arith.subf %200, %179 : vector<48x16xf32>
    %202 = arith.mulf %201, %179 : vector<48x16xf32>
    %203 = math.exp %202 : vector<48x16xf32>
    %204 = arith.mulf %199, %203 : vector<48x16xf32>
    %cst_130 = arith.constant 1.000000e+00 : f32
    %205 = vector.broadcast %cst_130 : f32 to vector<48x16xf32>
    %206 = arith.subf %205, %204 : vector<48x16xf32>
    %207 = arith.mulf %178, %206 : vector<48x16xf32>
    %cst_131 = arith.constant 1.000000e+00 : f32
    %208 = vector.broadcast %cst_131 : f32 to vector<48x16xf32>
    %209 = arith.addf %208, %207 : vector<48x16xf32>
    %210 = arith.mulf %171, %209 : vector<48x16xf32>
    %211 = arith.maximumf %105, %210 : vector<48x16xf32>
    %c0_132 = arith.constant 0 : index
    %c0_133 = arith.constant 0 : index
    %c0_134 = arith.constant 0 : index
    %c0_135 = arith.constant 0 : index
    %212 = vector.load %arg8[%c0_132, %c0_133, %c0_134, %c0_135] : memref<1x1x48x16xf32, #tpu.memory_space<vmem>>, vector<1x1x48x16xf32>
    %213 = vector.shape_cast %212 : vector<1x1x48x16xf32> to vector<48x16xf32>
    %214 = vector.shape_cast %211 : vector<48x16xf32> to vector<1x1x48x16xf32>
    tpu.vector_store %arg8[%c0_132, %c0_133, %c0_134, %c0_135], %214 {strides = array<i32>} : memref<1x1x48x16xf32, #tpu.memory_space<vmem>>, vector<1x1x48x16xf32>,
    return
  }
  func.func @transform_0(%arg0: i32, %arg1: i32) -> (i32, i32, i32, i32) {
    %c2_i32 = arith.constant 2 : i32
    %0 = arith.muli %c2_i32, %arg1 : i32
    %c0_i32 = arith.constant 0 : i32
    %1 = arith.addi %0, %c0_i32 : i32
    %c0_i32_0 = arith.constant 0 : i32
    %c0_i32_1 = arith.constant 0 : i32
    %c0_i32_2 = arith.constant 0 : i32
    return %arg0, %1, %c0_i32_0, %c0_i32_1 : i32, i32, i32, i32
  }
  func.func @transform_1(%arg0: i32, %arg1: i32) -> (i32, i32, i32, i32) {
    %c2_i32 = arith.constant 2 : i32
    %0 = arith.muli %c2_i32, %arg1 : i32
    %c1_i32 = arith.constant 1 : i32
    %1 = arith.addi %0, %c1_i32 : i32
    %c0_i32 = arith.constant 0 : i32
    %c0_i32_0 = arith.constant 0 : i32
    %c0_i32_1 = arith.constant 0 : i32
    return %arg0, %1, %c0_i32, %c0_i32_0 : i32, i32, i32, i32
  }
  func.func @transform_2(%arg0: i32, %arg1: i32) -> (i32, i32, i32, i32) {
    %c2_i32 = arith.constant 2 : i32
    %0 = arith.muli %c2_i32, %arg1 : i32
    %c2_i32_0 = arith.constant 2 : i32
    %1 = arith.addi %0, %c2_i32_0 : i32
    %c0_i32 = arith.constant 0 : i32
    %c0_i32_1 = arith.constant 0 : i32
    %c0_i32_2 = arith.constant 0 : i32
    return %arg0, %1, %c0_i32, %c0_i32_1 : i32, i32, i32, i32
  }
  func.func @transform_3(%arg0: i32, %arg1: i32) -> (i32, i32, i32, i32) {
    %c2_i32 = arith.constant 2 : i32
    %0 = arith.muli %c2_i32, %arg1 : i32
    %c3_i32 = arith.constant 3 : i32
    %1 = arith.addi %0, %c3_i32 : i32
    %c0_i32 = arith.constant 0 : i32
    %c0_i32_0 = arith.constant 0 : i32
    %c0_i32_1 = arith.constant 0 : i32
    return %arg0, %1, %c0_i32, %c0_i32_0 : i32, i32, i32, i32
  }
  func.func @transform_4(%arg0: i32, %arg1: i32) -> (i32, i32) {
    %c0_i32 = arith.constant 0 : i32
    %c0_i32_0 = arith.constant 0 : i32
    %c0_i32_1 = arith.constant 0 : i32
    return %c0_i32, %c0_i32_0 : i32, i32
  }
  func.func @transform_5(%arg0: i32, %arg1: i32) -> (i32, i32) {
    %c0_i32 = arith.constant 0 : i32
    %c0_i32_0 = arith.constant 0 : i32
    %c0_i32_1 = arith.constant 0 : i32
    return %c0_i32, %c0_i32_0 : i32, i32
  }
  func.func @transform_6(%arg0: i32, %arg1: i32) -> (i32, i32, i32, i32) {
    %c0_i32 = arith.constant 0 : i32
    %c0_i32_0 = arith.constant 0 : i32
    %c0_i32_1 = arith.constant 0 : i32
    return %arg0, %arg1, %c0_i32, %c0_i32_0 : i32, i32, i32, i32
  }
}

module attributes {stable_mosaic.version = 11 : i64} {
  func.func @_conv_row_kernel(%arg0: i32, %arg1: i32, %arg2: memref<1x1x26x16xf32, #tpu.memory_space<vmem>>, %arg3: memref<1x1x26x16xf32, #tpu.memory_space<vmem>>, %arg4: memref<1x1x26x16xf32, #tpu.memory_space<vmem>>, %arg5: memref<1x1x26x16xf32, #tpu.memory_space<vmem>>, %arg6: memref<144x32xf32, #tpu.memory_space<vmem>>, %arg7: memref<1x32xf32, #tpu.memory_space<vmem>>, %arg8: memref<1x1x24x32xf32, #tpu.memory_space<vmem>>) attributes {dimension_semantics = [#tpu.dimension_semantics<parallel>, #tpu.dimension_semantics<parallel>], iteration_bounds = array<i64: 2, 6>, scalar_prefetch = 0 : i64, scratch_operands = 0 : i64, tpu.core_type = #tpu.core_type<tc>, window_params = [{transform_indices = @transform_0, window_bounds = array<i64: 1, 1, 26, 16>}, {transform_indices = @transform_1, window_bounds = array<i64: 1, 1, 26, 16>}, {transform_indices = @transform_2, window_bounds = array<i64: 1, 1, 26, 16>}, {transform_indices = @transform_3, window_bounds = array<i64: 1, 1, 26, 16>}, {pipeline_mode = #tpu.pipeline_mode<synchronous>, transform_indices = @transform_4, window_bounds = array<i64: 144, 32>}, {pipeline_mode = #tpu.pipeline_mode<synchronous>, transform_indices = @transform_5, window_bounds = array<i64: 1, 32>}, {transform_indices = @transform_6, window_bounds = array<i64: 1, 1, 24, 32>}]} {
    %c0 = arith.constant 0 : index
    %c0_0 = arith.constant 0 : index
    %0 = vector.load %arg7[%c0, %c0_0] : memref<1x32xf32, #tpu.memory_space<vmem>>, vector<1x32xf32>
    %c0_1 = arith.constant 0 : index
    %c0_2 = arith.constant 0 : index
    %c0_3 = arith.constant 0 : index
    %c0_4 = arith.constant 0 : index
    %1 = vector.load %arg2[%c0_1, %c0_2, %c0_3, %c0_4] : memref<1x1x26x16xf32, #tpu.memory_space<vmem>>, vector<1x1x24x16xf32>
    %2 = vector.shape_cast %1 : vector<1x1x24x16xf32> to vector<24x16xf32>
    %c0_5 = arith.constant 0 : index
    %c0_6 = arith.constant 0 : index
    %3 = vector.load %arg6[%c0_5, %c0_6] : memref<144x32xf32, #tpu.memory_space<vmem>>, vector<16x32xf32>
    %cst = arith.constant dense<0.000000e+00> : vector<24x32xf32>
    %4 = tpu.matmul %2, %3, %cst {dimension_numbers = #tpu.dot_dimension_numbers<[1], [0], [0], [1], [0, 0, 1, 1], [], []>} : vector<24x16xf32>, vector<16x32xf32>, vector<24x32xf32> -> vector<24x32xf32>
    %c0_7 = arith.constant 0 : index
    %c0_8 = arith.constant 0 : index
    %c1 = arith.constant 1 : index
    %c0_9 = arith.constant 0 : index
    %5 = vector.load %arg2[%c0_7, %c0_8, %c1, %c0_9] : memref<1x1x26x16xf32, #tpu.memory_space<vmem>>, vector<1x1x24x16xf32>
    %6 = vector.shape_cast %5 : vector<1x1x24x16xf32> to vector<24x16xf32>
    %c16 = arith.constant 16 : index
    %c0_10 = arith.constant 0 : index
    %7 = vector.load %arg6[%c16, %c0_10] : memref<144x32xf32, #tpu.memory_space<vmem>>, vector<16x32xf32>
    %cst_11 = arith.constant dense<0.000000e+00> : vector<24x32xf32>
    %8 = tpu.matmul %6, %7, %cst_11 {dimension_numbers = #tpu.dot_dimension_numbers<[1], [0], [0], [1], [0, 0, 1, 1], [], []>} : vector<24x16xf32>, vector<16x32xf32>, vector<24x32xf32> -> vector<24x32xf32>
    %9 = arith.addf %4, %8 : vector<24x32xf32>
    %c0_12 = arith.constant 0 : index
    %c0_13 = arith.constant 0 : index
    %c2 = arith.constant 2 : index
    %c0_14 = arith.constant 0 : index
    %10 = vector.load %arg2[%c0_12, %c0_13, %c2, %c0_14] : memref<1x1x26x16xf32, #tpu.memory_space<vmem>>, vector<1x1x24x16xf32>
    %11 = vector.shape_cast %10 : vector<1x1x24x16xf32> to vector<24x16xf32>
    %c32 = arith.constant 32 : index
    %c0_15 = arith.constant 0 : index
    %12 = vector.load %arg6[%c32, %c0_15] : memref<144x32xf32, #tpu.memory_space<vmem>>, vector<16x32xf32>
    %cst_16 = arith.constant dense<0.000000e+00> : vector<24x32xf32>
    %13 = tpu.matmul %11, %12, %cst_16 {dimension_numbers = #tpu.dot_dimension_numbers<[1], [0], [0], [1], [0, 0, 1, 1], [], []>} : vector<24x16xf32>, vector<16x32xf32>, vector<24x32xf32> -> vector<24x32xf32>
    %14 = arith.addf %9, %13 : vector<24x32xf32>
    %c0_17 = arith.constant 0 : index
    %c0_18 = arith.constant 0 : index
    %c0_19 = arith.constant 0 : index
    %c0_20 = arith.constant 0 : index
    %15 = vector.load %arg3[%c0_17, %c0_18, %c0_19, %c0_20] : memref<1x1x26x16xf32, #tpu.memory_space<vmem>>, vector<1x1x24x16xf32>
    %16 = vector.shape_cast %15 : vector<1x1x24x16xf32> to vector<24x16xf32>
    %c48 = arith.constant 48 : index
    %c0_21 = arith.constant 0 : index
    %17 = vector.load %arg6[%c48, %c0_21] : memref<144x32xf32, #tpu.memory_space<vmem>>, vector<16x32xf32>
    %cst_22 = arith.constant dense<0.000000e+00> : vector<24x32xf32>
    %18 = tpu.matmul %16, %17, %cst_22 {dimension_numbers = #tpu.dot_dimension_numbers<[1], [0], [0], [1], [0, 0, 1, 1], [], []>} : vector<24x16xf32>, vector<16x32xf32>, vector<24x32xf32> -> vector<24x32xf32>
    %19 = arith.addf %14, %18 : vector<24x32xf32>
    %c0_23 = arith.constant 0 : index
    %c0_24 = arith.constant 0 : index
    %c1_25 = arith.constant 1 : index
    %c0_26 = arith.constant 0 : index
    %20 = vector.load %arg3[%c0_23, %c0_24, %c1_25, %c0_26] : memref<1x1x26x16xf32, #tpu.memory_space<vmem>>, vector<1x1x24x16xf32>
    %21 = vector.shape_cast %20 : vector<1x1x24x16xf32> to vector<24x16xf32>
    %c64 = arith.constant 64 : index
    %c0_27 = arith.constant 0 : index
    %22 = vector.load %arg6[%c64, %c0_27] : memref<144x32xf32, #tpu.memory_space<vmem>>, vector<16x32xf32>
    %cst_28 = arith.constant dense<0.000000e+00> : vector<24x32xf32>
    %23 = tpu.matmul %21, %22, %cst_28 {dimension_numbers = #tpu.dot_dimension_numbers<[1], [0], [0], [1], [0, 0, 1, 1], [], []>} : vector<24x16xf32>, vector<16x32xf32>, vector<24x32xf32> -> vector<24x32xf32>
    %24 = arith.addf %19, %23 : vector<24x32xf32>
    %c0_29 = arith.constant 0 : index
    %c0_30 = arith.constant 0 : index
    %c2_31 = arith.constant 2 : index
    %c0_32 = arith.constant 0 : index
    %25 = vector.load %arg3[%c0_29, %c0_30, %c2_31, %c0_32] : memref<1x1x26x16xf32, #tpu.memory_space<vmem>>, vector<1x1x24x16xf32>
    %26 = vector.shape_cast %25 : vector<1x1x24x16xf32> to vector<24x16xf32>
    %c80 = arith.constant 80 : index
    %c0_33 = arith.constant 0 : index
    %27 = vector.load %arg6[%c80, %c0_33] : memref<144x32xf32, #tpu.memory_space<vmem>>, vector<16x32xf32>
    %cst_34 = arith.constant dense<0.000000e+00> : vector<24x32xf32>
    %28 = tpu.matmul %26, %27, %cst_34 {dimension_numbers = #tpu.dot_dimension_numbers<[1], [0], [0], [1], [0, 0, 1, 1], [], []>} : vector<24x16xf32>, vector<16x32xf32>, vector<24x32xf32> -> vector<24x32xf32>
    %29 = arith.addf %24, %28 : vector<24x32xf32>
    %c0_35 = arith.constant 0 : index
    %c0_36 = arith.constant 0 : index
    %c0_37 = arith.constant 0 : index
    %c0_38 = arith.constant 0 : index
    %30 = vector.load %arg4[%c0_35, %c0_36, %c0_37, %c0_38] : memref<1x1x26x16xf32, #tpu.memory_space<vmem>>, vector<1x1x24x16xf32>
    %31 = vector.shape_cast %30 : vector<1x1x24x16xf32> to vector<24x16xf32>
    %c96 = arith.constant 96 : index
    %c0_39 = arith.constant 0 : index
    %32 = vector.load %arg6[%c96, %c0_39] : memref<144x32xf32, #tpu.memory_space<vmem>>, vector<16x32xf32>
    %cst_40 = arith.constant dense<0.000000e+00> : vector<24x32xf32>
    %33 = tpu.matmul %31, %32, %cst_40 {dimension_numbers = #tpu.dot_dimension_numbers<[1], [0], [0], [1], [0, 0, 1, 1], [], []>} : vector<24x16xf32>, vector<16x32xf32>, vector<24x32xf32> -> vector<24x32xf32>
    %34 = arith.addf %29, %33 : vector<24x32xf32>
    %c0_41 = arith.constant 0 : index
    %c0_42 = arith.constant 0 : index
    %c1_43 = arith.constant 1 : index
    %c0_44 = arith.constant 0 : index
    %35 = vector.load %arg4[%c0_41, %c0_42, %c1_43, %c0_44] : memref<1x1x26x16xf32, #tpu.memory_space<vmem>>, vector<1x1x24x16xf32>
    %36 = vector.shape_cast %35 : vector<1x1x24x16xf32> to vector<24x16xf32>
    %c112 = arith.constant 112 : index
    %c0_45 = arith.constant 0 : index
    %37 = vector.load %arg6[%c112, %c0_45] : memref<144x32xf32, #tpu.memory_space<vmem>>, vector<16x32xf32>
    %cst_46 = arith.constant dense<0.000000e+00> : vector<24x32xf32>
    %38 = tpu.matmul %36, %37, %cst_46 {dimension_numbers = #tpu.dot_dimension_numbers<[1], [0], [0], [1], [0, 0, 1, 1], [], []>} : vector<24x16xf32>, vector<16x32xf32>, vector<24x32xf32> -> vector<24x32xf32>
    %39 = arith.addf %34, %38 : vector<24x32xf32>
    %c0_47 = arith.constant 0 : index
    %c0_48 = arith.constant 0 : index
    %c2_49 = arith.constant 2 : index
    %c0_50 = arith.constant 0 : index
    %40 = vector.load %arg4[%c0_47, %c0_48, %c2_49, %c0_50] : memref<1x1x26x16xf32, #tpu.memory_space<vmem>>, vector<1x1x24x16xf32>
    %41 = vector.shape_cast %40 : vector<1x1x24x16xf32> to vector<24x16xf32>
    %c128 = arith.constant 128 : index
    %c0_51 = arith.constant 0 : index
    %42 = vector.load %arg6[%c128, %c0_51] : memref<144x32xf32, #tpu.memory_space<vmem>>, vector<16x32xf32>
    %cst_52 = arith.constant dense<0.000000e+00> : vector<24x32xf32>
    %43 = tpu.matmul %41, %42, %cst_52 {dimension_numbers = #tpu.dot_dimension_numbers<[1], [0], [0], [1], [0, 0, 1, 1], [], []>} : vector<24x16xf32>, vector<16x32xf32>, vector<24x32xf32> -> vector<24x32xf32>
    %44 = arith.addf %39, %43 : vector<24x32xf32>
    %45 = vector.broadcast %0 : vector<1x32xf32> to vector<24x32xf32>
    %46 = arith.addf %44, %45 : vector<24x32xf32>
    %cst_53 = arith.constant 5.000000e-01 : f32
    %47 = vector.broadcast %cst_53 : f32 to vector<24x32xf32>
    %48 = arith.mulf %47, %46 : vector<24x32xf32>
    %cst_54 = arith.constant 0.707106769 : f32
    %49 = vector.broadcast %cst_54 : f32 to vector<24x32xf32>
    %50 = arith.mulf %46, %49 : vector<24x32xf32>
    %cst_55 = arith.constant 0.000000e+00 : f32
    %51 = vector.broadcast %cst_55 : f32 to vector<24x32xf32>
    %52 = arith.cmpf oge, %50, %51 : vector<24x32xf32>
    %cst_56 = arith.constant 1.000000e+00 : f32
    %cst_57 = arith.constant -1.000000e+00 : f32
    %53 = vector.broadcast %cst_56 : f32 to vector<24x32xf32>
    %54 = vector.broadcast %cst_57 : f32 to vector<24x32xf32>
    %55 = arith.select %52, %53, %54 : vector<24x32xi1>, vector<24x32xf32>
    %56 = math.absf %50 : vector<24x32xf32>
    %cst_58 = arith.constant 0.327591091 : f32
    %57 = vector.broadcast %cst_58 : f32 to vector<24x32xf32>
    %58 = arith.mulf %57, %56 : vector<24x32xf32>
    %cst_59 = arith.constant 1.000000e+00 : f32
    %59 = vector.broadcast %cst_59 : f32 to vector<24x32xf32>
    %60 = arith.addf %59, %58 : vector<24x32xf32>
    %cst_60 = arith.constant 1.000000e+00 : f32
    %61 = vector.broadcast %cst_60 : f32 to vector<24x32xf32>
    %62 = arith.divf %61, %60 : vector<24x32xf32>
    %cst_61 = arith.constant 1.06140542 : f32
    %63 = vector.broadcast %cst_61 : f32 to vector<24x32xf32>
    %64 = arith.mulf %63, %62 : vector<24x32xf32>
    %cst_62 = arith.constant -1.45315206 : f32
    %65 = vector.broadcast %cst_62 : f32 to vector<24x32xf32>
    %66 = arith.addf %64, %65 : vector<24x32xf32>
    %67 = arith.mulf %66, %62 : vector<24x32xf32>
    %cst_63 = arith.constant 1.42141378 : f32
    %68 = vector.broadcast %cst_63 : f32 to vector<24x32xf32>
    %69 = arith.addf %67, %68 : vector<24x32xf32>
    %70 = arith.mulf %69, %62 : vector<24x32xf32>
    %cst_64 = arith.constant -0.284496725 : f32
    %71 = vector.broadcast %cst_64 : f32 to vector<24x32xf32>
    %72 = arith.addf %70, %71 : vector<24x32xf32>
    %73 = arith.mulf %72, %62 : vector<24x32xf32>
    %cst_65 = arith.constant 0.254829586 : f32
    %74 = vector.broadcast %cst_65 : f32 to vector<24x32xf32>
    %75 = arith.addf %73, %74 : vector<24x32xf32>
    %76 = arith.mulf %75, %62 : vector<24x32xf32>
    %cst_66 = arith.constant 0.000000e+00 : f32
    %77 = vector.broadcast %cst_66 : f32 to vector<24x32xf32>
    %78 = arith.subf %77, %56 : vector<24x32xf32>
    %79 = arith.mulf %78, %56 : vector<24x32xf32>
    %80 = math.exp %79 : vector<24x32xf32>
    %81 = arith.mulf %76, %80 : vector<24x32xf32>
    %cst_67 = arith.constant 1.000000e+00 : f32
    %82 = vector.broadcast %cst_67 : f32 to vector<24x32xf32>
    %83 = arith.subf %82, %81 : vector<24x32xf32>
    %84 = arith.mulf %55, %83 : vector<24x32xf32>
    %cst_68 = arith.constant 1.000000e+00 : f32
    %85 = vector.broadcast %cst_68 : f32 to vector<24x32xf32>
    %86 = arith.addf %85, %84 : vector<24x32xf32>
    %87 = arith.mulf %48, %86 : vector<24x32xf32>
    %c0_69 = arith.constant 0 : index
    %c0_70 = arith.constant 0 : index
    %c0_71 = arith.constant 0 : index
    %c0_72 = arith.constant 0 : index
    %88 = vector.load %arg3[%c0_69, %c0_70, %c0_71, %c0_72] : memref<1x1x26x16xf32, #tpu.memory_space<vmem>>, vector<1x1x24x16xf32>
    %89 = vector.shape_cast %88 : vector<1x1x24x16xf32> to vector<24x16xf32>
    %c0_73 = arith.constant 0 : index
    %c0_74 = arith.constant 0 : index
    %90 = vector.load %arg6[%c0_73, %c0_74] : memref<144x32xf32, #tpu.memory_space<vmem>>, vector<16x32xf32>
    %cst_75 = arith.constant dense<0.000000e+00> : vector<24x32xf32>
    %91 = tpu.matmul %89, %90, %cst_75 {dimension_numbers = #tpu.dot_dimension_numbers<[1], [0], [0], [1], [0, 0, 1, 1], [], []>} : vector<24x16xf32>, vector<16x32xf32>, vector<24x32xf32> -> vector<24x32xf32>
    %c0_76 = arith.constant 0 : index
    %c0_77 = arith.constant 0 : index
    %c1_78 = arith.constant 1 : index
    %c0_79 = arith.constant 0 : index
    %92 = vector.load %arg3[%c0_76, %c0_77, %c1_78, %c0_79] : memref<1x1x26x16xf32, #tpu.memory_space<vmem>>, vector<1x1x24x16xf32>
    %93 = vector.shape_cast %92 : vector<1x1x24x16xf32> to vector<24x16xf32>
    %c16_80 = arith.constant 16 : index
    %c0_81 = arith.constant 0 : index
    %94 = vector.load %arg6[%c16_80, %c0_81] : memref<144x32xf32, #tpu.memory_space<vmem>>, vector<16x32xf32>
    %cst_82 = arith.constant dense<0.000000e+00> : vector<24x32xf32>
    %95 = tpu.matmul %93, %94, %cst_82 {dimension_numbers = #tpu.dot_dimension_numbers<[1], [0], [0], [1], [0, 0, 1, 1], [], []>} : vector<24x16xf32>, vector<16x32xf32>, vector<24x32xf32> -> vector<24x32xf32>
    %96 = arith.addf %91, %95 : vector<24x32xf32>
    %c0_83 = arith.constant 0 : index
    %c0_84 = arith.constant 0 : index
    %c2_85 = arith.constant 2 : index
    %c0_86 = arith.constant 0 : index
    %97 = vector.load %arg3[%c0_83, %c0_84, %c2_85, %c0_86] : memref<1x1x26x16xf32, #tpu.memory_space<vmem>>, vector<1x1x24x16xf32>
    %98 = vector.shape_cast %97 : vector<1x1x24x16xf32> to vector<24x16xf32>
    %c32_87 = arith.constant 32 : index
    %c0_88 = arith.constant 0 : index
    %99 = vector.load %arg6[%c32_87, %c0_88] : memref<144x32xf32, #tpu.memory_space<vmem>>, vector<16x32xf32>
    %cst_89 = arith.constant dense<0.000000e+00> : vector<24x32xf32>
    %100 = tpu.matmul %98, %99, %cst_89 {dimension_numbers = #tpu.dot_dimension_numbers<[1], [0], [0], [1], [0, 0, 1, 1], [], []>} : vector<24x16xf32>, vector<16x32xf32>, vector<24x32xf32> -> vector<24x32xf32>
    %101 = arith.addf %96, %100 : vector<24x32xf32>
    %c0_90 = arith.constant 0 : index
    %c0_91 = arith.constant 0 : index
    %c0_92 = arith.constant 0 : index
    %c0_93 = arith.constant 0 : index
    %102 = vector.load %arg4[%c0_90, %c0_91, %c0_92, %c0_93] : memref<1x1x26x16xf32, #tpu.memory_space<vmem>>, vector<1x1x24x16xf32>
    %103 = vector.shape_cast %102 : vector<1x1x24x16xf32> to vector<24x16xf32>
    %c48_94 = arith.constant 48 : index
    %c0_95 = arith.constant 0 : index
    %104 = vector.load %arg6[%c48_94, %c0_95] : memref<144x32xf32, #tpu.memory_space<vmem>>, vector<16x32xf32>
    %cst_96 = arith.constant dense<0.000000e+00> : vector<24x32xf32>
    %105 = tpu.matmul %103, %104, %cst_96 {dimension_numbers = #tpu.dot_dimension_numbers<[1], [0], [0], [1], [0, 0, 1, 1], [], []>} : vector<24x16xf32>, vector<16x32xf32>, vector<24x32xf32> -> vector<24x32xf32>
    %106 = arith.addf %101, %105 : vector<24x32xf32>
    %c0_97 = arith.constant 0 : index
    %c0_98 = arith.constant 0 : index
    %c1_99 = arith.constant 1 : index
    %c0_100 = arith.constant 0 : index
    %107 = vector.load %arg4[%c0_97, %c0_98, %c1_99, %c0_100] : memref<1x1x26x16xf32, #tpu.memory_space<vmem>>, vector<1x1x24x16xf32>
    %108 = vector.shape_cast %107 : vector<1x1x24x16xf32> to vector<24x16xf32>
    %c64_101 = arith.constant 64 : index
    %c0_102 = arith.constant 0 : index
    %109 = vector.load %arg6[%c64_101, %c0_102] : memref<144x32xf32, #tpu.memory_space<vmem>>, vector<16x32xf32>
    %cst_103 = arith.constant dense<0.000000e+00> : vector<24x32xf32>
    %110 = tpu.matmul %108, %109, %cst_103 {dimension_numbers = #tpu.dot_dimension_numbers<[1], [0], [0], [1], [0, 0, 1, 1], [], []>} : vector<24x16xf32>, vector<16x32xf32>, vector<24x32xf32> -> vector<24x32xf32>
    %111 = arith.addf %106, %110 : vector<24x32xf32>
    %c0_104 = arith.constant 0 : index
    %c0_105 = arith.constant 0 : index
    %c2_106 = arith.constant 2 : index
    %c0_107 = arith.constant 0 : index
    %112 = vector.load %arg4[%c0_104, %c0_105, %c2_106, %c0_107] : memref<1x1x26x16xf32, #tpu.memory_space<vmem>>, vector<1x1x24x16xf32>
    %113 = vector.shape_cast %112 : vector<1x1x24x16xf32> to vector<24x16xf32>
    %c80_108 = arith.constant 80 : index
    %c0_109 = arith.constant 0 : index
    %114 = vector.load %arg6[%c80_108, %c0_109] : memref<144x32xf32, #tpu.memory_space<vmem>>, vector<16x32xf32>
    %cst_110 = arith.constant dense<0.000000e+00> : vector<24x32xf32>
    %115 = tpu.matmul %113, %114, %cst_110 {dimension_numbers = #tpu.dot_dimension_numbers<[1], [0], [0], [1], [0, 0, 1, 1], [], []>} : vector<24x16xf32>, vector<16x32xf32>, vector<24x32xf32> -> vector<24x32xf32>
    %116 = arith.addf %111, %115 : vector<24x32xf32>
    %c0_111 = arith.constant 0 : index
    %c0_112 = arith.constant 0 : index
    %c0_113 = arith.constant 0 : index
    %c0_114 = arith.constant 0 : index
    %117 = vector.load %arg5[%c0_111, %c0_112, %c0_113, %c0_114] : memref<1x1x26x16xf32, #tpu.memory_space<vmem>>, vector<1x1x24x16xf32>
    %118 = vector.shape_cast %117 : vector<1x1x24x16xf32> to vector<24x16xf32>
    %c96_115 = arith.constant 96 : index
    %c0_116 = arith.constant 0 : index
    %119 = vector.load %arg6[%c96_115, %c0_116] : memref<144x32xf32, #tpu.memory_space<vmem>>, vector<16x32xf32>
    %cst_117 = arith.constant dense<0.000000e+00> : vector<24x32xf32>
    %120 = tpu.matmul %118, %119, %cst_117 {dimension_numbers = #tpu.dot_dimension_numbers<[1], [0], [0], [1], [0, 0, 1, 1], [], []>} : vector<24x16xf32>, vector<16x32xf32>, vector<24x32xf32> -> vector<24x32xf32>
    %121 = arith.addf %116, %120 : vector<24x32xf32>
    %c0_118 = arith.constant 0 : index
    %c0_119 = arith.constant 0 : index
    %c1_120 = arith.constant 1 : index
    %c0_121 = arith.constant 0 : index
    %122 = vector.load %arg5[%c0_118, %c0_119, %c1_120, %c0_121] : memref<1x1x26x16xf32, #tpu.memory_space<vmem>>, vector<1x1x24x16xf32>
    %123 = vector.shape_cast %122 : vector<1x1x24x16xf32> to vector<24x16xf32>
    %c112_122 = arith.constant 112 : index
    %c0_123 = arith.constant 0 : index
    %124 = vector.load %arg6[%c112_122, %c0_123] : memref<144x32xf32, #tpu.memory_space<vmem>>, vector<16x32xf32>
    %cst_124 = arith.constant dense<0.000000e+00> : vector<24x32xf32>
    %125 = tpu.matmul %123, %124, %cst_124 {dimension_numbers = #tpu.dot_dimension_numbers<[1], [0], [0], [1], [0, 0, 1, 1], [], []>} : vector<24x16xf32>, vector<16x32xf32>, vector<24x32xf32> -> vector<24x32xf32>
    %126 = arith.addf %121, %125 : vector<24x32xf32>
    %c0_125 = arith.constant 0 : index
    %c0_126 = arith.constant 0 : index
    %c2_127 = arith.constant 2 : index
    %c0_128 = arith.constant 0 : index
    %127 = vector.load %arg5[%c0_125, %c0_126, %c2_127, %c0_128] : memref<1x1x26x16xf32, #tpu.memory_space<vmem>>, vector<1x1x24x16xf32>
    %128 = vector.shape_cast %127 : vector<1x1x24x16xf32> to vector<24x16xf32>
    %c128_129 = arith.constant 128 : index
    %c0_130 = arith.constant 0 : index
    %129 = vector.load %arg6[%c128_129, %c0_130] : memref<144x32xf32, #tpu.memory_space<vmem>>, vector<16x32xf32>
    %cst_131 = arith.constant dense<0.000000e+00> : vector<24x32xf32>
    %130 = tpu.matmul %128, %129, %cst_131 {dimension_numbers = #tpu.dot_dimension_numbers<[1], [0], [0], [1], [0, 0, 1, 1], [], []>} : vector<24x16xf32>, vector<16x32xf32>, vector<24x32xf32> -> vector<24x32xf32>
    %131 = arith.addf %126, %130 : vector<24x32xf32>
    %132 = vector.broadcast %0 : vector<1x32xf32> to vector<24x32xf32>
    %133 = arith.addf %131, %132 : vector<24x32xf32>
    %cst_132 = arith.constant 5.000000e-01 : f32
    %134 = vector.broadcast %cst_132 : f32 to vector<24x32xf32>
    %135 = arith.mulf %134, %133 : vector<24x32xf32>
    %cst_133 = arith.constant 0.707106769 : f32
    %136 = vector.broadcast %cst_133 : f32 to vector<24x32xf32>
    %137 = arith.mulf %133, %136 : vector<24x32xf32>
    %cst_134 = arith.constant 0.000000e+00 : f32
    %138 = vector.broadcast %cst_134 : f32 to vector<24x32xf32>
    %139 = arith.cmpf oge, %137, %138 : vector<24x32xf32>
    %cst_135 = arith.constant 1.000000e+00 : f32
    %cst_136 = arith.constant -1.000000e+00 : f32
    %140 = vector.broadcast %cst_135 : f32 to vector<24x32xf32>
    %141 = vector.broadcast %cst_136 : f32 to vector<24x32xf32>
    %142 = arith.select %139, %140, %141 : vector<24x32xi1>, vector<24x32xf32>
    %143 = math.absf %137 : vector<24x32xf32>
    %cst_137 = arith.constant 0.327591091 : f32
    %144 = vector.broadcast %cst_137 : f32 to vector<24x32xf32>
    %145 = arith.mulf %144, %143 : vector<24x32xf32>
    %cst_138 = arith.constant 1.000000e+00 : f32
    %146 = vector.broadcast %cst_138 : f32 to vector<24x32xf32>
    %147 = arith.addf %146, %145 : vector<24x32xf32>
    %cst_139 = arith.constant 1.000000e+00 : f32
    %148 = vector.broadcast %cst_139 : f32 to vector<24x32xf32>
    %149 = arith.divf %148, %147 : vector<24x32xf32>
    %cst_140 = arith.constant 1.06140542 : f32
    %150 = vector.broadcast %cst_140 : f32 to vector<24x32xf32>
    %151 = arith.mulf %150, %149 : vector<24x32xf32>
    %cst_141 = arith.constant -1.45315206 : f32
    %152 = vector.broadcast %cst_141 : f32 to vector<24x32xf32>
    %153 = arith.addf %151, %152 : vector<24x32xf32>
    %154 = arith.mulf %153, %149 : vector<24x32xf32>
    %cst_142 = arith.constant 1.42141378 : f32
    %155 = vector.broadcast %cst_142 : f32 to vector<24x32xf32>
    %156 = arith.addf %154, %155 : vector<24x32xf32>
    %157 = arith.mulf %156, %149 : vector<24x32xf32>
    %cst_143 = arith.constant -0.284496725 : f32
    %158 = vector.broadcast %cst_143 : f32 to vector<24x32xf32>
    %159 = arith.addf %157, %158 : vector<24x32xf32>
    %160 = arith.mulf %159, %149 : vector<24x32xf32>
    %cst_144 = arith.constant 0.254829586 : f32
    %161 = vector.broadcast %cst_144 : f32 to vector<24x32xf32>
    %162 = arith.addf %160, %161 : vector<24x32xf32>
    %163 = arith.mulf %162, %149 : vector<24x32xf32>
    %cst_145 = arith.constant 0.000000e+00 : f32
    %164 = vector.broadcast %cst_145 : f32 to vector<24x32xf32>
    %165 = arith.subf %164, %143 : vector<24x32xf32>
    %166 = arith.mulf %165, %143 : vector<24x32xf32>
    %167 = math.exp %166 : vector<24x32xf32>
    %168 = arith.mulf %163, %167 : vector<24x32xf32>
    %cst_146 = arith.constant 1.000000e+00 : f32
    %169 = vector.broadcast %cst_146 : f32 to vector<24x32xf32>
    %170 = arith.subf %169, %168 : vector<24x32xf32>
    %171 = arith.mulf %142, %170 : vector<24x32xf32>
    %cst_147 = arith.constant 1.000000e+00 : f32
    %172 = vector.broadcast %cst_147 : f32 to vector<24x32xf32>
    %173 = arith.addf %172, %171 : vector<24x32xf32>
    %174 = arith.mulf %135, %173 : vector<24x32xf32>
    %175 = arith.maximumf %87, %174 : vector<24x32xf32>
    %c0_148 = arith.constant 0 : index
    %c0_149 = arith.constant 0 : index
    %c0_150 = arith.constant 0 : index
    %c0_151 = arith.constant 0 : index
    %176 = vector.load %arg8[%c0_148, %c0_149, %c0_150, %c0_151] : memref<1x1x24x32xf32, #tpu.memory_space<vmem>>, vector<1x1x24x32xf32>
    %177 = vector.shape_cast %176 : vector<1x1x24x32xf32> to vector<24x32xf32>
    %178 = vector.shape_cast %175 : vector<24x32xf32> to vector<1x1x24x32xf32>
    tpu.vector_store %arg8[%c0_148, %c0_149, %c0_150, %c0_151], %178 {strides = array<i32>} : memref<1x1x24x32xf32, #tpu.memory_space<vmem>>, vector<1x1x24x32xf32>,
    return
  }
  func.func @transform_0(%arg0: i32, %arg1: i32) -> (i32, i32, i32, i32) {
    %c2_i32 = arith.constant 2 : i32
    %0 = arith.muli %c2_i32, %arg1 : i32
    %c0_i32 = arith.constant 0 : i32
    %1 = arith.addi %0, %c0_i32 : i32
    %c0_i32_0 = arith.constant 0 : i32
    %c0_i32_1 = arith.constant 0 : i32
    %c0_i32_2 = arith.constant 0 : i32
    return %arg0, %1, %c0_i32_0, %c0_i32_1 : i32, i32, i32, i32
  }
  func.func @transform_1(%arg0: i32, %arg1: i32) -> (i32, i32, i32, i32) {
    %c2_i32 = arith.constant 2 : i32
    %0 = arith.muli %c2_i32, %arg1 : i32
    %c1_i32 = arith.constant 1 : i32
    %1 = arith.addi %0, %c1_i32 : i32
    %c0_i32 = arith.constant 0 : i32
    %c0_i32_0 = arith.constant 0 : i32
    %c0_i32_1 = arith.constant 0 : i32
    return %arg0, %1, %c0_i32, %c0_i32_0 : i32, i32, i32, i32
  }
  func.func @transform_2(%arg0: i32, %arg1: i32) -> (i32, i32, i32, i32) {
    %c2_i32 = arith.constant 2 : i32
    %0 = arith.muli %c2_i32, %arg1 : i32
    %c2_i32_0 = arith.constant 2 : i32
    %1 = arith.addi %0, %c2_i32_0 : i32
    %c0_i32 = arith.constant 0 : i32
    %c0_i32_1 = arith.constant 0 : i32
    %c0_i32_2 = arith.constant 0 : i32
    return %arg0, %1, %c0_i32, %c0_i32_1 : i32, i32, i32, i32
  }
  func.func @transform_3(%arg0: i32, %arg1: i32) -> (i32, i32, i32, i32) {
    %c2_i32 = arith.constant 2 : i32
    %0 = arith.muli %c2_i32, %arg1 : i32
    %c3_i32 = arith.constant 3 : i32
    %1 = arith.addi %0, %c3_i32 : i32
    %c0_i32 = arith.constant 0 : i32
    %c0_i32_0 = arith.constant 0 : i32
    %c0_i32_1 = arith.constant 0 : i32
    return %arg0, %1, %c0_i32, %c0_i32_0 : i32, i32, i32, i32
  }
  func.func @transform_4(%arg0: i32, %arg1: i32) -> (i32, i32) {
    %c0_i32 = arith.constant 0 : i32
    %c0_i32_0 = arith.constant 0 : i32
    %c0_i32_1 = arith.constant 0 : i32
    return %c0_i32, %c0_i32_0 : i32, i32
  }
  func.func @transform_5(%arg0: i32, %arg1: i32) -> (i32, i32) {
    %c0_i32 = arith.constant 0 : i32
    %c0_i32_0 = arith.constant 0 : i32
    %c0_i32_1 = arith.constant 0 : i32
    return %c0_i32, %c0_i32_0 : i32, i32
  }
  func.func @transform_6(%arg0: i32, %arg1: i32) -> (i32, i32, i32, i32) {
    %c0_i32 = arith.constant 0 : i32
    %c0_i32_0 = arith.constant 0 : i32
    %c0_i32_1 = arith.constant 0 : i32
    return %arg0, %arg1, %c0_i32, %c0_i32_0 : i32, i32, i32, i32
  }
}

module attributes {stable_mosaic.version = 11 : i64} {
  func.func @_conv_row_kernel(%arg0: i32, %arg1: i32, %arg2: memref<1x1x14x32xf32, #tpu.memory_space<vmem>>, %arg3: memref<1x1x14x32xf32, #tpu.memory_space<vmem>>, %arg4: memref<1x1x14x32xf32, #tpu.memory_space<vmem>>, %arg5: memref<1x1x14x32xf32, #tpu.memory_space<vmem>>, %arg6: memref<288x32xf32, #tpu.memory_space<vmem>>, %arg7: memref<1x32xf32, #tpu.memory_space<vmem>>, %arg8: memref<1x1x12x32xf32, #tpu.memory_space<vmem>>) attributes {dimension_semantics = [#tpu.dimension_semantics<parallel>, #tpu.dimension_semantics<parallel>], iteration_bounds = array<i64: 2, 3>, scalar_prefetch = 0 : i64, scratch_operands = 0 : i64, tpu.core_type = #tpu.core_type<tc>, window_params = [{transform_indices = @transform_0, window_bounds = array<i64: 1, 1, 14, 32>}, {transform_indices = @transform_1, window_bounds = array<i64: 1, 1, 14, 32>}, {transform_indices = @transform_2, window_bounds = array<i64: 1, 1, 14, 32>}, {transform_indices = @transform_3, window_bounds = array<i64: 1, 1, 14, 32>}, {pipeline_mode = #tpu.pipeline_mode<synchronous>, transform_indices = @transform_4, window_bounds = array<i64: 288, 32>}, {pipeline_mode = #tpu.pipeline_mode<synchronous>, transform_indices = @transform_5, window_bounds = array<i64: 1, 32>}, {transform_indices = @transform_6, window_bounds = array<i64: 1, 1, 12, 32>}]} {
    %c0 = arith.constant 0 : index
    %c0_0 = arith.constant 0 : index
    %0 = vector.load %arg7[%c0, %c0_0] : memref<1x32xf32, #tpu.memory_space<vmem>>, vector<1x32xf32>
    %c0_1 = arith.constant 0 : index
    %c0_2 = arith.constant 0 : index
    %c0_3 = arith.constant 0 : index
    %c0_4 = arith.constant 0 : index
    %1 = vector.load %arg2[%c0_1, %c0_2, %c0_3, %c0_4] : memref<1x1x14x32xf32, #tpu.memory_space<vmem>>, vector<1x1x12x32xf32>
    %2 = vector.shape_cast %1 : vector<1x1x12x32xf32> to vector<12x32xf32>
    %c0_5 = arith.constant 0 : index
    %c0_6 = arith.constant 0 : index
    %3 = vector.load %arg6[%c0_5, %c0_6] : memref<288x32xf32, #tpu.memory_space<vmem>>, vector<32x32xf32>
    %cst = arith.constant dense<0.000000e+00> : vector<12x32xf32>
    %4 = tpu.matmul %2, %3, %cst {dimension_numbers = #tpu.dot_dimension_numbers<[1], [0], [0], [1], [0, 0, 1, 1], [], []>} : vector<12x32xf32>, vector<32x32xf32>, vector<12x32xf32> -> vector<12x32xf32>
    %c0_7 = arith.constant 0 : index
    %c0_8 = arith.constant 0 : index
    %c1 = arith.constant 1 : index
    %c0_9 = arith.constant 0 : index
    %5 = vector.load %arg2[%c0_7, %c0_8, %c1, %c0_9] : memref<1x1x14x32xf32, #tpu.memory_space<vmem>>, vector<1x1x12x32xf32>
    %6 = vector.shape_cast %5 : vector<1x1x12x32xf32> to vector<12x32xf32>
    %c32 = arith.constant 32 : index
    %c0_10 = arith.constant 0 : index
    %7 = vector.load %arg6[%c32, %c0_10] : memref<288x32xf32, #tpu.memory_space<vmem>>, vector<32x32xf32>
    %cst_11 = arith.constant dense<0.000000e+00> : vector<12x32xf32>
    %8 = tpu.matmul %6, %7, %cst_11 {dimension_numbers = #tpu.dot_dimension_numbers<[1], [0], [0], [1], [0, 0, 1, 1], [], []>} : vector<12x32xf32>, vector<32x32xf32>, vector<12x32xf32> -> vector<12x32xf32>
    %9 = arith.addf %4, %8 : vector<12x32xf32>
    %c0_12 = arith.constant 0 : index
    %c0_13 = arith.constant 0 : index
    %c2 = arith.constant 2 : index
    %c0_14 = arith.constant 0 : index
    %10 = vector.load %arg2[%c0_12, %c0_13, %c2, %c0_14] : memref<1x1x14x32xf32, #tpu.memory_space<vmem>>, vector<1x1x12x32xf32>
    %11 = vector.shape_cast %10 : vector<1x1x12x32xf32> to vector<12x32xf32>
    %c64 = arith.constant 64 : index
    %c0_15 = arith.constant 0 : index
    %12 = vector.load %arg6[%c64, %c0_15] : memref<288x32xf32, #tpu.memory_space<vmem>>, vector<32x32xf32>
    %cst_16 = arith.constant dense<0.000000e+00> : vector<12x32xf32>
    %13 = tpu.matmul %11, %12, %cst_16 {dimension_numbers = #tpu.dot_dimension_numbers<[1], [0], [0], [1], [0, 0, 1, 1], [], []>} : vector<12x32xf32>, vector<32x32xf32>, vector<12x32xf32> -> vector<12x32xf32>
    %14 = arith.addf %9, %13 : vector<12x32xf32>
    %c0_17 = arith.constant 0 : index
    %c0_18 = arith.constant 0 : index
    %c0_19 = arith.constant 0 : index
    %c0_20 = arith.constant 0 : index
    %15 = vector.load %arg3[%c0_17, %c0_18, %c0_19, %c0_20] : memref<1x1x14x32xf32, #tpu.memory_space<vmem>>, vector<1x1x12x32xf32>
    %16 = vector.shape_cast %15 : vector<1x1x12x32xf32> to vector<12x32xf32>
    %c96 = arith.constant 96 : index
    %c0_21 = arith.constant 0 : index
    %17 = vector.load %arg6[%c96, %c0_21] : memref<288x32xf32, #tpu.memory_space<vmem>>, vector<32x32xf32>
    %cst_22 = arith.constant dense<0.000000e+00> : vector<12x32xf32>
    %18 = tpu.matmul %16, %17, %cst_22 {dimension_numbers = #tpu.dot_dimension_numbers<[1], [0], [0], [1], [0, 0, 1, 1], [], []>} : vector<12x32xf32>, vector<32x32xf32>, vector<12x32xf32> -> vector<12x32xf32>
    %19 = arith.addf %14, %18 : vector<12x32xf32>
    %c0_23 = arith.constant 0 : index
    %c0_24 = arith.constant 0 : index
    %c1_25 = arith.constant 1 : index
    %c0_26 = arith.constant 0 : index
    %20 = vector.load %arg3[%c0_23, %c0_24, %c1_25, %c0_26] : memref<1x1x14x32xf32, #tpu.memory_space<vmem>>, vector<1x1x12x32xf32>
    %21 = vector.shape_cast %20 : vector<1x1x12x32xf32> to vector<12x32xf32>
    %c128 = arith.constant 128 : index
    %c0_27 = arith.constant 0 : index
    %22 = vector.load %arg6[%c128, %c0_27] : memref<288x32xf32, #tpu.memory_space<vmem>>, vector<32x32xf32>
    %cst_28 = arith.constant dense<0.000000e+00> : vector<12x32xf32>
    %23 = tpu.matmul %21, %22, %cst_28 {dimension_numbers = #tpu.dot_dimension_numbers<[1], [0], [0], [1], [0, 0, 1, 1], [], []>} : vector<12x32xf32>, vector<32x32xf32>, vector<12x32xf32> -> vector<12x32xf32>
    %24 = arith.addf %19, %23 : vector<12x32xf32>
    %c0_29 = arith.constant 0 : index
    %c0_30 = arith.constant 0 : index
    %c2_31 = arith.constant 2 : index
    %c0_32 = arith.constant 0 : index
    %25 = vector.load %arg3[%c0_29, %c0_30, %c2_31, %c0_32] : memref<1x1x14x32xf32, #tpu.memory_space<vmem>>, vector<1x1x12x32xf32>
    %26 = vector.shape_cast %25 : vector<1x1x12x32xf32> to vector<12x32xf32>
    %c160 = arith.constant 160 : index
    %c0_33 = arith.constant 0 : index
    %27 = vector.load %arg6[%c160, %c0_33] : memref<288x32xf32, #tpu.memory_space<vmem>>, vector<32x32xf32>
    %cst_34 = arith.constant dense<0.000000e+00> : vector<12x32xf32>
    %28 = tpu.matmul %26, %27, %cst_34 {dimension_numbers = #tpu.dot_dimension_numbers<[1], [0], [0], [1], [0, 0, 1, 1], [], []>} : vector<12x32xf32>, vector<32x32xf32>, vector<12x32xf32> -> vector<12x32xf32>
    %29 = arith.addf %24, %28 : vector<12x32xf32>
    %c0_35 = arith.constant 0 : index
    %c0_36 = arith.constant 0 : index
    %c0_37 = arith.constant 0 : index
    %c0_38 = arith.constant 0 : index
    %30 = vector.load %arg4[%c0_35, %c0_36, %c0_37, %c0_38] : memref<1x1x14x32xf32, #tpu.memory_space<vmem>>, vector<1x1x12x32xf32>
    %31 = vector.shape_cast %30 : vector<1x1x12x32xf32> to vector<12x32xf32>
    %c192 = arith.constant 192 : index
    %c0_39 = arith.constant 0 : index
    %32 = vector.load %arg6[%c192, %c0_39] : memref<288x32xf32, #tpu.memory_space<vmem>>, vector<32x32xf32>
    %cst_40 = arith.constant dense<0.000000e+00> : vector<12x32xf32>
    %33 = tpu.matmul %31, %32, %cst_40 {dimension_numbers = #tpu.dot_dimension_numbers<[1], [0], [0], [1], [0, 0, 1, 1], [], []>} : vector<12x32xf32>, vector<32x32xf32>, vector<12x32xf32> -> vector<12x32xf32>
    %34 = arith.addf %29, %33 : vector<12x32xf32>
    %c0_41 = arith.constant 0 : index
    %c0_42 = arith.constant 0 : index
    %c1_43 = arith.constant 1 : index
    %c0_44 = arith.constant 0 : index
    %35 = vector.load %arg4[%c0_41, %c0_42, %c1_43, %c0_44] : memref<1x1x14x32xf32, #tpu.memory_space<vmem>>, vector<1x1x12x32xf32>
    %36 = vector.shape_cast %35 : vector<1x1x12x32xf32> to vector<12x32xf32>
    %c224 = arith.constant 224 : index
    %c0_45 = arith.constant 0 : index
    %37 = vector.load %arg6[%c224, %c0_45] : memref<288x32xf32, #tpu.memory_space<vmem>>, vector<32x32xf32>
    %cst_46 = arith.constant dense<0.000000e+00> : vector<12x32xf32>
    %38 = tpu.matmul %36, %37, %cst_46 {dimension_numbers = #tpu.dot_dimension_numbers<[1], [0], [0], [1], [0, 0, 1, 1], [], []>} : vector<12x32xf32>, vector<32x32xf32>, vector<12x32xf32> -> vector<12x32xf32>
    %39 = arith.addf %34, %38 : vector<12x32xf32>
    %c0_47 = arith.constant 0 : index
    %c0_48 = arith.constant 0 : index
    %c2_49 = arith.constant 2 : index
    %c0_50 = arith.constant 0 : index
    %40 = vector.load %arg4[%c0_47, %c0_48, %c2_49, %c0_50] : memref<1x1x14x32xf32, #tpu.memory_space<vmem>>, vector<1x1x12x32xf32>
    %41 = vector.shape_cast %40 : vector<1x1x12x32xf32> to vector<12x32xf32>
    %c256 = arith.constant 256 : index
    %c0_51 = arith.constant 0 : index
    %42 = vector.load %arg6[%c256, %c0_51] : memref<288x32xf32, #tpu.memory_space<vmem>>, vector<32x32xf32>
    %cst_52 = arith.constant dense<0.000000e+00> : vector<12x32xf32>
    %43 = tpu.matmul %41, %42, %cst_52 {dimension_numbers = #tpu.dot_dimension_numbers<[1], [0], [0], [1], [0, 0, 1, 1], [], []>} : vector<12x32xf32>, vector<32x32xf32>, vector<12x32xf32> -> vector<12x32xf32>
    %44 = arith.addf %39, %43 : vector<12x32xf32>
    %45 = vector.broadcast %0 : vector<1x32xf32> to vector<12x32xf32>
    %46 = arith.addf %44, %45 : vector<12x32xf32>
    %cst_53 = arith.constant 5.000000e-01 : f32
    %47 = vector.broadcast %cst_53 : f32 to vector<12x32xf32>
    %48 = arith.mulf %47, %46 : vector<12x32xf32>
    %cst_54 = arith.constant 0.707106769 : f32
    %49 = vector.broadcast %cst_54 : f32 to vector<12x32xf32>
    %50 = arith.mulf %46, %49 : vector<12x32xf32>
    %cst_55 = arith.constant 0.000000e+00 : f32
    %51 = vector.broadcast %cst_55 : f32 to vector<12x32xf32>
    %52 = arith.cmpf oge, %50, %51 : vector<12x32xf32>
    %cst_56 = arith.constant 1.000000e+00 : f32
    %cst_57 = arith.constant -1.000000e+00 : f32
    %53 = vector.broadcast %cst_56 : f32 to vector<12x32xf32>
    %54 = vector.broadcast %cst_57 : f32 to vector<12x32xf32>
    %55 = arith.select %52, %53, %54 : vector<12x32xi1>, vector<12x32xf32>
    %56 = math.absf %50 : vector<12x32xf32>
    %cst_58 = arith.constant 0.327591091 : f32
    %57 = vector.broadcast %cst_58 : f32 to vector<12x32xf32>
    %58 = arith.mulf %57, %56 : vector<12x32xf32>
    %cst_59 = arith.constant 1.000000e+00 : f32
    %59 = vector.broadcast %cst_59 : f32 to vector<12x32xf32>
    %60 = arith.addf %59, %58 : vector<12x32xf32>
    %cst_60 = arith.constant 1.000000e+00 : f32
    %61 = vector.broadcast %cst_60 : f32 to vector<12x32xf32>
    %62 = arith.divf %61, %60 : vector<12x32xf32>
    %cst_61 = arith.constant 1.06140542 : f32
    %63 = vector.broadcast %cst_61 : f32 to vector<12x32xf32>
    %64 = arith.mulf %63, %62 : vector<12x32xf32>
    %cst_62 = arith.constant -1.45315206 : f32
    %65 = vector.broadcast %cst_62 : f32 to vector<12x32xf32>
    %66 = arith.addf %64, %65 : vector<12x32xf32>
    %67 = arith.mulf %66, %62 : vector<12x32xf32>
    %cst_63 = arith.constant 1.42141378 : f32
    %68 = vector.broadcast %cst_63 : f32 to vector<12x32xf32>
    %69 = arith.addf %67, %68 : vector<12x32xf32>
    %70 = arith.mulf %69, %62 : vector<12x32xf32>
    %cst_64 = arith.constant -0.284496725 : f32
    %71 = vector.broadcast %cst_64 : f32 to vector<12x32xf32>
    %72 = arith.addf %70, %71 : vector<12x32xf32>
    %73 = arith.mulf %72, %62 : vector<12x32xf32>
    %cst_65 = arith.constant 0.254829586 : f32
    %74 = vector.broadcast %cst_65 : f32 to vector<12x32xf32>
    %75 = arith.addf %73, %74 : vector<12x32xf32>
    %76 = arith.mulf %75, %62 : vector<12x32xf32>
    %cst_66 = arith.constant 0.000000e+00 : f32
    %77 = vector.broadcast %cst_66 : f32 to vector<12x32xf32>
    %78 = arith.subf %77, %56 : vector<12x32xf32>
    %79 = arith.mulf %78, %56 : vector<12x32xf32>
    %80 = math.exp %79 : vector<12x32xf32>
    %81 = arith.mulf %76, %80 : vector<12x32xf32>
    %cst_67 = arith.constant 1.000000e+00 : f32
    %82 = vector.broadcast %cst_67 : f32 to vector<12x32xf32>
    %83 = arith.subf %82, %81 : vector<12x32xf32>
    %84 = arith.mulf %55, %83 : vector<12x32xf32>
    %cst_68 = arith.constant 1.000000e+00 : f32
    %85 = vector.broadcast %cst_68 : f32 to vector<12x32xf32>
    %86 = arith.addf %85, %84 : vector<12x32xf32>
    %87 = arith.mulf %48, %86 : vector<12x32xf32>
    %c0_69 = arith.constant 0 : index
    %c0_70 = arith.constant 0 : index
    %c0_71 = arith.constant 0 : index
    %c0_72 = arith.constant 0 : index
    %88 = vector.load %arg3[%c0_69, %c0_70, %c0_71, %c0_72] : memref<1x1x14x32xf32, #tpu.memory_space<vmem>>, vector<1x1x12x32xf32>
    %89 = vector.shape_cast %88 : vector<1x1x12x32xf32> to vector<12x32xf32>
    %c0_73 = arith.constant 0 : index
    %c0_74 = arith.constant 0 : index
    %90 = vector.load %arg6[%c0_73, %c0_74] : memref<288x32xf32, #tpu.memory_space<vmem>>, vector<32x32xf32>
    %cst_75 = arith.constant dense<0.000000e+00> : vector<12x32xf32>
    %91 = tpu.matmul %89, %90, %cst_75 {dimension_numbers = #tpu.dot_dimension_numbers<[1], [0], [0], [1], [0, 0, 1, 1], [], []>} : vector<12x32xf32>, vector<32x32xf32>, vector<12x32xf32> -> vector<12x32xf32>
    %c0_76 = arith.constant 0 : index
    %c0_77 = arith.constant 0 : index
    %c1_78 = arith.constant 1 : index
    %c0_79 = arith.constant 0 : index
    %92 = vector.load %arg3[%c0_76, %c0_77, %c1_78, %c0_79] : memref<1x1x14x32xf32, #tpu.memory_space<vmem>>, vector<1x1x12x32xf32>
    %93 = vector.shape_cast %92 : vector<1x1x12x32xf32> to vector<12x32xf32>
    %c32_80 = arith.constant 32 : index
    %c0_81 = arith.constant 0 : index
    %94 = vector.load %arg6[%c32_80, %c0_81] : memref<288x32xf32, #tpu.memory_space<vmem>>, vector<32x32xf32>
    %cst_82 = arith.constant dense<0.000000e+00> : vector<12x32xf32>
    %95 = tpu.matmul %93, %94, %cst_82 {dimension_numbers = #tpu.dot_dimension_numbers<[1], [0], [0], [1], [0, 0, 1, 1], [], []>} : vector<12x32xf32>, vector<32x32xf32>, vector<12x32xf32> -> vector<12x32xf32>
    %96 = arith.addf %91, %95 : vector<12x32xf32>
    %c0_83 = arith.constant 0 : index
    %c0_84 = arith.constant 0 : index
    %c2_85 = arith.constant 2 : index
    %c0_86 = arith.constant 0 : index
    %97 = vector.load %arg3[%c0_83, %c0_84, %c2_85, %c0_86] : memref<1x1x14x32xf32, #tpu.memory_space<vmem>>, vector<1x1x12x32xf32>
    %98 = vector.shape_cast %97 : vector<1x1x12x32xf32> to vector<12x32xf32>
    %c64_87 = arith.constant 64 : index
    %c0_88 = arith.constant 0 : index
    %99 = vector.load %arg6[%c64_87, %c0_88] : memref<288x32xf32, #tpu.memory_space<vmem>>, vector<32x32xf32>
    %cst_89 = arith.constant dense<0.000000e+00> : vector<12x32xf32>
    %100 = tpu.matmul %98, %99, %cst_89 {dimension_numbers = #tpu.dot_dimension_numbers<[1], [0], [0], [1], [0, 0, 1, 1], [], []>} : vector<12x32xf32>, vector<32x32xf32>, vector<12x32xf32> -> vector<12x32xf32>
    %101 = arith.addf %96, %100 : vector<12x32xf32>
    %c0_90 = arith.constant 0 : index
    %c0_91 = arith.constant 0 : index
    %c0_92 = arith.constant 0 : index
    %c0_93 = arith.constant 0 : index
    %102 = vector.load %arg4[%c0_90, %c0_91, %c0_92, %c0_93] : memref<1x1x14x32xf32, #tpu.memory_space<vmem>>, vector<1x1x12x32xf32>
    %103 = vector.shape_cast %102 : vector<1x1x12x32xf32> to vector<12x32xf32>
    %c96_94 = arith.constant 96 : index
    %c0_95 = arith.constant 0 : index
    %104 = vector.load %arg6[%c96_94, %c0_95] : memref<288x32xf32, #tpu.memory_space<vmem>>, vector<32x32xf32>
    %cst_96 = arith.constant dense<0.000000e+00> : vector<12x32xf32>
    %105 = tpu.matmul %103, %104, %cst_96 {dimension_numbers = #tpu.dot_dimension_numbers<[1], [0], [0], [1], [0, 0, 1, 1], [], []>} : vector<12x32xf32>, vector<32x32xf32>, vector<12x32xf32> -> vector<12x32xf32>
    %106 = arith.addf %101, %105 : vector<12x32xf32>
    %c0_97 = arith.constant 0 : index
    %c0_98 = arith.constant 0 : index
    %c1_99 = arith.constant 1 : index
    %c0_100 = arith.constant 0 : index
    %107 = vector.load %arg4[%c0_97, %c0_98, %c1_99, %c0_100] : memref<1x1x14x32xf32, #tpu.memory_space<vmem>>, vector<1x1x12x32xf32>
    %108 = vector.shape_cast %107 : vector<1x1x12x32xf32> to vector<12x32xf32>
    %c128_101 = arith.constant 128 : index
    %c0_102 = arith.constant 0 : index
    %109 = vector.load %arg6[%c128_101, %c0_102] : memref<288x32xf32, #tpu.memory_space<vmem>>, vector<32x32xf32>
    %cst_103 = arith.constant dense<0.000000e+00> : vector<12x32xf32>
    %110 = tpu.matmul %108, %109, %cst_103 {dimension_numbers = #tpu.dot_dimension_numbers<[1], [0], [0], [1], [0, 0, 1, 1], [], []>} : vector<12x32xf32>, vector<32x32xf32>, vector<12x32xf32> -> vector<12x32xf32>
    %111 = arith.addf %106, %110 : vector<12x32xf32>
    %c0_104 = arith.constant 0 : index
    %c0_105 = arith.constant 0 : index
    %c2_106 = arith.constant 2 : index
    %c0_107 = arith.constant 0 : index
    %112 = vector.load %arg4[%c0_104, %c0_105, %c2_106, %c0_107] : memref<1x1x14x32xf32, #tpu.memory_space<vmem>>, vector<1x1x12x32xf32>
    %113 = vector.shape_cast %112 : vector<1x1x12x32xf32> to vector<12x32xf32>
    %c160_108 = arith.constant 160 : index
    %c0_109 = arith.constant 0 : index
    %114 = vector.load %arg6[%c160_108, %c0_109] : memref<288x32xf32, #tpu.memory_space<vmem>>, vector<32x32xf32>
    %cst_110 = arith.constant dense<0.000000e+00> : vector<12x32xf32>
    %115 = tpu.matmul %113, %114, %cst_110 {dimension_numbers = #tpu.dot_dimension_numbers<[1], [0], [0], [1], [0, 0, 1, 1], [], []>} : vector<12x32xf32>, vector<32x32xf32>, vector<12x32xf32> -> vector<12x32xf32>
    %116 = arith.addf %111, %115 : vector<12x32xf32>
    %c0_111 = arith.constant 0 : index
    %c0_112 = arith.constant 0 : index
    %c0_113 = arith.constant 0 : index
    %c0_114 = arith.constant 0 : index
    %117 = vector.load %arg5[%c0_111, %c0_112, %c0_113, %c0_114] : memref<1x1x14x32xf32, #tpu.memory_space<vmem>>, vector<1x1x12x32xf32>
    %118 = vector.shape_cast %117 : vector<1x1x12x32xf32> to vector<12x32xf32>
    %c192_115 = arith.constant 192 : index
    %c0_116 = arith.constant 0 : index
    %119 = vector.load %arg6[%c192_115, %c0_116] : memref<288x32xf32, #tpu.memory_space<vmem>>, vector<32x32xf32>
    %cst_117 = arith.constant dense<0.000000e+00> : vector<12x32xf32>
    %120 = tpu.matmul %118, %119, %cst_117 {dimension_numbers = #tpu.dot_dimension_numbers<[1], [0], [0], [1], [0, 0, 1, 1], [], []>} : vector<12x32xf32>, vector<32x32xf32>, vector<12x32xf32> -> vector<12x32xf32>
    %121 = arith.addf %116, %120 : vector<12x32xf32>
    %c0_118 = arith.constant 0 : index
    %c0_119 = arith.constant 0 : index
    %c1_120 = arith.constant 1 : index
    %c0_121 = arith.constant 0 : index
    %122 = vector.load %arg5[%c0_118, %c0_119, %c1_120, %c0_121] : memref<1x1x14x32xf32, #tpu.memory_space<vmem>>, vector<1x1x12x32xf32>
    %123 = vector.shape_cast %122 : vector<1x1x12x32xf32> to vector<12x32xf32>
    %c224_122 = arith.constant 224 : index
    %c0_123 = arith.constant 0 : index
    %124 = vector.load %arg6[%c224_122, %c0_123] : memref<288x32xf32, #tpu.memory_space<vmem>>, vector<32x32xf32>
    %cst_124 = arith.constant dense<0.000000e+00> : vector<12x32xf32>
    %125 = tpu.matmul %123, %124, %cst_124 {dimension_numbers = #tpu.dot_dimension_numbers<[1], [0], [0], [1], [0, 0, 1, 1], [], []>} : vector<12x32xf32>, vector<32x32xf32>, vector<12x32xf32> -> vector<12x32xf32>
    %126 = arith.addf %121, %125 : vector<12x32xf32>
    %c0_125 = arith.constant 0 : index
    %c0_126 = arith.constant 0 : index
    %c2_127 = arith.constant 2 : index
    %c0_128 = arith.constant 0 : index
    %127 = vector.load %arg5[%c0_125, %c0_126, %c2_127, %c0_128] : memref<1x1x14x32xf32, #tpu.memory_space<vmem>>, vector<1x1x12x32xf32>
    %128 = vector.shape_cast %127 : vector<1x1x12x32xf32> to vector<12x32xf32>
    %c256_129 = arith.constant 256 : index
    %c0_130 = arith.constant 0 : index
    %129 = vector.load %arg6[%c256_129, %c0_130] : memref<288x32xf32, #tpu.memory_space<vmem>>, vector<32x32xf32>
    %cst_131 = arith.constant dense<0.000000e+00> : vector<12x32xf32>
    %130 = tpu.matmul %128, %129, %cst_131 {dimension_numbers = #tpu.dot_dimension_numbers<[1], [0], [0], [1], [0, 0, 1, 1], [], []>} : vector<12x32xf32>, vector<32x32xf32>, vector<12x32xf32> -> vector<12x32xf32>
    %131 = arith.addf %126, %130 : vector<12x32xf32>
    %132 = vector.broadcast %0 : vector<1x32xf32> to vector<12x32xf32>
    %133 = arith.addf %131, %132 : vector<12x32xf32>
    %cst_132 = arith.constant 5.000000e-01 : f32
    %134 = vector.broadcast %cst_132 : f32 to vector<12x32xf32>
    %135 = arith.mulf %134, %133 : vector<12x32xf32>
    %cst_133 = arith.constant 0.707106769 : f32
    %136 = vector.broadcast %cst_133 : f32 to vector<12x32xf32>
    %137 = arith.mulf %133, %136 : vector<12x32xf32>
    %cst_134 = arith.constant 0.000000e+00 : f32
    %138 = vector.broadcast %cst_134 : f32 to vector<12x32xf32>
    %139 = arith.cmpf oge, %137, %138 : vector<12x32xf32>
    %cst_135 = arith.constant 1.000000e+00 : f32
    %cst_136 = arith.constant -1.000000e+00 : f32
    %140 = vector.broadcast %cst_135 : f32 to vector<12x32xf32>
    %141 = vector.broadcast %cst_136 : f32 to vector<12x32xf32>
    %142 = arith.select %139, %140, %141 : vector<12x32xi1>, vector<12x32xf32>
    %143 = math.absf %137 : vector<12x32xf32>
    %cst_137 = arith.constant 0.327591091 : f32
    %144 = vector.broadcast %cst_137 : f32 to vector<12x32xf32>
    %145 = arith.mulf %144, %143 : vector<12x32xf32>
    %cst_138 = arith.constant 1.000000e+00 : f32
    %146 = vector.broadcast %cst_138 : f32 to vector<12x32xf32>
    %147 = arith.addf %146, %145 : vector<12x32xf32>
    %cst_139 = arith.constant 1.000000e+00 : f32
    %148 = vector.broadcast %cst_139 : f32 to vector<12x32xf32>
    %149 = arith.divf %148, %147 : vector<12x32xf32>
    %cst_140 = arith.constant 1.06140542 : f32
    %150 = vector.broadcast %cst_140 : f32 to vector<12x32xf32>
    %151 = arith.mulf %150, %149 : vector<12x32xf32>
    %cst_141 = arith.constant -1.45315206 : f32
    %152 = vector.broadcast %cst_141 : f32 to vector<12x32xf32>
    %153 = arith.addf %151, %152 : vector<12x32xf32>
    %154 = arith.mulf %153, %149 : vector<12x32xf32>
    %cst_142 = arith.constant 1.42141378 : f32
    %155 = vector.broadcast %cst_142 : f32 to vector<12x32xf32>
    %156 = arith.addf %154, %155 : vector<12x32xf32>
    %157 = arith.mulf %156, %149 : vector<12x32xf32>
    %cst_143 = arith.constant -0.284496725 : f32
    %158 = vector.broadcast %cst_143 : f32 to vector<12x32xf32>
    %159 = arith.addf %157, %158 : vector<12x32xf32>
    %160 = arith.mulf %159, %149 : vector<12x32xf32>
    %cst_144 = arith.constant 0.254829586 : f32
    %161 = vector.broadcast %cst_144 : f32 to vector<12x32xf32>
    %162 = arith.addf %160, %161 : vector<12x32xf32>
    %163 = arith.mulf %162, %149 : vector<12x32xf32>
    %cst_145 = arith.constant 0.000000e+00 : f32
    %164 = vector.broadcast %cst_145 : f32 to vector<12x32xf32>
    %165 = arith.subf %164, %143 : vector<12x32xf32>
    %166 = arith.mulf %165, %143 : vector<12x32xf32>
    %167 = math.exp %166 : vector<12x32xf32>
    %168 = arith.mulf %163, %167 : vector<12x32xf32>
    %cst_146 = arith.constant 1.000000e+00 : f32
    %169 = vector.broadcast %cst_146 : f32 to vector<12x32xf32>
    %170 = arith.subf %169, %168 : vector<12x32xf32>
    %171 = arith.mulf %142, %170 : vector<12x32xf32>
    %cst_147 = arith.constant 1.000000e+00 : f32
    %172 = vector.broadcast %cst_147 : f32 to vector<12x32xf32>
    %173 = arith.addf %172, %171 : vector<12x32xf32>
    %174 = arith.mulf %135, %173 : vector<12x32xf32>
    %175 = arith.maximumf %87, %174 : vector<12x32xf32>
    %c0_148 = arith.constant 0 : index
    %c0_149 = arith.constant 0 : index
    %c0_150 = arith.constant 0 : index
    %c0_151 = arith.constant 0 : index
    %176 = vector.load %arg8[%c0_148, %c0_149, %c0_150, %c0_151] : memref<1x1x12x32xf32, #tpu.memory_space<vmem>>, vector<1x1x12x32xf32>
    %177 = vector.shape_cast %176 : vector<1x1x12x32xf32> to vector<12x32xf32>
    %178 = vector.shape_cast %175 : vector<12x32xf32> to vector<1x1x12x32xf32>
    tpu.vector_store %arg8[%c0_148, %c0_149, %c0_150, %c0_151], %178 {strides = array<i32>} : memref<1x1x12x32xf32, #tpu.memory_space<vmem>>, vector<1x1x12x32xf32>,
    return
  }
  func.func @transform_0(%arg0: i32, %arg1: i32) -> (i32, i32, i32, i32) {
    %c2_i32 = arith.constant 2 : i32
    %0 = arith.muli %c2_i32, %arg1 : i32
    %c0_i32 = arith.constant 0 : i32
    %1 = arith.addi %0, %c0_i32 : i32
    %c0_i32_0 = arith.constant 0 : i32
    %c0_i32_1 = arith.constant 0 : i32
    %c0_i32_2 = arith.constant 0 : i32
    return %arg0, %1, %c0_i32_0, %c0_i32_1 : i32, i32, i32, i32
  }
  func.func @transform_1(%arg0: i32, %arg1: i32) -> (i32, i32, i32, i32) {
    %c2_i32 = arith.constant 2 : i32
    %0 = arith.muli %c2_i32, %arg1 : i32
    %c1_i32 = arith.constant 1 : i32
    %1 = arith.addi %0, %c1_i32 : i32
    %c0_i32 = arith.constant 0 : i32
    %c0_i32_0 = arith.constant 0 : i32
    %c0_i32_1 = arith.constant 0 : i32
    return %arg0, %1, %c0_i32, %c0_i32_0 : i32, i32, i32, i32
  }
  func.func @transform_2(%arg0: i32, %arg1: i32) -> (i32, i32, i32, i32) {
    %c2_i32 = arith.constant 2 : i32
    %0 = arith.muli %c2_i32, %arg1 : i32
    %c2_i32_0 = arith.constant 2 : i32
    %1 = arith.addi %0, %c2_i32_0 : i32
    %c0_i32 = arith.constant 0 : i32
    %c0_i32_1 = arith.constant 0 : i32
    %c0_i32_2 = arith.constant 0 : i32
    return %arg0, %1, %c0_i32, %c0_i32_1 : i32, i32, i32, i32
  }
  func.func @transform_3(%arg0: i32, %arg1: i32) -> (i32, i32, i32, i32) {
    %c2_i32 = arith.constant 2 : i32
    %0 = arith.muli %c2_i32, %arg1 : i32
    %c3_i32 = arith.constant 3 : i32
    %1 = arith.addi %0, %c3_i32 : i32
    %c0_i32 = arith.constant 0 : i32
    %c0_i32_0 = arith.constant 0 : i32
    %c0_i32_1 = arith.constant 0 : i32
    return %arg0, %1, %c0_i32, %c0_i32_0 : i32, i32, i32, i32
  }
  func.func @transform_4(%arg0: i32, %arg1: i32) -> (i32, i32) {
    %c0_i32 = arith.constant 0 : i32
    %c0_i32_0 = arith.constant 0 : i32
    %c0_i32_1 = arith.constant 0 : i32
    return %c0_i32, %c0_i32_0 : i32, i32
  }
  func.func @transform_5(%arg0: i32, %arg1: i32) -> (i32, i32) {
    %c0_i32 = arith.constant 0 : i32
    %c0_i32_0 = arith.constant 0 : i32
    %c0_i32_1 = arith.constant 0 : i32
    return %c0_i32, %c0_i32_0 : i32, i32
  }
  func.func @transform_6(%arg0: i32, %arg1: i32) -> (i32, i32, i32, i32) {
    %c0_i32 = arith.constant 0 : i32
    %c0_i32_0 = arith.constant 0 : i32
    %c0_i32_1 = arith.constant 0 : i32
    return %arg0, %arg1, %c0_i32, %c0_i32_0 : i32, i32, i32, i32
  }
}

module attributes {stable_mosaic.version = 11 : i64} {
  func.func @_mm_kernel(%arg0: i32, %arg1: i32, %arg2: i32, %arg3: memref<2x576xf32, #tpu.memory_space<vmem>>, %arg4: memref<576x128xf32, #tpu.memory_space<vmem>>, %arg5: memref<1x128xf32, #tpu.memory_space<vmem>>, %arg6: memref<2x128xf32, #tpu.memory_space<vmem>>, %arg7: memref<2x128xf32, #tpu.memory_space<vmem>>) attributes {dimension_semantics = [#tpu.dimension_semantics<parallel>, #tpu.dimension_semantics<parallel>, #tpu.dimension_semantics<arbitrary>], iteration_bounds = array<i64: 1, 1, 1>, scalar_prefetch = 0 : i64, scratch_operands = 1 : i64, tpu.core_type = #tpu.core_type<tc>, window_params = [{transform_indices = @transform_0, window_bounds = array<i64: 2, 576>}, {transform_indices = @transform_1, window_bounds = array<i64: 576, 128>}, {transform_indices = @transform_2, window_bounds = array<i64: 1, 128>}, {transform_indices = @transform_3, window_bounds = array<i64: 2, 128>}]} {
    %c0_i32 = arith.constant 0 : i32
    %0 = arith.cmpi eq, %arg2, %c0_i32 : i32
    %1 = arith.extui %0 : i1 to i32
    %c0_i32_0 = arith.constant 0 : i32
    %2 = arith.cmpi ne, %1, %c0_i32_0 : i32
    scf.if %2 {
      %cst_10 = arith.constant 0.000000e+00 : f32
      %12 = vector.broadcast %cst_10 : f32 to vector<2x128xf32>
      %c0_11 = arith.constant 0 : index
      %c0_12 = arith.constant 0 : index
      %13 = vector.load %arg7[%c0_11, %c0_12] : memref<2x128xf32, #tpu.memory_space<vmem>>, vector<2x128xf32>
      tpu.vector_store %arg7[%c0_11, %c0_12], %12 {strides = array<i32>} : memref<2x128xf32, #tpu.memory_space<vmem>>, vector<2x128xf32>,
    } else {
    }
    %c0 = arith.constant 0 : index
    %c0_1 = arith.constant 0 : index
    %3 = vector.load %arg7[%c0, %c0_1] : memref<2x128xf32, #tpu.memory_space<vmem>>, vector<2x128xf32>
    %c0_2 = arith.constant 0 : index
    %c0_3 = arith.constant 0 : index
    %4 = vector.load %arg3[%c0_2, %c0_3] : memref<2x576xf32, #tpu.memory_space<vmem>>, vector<2x576xf32>
    %c0_4 = arith.constant 0 : index
    %c0_5 = arith.constant 0 : index
    %5 = vector.load %arg4[%c0_4, %c0_5] : memref<576x128xf32, #tpu.memory_space<vmem>>, vector<576x128xf32>
    %cst = arith.constant dense<0.000000e+00> : vector<2x128xf32>
    %6 = tpu.matmul %4, %5, %cst {dimension_numbers = #tpu.dot_dimension_numbers<[1], [0], [0], [1], [0, 0, 1, 1], [], []>} : vector<2x576xf32>, vector<576x128xf32>, vector<2x128xf32> -> vector<2x128xf32>
    %7 = arith.addf %3, %6 : vector<2x128xf32>
    %c0_6 = arith.constant 0 : index
    %c0_7 = arith.constant 0 : index
    %8 = vector.load %arg7[%c0_6, %c0_7] : memref<2x128xf32, #tpu.memory_space<vmem>>, vector<2x128xf32>
    tpu.vector_store %arg7[%c0_6, %c0_7], %7 {strides = array<i32>} : memref<2x128xf32, #tpu.memory_space<vmem>>, vector<2x128xf32>,
    %c0_i32_8 = arith.constant 0 : i32
    %9 = arith.cmpi eq, %arg2, %c0_i32_8 : i32
    %10 = arith.extui %9 : i1 to i32
    %c0_i32_9 = arith.constant 0 : i32
    %11 = arith.cmpi ne, %10, %c0_i32_9 : i32
    scf.if %11 {
      %c0_10 = arith.constant 0 : index
      %c0_11 = arith.constant 0 : index
      %12 = vector.load %arg7[%c0_10, %c0_11] : memref<2x128xf32, #tpu.memory_space<vmem>>, vector<2x128xf32>
      %c0_12 = arith.constant 0 : index
      %c0_13 = arith.constant 0 : index
      %13 = vector.load %arg5[%c0_12, %c0_13] : memref<1x128xf32, #tpu.memory_space<vmem>>, vector<1x128xf32>
      %14 = vector.broadcast %13 : vector<1x128xf32> to vector<2x128xf32>
      %15 = arith.addf %12, %14 : vector<2x128xf32>
      %c0_14 = arith.constant 0 : index
      %c0_15 = arith.constant 0 : index
      %16 = vector.load %arg6[%c0_14, %c0_15] : memref<2x128xf32, #tpu.memory_space<vmem>>, vector<2x128xf32>
      tpu.vector_store %arg6[%c0_14, %c0_15], %15 {strides = array<i32>} : memref<2x128xf32, #tpu.memory_space<vmem>>, vector<2x128xf32>,
    } else {
    }
    return
  }
  func.func @transform_0(%arg0: i32, %arg1: i32, %arg2: i32) -> (i32, i32) {
    %c0_i32 = arith.constant 0 : i32
    return %arg0, %arg2 : i32, i32
  }
  func.func @transform_1(%arg0: i32, %arg1: i32, %arg2: i32) -> (i32, i32) {
    %c0_i32 = arith.constant 0 : i32
    return %arg2, %arg1 : i32, i32
  }
  func.func @transform_2(%arg0: i32, %arg1: i32, %arg2: i32) -> (i32, i32) {
    %c0_i32 = arith.constant 0 : i32
    %c0_i32_0 = arith.constant 0 : i32
    return %c0_i32, %arg1 : i32, i32
  }
  func.func @transform_3(%arg0: i32, %arg1: i32, %arg2: i32) -> (i32, i32) {
    %c0_i32 = arith.constant 0 : i32
    return %arg0, %arg1 : i32, i32
  }
}

module attributes {stable_mosaic.version = 11 : i64} {
  func.func @_mm_kernel(%arg0: i32, %arg1: i32, %arg2: i32, %arg3: memref<1x64xf32, #tpu.memory_space<vmem>>, %arg4: memref<64x128xf32, #tpu.memory_space<vmem>>, %arg5: memref<1x128xf32, #tpu.memory_space<vmem>>, %arg6: memref<1x128xf32, #tpu.memory_space<vmem>>, %arg7: memref<1x128xf32, #tpu.memory_space<vmem>>) attributes {dimension_semantics = [#tpu.dimension_semantics<parallel>, #tpu.dimension_semantics<parallel>, #tpu.dimension_semantics<arbitrary>], iteration_bounds = array<i64: 1, 1, 1>, scalar_prefetch = 0 : i64, scratch_operands = 1 : i64, tpu.core_type = #tpu.core_type<tc>, window_params = [{transform_indices = @transform_0, window_bounds = array<i64: 1, 64>}, {transform_indices = @transform_1, window_bounds = array<i64: 64, 128>}, {transform_indices = @transform_2, window_bounds = array<i64: 1, 128>}, {transform_indices = @transform_3, window_bounds = array<i64: 1, 128>}]} {
    %c0_i32 = arith.constant 0 : i32
    %0 = arith.cmpi eq, %arg2, %c0_i32 : i32
    %1 = arith.extui %0 : i1 to i32
    %c0_i32_0 = arith.constant 0 : i32
    %2 = arith.cmpi ne, %1, %c0_i32_0 : i32
    scf.if %2 {
      %cst_10 = arith.constant 0.000000e+00 : f32
      %12 = vector.broadcast %cst_10 : f32 to vector<1x128xf32>
      %c0_11 = arith.constant 0 : index
      %c0_12 = arith.constant 0 : index
      %13 = vector.load %arg7[%c0_11, %c0_12] : memref<1x128xf32, #tpu.memory_space<vmem>>, vector<1x128xf32>
      tpu.vector_store %arg7[%c0_11, %c0_12], %12 {strides = array<i32>} : memref<1x128xf32, #tpu.memory_space<vmem>>, vector<1x128xf32>,
    } else {
    }
    %c0 = arith.constant 0 : index
    %c0_1 = arith.constant 0 : index
    %3 = vector.load %arg7[%c0, %c0_1] : memref<1x128xf32, #tpu.memory_space<vmem>>, vector<1x128xf32>
    %c0_2 = arith.constant 0 : index
    %c0_3 = arith.constant 0 : index
    %4 = vector.load %arg3[%c0_2, %c0_3] : memref<1x64xf32, #tpu.memory_space<vmem>>, vector<1x64xf32>
    %c0_4 = arith.constant 0 : index
    %c0_5 = arith.constant 0 : index
    %5 = vector.load %arg4[%c0_4, %c0_5] : memref<64x128xf32, #tpu.memory_space<vmem>>, vector<64x128xf32>
    %cst = arith.constant dense<0.000000e+00> : vector<1x128xf32>
    %6 = tpu.matmul %4, %5, %cst {dimension_numbers = #tpu.dot_dimension_numbers<[1], [0], [0], [1], [0, 0, 1, 1], [], []>} : vector<1x64xf32>, vector<64x128xf32>, vector<1x128xf32> -> vector<1x128xf32>
    %7 = arith.addf %3, %6 : vector<1x128xf32>
    %c0_6 = arith.constant 0 : index
    %c0_7 = arith.constant 0 : index
    %8 = vector.load %arg7[%c0_6, %c0_7] : memref<1x128xf32, #tpu.memory_space<vmem>>, vector<1x128xf32>
    tpu.vector_store %arg7[%c0_6, %c0_7], %7 {strides = array<i32>} : memref<1x128xf32, #tpu.memory_space<vmem>>, vector<1x128xf32>,
    %c0_i32_8 = arith.constant 0 : i32
    %9 = arith.cmpi eq, %arg2, %c0_i32_8 : i32
    %10 = arith.extui %9 : i1 to i32
    %c0_i32_9 = arith.constant 0 : i32
    %11 = arith.cmpi ne, %10, %c0_i32_9 : i32
    scf.if %11 {
      %c0_10 = arith.constant 0 : index
      %c0_11 = arith.constant 0 : index
      %12 = vector.load %arg7[%c0_10, %c0_11] : memref<1x128xf32, #tpu.memory_space<vmem>>, vector<1x128xf32>
      %c0_12 = arith.constant 0 : index
      %c0_13 = arith.constant 0 : index
      %13 = vector.load %arg5[%c0_12, %c0_13] : memref<1x128xf32, #tpu.memory_space<vmem>>, vector<1x128xf32>
      %14 = arith.addf %12, %13 : vector<1x128xf32>
      %c0_14 = arith.constant 0 : index
      %c0_15 = arith.constant 0 : index
      %15 = vector.load %arg6[%c0_14, %c0_15] : memref<1x128xf32, #tpu.memory_space<vmem>>, vector<1x128xf32>
      tpu.vector_store %arg6[%c0_14, %c0_15], %14 {strides = array<i32>} : memref<1x128xf32, #tpu.memory_space<vmem>>, vector<1x128xf32>,
    } else {
    }
    return
  }
  func.func @transform_0(%arg0: i32, %arg1: i32, %arg2: i32) -> (i32, i32) {
    %c0_i32 = arith.constant 0 : i32
    return %arg0, %arg2 : i32, i32
  }
  func.func @transform_1(%arg0: i32, %arg1: i32, %arg2: i32) -> (i32, i32) {
    %c0_i32 = arith.constant 0 : i32
    return %arg2, %arg1 : i32, i32
  }
  func.func @transform_2(%arg0: i32, %arg1: i32, %arg2: i32) -> (i32, i32) {
    %c0_i32 = arith.constant 0 : i32
    %c0_i32_0 = arith.constant 0 : i32
    return %c0_i32, %arg1 : i32, i32
  }
  func.func @transform_3(%arg0: i32, %arg1: i32, %arg2: i32) -> (i32, i32) {
    %c0_i32 = arith.constant 0 : i32
    return %arg0, %arg1 : i32, i32
  }
}

module attributes {stable_mosaic.version = 11 : i64} {
  func.func @_mm_kernel(%arg0: i32, %arg1: i32, %arg2: i32, %arg3: memref<1x3xf32, #tpu.memory_space<vmem>>, %arg4: memref<3x128xf32, #tpu.memory_space<vmem>>, %arg5: memref<1x128xf32, #tpu.memory_space<vmem>>, %arg6: memref<1x128xf32, #tpu.memory_space<vmem>>, %arg7: memref<1x128xf32, #tpu.memory_space<vmem>>) attributes {dimension_semantics = [#tpu.dimension_semantics<parallel>, #tpu.dimension_semantics<parallel>, #tpu.dimension_semantics<arbitrary>], iteration_bounds = array<i64: 1, 1, 1>, scalar_prefetch = 0 : i64, scratch_operands = 1 : i64, tpu.core_type = #tpu.core_type<tc>, window_params = [{transform_indices = @transform_0, window_bounds = array<i64: 1, 3>}, {transform_indices = @transform_1, window_bounds = array<i64: 3, 128>}, {transform_indices = @transform_2, window_bounds = array<i64: 1, 128>}, {transform_indices = @transform_3, window_bounds = array<i64: 1, 128>}]} {
    %c0_i32 = arith.constant 0 : i32
    %0 = arith.cmpi eq, %arg2, %c0_i32 : i32
    %1 = arith.extui %0 : i1 to i32
    %c0_i32_0 = arith.constant 0 : i32
    %2 = arith.cmpi ne, %1, %c0_i32_0 : i32
    scf.if %2 {
      %cst_10 = arith.constant 0.000000e+00 : f32
      %12 = vector.broadcast %cst_10 : f32 to vector<1x128xf32>
      %c0_11 = arith.constant 0 : index
      %c0_12 = arith.constant 0 : index
      %13 = vector.load %arg7[%c0_11, %c0_12] : memref<1x128xf32, #tpu.memory_space<vmem>>, vector<1x128xf32>
      tpu.vector_store %arg7[%c0_11, %c0_12], %12 {strides = array<i32>} : memref<1x128xf32, #tpu.memory_space<vmem>>, vector<1x128xf32>,
    } else {
    }
    %c0 = arith.constant 0 : index
    %c0_1 = arith.constant 0 : index
    %3 = vector.load %arg7[%c0, %c0_1] : memref<1x128xf32, #tpu.memory_space<vmem>>, vector<1x128xf32>
    %c0_2 = arith.constant 0 : index
    %c0_3 = arith.constant 0 : index
    %4 = vector.load %arg3[%c0_2, %c0_3] : memref<1x3xf32, #tpu.memory_space<vmem>>, vector<1x3xf32>
    %c0_4 = arith.constant 0 : index
    %c0_5 = arith.constant 0 : index
    %5 = vector.load %arg4[%c0_4, %c0_5] : memref<3x128xf32, #tpu.memory_space<vmem>>, vector<3x128xf32>
    %cst = arith.constant dense<0.000000e+00> : vector<1x128xf32>
    %6 = tpu.matmul %4, %5, %cst {dimension_numbers = #tpu.dot_dimension_numbers<[1], [0], [0], [1], [0, 0, 1, 1], [], []>} : vector<1x3xf32>, vector<3x128xf32>, vector<1x128xf32> -> vector<1x128xf32>
    %7 = arith.addf %3, %6 : vector<1x128xf32>
    %c0_6 = arith.constant 0 : index
    %c0_7 = arith.constant 0 : index
    %8 = vector.load %arg7[%c0_6, %c0_7] : memref<1x128xf32, #tpu.memory_space<vmem>>, vector<1x128xf32>
    tpu.vector_store %arg7[%c0_6, %c0_7], %7 {strides = array<i32>} : memref<1x128xf32, #tpu.memory_space<vmem>>, vector<1x128xf32>,
    %c0_i32_8 = arith.constant 0 : i32
    %9 = arith.cmpi eq, %arg2, %c0_i32_8 : i32
    %10 = arith.extui %9 : i1 to i32
    %c0_i32_9 = arith.constant 0 : i32
    %11 = arith.cmpi ne, %10, %c0_i32_9 : i32
    scf.if %11 {
      %c0_10 = arith.constant 0 : index
      %c0_11 = arith.constant 0 : index
      %12 = vector.load %arg7[%c0_10, %c0_11] : memref<1x128xf32, #tpu.memory_space<vmem>>, vector<1x128xf32>
      %c0_12 = arith.constant 0 : index
      %c0_13 = arith.constant 0 : index
      %13 = vector.load %arg5[%c0_12, %c0_13] : memref<1x128xf32, #tpu.memory_space<vmem>>, vector<1x128xf32>
      %14 = arith.addf %12, %13 : vector<1x128xf32>
      %cst_14 = arith.constant 5.000000e-01 : f32
      %15 = vector.broadcast %cst_14 : f32 to vector<1x128xf32>
      %16 = arith.mulf %15, %14 : vector<1x128xf32>
      %cst_15 = arith.constant 0.707106769 : f32
      %17 = vector.broadcast %cst_15 : f32 to vector<1x128xf32>
      %18 = arith.mulf %14, %17 : vector<1x128xf32>
      %cst_16 = arith.constant 0.000000e+00 : f32
      %19 = vector.broadcast %cst_16 : f32 to vector<1x128xf32>
      %20 = arith.cmpf oge, %18, %19 : vector<1x128xf32>
      %cst_17 = arith.constant 1.000000e+00 : f32
      %cst_18 = arith.constant -1.000000e+00 : f32
      %21 = vector.broadcast %cst_17 : f32 to vector<1x128xf32>
      %22 = vector.broadcast %cst_18 : f32 to vector<1x128xf32>
      %23 = arith.select %20, %21, %22 : vector<1x128xi1>, vector<1x128xf32>
      %24 = math.absf %18 : vector<1x128xf32>
      %cst_19 = arith.constant 0.327591091 : f32
      %25 = vector.broadcast %cst_19 : f32 to vector<1x128xf32>
      %26 = arith.mulf %25, %24 : vector<1x128xf32>
      %cst_20 = arith.constant 1.000000e+00 : f32
      %27 = vector.broadcast %cst_20 : f32 to vector<1x128xf32>
      %28 = arith.addf %27, %26 : vector<1x128xf32>
      %cst_21 = arith.constant 1.000000e+00 : f32
      %29 = vector.broadcast %cst_21 : f32 to vector<1x128xf32>
      %30 = arith.divf %29, %28 : vector<1x128xf32>
      %cst_22 = arith.constant 1.06140542 : f32
      %31 = vector.broadcast %cst_22 : f32 to vector<1x128xf32>
      %32 = arith.mulf %31, %30 : vector<1x128xf32>
      %cst_23 = arith.constant -1.45315206 : f32
      %33 = vector.broadcast %cst_23 : f32 to vector<1x128xf32>
      %34 = arith.addf %32, %33 : vector<1x128xf32>
      %35 = arith.mulf %34, %30 : vector<1x128xf32>
      %cst_24 = arith.constant 1.42141378 : f32
      %36 = vector.broadcast %cst_24 : f32 to vector<1x128xf32>
      %37 = arith.addf %35, %36 : vector<1x128xf32>
      %38 = arith.mulf %37, %30 : vector<1x128xf32>
      %cst_25 = arith.constant -0.284496725 : f32
      %39 = vector.broadcast %cst_25 : f32 to vector<1x128xf32>
      %40 = arith.addf %38, %39 : vector<1x128xf32>
      %41 = arith.mulf %40, %30 : vector<1x128xf32>
      %cst_26 = arith.constant 0.254829586 : f32
      %42 = vector.broadcast %cst_26 : f32 to vector<1x128xf32>
      %43 = arith.addf %41, %42 : vector<1x128xf32>
      %44 = arith.mulf %43, %30 : vector<1x128xf32>
      %cst_27 = arith.constant 0.000000e+00 : f32
      %45 = vector.broadcast %cst_27 : f32 to vector<1x128xf32>
      %46 = arith.subf %45, %24 : vector<1x128xf32>
      %47 = arith.mulf %46, %24 : vector<1x128xf32>
      %48 = math.exp %47 : vector<1x128xf32>
      %49 = arith.mulf %44, %48 : vector<1x128xf32>
      %cst_28 = arith.constant 1.000000e+00 : f32
      %50 = vector.broadcast %cst_28 : f32 to vector<1x128xf32>
      %51 = arith.subf %50, %49 : vector<1x128xf32>
      %52 = arith.mulf %23, %51 : vector<1x128xf32>
      %cst_29 = arith.constant 1.000000e+00 : f32
      %53 = vector.broadcast %cst_29 : f32 to vector<1x128xf32>
      %54 = arith.addf %53, %52 : vector<1x128xf32>
      %55 = arith.mulf %16, %54 : vector<1x128xf32>
      %c0_30 = arith.constant 0 : index
      %c0_31 = arith.constant 0 : index
      %56 = vector.load %arg6[%c0_30, %c0_31] : memref<1x128xf32, #tpu.memory_space<vmem>>, vector<1x128xf32>
      tpu.vector_store %arg6[%c0_30, %c0_31], %55 {strides = array<i32>} : memref<1x128xf32, #tpu.memory_space<vmem>>, vector<1x128xf32>,
    } else {
    }
    return
  }
  func.func @transform_0(%arg0: i32, %arg1: i32, %arg2: i32) -> (i32, i32) {
    %c0_i32 = arith.constant 0 : i32
    return %arg0, %arg2 : i32, i32
  }
  func.func @transform_1(%arg0: i32, %arg1: i32, %arg2: i32) -> (i32, i32) {
    %c0_i32 = arith.constant 0 : i32
    return %arg2, %arg1 : i32, i32
  }
  func.func @transform_2(%arg0: i32, %arg1: i32, %arg2: i32) -> (i32, i32) {
    %c0_i32 = arith.constant 0 : i32
    %c0_i32_0 = arith.constant 0 : i32
    return %c0_i32, %arg1 : i32, i32
  }
  func.func @transform_3(%arg0: i32, %arg1: i32, %arg2: i32) -> (i32, i32) {
    %c0_i32 = arith.constant 0 : i32
    return %arg0, %arg1 : i32, i32
  }
}

module attributes {stable_mosaic.version = 11 : i64} {
  func.func @_mm_kernel(%arg0: i32, %arg1: i32, %arg2: i32, %arg3: memref<2x3xf32, #tpu.memory_space<vmem>>, %arg4: memref<3x128xf32, #tpu.memory_space<vmem>>, %arg5: memref<1x128xf32, #tpu.memory_space<vmem>>, %arg6: memref<2x128xf32, #tpu.memory_space<vmem>>, %arg7: memref<2x128xf32, #tpu.memory_space<vmem>>) attributes {dimension_semantics = [#tpu.dimension_semantics<parallel>, #tpu.dimension_semantics<parallel>, #tpu.dimension_semantics<arbitrary>], iteration_bounds = array<i64: 1, 1, 1>, scalar_prefetch = 0 : i64, scratch_operands = 1 : i64, tpu.core_type = #tpu.core_type<tc>, window_params = [{transform_indices = @transform_0, window_bounds = array<i64: 2, 3>}, {transform_indices = @transform_1, window_bounds = array<i64: 3, 128>}, {transform_indices = @transform_2, window_bounds = array<i64: 1, 128>}, {transform_indices = @transform_3, window_bounds = array<i64: 2, 128>}]} {
    %c0_i32 = arith.constant 0 : i32
    %0 = arith.cmpi eq, %arg2, %c0_i32 : i32
    %1 = arith.extui %0 : i1 to i32
    %c0_i32_0 = arith.constant 0 : i32
    %2 = arith.cmpi ne, %1, %c0_i32_0 : i32
    scf.if %2 {
      %cst_10 = arith.constant 0.000000e+00 : f32
      %12 = vector.broadcast %cst_10 : f32 to vector<2x128xf32>
      %c0_11 = arith.constant 0 : index
      %c0_12 = arith.constant 0 : index
      %13 = vector.load %arg7[%c0_11, %c0_12] : memref<2x128xf32, #tpu.memory_space<vmem>>, vector<2x128xf32>
      tpu.vector_store %arg7[%c0_11, %c0_12], %12 {strides = array<i32>} : memref<2x128xf32, #tpu.memory_space<vmem>>, vector<2x128xf32>,
    } else {
    }
    %c0 = arith.constant 0 : index
    %c0_1 = arith.constant 0 : index
    %3 = vector.load %arg7[%c0, %c0_1] : memref<2x128xf32, #tpu.memory_space<vmem>>, vector<2x128xf32>
    %c0_2 = arith.constant 0 : index
    %c0_3 = arith.constant 0 : index
    %4 = vector.load %arg3[%c0_2, %c0_3] : memref<2x3xf32, #tpu.memory_space<vmem>>, vector<2x3xf32>
    %c0_4 = arith.constant 0 : index
    %c0_5 = arith.constant 0 : index
    %5 = vector.load %arg4[%c0_4, %c0_5] : memref<3x128xf32, #tpu.memory_space<vmem>>, vector<3x128xf32>
    %cst = arith.constant dense<0.000000e+00> : vector<2x128xf32>
    %6 = tpu.matmul %4, %5, %cst {dimension_numbers = #tpu.dot_dimension_numbers<[1], [0], [0], [1], [0, 0, 1, 1], [], []>} : vector<2x3xf32>, vector<3x128xf32>, vector<2x128xf32> -> vector<2x128xf32>
    %7 = arith.addf %3, %6 : vector<2x128xf32>
    %c0_6 = arith.constant 0 : index
    %c0_7 = arith.constant 0 : index
    %8 = vector.load %arg7[%c0_6, %c0_7] : memref<2x128xf32, #tpu.memory_space<vmem>>, vector<2x128xf32>
    tpu.vector_store %arg7[%c0_6, %c0_7], %7 {strides = array<i32>} : memref<2x128xf32, #tpu.memory_space<vmem>>, vector<2x128xf32>,
    %c0_i32_8 = arith.constant 0 : i32
    %9 = arith.cmpi eq, %arg2, %c0_i32_8 : i32
    %10 = arith.extui %9 : i1 to i32
    %c0_i32_9 = arith.constant 0 : i32
    %11 = arith.cmpi ne, %10, %c0_i32_9 : i32
    scf.if %11 {
      %c0_10 = arith.constant 0 : index
      %c0_11 = arith.constant 0 : index
      %12 = vector.load %arg7[%c0_10, %c0_11] : memref<2x128xf32, #tpu.memory_space<vmem>>, vector<2x128xf32>
      %c0_12 = arith.constant 0 : index
      %c0_13 = arith.constant 0 : index
      %13 = vector.load %arg5[%c0_12, %c0_13] : memref<1x128xf32, #tpu.memory_space<vmem>>, vector<1x128xf32>
      %14 = vector.broadcast %13 : vector<1x128xf32> to vector<2x128xf32>
      %15 = arith.addf %12, %14 : vector<2x128xf32>
      %cst_14 = arith.constant 5.000000e-01 : f32
      %16 = vector.broadcast %cst_14 : f32 to vector<2x128xf32>
      %17 = arith.mulf %16, %15 : vector<2x128xf32>
      %cst_15 = arith.constant 0.707106769 : f32
      %18 = vector.broadcast %cst_15 : f32 to vector<2x128xf32>
      %19 = arith.mulf %15, %18 : vector<2x128xf32>
      %cst_16 = arith.constant 0.000000e+00 : f32
      %20 = vector.broadcast %cst_16 : f32 to vector<2x128xf32>
      %21 = arith.cmpf oge, %19, %20 : vector<2x128xf32>
      %cst_17 = arith.constant 1.000000e+00 : f32
      %cst_18 = arith.constant -1.000000e+00 : f32
      %22 = vector.broadcast %cst_17 : f32 to vector<2x128xf32>
      %23 = vector.broadcast %cst_18 : f32 to vector<2x128xf32>
      %24 = arith.select %21, %22, %23 : vector<2x128xi1>, vector<2x128xf32>
      %25 = math.absf %19 : vector<2x128xf32>
      %cst_19 = arith.constant 0.327591091 : f32
      %26 = vector.broadcast %cst_19 : f32 to vector<2x128xf32>
      %27 = arith.mulf %26, %25 : vector<2x128xf32>
      %cst_20 = arith.constant 1.000000e+00 : f32
      %28 = vector.broadcast %cst_20 : f32 to vector<2x128xf32>
      %29 = arith.addf %28, %27 : vector<2x128xf32>
      %cst_21 = arith.constant 1.000000e+00 : f32
      %30 = vector.broadcast %cst_21 : f32 to vector<2x128xf32>
      %31 = arith.divf %30, %29 : vector<2x128xf32>
      %cst_22 = arith.constant 1.06140542 : f32
      %32 = vector.broadcast %cst_22 : f32 to vector<2x128xf32>
      %33 = arith.mulf %32, %31 : vector<2x128xf32>
      %cst_23 = arith.constant -1.45315206 : f32
      %34 = vector.broadcast %cst_23 : f32 to vector<2x128xf32>
      %35 = arith.addf %33, %34 : vector<2x128xf32>
      %36 = arith.mulf %35, %31 : vector<2x128xf32>
      %cst_24 = arith.constant 1.42141378 : f32
      %37 = vector.broadcast %cst_24 : f32 to vector<2x128xf32>
      %38 = arith.addf %36, %37 : vector<2x128xf32>
      %39 = arith.mulf %38, %31 : vector<2x128xf32>
      %cst_25 = arith.constant -0.284496725 : f32
      %40 = vector.broadcast %cst_25 : f32 to vector<2x128xf32>
      %41 = arith.addf %39, %40 : vector<2x128xf32>
      %42 = arith.mulf %41, %31 : vector<2x128xf32>
      %cst_26 = arith.constant 0.254829586 : f32
      %43 = vector.broadcast %cst_26 : f32 to vector<2x128xf32>
      %44 = arith.addf %42, %43 : vector<2x128xf32>
      %45 = arith.mulf %44, %31 : vector<2x128xf32>
      %cst_27 = arith.constant 0.000000e+00 : f32
      %46 = vector.broadcast %cst_27 : f32 to vector<2x128xf32>
      %47 = arith.subf %46, %25 : vector<2x128xf32>
      %48 = arith.mulf %47, %25 : vector<2x128xf32>
      %49 = math.exp %48 : vector<2x128xf32>
      %50 = arith.mulf %45, %49 : vector<2x128xf32>
      %cst_28 = arith.constant 1.000000e+00 : f32
      %51 = vector.broadcast %cst_28 : f32 to vector<2x128xf32>
      %52 = arith.subf %51, %50 : vector<2x128xf32>
      %53 = arith.mulf %24, %52 : vector<2x128xf32>
      %cst_29 = arith.constant 1.000000e+00 : f32
      %54 = vector.broadcast %cst_29 : f32 to vector<2x128xf32>
      %55 = arith.addf %54, %53 : vector<2x128xf32>
      %56 = arith.mulf %17, %55 : vector<2x128xf32>
      %c0_30 = arith.constant 0 : index
      %c0_31 = arith.constant 0 : index
      %57 = vector.load %arg6[%c0_30, %c0_31] : memref<2x128xf32, #tpu.memory_space<vmem>>, vector<2x128xf32>
      tpu.vector_store %arg6[%c0_30, %c0_31], %56 {strides = array<i32>} : memref<2x128xf32, #tpu.memory_space<vmem>>, vector<2x128xf32>,
    } else {
    }
    return
  }
  func.func @transform_0(%arg0: i32, %arg1: i32, %arg2: i32) -> (i32, i32) {
    %c0_i32 = arith.constant 0 : i32
    return %arg0, %arg2 : i32, i32
  }
  func.func @transform_1(%arg0: i32, %arg1: i32, %arg2: i32) -> (i32, i32) {
    %c0_i32 = arith.constant 0 : i32
    return %arg2, %arg1 : i32, i32
  }
  func.func @transform_2(%arg0: i32, %arg1: i32, %arg2: i32) -> (i32, i32) {
    %c0_i32 = arith.constant 0 : i32
    %c0_i32_0 = arith.constant 0 : i32
    return %c0_i32, %arg1 : i32, i32
  }
  func.func @transform_3(%arg0: i32, %arg1: i32, %arg2: i32) -> (i32, i32) {
    %c0_i32 = arith.constant 0 : i32
    return %arg0, %arg1 : i32, i32
  }
}

module attributes {stable_mosaic.version = 11 : i64} {
  func.func @_mm_kernel(%arg0: i32, %arg1: i32, %arg2: i32, %arg3: memref<2x64xf32, #tpu.memory_space<vmem>>, %arg4: memref<64x128xf32, #tpu.memory_space<vmem>>, %arg5: memref<1x128xf32, #tpu.memory_space<vmem>>, %arg6: memref<2x128xf32, #tpu.memory_space<vmem>>, %arg7: memref<2x128xf32, #tpu.memory_space<vmem>>) attributes {dimension_semantics = [#tpu.dimension_semantics<parallel>, #tpu.dimension_semantics<parallel>, #tpu.dimension_semantics<arbitrary>], iteration_bounds = array<i64: 1, 1, 1>, scalar_prefetch = 0 : i64, scratch_operands = 1 : i64, tpu.core_type = #tpu.core_type<tc>, window_params = [{transform_indices = @transform_0, window_bounds = array<i64: 2, 64>}, {transform_indices = @transform_1, window_bounds = array<i64: 64, 128>}, {transform_indices = @transform_2, window_bounds = array<i64: 1, 128>}, {transform_indices = @transform_3, window_bounds = array<i64: 2, 128>}]} {
    %c0_i32 = arith.constant 0 : i32
    %0 = arith.cmpi eq, %arg2, %c0_i32 : i32
    %1 = arith.extui %0 : i1 to i32
    %c0_i32_0 = arith.constant 0 : i32
    %2 = arith.cmpi ne, %1, %c0_i32_0 : i32
    scf.if %2 {
      %cst_10 = arith.constant 0.000000e+00 : f32
      %12 = vector.broadcast %cst_10 : f32 to vector<2x128xf32>
      %c0_11 = arith.constant 0 : index
      %c0_12 = arith.constant 0 : index
      %13 = vector.load %arg7[%c0_11, %c0_12] : memref<2x128xf32, #tpu.memory_space<vmem>>, vector<2x128xf32>
      tpu.vector_store %arg7[%c0_11, %c0_12], %12 {strides = array<i32>} : memref<2x128xf32, #tpu.memory_space<vmem>>, vector<2x128xf32>,
    } else {
    }
    %c0 = arith.constant 0 : index
    %c0_1 = arith.constant 0 : index
    %3 = vector.load %arg7[%c0, %c0_1] : memref<2x128xf32, #tpu.memory_space<vmem>>, vector<2x128xf32>
    %c0_2 = arith.constant 0 : index
    %c0_3 = arith.constant 0 : index
    %4 = vector.load %arg3[%c0_2, %c0_3] : memref<2x64xf32, #tpu.memory_space<vmem>>, vector<2x64xf32>
    %c0_4 = arith.constant 0 : index
    %c0_5 = arith.constant 0 : index
    %5 = vector.load %arg4[%c0_4, %c0_5] : memref<64x128xf32, #tpu.memory_space<vmem>>, vector<64x128xf32>
    %cst = arith.constant dense<0.000000e+00> : vector<2x128xf32>
    %6 = tpu.matmul %4, %5, %cst {dimension_numbers = #tpu.dot_dimension_numbers<[1], [0], [0], [1], [0, 0, 1, 1], [], []>} : vector<2x64xf32>, vector<64x128xf32>, vector<2x128xf32> -> vector<2x128xf32>
    %7 = arith.addf %3, %6 : vector<2x128xf32>
    %c0_6 = arith.constant 0 : index
    %c0_7 = arith.constant 0 : index
    %8 = vector.load %arg7[%c0_6, %c0_7] : memref<2x128xf32, #tpu.memory_space<vmem>>, vector<2x128xf32>
    tpu.vector_store %arg7[%c0_6, %c0_7], %7 {strides = array<i32>} : memref<2x128xf32, #tpu.memory_space<vmem>>, vector<2x128xf32>,
    %c0_i32_8 = arith.constant 0 : i32
    %9 = arith.cmpi eq, %arg2, %c0_i32_8 : i32
    %10 = arith.extui %9 : i1 to i32
    %c0_i32_9 = arith.constant 0 : i32
    %11 = arith.cmpi ne, %10, %c0_i32_9 : i32
    scf.if %11 {
      %c0_10 = arith.constant 0 : index
      %c0_11 = arith.constant 0 : index
      %12 = vector.load %arg7[%c0_10, %c0_11] : memref<2x128xf32, #tpu.memory_space<vmem>>, vector<2x128xf32>
      %c0_12 = arith.constant 0 : index
      %c0_13 = arith.constant 0 : index
      %13 = vector.load %arg5[%c0_12, %c0_13] : memref<1x128xf32, #tpu.memory_space<vmem>>, vector<1x128xf32>
      %14 = vector.broadcast %13 : vector<1x128xf32> to vector<2x128xf32>
      %15 = arith.addf %12, %14 : vector<2x128xf32>
      %cst_14 = arith.constant 5.000000e-01 : f32
      %16 = vector.broadcast %cst_14 : f32 to vector<2x128xf32>
      %17 = arith.mulf %16, %15 : vector<2x128xf32>
      %cst_15 = arith.constant 0.707106769 : f32
      %18 = vector.broadcast %cst_15 : f32 to vector<2x128xf32>
      %19 = arith.mulf %15, %18 : vector<2x128xf32>
      %cst_16 = arith.constant 0.000000e+00 : f32
      %20 = vector.broadcast %cst_16 : f32 to vector<2x128xf32>
      %21 = arith.cmpf oge, %19, %20 : vector<2x128xf32>
      %cst_17 = arith.constant 1.000000e+00 : f32
      %cst_18 = arith.constant -1.000000e+00 : f32
      %22 = vector.broadcast %cst_17 : f32 to vector<2x128xf32>
      %23 = vector.broadcast %cst_18 : f32 to vector<2x128xf32>
      %24 = arith.select %21, %22, %23 : vector<2x128xi1>, vector<2x128xf32>
      %25 = math.absf %19 : vector<2x128xf32>
      %cst_19 = arith.constant 0.327591091 : f32
      %26 = vector.broadcast %cst_19 : f32 to vector<2x128xf32>
      %27 = arith.mulf %26, %25 : vector<2x128xf32>
      %cst_20 = arith.constant 1.000000e+00 : f32
      %28 = vector.broadcast %cst_20 : f32 to vector<2x128xf32>
      %29 = arith.addf %28, %27 : vector<2x128xf32>
      %cst_21 = arith.constant 1.000000e+00 : f32
      %30 = vector.broadcast %cst_21 : f32 to vector<2x128xf32>
      %31 = arith.divf %30, %29 : vector<2x128xf32>
      %cst_22 = arith.constant 1.06140542 : f32
      %32 = vector.broadcast %cst_22 : f32 to vector<2x128xf32>
      %33 = arith.mulf %32, %31 : vector<2x128xf32>
      %cst_23 = arith.constant -1.45315206 : f32
      %34 = vector.broadcast %cst_23 : f32 to vector<2x128xf32>
      %35 = arith.addf %33, %34 : vector<2x128xf32>
      %36 = arith.mulf %35, %31 : vector<2x128xf32>
      %cst_24 = arith.constant 1.42141378 : f32
      %37 = vector.broadcast %cst_24 : f32 to vector<2x128xf32>
      %38 = arith.addf %36, %37 : vector<2x128xf32>
      %39 = arith.mulf %38, %31 : vector<2x128xf32>
      %cst_25 = arith.constant -0.284496725 : f32
      %40 = vector.broadcast %cst_25 : f32 to vector<2x128xf32>
      %41 = arith.addf %39, %40 : vector<2x128xf32>
      %42 = arith.mulf %41, %31 : vector<2x128xf32>
      %cst_26 = arith.constant 0.254829586 : f32
      %43 = vector.broadcast %cst_26 : f32 to vector<2x128xf32>
      %44 = arith.addf %42, %43 : vector<2x128xf32>
      %45 = arith.mulf %44, %31 : vector<2x128xf32>
      %cst_27 = arith.constant 0.000000e+00 : f32
      %46 = vector.broadcast %cst_27 : f32 to vector<2x128xf32>
      %47 = arith.subf %46, %25 : vector<2x128xf32>
      %48 = arith.mulf %47, %25 : vector<2x128xf32>
      %49 = math.exp %48 : vector<2x128xf32>
      %50 = arith.mulf %45, %49 : vector<2x128xf32>
      %cst_28 = arith.constant 1.000000e+00 : f32
      %51 = vector.broadcast %cst_28 : f32 to vector<2x128xf32>
      %52 = arith.subf %51, %50 : vector<2x128xf32>
      %53 = arith.mulf %24, %52 : vector<2x128xf32>
      %cst_29 = arith.constant 1.000000e+00 : f32
      %54 = vector.broadcast %cst_29 : f32 to vector<2x128xf32>
      %55 = arith.addf %54, %53 : vector<2x128xf32>
      %56 = arith.mulf %17, %55 : vector<2x128xf32>
      %c0_30 = arith.constant 0 : index
      %c0_31 = arith.constant 0 : index
      %57 = vector.load %arg6[%c0_30, %c0_31] : memref<2x128xf32, #tpu.memory_space<vmem>>, vector<2x128xf32>
      tpu.vector_store %arg6[%c0_30, %c0_31], %56 {strides = array<i32>} : memref<2x128xf32, #tpu.memory_space<vmem>>, vector<2x128xf32>,
    } else {
    }
    return
  }
  func.func @transform_0(%arg0: i32, %arg1: i32, %arg2: i32) -> (i32, i32) {
    %c0_i32 = arith.constant 0 : i32
    return %arg0, %arg2 : i32, i32
  }
  func.func @transform_1(%arg0: i32, %arg1: i32, %arg2: i32) -> (i32, i32) {
    %c0_i32 = arith.constant 0 : i32
    return %arg2, %arg1 : i32, i32
  }
  func.func @transform_2(%arg0: i32, %arg1: i32, %arg2: i32) -> (i32, i32) {
    %c0_i32 = arith.constant 0 : i32
    %c0_i32_0 = arith.constant 0 : i32
    return %c0_i32, %arg1 : i32, i32
  }
  func.func @transform_3(%arg0: i32, %arg1: i32, %arg2: i32) -> (i32, i32) {
    %c0_i32 = arith.constant 0 : i32
    return %arg0, %arg1 : i32, i32
  }
}

module attributes {stable_mosaic.version = 11 : i64} {
  func.func @_mm_kernel(%arg0: i32, %arg1: i32, %arg2: i32, %arg3: memref<2x128xf32, #tpu.memory_space<vmem>>, %arg4: memref<128x576xf32, #tpu.memory_space<vmem>>, %arg5: memref<1x576xf32, #tpu.memory_space<vmem>>, %arg6: memref<2x576xf32, #tpu.memory_space<vmem>>, %arg7: memref<2x576xf32, #tpu.memory_space<vmem>>) attributes {dimension_semantics = [#tpu.dimension_semantics<parallel>, #tpu.dimension_semantics<parallel>, #tpu.dimension_semantics<arbitrary>], iteration_bounds = array<i64: 1, 1, 1>, scalar_prefetch = 0 : i64, scratch_operands = 1 : i64, tpu.core_type = #tpu.core_type<tc>, window_params = [{transform_indices = @transform_0, window_bounds = array<i64: 2, 128>}, {transform_indices = @transform_1, window_bounds = array<i64: 128, 576>}, {transform_indices = @transform_2, window_bounds = array<i64: 1, 576>}, {transform_indices = @transform_3, window_bounds = array<i64: 2, 576>}]} {
    %c0_i32 = arith.constant 0 : i32
    %0 = arith.cmpi eq, %arg2, %c0_i32 : i32
    %1 = arith.extui %0 : i1 to i32
    %c0_i32_0 = arith.constant 0 : i32
    %2 = arith.cmpi ne, %1, %c0_i32_0 : i32
    scf.if %2 {
      %cst_10 = arith.constant 0.000000e+00 : f32
      %12 = vector.broadcast %cst_10 : f32 to vector<2x576xf32>
      %c0_11 = arith.constant 0 : index
      %c0_12 = arith.constant 0 : index
      %13 = vector.load %arg7[%c0_11, %c0_12] : memref<2x576xf32, #tpu.memory_space<vmem>>, vector<2x576xf32>
      tpu.vector_store %arg7[%c0_11, %c0_12], %12 {strides = array<i32>} : memref<2x576xf32, #tpu.memory_space<vmem>>, vector<2x576xf32>,
    } else {
    }
    %c0 = arith.constant 0 : index
    %c0_1 = arith.constant 0 : index
    %3 = vector.load %arg7[%c0, %c0_1] : memref<2x576xf32, #tpu.memory_space<vmem>>, vector<2x576xf32>
    %c0_2 = arith.constant 0 : index
    %c0_3 = arith.constant 0 : index
    %4 = vector.load %arg3[%c0_2, %c0_3] : memref<2x128xf32, #tpu.memory_space<vmem>>, vector<2x128xf32>
    %c0_4 = arith.constant 0 : index
    %c0_5 = arith.constant 0 : index
    %5 = vector.load %arg4[%c0_4, %c0_5] : memref<128x576xf32, #tpu.memory_space<vmem>>, vector<128x576xf32>
    %cst = arith.constant dense<0.000000e+00> : vector<2x576xf32>
    %6 = tpu.matmul %4, %5, %cst {dimension_numbers = #tpu.dot_dimension_numbers<[1], [0], [0], [1], [0, 0, 1, 1], [], []>} : vector<2x128xf32>, vector<128x576xf32>, vector<2x576xf32> -> vector<2x576xf32>
    %7 = arith.addf %3, %6 : vector<2x576xf32>
    %c0_6 = arith.constant 0 : index
    %c0_7 = arith.constant 0 : index
    %8 = vector.load %arg7[%c0_6, %c0_7] : memref<2x576xf32, #tpu.memory_space<vmem>>, vector<2x576xf32>
    tpu.vector_store %arg7[%c0_6, %c0_7], %7 {strides = array<i32>} : memref<2x576xf32, #tpu.memory_space<vmem>>, vector<2x576xf32>,
    %c0_i32_8 = arith.constant 0 : i32
    %9 = arith.cmpi eq, %arg2, %c0_i32_8 : i32
    %10 = arith.extui %9 : i1 to i32
    %c0_i32_9 = arith.constant 0 : i32
    %11 = arith.cmpi ne, %10, %c0_i32_9 : i32
    scf.if %11 {
      %c0_10 = arith.constant 0 : index
      %c0_11 = arith.constant 0 : index
      %12 = vector.load %arg7[%c0_10, %c0_11] : memref<2x576xf32, #tpu.memory_space<vmem>>, vector<2x576xf32>
      %c0_12 = arith.constant 0 : index
      %c0_13 = arith.constant 0 : index
      %13 = vector.load %arg5[%c0_12, %c0_13] : memref<1x576xf32, #tpu.memory_space<vmem>>, vector<1x576xf32>
      %14 = vector.broadcast %13 : vector<1x576xf32> to vector<2x576xf32>
      %15 = arith.addf %12, %14 : vector<2x576xf32>
      %c0_14 = arith.constant 0 : index
      %c0_15 = arith.constant 0 : index
      %16 = vector.load %arg6[%c0_14, %c0_15] : memref<2x576xf32, #tpu.memory_space<vmem>>, vector<2x576xf32>
      tpu.vector_store %arg6[%c0_14, %c0_15], %15 {strides = array<i32>} : memref<2x576xf32, #tpu.memory_space<vmem>>, vector<2x576xf32>,
    } else {
    }
    return
  }
  func.func @transform_0(%arg0: i32, %arg1: i32, %arg2: i32) -> (i32, i32) {
    %c0_i32 = arith.constant 0 : i32
    return %arg0, %arg2 : i32, i32
  }
  func.func @transform_1(%arg0: i32, %arg1: i32, %arg2: i32) -> (i32, i32) {
    %c0_i32 = arith.constant 0 : i32
    return %arg2, %arg1 : i32, i32
  }
  func.func @transform_2(%arg0: i32, %arg1: i32, %arg2: i32) -> (i32, i32) {
    %c0_i32 = arith.constant 0 : i32
    %c0_i32_0 = arith.constant 0 : i32
    return %c0_i32, %arg1 : i32, i32
  }
  func.func @transform_3(%arg0: i32, %arg1: i32, %arg2: i32) -> (i32, i32) {
    %c0_i32 = arith.constant 0 : i32
    return %arg0, %arg1 : i32, i32
  }
}

module attributes {stable_mosaic.version = 11 : i64} {
  func.func @_conv_row_kernel(%arg0: i32, %arg1: i32, %arg2: memref<1x1x14x32xf32, #tpu.memory_space<vmem>>, %arg3: memref<1x1x14x32xf32, #tpu.memory_space<vmem>>, %arg4: memref<1x1x14x32xf32, #tpu.memory_space<vmem>>, %arg5: memref<288x32xf32, #tpu.memory_space<vmem>>, %arg6: memref<1x32xf32, #tpu.memory_space<vmem>>, %arg7: memref<1x1x12x32xf32, #tpu.memory_space<vmem>>) attributes {dimension_semantics = [#tpu.dimension_semantics<parallel>, #tpu.dimension_semantics<parallel>], iteration_bounds = array<i64: 2, 6>, scalar_prefetch = 0 : i64, scratch_operands = 0 : i64, tpu.core_type = #tpu.core_type<tc>, window_params = [{transform_indices = @transform_0, window_bounds = array<i64: 1, 1, 14, 32>}, {transform_indices = @transform_1, window_bounds = array<i64: 1, 1, 14, 32>}, {transform_indices = @transform_2, window_bounds = array<i64: 1, 1, 14, 32>}, {pipeline_mode = #tpu.pipeline_mode<synchronous>, transform_indices = @transform_3, window_bounds = array<i64: 288, 32>}, {pipeline_mode = #tpu.pipeline_mode<synchronous>, transform_indices = @transform_4, window_bounds = array<i64: 1, 32>}, {transform_indices = @transform_5, window_bounds = array<i64: 1, 1, 12, 32>}]} {
    %c0 = arith.constant 0 : index
    %c0_0 = arith.constant 0 : index
    %0 = vector.load %arg6[%c0, %c0_0] : memref<1x32xf32, #tpu.memory_space<vmem>>, vector<1x32xf32>
    %c0_1 = arith.constant 0 : index
    %c0_2 = arith.constant 0 : index
    %c0_3 = arith.constant 0 : index
    %c0_4 = arith.constant 0 : index
    %1 = vector.load %arg2[%c0_1, %c0_2, %c0_3, %c0_4] : memref<1x1x14x32xf32, #tpu.memory_space<vmem>>, vector<1x1x12x32xf32>
    %2 = vector.shape_cast %1 : vector<1x1x12x32xf32> to vector<12x32xf32>
    %c0_5 = arith.constant 0 : index
    %c0_6 = arith.constant 0 : index
    %3 = vector.load %arg5[%c0_5, %c0_6] : memref<288x32xf32, #tpu.memory_space<vmem>>, vector<32x32xf32>
    %cst = arith.constant dense<0.000000e+00> : vector<12x32xf32>
    %4 = tpu.matmul %2, %3, %cst {dimension_numbers = #tpu.dot_dimension_numbers<[1], [0], [0], [1], [0, 0, 1, 1], [], []>} : vector<12x32xf32>, vector<32x32xf32>, vector<12x32xf32> -> vector<12x32xf32>
    %c0_7 = arith.constant 0 : index
    %c0_8 = arith.constant 0 : index
    %c1 = arith.constant 1 : index
    %c0_9 = arith.constant 0 : index
    %5 = vector.load %arg2[%c0_7, %c0_8, %c1, %c0_9] : memref<1x1x14x32xf32, #tpu.memory_space<vmem>>, vector<1x1x12x32xf32>
    %6 = vector.shape_cast %5 : vector<1x1x12x32xf32> to vector<12x32xf32>
    %c32 = arith.constant 32 : index
    %c0_10 = arith.constant 0 : index
    %7 = vector.load %arg5[%c32, %c0_10] : memref<288x32xf32, #tpu.memory_space<vmem>>, vector<32x32xf32>
    %cst_11 = arith.constant dense<0.000000e+00> : vector<12x32xf32>
    %8 = tpu.matmul %6, %7, %cst_11 {dimension_numbers = #tpu.dot_dimension_numbers<[1], [0], [0], [1], [0, 0, 1, 1], [], []>} : vector<12x32xf32>, vector<32x32xf32>, vector<12x32xf32> -> vector<12x32xf32>
    %9 = arith.addf %4, %8 : vector<12x32xf32>
    %c0_12 = arith.constant 0 : index
    %c0_13 = arith.constant 0 : index
    %c2 = arith.constant 2 : index
    %c0_14 = arith.constant 0 : index
    %10 = vector.load %arg2[%c0_12, %c0_13, %c2, %c0_14] : memref<1x1x14x32xf32, #tpu.memory_space<vmem>>, vector<1x1x12x32xf32>
    %11 = vector.shape_cast %10 : vector<1x1x12x32xf32> to vector<12x32xf32>
    %c64 = arith.constant 64 : index
    %c0_15 = arith.constant 0 : index
    %12 = vector.load %arg5[%c64, %c0_15] : memref<288x32xf32, #tpu.memory_space<vmem>>, vector<32x32xf32>
    %cst_16 = arith.constant dense<0.000000e+00> : vector<12x32xf32>
    %13 = tpu.matmul %11, %12, %cst_16 {dimension_numbers = #tpu.dot_dimension_numbers<[1], [0], [0], [1], [0, 0, 1, 1], [], []>} : vector<12x32xf32>, vector<32x32xf32>, vector<12x32xf32> -> vector<12x32xf32>
    %14 = arith.addf %9, %13 : vector<12x32xf32>
    %c0_17 = arith.constant 0 : index
    %c0_18 = arith.constant 0 : index
    %c0_19 = arith.constant 0 : index
    %c0_20 = arith.constant 0 : index
    %15 = vector.load %arg3[%c0_17, %c0_18, %c0_19, %c0_20] : memref<1x1x14x32xf32, #tpu.memory_space<vmem>>, vector<1x1x12x32xf32>
    %16 = vector.shape_cast %15 : vector<1x1x12x32xf32> to vector<12x32xf32>
    %c96 = arith.constant 96 : index
    %c0_21 = arith.constant 0 : index
    %17 = vector.load %arg5[%c96, %c0_21] : memref<288x32xf32, #tpu.memory_space<vmem>>, vector<32x32xf32>
    %cst_22 = arith.constant dense<0.000000e+00> : vector<12x32xf32>
    %18 = tpu.matmul %16, %17, %cst_22 {dimension_numbers = #tpu.dot_dimension_numbers<[1], [0], [0], [1], [0, 0, 1, 1], [], []>} : vector<12x32xf32>, vector<32x32xf32>, vector<12x32xf32> -> vector<12x32xf32>
    %19 = arith.addf %14, %18 : vector<12x32xf32>
    %c0_23 = arith.constant 0 : index
    %c0_24 = arith.constant 0 : index
    %c1_25 = arith.constant 1 : index
    %c0_26 = arith.constant 0 : index
    %20 = vector.load %arg3[%c0_23, %c0_24, %c1_25, %c0_26] : memref<1x1x14x32xf32, #tpu.memory_space<vmem>>, vector<1x1x12x32xf32>
    %21 = vector.shape_cast %20 : vector<1x1x12x32xf32> to vector<12x32xf32>
    %c128 = arith.constant 128 : index
    %c0_27 = arith.constant 0 : index
    %22 = vector.load %arg5[%c128, %c0_27] : memref<288x32xf32, #tpu.memory_space<vmem>>, vector<32x32xf32>
    %cst_28 = arith.constant dense<0.000000e+00> : vector<12x32xf32>
    %23 = tpu.matmul %21, %22, %cst_28 {dimension_numbers = #tpu.dot_dimension_numbers<[1], [0], [0], [1], [0, 0, 1, 1], [], []>} : vector<12x32xf32>, vector<32x32xf32>, vector<12x32xf32> -> vector<12x32xf32>
    %24 = arith.addf %19, %23 : vector<12x32xf32>
    %c0_29 = arith.constant 0 : index
    %c0_30 = arith.constant 0 : index
    %c2_31 = arith.constant 2 : index
    %c0_32 = arith.constant 0 : index
    %25 = vector.load %arg3[%c0_29, %c0_30, %c2_31, %c0_32] : memref<1x1x14x32xf32, #tpu.memory_space<vmem>>, vector<1x1x12x32xf32>
    %26 = vector.shape_cast %25 : vector<1x1x12x32xf32> to vector<12x32xf32>
    %c160 = arith.constant 160 : index
    %c0_33 = arith.constant 0 : index
    %27 = vector.load %arg5[%c160, %c0_33] : memref<288x32xf32, #tpu.memory_space<vmem>>, vector<32x32xf32>
    %cst_34 = arith.constant dense<0.000000e+00> : vector<12x32xf32>
    %28 = tpu.matmul %26, %27, %cst_34 {dimension_numbers = #tpu.dot_dimension_numbers<[1], [0], [0], [1], [0, 0, 1, 1], [], []>} : vector<12x32xf32>, vector<32x32xf32>, vector<12x32xf32> -> vector<12x32xf32>
    %29 = arith.addf %24, %28 : vector<12x32xf32>
    %c0_35 = arith.constant 0 : index
    %c0_36 = arith.constant 0 : index
    %c0_37 = arith.constant 0 : index
    %c0_38 = arith.constant 0 : index
    %30 = vector.load %arg4[%c0_35, %c0_36, %c0_37, %c0_38] : memref<1x1x14x32xf32, #tpu.memory_space<vmem>>, vector<1x1x12x32xf32>
    %31 = vector.shape_cast %30 : vector<1x1x12x32xf32> to vector<12x32xf32>
    %c192 = arith.constant 192 : index
    %c0_39 = arith.constant 0 : index
    %32 = vector.load %arg5[%c192, %c0_39] : memref<288x32xf32, #tpu.memory_space<vmem>>, vector<32x32xf32>
    %cst_40 = arith.constant dense<0.000000e+00> : vector<12x32xf32>
    %33 = tpu.matmul %31, %32, %cst_40 {dimension_numbers = #tpu.dot_dimension_numbers<[1], [0], [0], [1], [0, 0, 1, 1], [], []>} : vector<12x32xf32>, vector<32x32xf32>, vector<12x32xf32> -> vector<12x32xf32>
    %34 = arith.addf %29, %33 : vector<12x32xf32>
    %c0_41 = arith.constant 0 : index
    %c0_42 = arith.constant 0 : index
    %c1_43 = arith.constant 1 : index
    %c0_44 = arith.constant 0 : index
    %35 = vector.load %arg4[%c0_41, %c0_42, %c1_43, %c0_44] : memref<1x1x14x32xf32, #tpu.memory_space<vmem>>, vector<1x1x12x32xf32>
    %36 = vector.shape_cast %35 : vector<1x1x12x32xf32> to vector<12x32xf32>
    %c224 = arith.constant 224 : index
    %c0_45 = arith.constant 0 : index
    %37 = vector.load %arg5[%c224, %c0_45] : memref<288x32xf32, #tpu.memory_space<vmem>>, vector<32x32xf32>
    %cst_46 = arith.constant dense<0.000000e+00> : vector<12x32xf32>
    %38 = tpu.matmul %36, %37, %cst_46 {dimension_numbers = #tpu.dot_dimension_numbers<[1], [0], [0], [1], [0, 0, 1, 1], [], []>} : vector<12x32xf32>, vector<32x32xf32>, vector<12x32xf32> -> vector<12x32xf32>
    %39 = arith.addf %34, %38 : vector<12x32xf32>
    %c0_47 = arith.constant 0 : index
    %c0_48 = arith.constant 0 : index
    %c2_49 = arith.constant 2 : index
    %c0_50 = arith.constant 0 : index
    %40 = vector.load %arg4[%c0_47, %c0_48, %c2_49, %c0_50] : memref<1x1x14x32xf32, #tpu.memory_space<vmem>>, vector<1x1x12x32xf32>
    %41 = vector.shape_cast %40 : vector<1x1x12x32xf32> to vector<12x32xf32>
    %c256 = arith.constant 256 : index
    %c0_51 = arith.constant 0 : index
    %42 = vector.load %arg5[%c256, %c0_51] : memref<288x32xf32, #tpu.memory_space<vmem>>, vector<32x32xf32>
    %cst_52 = arith.constant dense<0.000000e+00> : vector<12x32xf32>
    %43 = tpu.matmul %41, %42, %cst_52 {dimension_numbers = #tpu.dot_dimension_numbers<[1], [0], [0], [1], [0, 0, 1, 1], [], []>} : vector<12x32xf32>, vector<32x32xf32>, vector<12x32xf32> -> vector<12x32xf32>
    %44 = arith.addf %39, %43 : vector<12x32xf32>
    %45 = vector.broadcast %0 : vector<1x32xf32> to vector<12x32xf32>
    %46 = arith.addf %44, %45 : vector<12x32xf32>
    %cst_53 = arith.constant 5.000000e-01 : f32
    %47 = vector.broadcast %cst_53 : f32 to vector<12x32xf32>
    %48 = arith.mulf %47, %46 : vector<12x32xf32>
    %cst_54 = arith.constant 0.707106769 : f32
    %49 = vector.broadcast %cst_54 : f32 to vector<12x32xf32>
    %50 = arith.mulf %46, %49 : vector<12x32xf32>
    %cst_55 = arith.constant 0.000000e+00 : f32
    %51 = vector.broadcast %cst_55 : f32 to vector<12x32xf32>
    %52 = arith.cmpf oge, %50, %51 : vector<12x32xf32>
    %cst_56 = arith.constant 1.000000e+00 : f32
    %cst_57 = arith.constant -1.000000e+00 : f32
    %53 = vector.broadcast %cst_56 : f32 to vector<12x32xf32>
    %54 = vector.broadcast %cst_57 : f32 to vector<12x32xf32>
    %55 = arith.select %52, %53, %54 : vector<12x32xi1>, vector<12x32xf32>
    %56 = math.absf %50 : vector<12x32xf32>
    %cst_58 = arith.constant 0.327591091 : f32
    %57 = vector.broadcast %cst_58 : f32 to vector<12x32xf32>
    %58 = arith.mulf %57, %56 : vector<12x32xf32>
    %cst_59 = arith.constant 1.000000e+00 : f32
    %59 = vector.broadcast %cst_59 : f32 to vector<12x32xf32>
    %60 = arith.addf %59, %58 : vector<12x32xf32>
    %cst_60 = arith.constant 1.000000e+00 : f32
    %61 = vector.broadcast %cst_60 : f32 to vector<12x32xf32>
    %62 = arith.divf %61, %60 : vector<12x32xf32>
    %cst_61 = arith.constant 1.06140542 : f32
    %63 = vector.broadcast %cst_61 : f32 to vector<12x32xf32>
    %64 = arith.mulf %63, %62 : vector<12x32xf32>
    %cst_62 = arith.constant -1.45315206 : f32
    %65 = vector.broadcast %cst_62 : f32 to vector<12x32xf32>
    %66 = arith.addf %64, %65 : vector<12x32xf32>
    %67 = arith.mulf %66, %62 : vector<12x32xf32>
    %cst_63 = arith.constant 1.42141378 : f32
    %68 = vector.broadcast %cst_63 : f32 to vector<12x32xf32>
    %69 = arith.addf %67, %68 : vector<12x32xf32>
    %70 = arith.mulf %69, %62 : vector<12x32xf32>
    %cst_64 = arith.constant -0.284496725 : f32
    %71 = vector.broadcast %cst_64 : f32 to vector<12x32xf32>
    %72 = arith.addf %70, %71 : vector<12x32xf32>
    %73 = arith.mulf %72, %62 : vector<12x32xf32>
    %cst_65 = arith.constant 0.254829586 : f32
    %74 = vector.broadcast %cst_65 : f32 to vector<12x32xf32>
    %75 = arith.addf %73, %74 : vector<12x32xf32>
    %76 = arith.mulf %75, %62 : vector<12x32xf32>
    %cst_66 = arith.constant 0.000000e+00 : f32
    %77 = vector.broadcast %cst_66 : f32 to vector<12x32xf32>
    %78 = arith.subf %77, %56 : vector<12x32xf32>
    %79 = arith.mulf %78, %56 : vector<12x32xf32>
    %80 = math.exp %79 : vector<12x32xf32>
    %81 = arith.mulf %76, %80 : vector<12x32xf32>
    %cst_67 = arith.constant 1.000000e+00 : f32
    %82 = vector.broadcast %cst_67 : f32 to vector<12x32xf32>
    %83 = arith.subf %82, %81 : vector<12x32xf32>
    %84 = arith.mulf %55, %83 : vector<12x32xf32>
    %cst_68 = arith.constant 1.000000e+00 : f32
    %85 = vector.broadcast %cst_68 : f32 to vector<12x32xf32>
    %86 = arith.addf %85, %84 : vector<12x32xf32>
    %87 = arith.mulf %48, %86 : vector<12x32xf32>
    %c0_69 = arith.constant 0 : index
    %c0_70 = arith.constant 0 : index
    %c0_71 = arith.constant 0 : index
    %c0_72 = arith.constant 0 : index
    %88 = vector.load %arg7[%c0_69, %c0_70, %c0_71, %c0_72] : memref<1x1x12x32xf32, #tpu.memory_space<vmem>>, vector<1x1x12x32xf32>
    %89 = vector.shape_cast %88 : vector<1x1x12x32xf32> to vector<12x32xf32>
    %90 = vector.shape_cast %87 : vector<12x32xf32> to vector<1x1x12x32xf32>
    tpu.vector_store %arg7[%c0_69, %c0_70, %c0_71, %c0_72], %90 {strides = array<i32>} : memref<1x1x12x32xf32, #tpu.memory_space<vmem>>, vector<1x1x12x32xf32>,
    return
  }
  func.func @transform_0(%arg0: i32, %arg1: i32) -> (i32, i32, i32, i32) {
    %c1_i32 = arith.constant 1 : i32
    %0 = arith.muli %c1_i32, %arg1 : i32
    %c0_i32 = arith.constant 0 : i32
    %1 = arith.addi %0, %c0_i32 : i32
    %c0_i32_0 = arith.constant 0 : i32
    %c0_i32_1 = arith.constant 0 : i32
    %c0_i32_2 = arith.constant 0 : i32
    return %arg0, %1, %c0_i32_0, %c0_i32_1 : i32, i32, i32, i32
  }
  func.func @transform_1(%arg0: i32, %arg1: i32) -> (i32, i32, i32, i32) {
    %c1_i32 = arith.constant 1 : i32
    %0 = arith.muli %c1_i32, %arg1 : i32
    %c1_i32_0 = arith.constant 1 : i32
    %1 = arith.addi %0, %c1_i32_0 : i32
    %c0_i32 = arith.constant 0 : i32
    %c0_i32_1 = arith.constant 0 : i32
    %c0_i32_2 = arith.constant 0 : i32
    return %arg0, %1, %c0_i32, %c0_i32_1 : i32, i32, i32, i32
  }
  func.func @transform_2(%arg0: i32, %arg1: i32) -> (i32, i32, i32, i32) {
    %c1_i32 = arith.constant 1 : i32
    %0 = arith.muli %c1_i32, %arg1 : i32
    %c2_i32 = arith.constant 2 : i32
    %1 = arith.addi %0, %c2_i32 : i32
    %c0_i32 = arith.constant 0 : i32
    %c0_i32_0 = arith.constant 0 : i32
    %c0_i32_1 = arith.constant 0 : i32
    return %arg0, %1, %c0_i32, %c0_i32_0 : i32, i32, i32, i32
  }
  func.func @transform_3(%arg0: i32, %arg1: i32) -> (i32, i32) {
    %c0_i32 = arith.constant 0 : i32
    %c0_i32_0 = arith.constant 0 : i32
    %c0_i32_1 = arith.constant 0 : i32
    return %c0_i32, %c0_i32_0 : i32, i32
  }
  func.func @transform_4(%arg0: i32, %arg1: i32) -> (i32, i32) {
    %c0_i32 = arith.constant 0 : i32
    %c0_i32_0 = arith.constant 0 : i32
    %c0_i32_1 = arith.constant 0 : i32
    return %c0_i32, %c0_i32_0 : i32, i32
  }
  func.func @transform_5(%arg0: i32, %arg1: i32) -> (i32, i32, i32, i32) {
    %c0_i32 = arith.constant 0 : i32
    %c0_i32_0 = arith.constant 0 : i32
    %c0_i32_1 = arith.constant 0 : i32
    return %arg0, %arg1, %c0_i32, %c0_i32_0 : i32, i32, i32, i32
  }
}

module attributes {stable_mosaic.version = 11 : i64} {
  func.func @_conv_row_kernel(%arg0: i32, %arg1: i32, %arg2: memref<1x1x26x32xf32, #tpu.memory_space<vmem>>, %arg3: memref<1x1x26x32xf32, #tpu.memory_space<vmem>>, %arg4: memref<1x1x26x32xf32, #tpu.memory_space<vmem>>, %arg5: memref<288x16xf32, #tpu.memory_space<vmem>>, %arg6: memref<1x16xf32, #tpu.memory_space<vmem>>, %arg7: memref<1x1x24x16xf32, #tpu.memory_space<vmem>>) attributes {dimension_semantics = [#tpu.dimension_semantics<parallel>, #tpu.dimension_semantics<parallel>], iteration_bounds = array<i64: 2, 12>, scalar_prefetch = 0 : i64, scratch_operands = 0 : i64, tpu.core_type = #tpu.core_type<tc>, window_params = [{transform_indices = @transform_0, window_bounds = array<i64: 1, 1, 26, 32>}, {transform_indices = @transform_1, window_bounds = array<i64: 1, 1, 26, 32>}, {transform_indices = @transform_2, window_bounds = array<i64: 1, 1, 26, 32>}, {pipeline_mode = #tpu.pipeline_mode<synchronous>, transform_indices = @transform_3, window_bounds = array<i64: 288, 16>}, {pipeline_mode = #tpu.pipeline_mode<synchronous>, transform_indices = @transform_4, window_bounds = array<i64: 1, 16>}, {transform_indices = @transform_5, window_bounds = array<i64: 1, 1, 24, 16>}]} {
    %c0 = arith.constant 0 : index
    %c0_0 = arith.constant 0 : index
    %0 = vector.load %arg6[%c0, %c0_0] : memref<1x16xf32, #tpu.memory_space<vmem>>, vector<1x16xf32>
    %c0_1 = arith.constant 0 : index
    %c0_2 = arith.constant 0 : index
    %c0_3 = arith.constant 0 : index
    %c0_4 = arith.constant 0 : index
    %1 = vector.load %arg2[%c0_1, %c0_2, %c0_3, %c0_4] : memref<1x1x26x32xf32, #tpu.memory_space<vmem>>, vector<1x1x24x32xf32>
    %2 = vector.shape_cast %1 : vector<1x1x24x32xf32> to vector<24x32xf32>
    %c0_5 = arith.constant 0 : index
    %c0_6 = arith.constant 0 : index
    %3 = vector.load %arg5[%c0_5, %c0_6] : memref<288x16xf32, #tpu.memory_space<vmem>>, vector<32x16xf32>
    %cst = arith.constant dense<0.000000e+00> : vector<24x16xf32>
    %4 = tpu.matmul %2, %3, %cst {dimension_numbers = #tpu.dot_dimension_numbers<[1], [0], [0], [1], [0, 0, 1, 1], [], []>} : vector<24x32xf32>, vector<32x16xf32>, vector<24x16xf32> -> vector<24x16xf32>
    %c0_7 = arith.constant 0 : index
    %c0_8 = arith.constant 0 : index
    %c1 = arith.constant 1 : index
    %c0_9 = arith.constant 0 : index
    %5 = vector.load %arg2[%c0_7, %c0_8, %c1, %c0_9] : memref<1x1x26x32xf32, #tpu.memory_space<vmem>>, vector<1x1x24x32xf32>
    %6 = vector.shape_cast %5 : vector<1x1x24x32xf32> to vector<24x32xf32>
    %c32 = arith.constant 32 : index
    %c0_10 = arith.constant 0 : index
    %7 = vector.load %arg5[%c32, %c0_10] : memref<288x16xf32, #tpu.memory_space<vmem>>, vector<32x16xf32>
    %cst_11 = arith.constant dense<0.000000e+00> : vector<24x16xf32>
    %8 = tpu.matmul %6, %7, %cst_11 {dimension_numbers = #tpu.dot_dimension_numbers<[1], [0], [0], [1], [0, 0, 1, 1], [], []>} : vector<24x32xf32>, vector<32x16xf32>, vector<24x16xf32> -> vector<24x16xf32>
    %9 = arith.addf %4, %8 : vector<24x16xf32>
    %c0_12 = arith.constant 0 : index
    %c0_13 = arith.constant 0 : index
    %c2 = arith.constant 2 : index
    %c0_14 = arith.constant 0 : index
    %10 = vector.load %arg2[%c0_12, %c0_13, %c2, %c0_14] : memref<1x1x26x32xf32, #tpu.memory_space<vmem>>, vector<1x1x24x32xf32>
    %11 = vector.shape_cast %10 : vector<1x1x24x32xf32> to vector<24x32xf32>
    %c64 = arith.constant 64 : index
    %c0_15 = arith.constant 0 : index
    %12 = vector.load %arg5[%c64, %c0_15] : memref<288x16xf32, #tpu.memory_space<vmem>>, vector<32x16xf32>
    %cst_16 = arith.constant dense<0.000000e+00> : vector<24x16xf32>
    %13 = tpu.matmul %11, %12, %cst_16 {dimension_numbers = #tpu.dot_dimension_numbers<[1], [0], [0], [1], [0, 0, 1, 1], [], []>} : vector<24x32xf32>, vector<32x16xf32>, vector<24x16xf32> -> vector<24x16xf32>
    %14 = arith.addf %9, %13 : vector<24x16xf32>
    %c0_17 = arith.constant 0 : index
    %c0_18 = arith.constant 0 : index
    %c0_19 = arith.constant 0 : index
    %c0_20 = arith.constant 0 : index
    %15 = vector.load %arg3[%c0_17, %c0_18, %c0_19, %c0_20] : memref<1x1x26x32xf32, #tpu.memory_space<vmem>>, vector<1x1x24x32xf32>
    %16 = vector.shape_cast %15 : vector<1x1x24x32xf32> to vector<24x32xf32>
    %c96 = arith.constant 96 : index
    %c0_21 = arith.constant 0 : index
    %17 = vector.load %arg5[%c96, %c0_21] : memref<288x16xf32, #tpu.memory_space<vmem>>, vector<32x16xf32>
    %cst_22 = arith.constant dense<0.000000e+00> : vector<24x16xf32>
    %18 = tpu.matmul %16, %17, %cst_22 {dimension_numbers = #tpu.dot_dimension_numbers<[1], [0], [0], [1], [0, 0, 1, 1], [], []>} : vector<24x32xf32>, vector<32x16xf32>, vector<24x16xf32> -> vector<24x16xf32>
    %19 = arith.addf %14, %18 : vector<24x16xf32>
    %c0_23 = arith.constant 0 : index
    %c0_24 = arith.constant 0 : index
    %c1_25 = arith.constant 1 : index
    %c0_26 = arith.constant 0 : index
    %20 = vector.load %arg3[%c0_23, %c0_24, %c1_25, %c0_26] : memref<1x1x26x32xf32, #tpu.memory_space<vmem>>, vector<1x1x24x32xf32>
    %21 = vector.shape_cast %20 : vector<1x1x24x32xf32> to vector<24x32xf32>
    %c128 = arith.constant 128 : index
    %c0_27 = arith.constant 0 : index
    %22 = vector.load %arg5[%c128, %c0_27] : memref<288x16xf32, #tpu.memory_space<vmem>>, vector<32x16xf32>
    %cst_28 = arith.constant dense<0.000000e+00> : vector<24x16xf32>
    %23 = tpu.matmul %21, %22, %cst_28 {dimension_numbers = #tpu.dot_dimension_numbers<[1], [0], [0], [1], [0, 0, 1, 1], [], []>} : vector<24x32xf32>, vector<32x16xf32>, vector<24x16xf32> -> vector<24x16xf32>
    %24 = arith.addf %19, %23 : vector<24x16xf32>
    %c0_29 = arith.constant 0 : index
    %c0_30 = arith.constant 0 : index
    %c2_31 = arith.constant 2 : index
    %c0_32 = arith.constant 0 : index
    %25 = vector.load %arg3[%c0_29, %c0_30, %c2_31, %c0_32] : memref<1x1x26x32xf32, #tpu.memory_space<vmem>>, vector<1x1x24x32xf32>
    %26 = vector.shape_cast %25 : vector<1x1x24x32xf32> to vector<24x32xf32>
    %c160 = arith.constant 160 : index
    %c0_33 = arith.constant 0 : index
    %27 = vector.load %arg5[%c160, %c0_33] : memref<288x16xf32, #tpu.memory_space<vmem>>, vector<32x16xf32>
    %cst_34 = arith.constant dense<0.000000e+00> : vector<24x16xf32>
    %28 = tpu.matmul %26, %27, %cst_34 {dimension_numbers = #tpu.dot_dimension_numbers<[1], [0], [0], [1], [0, 0, 1, 1], [], []>} : vector<24x32xf32>, vector<32x16xf32>, vector<24x16xf32> -> vector<24x16xf32>
    %29 = arith.addf %24, %28 : vector<24x16xf32>
    %c0_35 = arith.constant 0 : index
    %c0_36 = arith.constant 0 : index
    %c0_37 = arith.constant 0 : index
    %c0_38 = arith.constant 0 : index
    %30 = vector.load %arg4[%c0_35, %c0_36, %c0_37, %c0_38] : memref<1x1x26x32xf32, #tpu.memory_space<vmem>>, vector<1x1x24x32xf32>
    %31 = vector.shape_cast %30 : vector<1x1x24x32xf32> to vector<24x32xf32>
    %c192 = arith.constant 192 : index
    %c0_39 = arith.constant 0 : index
    %32 = vector.load %arg5[%c192, %c0_39] : memref<288x16xf32, #tpu.memory_space<vmem>>, vector<32x16xf32>
    %cst_40 = arith.constant dense<0.000000e+00> : vector<24x16xf32>
    %33 = tpu.matmul %31, %32, %cst_40 {dimension_numbers = #tpu.dot_dimension_numbers<[1], [0], [0], [1], [0, 0, 1, 1], [], []>} : vector<24x32xf32>, vector<32x16xf32>, vector<24x16xf32> -> vector<24x16xf32>
    %34 = arith.addf %29, %33 : vector<24x16xf32>
    %c0_41 = arith.constant 0 : index
    %c0_42 = arith.constant 0 : index
    %c1_43 = arith.constant 1 : index
    %c0_44 = arith.constant 0 : index
    %35 = vector.load %arg4[%c0_41, %c0_42, %c1_43, %c0_44] : memref<1x1x26x32xf32, #tpu.memory_space<vmem>>, vector<1x1x24x32xf32>
    %36 = vector.shape_cast %35 : vector<1x1x24x32xf32> to vector<24x32xf32>
    %c224 = arith.constant 224 : index
    %c0_45 = arith.constant 0 : index
    %37 = vector.load %arg5[%c224, %c0_45] : memref<288x16xf32, #tpu.memory_space<vmem>>, vector<32x16xf32>
    %cst_46 = arith.constant dense<0.000000e+00> : vector<24x16xf32>
    %38 = tpu.matmul %36, %37, %cst_46 {dimension_numbers = #tpu.dot_dimension_numbers<[1], [0], [0], [1], [0, 0, 1, 1], [], []>} : vector<24x32xf32>, vector<32x16xf32>, vector<24x16xf32> -> vector<24x16xf32>
    %39 = arith.addf %34, %38 : vector<24x16xf32>
    %c0_47 = arith.constant 0 : index
    %c0_48 = arith.constant 0 : index
    %c2_49 = arith.constant 2 : index
    %c0_50 = arith.constant 0 : index
    %40 = vector.load %arg4[%c0_47, %c0_48, %c2_49, %c0_50] : memref<1x1x26x32xf32, #tpu.memory_space<vmem>>, vector<1x1x24x32xf32>
    %41 = vector.shape_cast %40 : vector<1x1x24x32xf32> to vector<24x32xf32>
    %c256 = arith.constant 256 : index
    %c0_51 = arith.constant 0 : index
    %42 = vector.load %arg5[%c256, %c0_51] : memref<288x16xf32, #tpu.memory_space<vmem>>, vector<32x16xf32>
    %cst_52 = arith.constant dense<0.000000e+00> : vector<24x16xf32>
    %43 = tpu.matmul %41, %42, %cst_52 {dimension_numbers = #tpu.dot_dimension_numbers<[1], [0], [0], [1], [0, 0, 1, 1], [], []>} : vector<24x32xf32>, vector<32x16xf32>, vector<24x16xf32> -> vector<24x16xf32>
    %44 = arith.addf %39, %43 : vector<24x16xf32>
    %45 = vector.broadcast %0 : vector<1x16xf32> to vector<24x16xf32>
    %46 = arith.addf %44, %45 : vector<24x16xf32>
    %cst_53 = arith.constant 5.000000e-01 : f32
    %47 = vector.broadcast %cst_53 : f32 to vector<24x16xf32>
    %48 = arith.mulf %47, %46 : vector<24x16xf32>
    %cst_54 = arith.constant 0.707106769 : f32
    %49 = vector.broadcast %cst_54 : f32 to vector<24x16xf32>
    %50 = arith.mulf %46, %49 : vector<24x16xf32>
    %cst_55 = arith.constant 0.000000e+00 : f32
    %51 = vector.broadcast %cst_55 : f32 to vector<24x16xf32>
    %52 = arith.cmpf oge, %50, %51 : vector<24x16xf32>
    %cst_56 = arith.constant 1.000000e+00 : f32
    %cst_57 = arith.constant -1.000000e+00 : f32
    %53 = vector.broadcast %cst_56 : f32 to vector<24x16xf32>
    %54 = vector.broadcast %cst_57 : f32 to vector<24x16xf32>
    %55 = arith.select %52, %53, %54 : vector<24x16xi1>, vector<24x16xf32>
    %56 = math.absf %50 : vector<24x16xf32>
    %cst_58 = arith.constant 0.327591091 : f32
    %57 = vector.broadcast %cst_58 : f32 to vector<24x16xf32>
    %58 = arith.mulf %57, %56 : vector<24x16xf32>
    %cst_59 = arith.constant 1.000000e+00 : f32
    %59 = vector.broadcast %cst_59 : f32 to vector<24x16xf32>
    %60 = arith.addf %59, %58 : vector<24x16xf32>
    %cst_60 = arith.constant 1.000000e+00 : f32
    %61 = vector.broadcast %cst_60 : f32 to vector<24x16xf32>
    %62 = arith.divf %61, %60 : vector<24x16xf32>
    %cst_61 = arith.constant 1.06140542 : f32
    %63 = vector.broadcast %cst_61 : f32 to vector<24x16xf32>
    %64 = arith.mulf %63, %62 : vector<24x16xf32>
    %cst_62 = arith.constant -1.45315206 : f32
    %65 = vector.broadcast %cst_62 : f32 to vector<24x16xf32>
    %66 = arith.addf %64, %65 : vector<24x16xf32>
    %67 = arith.mulf %66, %62 : vector<24x16xf32>
    %cst_63 = arith.constant 1.42141378 : f32
    %68 = vector.broadcast %cst_63 : f32 to vector<24x16xf32>
    %69 = arith.addf %67, %68 : vector<24x16xf32>
    %70 = arith.mulf %69, %62 : vector<24x16xf32>
    %cst_64 = arith.constant -0.284496725 : f32
    %71 = vector.broadcast %cst_64 : f32 to vector<24x16xf32>
    %72 = arith.addf %70, %71 : vector<24x16xf32>
    %73 = arith.mulf %72, %62 : vector<24x16xf32>
    %cst_65 = arith.constant 0.254829586 : f32
    %74 = vector.broadcast %cst_65 : f32 to vector<24x16xf32>
    %75 = arith.addf %73, %74 : vector<24x16xf32>
    %76 = arith.mulf %75, %62 : vector<24x16xf32>
    %cst_66 = arith.constant 0.000000e+00 : f32
    %77 = vector.broadcast %cst_66 : f32 to vector<24x16xf32>
    %78 = arith.subf %77, %56 : vector<24x16xf32>
    %79 = arith.mulf %78, %56 : vector<24x16xf32>
    %80 = math.exp %79 : vector<24x16xf32>
    %81 = arith.mulf %76, %80 : vector<24x16xf32>
    %cst_67 = arith.constant 1.000000e+00 : f32
    %82 = vector.broadcast %cst_67 : f32 to vector<24x16xf32>
    %83 = arith.subf %82, %81 : vector<24x16xf32>
    %84 = arith.mulf %55, %83 : vector<24x16xf32>
    %cst_68 = arith.constant 1.000000e+00 : f32
    %85 = vector.broadcast %cst_68 : f32 to vector<24x16xf32>
    %86 = arith.addf %85, %84 : vector<24x16xf32>
    %87 = arith.mulf %48, %86 : vector<24x16xf32>
    %c0_69 = arith.constant 0 : index
    %c0_70 = arith.constant 0 : index
    %c0_71 = arith.constant 0 : index
    %c0_72 = arith.constant 0 : index
    %88 = vector.load %arg7[%c0_69, %c0_70, %c0_71, %c0_72] : memref<1x1x24x16xf32, #tpu.memory_space<vmem>>, vector<1x1x24x16xf32>
    %89 = vector.shape_cast %88 : vector<1x1x24x16xf32> to vector<24x16xf32>
    %90 = vector.shape_cast %87 : vector<24x16xf32> to vector<1x1x24x16xf32>
    tpu.vector_store %arg7[%c0_69, %c0_70, %c0_71, %c0_72], %90 {strides = array<i32>} : memref<1x1x24x16xf32, #tpu.memory_space<vmem>>, vector<1x1x24x16xf32>,
    return
  }
  func.func @transform_0(%arg0: i32, %arg1: i32) -> (i32, i32, i32, i32) {
    %c1_i32 = arith.constant 1 : i32
    %0 = arith.muli %c1_i32, %arg1 : i32
    %c0_i32 = arith.constant 0 : i32
    %1 = arith.addi %0, %c0_i32 : i32
    %c0_i32_0 = arith.constant 0 : i32
    %c0_i32_1 = arith.constant 0 : i32
    %c0_i32_2 = arith.constant 0 : i32
    return %arg0, %1, %c0_i32_0, %c0_i32_1 : i32, i32, i32, i32
  }
  func.func @transform_1(%arg0: i32, %arg1: i32) -> (i32, i32, i32, i32) {
    %c1_i32 = arith.constant 1 : i32
    %0 = arith.muli %c1_i32, %arg1 : i32
    %c1_i32_0 = arith.constant 1 : i32
    %1 = arith.addi %0, %c1_i32_0 : i32
    %c0_i32 = arith.constant 0 : i32
    %c0_i32_1 = arith.constant 0 : i32
    %c0_i32_2 = arith.constant 0 : i32
    return %arg0, %1, %c0_i32, %c0_i32_1 : i32, i32, i32, i32
  }
  func.func @transform_2(%arg0: i32, %arg1: i32) -> (i32, i32, i32, i32) {
    %c1_i32 = arith.constant 1 : i32
    %0 = arith.muli %c1_i32, %arg1 : i32
    %c2_i32 = arith.constant 2 : i32
    %1 = arith.addi %0, %c2_i32 : i32
    %c0_i32 = arith.constant 0 : i32
    %c0_i32_0 = arith.constant 0 : i32
    %c0_i32_1 = arith.constant 0 : i32
    return %arg0, %1, %c0_i32, %c0_i32_0 : i32, i32, i32, i32
  }
  func.func @transform_3(%arg0: i32, %arg1: i32) -> (i32, i32) {
    %c0_i32 = arith.constant 0 : i32
    %c0_i32_0 = arith.constant 0 : i32
    %c0_i32_1 = arith.constant 0 : i32
    return %c0_i32, %c0_i32_0 : i32, i32
  }
  func.func @transform_4(%arg0: i32, %arg1: i32) -> (i32, i32) {
    %c0_i32 = arith.constant 0 : i32
    %c0_i32_0 = arith.constant 0 : i32
    %c0_i32_1 = arith.constant 0 : i32
    return %c0_i32, %c0_i32_0 : i32, i32
  }
  func.func @transform_5(%arg0: i32, %arg1: i32) -> (i32, i32, i32, i32) {
    %c0_i32 = arith.constant 0 : i32
    %c0_i32_0 = arith.constant 0 : i32
    %c0_i32_1 = arith.constant 0 : i32
    return %arg0, %arg1, %c0_i32, %c0_i32_0 : i32, i32, i32, i32
  }
}

module attributes {stable_mosaic.version = 11 : i64} {
  func.func @_conv_row_kernel(%arg0: i32, %arg1: i32, %arg2: memref<1x1x50x16xf32, #tpu.memory_space<vmem>>, %arg3: memref<1x1x50x16xf32, #tpu.memory_space<vmem>>, %arg4: memref<1x1x50x16xf32, #tpu.memory_space<vmem>>, %arg5: memref<144x128xf32, #tpu.memory_space<vmem>>, %arg6: memref<1x128xf32, #tpu.memory_space<vmem>>, %arg7: memref<1x1x48x1xf32, #tpu.memory_space<vmem>>) attributes {dimension_semantics = [#tpu.dimension_semantics<parallel>, #tpu.dimension_semantics<parallel>], iteration_bounds = array<i64: 2, 24>, scalar_prefetch = 0 : i64, scratch_operands = 0 : i64, tpu.core_type = #tpu.core_type<tc>, window_params = [{transform_indices = @transform_0, window_bounds = array<i64: 1, 1, 50, 16>}, {transform_indices = @transform_1, window_bounds = array<i64: 1, 1, 50, 16>}, {transform_indices = @transform_2, window_bounds = array<i64: 1, 1, 50, 16>}, {pipeline_mode = #tpu.pipeline_mode<synchronous>, transform_indices = @transform_3, window_bounds = array<i64: 144, 128>}, {pipeline_mode = #tpu.pipeline_mode<synchronous>, transform_indices = @transform_4, window_bounds = array<i64: 1, 128>}, {transform_indices = @transform_5, window_bounds = array<i64: 1, 1, 48, 1>}]} {
    %c0 = arith.constant 0 : index
    %c0_0 = arith.constant 0 : index
    %0 = vector.load %arg6[%c0, %c0_0] : memref<1x128xf32, #tpu.memory_space<vmem>>, vector<1x128xf32>
    %c0_1 = arith.constant 0 : index
    %c0_2 = arith.constant 0 : index
    %c0_3 = arith.constant 0 : index
    %c0_4 = arith.constant 0 : index
    %1 = vector.load %arg2[%c0_1, %c0_2, %c0_3, %c0_4] : memref<1x1x50x16xf32, #tpu.memory_space<vmem>>, vector<1x1x48x16xf32>
    %2 = vector.shape_cast %1 : vector<1x1x48x16xf32> to vector<48x16xf32>
    %c0_5 = arith.constant 0 : index
    %c0_6 = arith.constant 0 : index
    %3 = vector.load %arg5[%c0_5, %c0_6] : memref<144x128xf32, #tpu.memory_space<vmem>>, vector<16x128xf32>
    %cst = arith.constant dense<0.000000e+00> : vector<48x128xf32>
    %4 = tpu.matmul %2, %3, %cst {dimension_numbers = #tpu.dot_dimension_numbers<[1], [0], [0], [1], [0, 0, 1, 1], [], []>} : vector<48x16xf32>, vector<16x128xf32>, vector<48x128xf32> -> vector<48x128xf32>
    %c0_7 = arith.constant 0 : index
    %c0_8 = arith.constant 0 : index
    %c1 = arith.constant 1 : index
    %c0_9 = arith.constant 0 : index
    %5 = vector.load %arg2[%c0_7, %c0_8, %c1, %c0_9] : memref<1x1x50x16xf32, #tpu.memory_space<vmem>>, vector<1x1x48x16xf32>
    %6 = vector.shape_cast %5 : vector<1x1x48x16xf32> to vector<48x16xf32>
    %c16 = arith.constant 16 : index
    %c0_10 = arith.constant 0 : index
    %7 = vector.load %arg5[%c16, %c0_10] : memref<144x128xf32, #tpu.memory_space<vmem>>, vector<16x128xf32>
    %cst_11 = arith.constant dense<0.000000e+00> : vector<48x128xf32>
    %8 = tpu.matmul %6, %7, %cst_11 {dimension_numbers = #tpu.dot_dimension_numbers<[1], [0], [0], [1], [0, 0, 1, 1], [], []>} : vector<48x16xf32>, vector<16x128xf32>, vector<48x128xf32> -> vector<48x128xf32>
    %9 = arith.addf %4, %8 : vector<48x128xf32>
    %c0_12 = arith.constant 0 : index
    %c0_13 = arith.constant 0 : index
    %c2 = arith.constant 2 : index
    %c0_14 = arith.constant 0 : index
    %10 = vector.load %arg2[%c0_12, %c0_13, %c2, %c0_14] : memref<1x1x50x16xf32, #tpu.memory_space<vmem>>, vector<1x1x48x16xf32>
    %11 = vector.shape_cast %10 : vector<1x1x48x16xf32> to vector<48x16xf32>
    %c32 = arith.constant 32 : index
    %c0_15 = arith.constant 0 : index
    %12 = vector.load %arg5[%c32, %c0_15] : memref<144x128xf32, #tpu.memory_space<vmem>>, vector<16x128xf32>
    %cst_16 = arith.constant dense<0.000000e+00> : vector<48x128xf32>
    %13 = tpu.matmul %11, %12, %cst_16 {dimension_numbers = #tpu.dot_dimension_numbers<[1], [0], [0], [1], [0, 0, 1, 1], [], []>} : vector<48x16xf32>, vector<16x128xf32>, vector<48x128xf32> -> vector<48x128xf32>
    %14 = arith.addf %9, %13 : vector<48x128xf32>
    %c0_17 = arith.constant 0 : index
    %c0_18 = arith.constant 0 : index
    %c0_19 = arith.constant 0 : index
    %c0_20 = arith.constant 0 : index
    %15 = vector.load %arg3[%c0_17, %c0_18, %c0_19, %c0_20] : memref<1x1x50x16xf32, #tpu.memory_space<vmem>>, vector<1x1x48x16xf32>
    %16 = vector.shape_cast %15 : vector<1x1x48x16xf32> to vector<48x16xf32>
    %c48 = arith.constant 48 : index
    %c0_21 = arith.constant 0 : index
    %17 = vector.load %arg5[%c48, %c0_21] : memref<144x128xf32, #tpu.memory_space<vmem>>, vector<16x128xf32>
    %cst_22 = arith.constant dense<0.000000e+00> : vector<48x128xf32>
    %18 = tpu.matmul %16, %17, %cst_22 {dimension_numbers = #tpu.dot_dimension_numbers<[1], [0], [0], [1], [0, 0, 1, 1], [], []>} : vector<48x16xf32>, vector<16x128xf32>, vector<48x128xf32> -> vector<48x128xf32>
    %19 = arith.addf %14, %18 : vector<48x128xf32>
    %c0_23 = arith.constant 0 : index
    %c0_24 = arith.constant 0 : index
    %c1_25 = arith.constant 1 : index
    %c0_26 = arith.constant 0 : index
    %20 = vector.load %arg3[%c0_23, %c0_24, %c1_25, %c0_26] : memref<1x1x50x16xf32, #tpu.memory_space<vmem>>, vector<1x1x48x16xf32>
    %21 = vector.shape_cast %20 : vector<1x1x48x16xf32> to vector<48x16xf32>
    %c64 = arith.constant 64 : index
    %c0_27 = arith.constant 0 : index
    %22 = vector.load %arg5[%c64, %c0_27] : memref<144x128xf32, #tpu.memory_space<vmem>>, vector<16x128xf32>
    %cst_28 = arith.constant dense<0.000000e+00> : vector<48x128xf32>
    %23 = tpu.matmul %21, %22, %cst_28 {dimension_numbers = #tpu.dot_dimension_numbers<[1], [0], [0], [1], [0, 0, 1, 1], [], []>} : vector<48x16xf32>, vector<16x128xf32>, vector<48x128xf32> -> vector<48x128xf32>
    %24 = arith.addf %19, %23 : vector<48x128xf32>
    %c0_29 = arith.constant 0 : index
    %c0_30 = arith.constant 0 : index
    %c2_31 = arith.constant 2 : index
    %c0_32 = arith.constant 0 : index
    %25 = vector.load %arg3[%c0_29, %c0_30, %c2_31, %c0_32] : memref<1x1x50x16xf32, #tpu.memory_space<vmem>>, vector<1x1x48x16xf32>
    %26 = vector.shape_cast %25 : vector<1x1x48x16xf32> to vector<48x16xf32>
    %c80 = arith.constant 80 : index
    %c0_33 = arith.constant 0 : index
    %27 = vector.load %arg5[%c80, %c0_33] : memref<144x128xf32, #tpu.memory_space<vmem>>, vector<16x128xf32>
    %cst_34 = arith.constant dense<0.000000e+00> : vector<48x128xf32>
    %28 = tpu.matmul %26, %27, %cst_34 {dimension_numbers = #tpu.dot_dimension_numbers<[1], [0], [0], [1], [0, 0, 1, 1], [], []>} : vector<48x16xf32>, vector<16x128xf32>, vector<48x128xf32> -> vector<48x128xf32>
    %29 = arith.addf %24, %28 : vector<48x128xf32>
    %c0_35 = arith.constant 0 : index
    %c0_36 = arith.constant 0 : index
    %c0_37 = arith.constant 0 : index
    %c0_38 = arith.constant 0 : index
    %30 = vector.load %arg4[%c0_35, %c0_36, %c0_37, %c0_38] : memref<1x1x50x16xf32, #tpu.memory_space<vmem>>, vector<1x1x48x16xf32>
    %31 = vector.shape_cast %30 : vector<1x1x48x16xf32> to vector<48x16xf32>
    %c96 = arith.constant 96 : index
    %c0_39 = arith.constant 0 : index
    %32 = vector.load %arg5[%c96, %c0_39] : memref<144x128xf32, #tpu.memory_space<vmem>>, vector<16x128xf32>
    %cst_40 = arith.constant dense<0.000000e+00> : vector<48x128xf32>
    %33 = tpu.matmul %31, %32, %cst_40 {dimension_numbers = #tpu.dot_dimension_numbers<[1], [0], [0], [1], [0, 0, 1, 1], [], []>} : vector<48x16xf32>, vector<16x128xf32>, vector<48x128xf32> -> vector<48x128xf32>
    %34 = arith.addf %29, %33 : vector<48x128xf32>
    %c0_41 = arith.constant 0 : index
    %c0_42 = arith.constant 0 : index
    %c1_43 = arith.constant 1 : index
    %c0_44 = arith.constant 0 : index
    %35 = vector.load %arg4[%c0_41, %c0_42, %c1_43, %c0_44] : memref<1x1x50x16xf32, #tpu.memory_space<vmem>>, vector<1x1x48x16xf32>
    %36 = vector.shape_cast %35 : vector<1x1x48x16xf32> to vector<48x16xf32>
    %c112 = arith.constant 112 : index
    %c0_45 = arith.constant 0 : index
    %37 = vector.load %arg5[%c112, %c0_45] : memref<144x128xf32, #tpu.memory_space<vmem>>, vector<16x128xf32>
    %cst_46 = arith.constant dense<0.000000e+00> : vector<48x128xf32>
    %38 = tpu.matmul %36, %37, %cst_46 {dimension_numbers = #tpu.dot_dimension_numbers<[1], [0], [0], [1], [0, 0, 1, 1], [], []>} : vector<48x16xf32>, vector<16x128xf32>, vector<48x128xf32> -> vector<48x128xf32>
    %39 = arith.addf %34, %38 : vector<48x128xf32>
    %c0_47 = arith.constant 0 : index
    %c0_48 = arith.constant 0 : index
    %c2_49 = arith.constant 2 : index
    %c0_50 = arith.constant 0 : index
    %40 = vector.load %arg4[%c0_47, %c0_48, %c2_49, %c0_50] : memref<1x1x50x16xf32, #tpu.memory_space<vmem>>, vector<1x1x48x16xf32>
    %41 = vector.shape_cast %40 : vector<1x1x48x16xf32> to vector<48x16xf32>
    %c128 = arith.constant 128 : index
    %c0_51 = arith.constant 0 : index
    %42 = vector.load %arg5[%c128, %c0_51] : memref<144x128xf32, #tpu.memory_space<vmem>>, vector<16x128xf32>
    %cst_52 = arith.constant dense<0.000000e+00> : vector<48x128xf32>
    %43 = tpu.matmul %41, %42, %cst_52 {dimension_numbers = #tpu.dot_dimension_numbers<[1], [0], [0], [1], [0, 0, 1, 1], [], []>} : vector<48x16xf32>, vector<16x128xf32>, vector<48x128xf32> -> vector<48x128xf32>
    %44 = arith.addf %39, %43 : vector<48x128xf32>
    %45 = vector.broadcast %0 : vector<1x128xf32> to vector<48x128xf32>
    %46 = arith.addf %44, %45 : vector<48x128xf32>
    %47 = vector.extract_strided_slice %46 {offsets = [0, 0], sizes = [48, 1], strides = [1, 1]} : vector<48x128xf32> to vector<48x1xf32>
    %c0_53 = arith.constant 0 : index
    %c0_54 = arith.constant 0 : index
    %c0_55 = arith.constant 0 : index
    %c0_56 = arith.constant 0 : index
    %48 = vector.load %arg7[%c0_53, %c0_54, %c0_55, %c0_56] : memref<1x1x48x1xf32, #tpu.memory_space<vmem>>, vector<1x1x48x1xf32>
    %49 = vector.shape_cast %48 : vector<1x1x48x1xf32> to vector<48x1xf32>
    %50 = vector.shape_cast %47 : vector<48x1xf32> to vector<1x1x48x1xf32>
    tpu.vector_store %arg7[%c0_53, %c0_54, %c0_55, %c0_56], %50 {strides = array<i32>} : memref<1x1x48x1xf32, #tpu.memory_space<vmem>>, vector<1x1x48x1xf32>,
    return
  }
  func.func @transform_0(%arg0: i32, %arg1: i32) -> (i32, i32, i32, i32) {
    %c1_i32 = arith.constant 1 : i32
    %0 = arith.muli %c1_i32, %arg1 : i32
    %c0_i32 = arith.constant 0 : i32
    %1 = arith.addi %0, %c0_i32 : i32
    %c0_i32_0 = arith.constant 0 : i32
    %c0_i32_1 = arith.constant 0 : i32
    %c0_i32_2 = arith.constant 0 : i32
    return %arg0, %1, %c0_i32_0, %c0_i32_1 : i32, i32, i32, i32
  }
  func.func @transform_1(%arg0: i32, %arg1: i32) -> (i32, i32, i32, i32) {
    %c1_i32 = arith.constant 1 : i32
    %0 = arith.muli %c1_i32, %arg1 : i32
    %c1_i32_0 = arith.constant 1 : i32
    %1 = arith.addi %0, %c1_i32_0 : i32
    %c0_i32 = arith.constant 0 : i32
    %c0_i32_1 = arith.constant 0 : i32
    %c0_i32_2 = arith.constant 0 : i32
    return %arg0, %1, %c0_i32, %c0_i32_1 : i32, i32, i32, i32
  }
  func.func @transform_2(%arg0: i32, %arg1: i32) -> (i32, i32, i32, i32) {
    %c1_i32 = arith.constant 1 : i32
    %0 = arith.muli %c1_i32, %arg1 : i32
    %c2_i32 = arith.constant 2 : i32
    %1 = arith.addi %0, %c2_i32 : i32
    %c0_i32 = arith.constant 0 : i32
    %c0_i32_0 = arith.constant 0 : i32
    %c0_i32_1 = arith.constant 0 : i32
    return %arg0, %1, %c0_i32, %c0_i32_0 : i32, i32, i32, i32
  }
  func.func @transform_3(%arg0: i32, %arg1: i32) -> (i32, i32) {
    %c0_i32 = arith.constant 0 : i32
    %c0_i32_0 = arith.constant 0 : i32
    %c0_i32_1 = arith.constant 0 : i32
    return %c0_i32, %c0_i32_0 : i32, i32
  }
  func.func @transform_4(%arg0: i32, %arg1: i32) -> (i32, i32) {
    %c0_i32 = arith.constant 0 : i32
    %c0_i32_0 = arith.constant 0 : i32
    %c0_i32_1 = arith.constant 0 : i32
    return %c0_i32, %c0_i32_0 : i32, i32
  }
  func.func @transform_5(%arg0: i32, %arg1: i32) -> (i32, i32, i32, i32) {
    %c0_i32 = arith.constant 0 : i32
    %c0_i32_0 = arith.constant 0 : i32
    %c0_i32_1 = arith.constant 0 : i32
    return %arg0, %arg1, %c0_i32, %c0_i32_0 : i32, i32, i32, i32
  }
}

</mosaic_0001>

<bundles_post_ra>
// kernel: forward.12
= control target key start
LH: loop header
LB: loop body
LE: loop exit
PB: predicated region body
PF: predicated region fallthrough
CT: control target
= control target key end

     0   :  { %s1844_s21 = smov 0   ;;  %s1846_s22 = smov 0   ;;  %s2668_s0 = inlined_call_operand.vmem [shape: f32[2,26,50,1], index: 0, kind: input, shape index: {}, may-alias: {0,1,2,3}]   ;;  %s2669_s1 = inlined_call_operand.vmem [shape: f32[2,26,50,1], index: 1, kind: input, shape index: {}, may-alias: {0,1,2,3}]   ;;  %s2670_s2 = inlined_call_operand.vmem [shape: f32[2,26,50,1], index: 2, kind: input, shape index: {}, may-alias: {0,1,2,3}]   ;;  %s2671_s3 = inlined_call_operand.vmem [shape: f32[2,26,50,1], index: 3, kind: input, shape index: {}, may-alias: {0,1,2,3}]   ;;  %s2672_s4 = inlined_call_operand.vmem [shape: f32[9,16], index: 4, kind: input, shape index: {}]   ;;  %s2673_s5 = inlined_call_operand.vmem [shape: f32[1,16], index: 5, kind: input, shape index: {}]   ;;  %s2674_s6 = inlined_call_operand.vmem [shape: f32[2,12,48,16], index: 6, kind: output, shape index: {}]  }
   0x1   :  { %s1848_s23 = smov 0   ;;  %s1850_s24 = smov 0  }
   0x2   :  { %s1852_s25 = smov 0  }
   0x3 LB: > { %s25_s26 = sadd.s32 1, %s1797_s23  ;;  %s28_s27 = sadd.s32 1, %s1801_s24  ;;  %s1805_s25 = sphi %s1852_s25, %s16_s25   ;;  %s1801_s24 = sphi %s1850_s24, %s2680_s24   ;;  %s1797_s23 = sphi %s1848_s23, %s2679_s23   ;;  %s1793_s22 = sphi %s1846_s22, %s2678_s22   ;;  %s1789_s21 = sphi %s1844_s21, %s2677_s21  }
   0x4   : > { %p26_p0 = scmp.ge.s32.totalorder %s25_s26, 12  ;;  %p1646_p1 = scmp.ge.s32.totalorder %s1805_s25, 1 }
   0x5   : > { %p308_p2 = scmp.lt.s32.totalorder %s1805_s25, 25 }
   0x6   : > { %s2682_s26 = smov (%p26_p0, %s25_s26), 0  ;;  %s2684_s27 = smov (!%p26_p0, %s28_s27), %s1801_s24 }
   0x7   : > { %p309_p3 = pnand %p1646_p1, %p308_p2  ;;  %p30_p4 = scmp.ge.s32.totalorder %s2684_s27, 2 }
   0x9   : > { %s2686_s27 = smov (%p30_p4, %s2684_s27), 0  ;;  %312 = sbr.rel (%p309_p3) target bundleno = 369 (0x171), region = 44 }
  0x10   : > { %s1877_s28 = sshll.u32 %s1789_s21, 1  ;;  %p381_p5 = scmp.lt.s32.totalorder %s1793_s22, 1  ;;  %v1807_v0 = vmov 0   ;;  %vm1469_vm5 = vcmask 130048  }
  0x11   : > { %1718 = vset.pattern.permute.xlu1 %v1807_v0  ;;  %1717 = vset.pattern.permute.xlu0 %v1807_v0  ;;  %p383_p6 = scmp.lt.s32.totalorder %s1877_s28, 25  ;;  %s405_s8 = sadd.s32 2, %s1877_s28 }
  0x12   : > { %s2688_s22 = smov (!%p381_p5, %s1793_s22), 1  ;;  %p408_p7 = scmp.lt.s32.totalorder %s405_s8, 25 }
  0x13   : > { %s384_s29 = scalar_select %p383_p6, %s1877_s28, 25 }
  0x14   : > { %s1884_s30 = smul.u32 182, %s2688_s22  ;;  %s418_s14 = sadd.s32 3, %s1877_s28 }
  0x15   : > { %s1668_s7 = smul.u32 7, %s384_s29  ;;  %p421_p8 = scmp.lt.s32.totalorder %s418_s14, 25 }
  0x16   : > { %s2690_s8 = smov (!%p408_p7, %s405_s8), 25  ;;  %s392_s19 = sadd.s32 1, %s1877_s28 }
  0x17   : > { %s387_s9 = sadd.s32 %s1884_s30, %s1668_s7  ;;  %s2692_s14 = smov (!%p421_p8, %s418_s14), 25 }
  0x18   : > { %s1648_s10 = sshll.u32 %s387_s9, 3  ;;  %s1671_s15 = smul.u32 7, %s2690_s8 }
  0x19   : > { %s1891_s13 = scalar_lea.vmem %s2668_s0, %s1648_s10  ;;  %s1672_s16 = smul.u32 7, %s2692_s14 }
  0x1a   : > { %v442_v1 = vld [vmem:[%s1891_s13 + $0x10] sm:$0xff]  ;;  %v440_v2 = vld [vmem:[%s1891_s13] sm:$0xff]  ;;  %v443_v3 = vld [vmem:[%s1891_s13 + $0x18] sm:$0xff]  ;;  %s1901_s17 = sadd.s32 %s1671_s15, %s1884_s30  ;;  %p395_p9 = scmp.lt.s32.totalorder %s392_s19, 25 }
  0x1b   : > { %459 = vperm.xlu1 %1718, %v442_v1   ;;  %449 = vperm.xlu0 %1717, %v440_v2   ;;  %v441_v4 = vld [vmem:[%s1891_s13 + $0x8] sm:$0xff]  ;;  %v444_v6 = vld [vmem:[%s1891_s13 + $0x20] sm:$0xff]  ;;  %s1904_s18 = sadd.s32 %s1672_s16, %s1884_s30  ;;  %v489_v10 = vld [vmem:[%s1891_s13 + $0x11] sm:$0xff]  ;;  %p432_p10 = scmp.lt.s32.totalorder %s1789_s21, 11 }
  0x1c   : > { %v445_v5 = vld [vmem:[%s1891_s13 + $0x28] sm:$0xff]  ;;  %v490_v9 = vld [vmem:[%s1891_s13 + $0x19] sm:$0xff]  ;;  %s2694_s19 = smov (!%p395_p9, %s392_s19), 25 }
  0x1d   : > { %v488_v7 = vld [vmem:[%s1891_s13 + $0x9] sm:$0xff]  ;;  %v487_v8 = vld [vmem:[%s1891_s13 + $0x1] sm:$0xff]  ;;  %s1670_s20 = smul.u32 7, %s2694_s19  ;;  %v542_v16 = vld [vmem:[%s1891_s13 + $0x12] sm:$0xff]  ;;  %s2696_s21 = smov (!%p432_p10, %s1789_s21), 11 }
  0x1e   : > { %v492_v11 = vld [vmem:[%s1891_s13 + $0x29] sm:$0xff]  ;;  %v491_v12 = vld [vmem:[%s1891_s13 + $0x21] sm:$0xff] }
  0x1f   : > { %464 = vperm.xlu1 %1718, %v443_v3   ;;  %454 = vperm.xlu0 %1717, %v441_v4   ;;  %v541_v13 = vld [vmem:[%s1891_s13 + $0xa] sm:$0xff]  ;;  %v540_v14 = vld [vmem:[%s1891_s13 + $0x2] sm:$0xff]  ;;  %s399_s28 = sadd.s32 %s1670_s20, %s1884_s30  ;;  %v543_v15 = vld [vmem:[%s1891_s13 + $0x1a] sm:$0xff]  ;;  %s1652_s30 = sshll.u32 %s1901_s17, 3 }
  0x20   : > { %s1650_s29 = sshll.u32 %s399_s28, 3  ;;  %v545_v17 = vld [vmem:[%s1891_s13 + $0x2a] sm:$0xff]  ;;  %v544_v18 = vld [vmem:[%s1891_s13 + $0x22] sm:$0xff]  ;;  %s1947_s12 = scalar_lea.vmem %s2670_s2, %s1652_s30 }
  0x21   : > { %s1923_s9 = scalar_lea.vmem %s2669_s1, %s1650_s29  ;;  %v753_v37 = vld [vmem:[%s1947_s12 + $0x8] sm:$0xff]  ;;  %v752_v38 = vld [vmem:[%s1947_s12] sm:$0xff]  ;;  %v755_v39 = vld [vmem:[%s1947_s12 + $0x18] sm:$0xff]  ;;  %s1654_s13 = sshll.u32 %s1904_s18, 3 }
  0x22   : > { %v594_v19 = vld [vmem:[%s1923_s9 + $0x8] sm:$0xff]  ;;  %v593_v20 = vld [vmem:[%s1923_s9] sm:$0xff]  ;;  %v596_v21 = vld [vmem:[%s1923_s9 + $0x18] sm:$0xff]  ;;  %s1971_s16 = scalar_lea.vmem %s2671_s3, %s1654_s13  ;;  %s1674_s20 = smul.u32 72, %s2688_s22 }
  0x23   : > { %474 = vperm.xlu1 %1718, %v445_v5   ;;  %469 = vperm.xlu0 %1717, %v444_v6   ;;  %v595_v22 = vld [vmem:[%s1923_s9 + $0x10] sm:$0xff]  ;;  %v598_v23 = vld [vmem:[%s1923_s9 + $0x28] sm:$0xff]  ;;  %v597_v24 = vld [vmem:[%s1923_s9 + $0x20] sm:$0xff]  ;;  %s1673_s28 = smul.u32 6, %s2696_s21 }
  0x24   : > { %v647_v25 = vld [vmem:[%s1923_s9 + $0x9] sm:$0xff]  ;;  %v646_v26 = vld [vmem:[%s1923_s9 + $0x1] sm:$0xff]  ;;  %v649_v27 = vld [vmem:[%s1923_s9 + $0x19] sm:$0xff] }
  0x25   : > { %v648_v28 = vld [vmem:[%s1923_s9 + $0x11] sm:$0xff]  ;;  %v651_v29 = vld [vmem:[%s1923_s9 + $0x29] sm:$0xff]  ;;  %v650_v30 = vld [vmem:[%s1923_s9 + $0x21] sm:$0xff]  ;;  %s2570_s21 = sadd.s32 %s1674_s20, %s1673_s28 }
  0x26   : > { %v700_v31 = vld [vmem:[%s1923_s9 + $0xa] sm:$0xff]  ;;  %v699_v32 = vld [vmem:[%s1923_s9 + $0x2] sm:$0xff]  ;;  %v702_v33 = vld [vmem:[%s1923_s9 + $0x1a] sm:$0xff]  ;;  %s1655_s22 = sshll.u32 %s2570_s21, 3 }
  0x27   : > { %501 = vperm.xlu1 %1718, %v488_v7   ;;  %496 = vperm.xlu0 %1717, %v487_v8   ;;  %v701_v34 = vld [vmem:[%s1923_s9 + $0x12] sm:$0xff]  ;;  %v704_v35 = vld [vmem:[%s1923_s9 + $0x2a] sm:$0xff]  ;;  %v703_v36 = vld [vmem:[%s1923_s9 + $0x22] sm:$0xff]  ;;  %s2595_s8 = scalar_lea.vmem %s2674_s6, %s1655_s22 }
  0x28   : > { %v754_v40 = vld [vmem:[%s1947_s12 + $0x10] sm:$0xff]  ;;  %v757_v41 = vld [vmem:[%s1947_s12 + $0x28] sm:$0xff]  ;;  %v756_v42 = vld [vmem:[%s1947_s12 + $0x20] sm:$0xff] }
  0x29   : > { %v806_v43 = vld [vmem:[%s1947_s12 + $0x9] sm:$0xff]  ;;  %v805_v44 = vld [vmem:[%s1947_s12 + $0x1] sm:$0xff]  ;;  %v808_v45 = vld [vmem:[%s1947_s12 + $0x19] sm:$0xff] }
  0x2a   : > { %v807_v46 = vld [vmem:[%s1947_s12 + $0x11] sm:$0xff]  ;;  %v810_v47 = vld [vmem:[%s1947_s12 + $0x29] sm:$0xff]  ;;  %v809_v48 = vld [vmem:[%s1947_s12 + $0x21] sm:$0xff] }
  0x2b   : > { %511 = vperm.xlu1 %1718, %v490_v9   ;;  %506 = vperm.xlu0 %1717, %v489_v10   ;;  %v859_v49 = vld [vmem:[%s1947_s12 + $0xa] sm:$0xff]  ;;  %v858_v50 = vld [vmem:[%s1947_s12 + $0x2] sm:$0xff]  ;;  %v861_v51 = vld [vmem:[%s1947_s12 + $0x1a] sm:$0xff] }
  0x2c   : > { %v860_v52 = vld [vmem:[%s1947_s12 + $0x12] sm:$0xff]  ;;  %v863_v53 = vld [vmem:[%s1947_s12 + $0x2a] sm:$0xff]  ;;  %v862_v54 = vld [vmem:[%s1947_s12 + $0x22] sm:$0xff] }
  0x2d   : > { %v1152_v55 = vld [vmem:[%s1971_s16 + $0x8] sm:$0xff]  ;;  %v1151_v56 = vld [vmem:[%s1971_s16] sm:$0xff]  ;;  %v1154_v57 = vld [vmem:[%s1971_s16 + $0x18] sm:$0xff] }
  0x2e   : > { %v1153_v58 = vld [vmem:[%s1971_s16 + $0x10] sm:$0xff]  ;;  %v1156_v59 = vld [vmem:[%s1971_s16 + $0x28] sm:$0xff]  ;;  %v1155_v60 = vld [vmem:[%s1971_s16 + $0x20] sm:$0xff] }
  0x2f   : > { %521 = vperm.xlu1 %1718, %v492_v11   ;;  %516 = vperm.xlu0 %1717, %v491_v12   ;;  %v1200_v61 = vld [vmem:[%s1971_s16 + $0x9] sm:$0xff]  ;;  %v1199_v62 = vld [vmem:[%s1971_s16 + $0x1] sm:$0xff]  ;;  %v1202_v63 = vld [vmem:[%s1971_s16 + $0x19] sm:$0xff] }
  0x30   : > { %v1201_v0 = vld [vmem:[%s1971_s16 + $0x11] sm:$0xff]  ;;  %v1204_v1 = vld [vmem:[%s1971_s16 + $0x29] sm:$0xff]  ;;  %v1203_v2 = vld [vmem:[%s1971_s16 + $0x21] sm:$0xff] }
  0x31   : > { %v1248_v5 = vld [vmem:[%s1971_s16 + $0xa] sm:$0xff]  ;;  %v1247_v6 = vld [vmem:[%s1971_s16 + $0x2] sm:$0xff]  ;;  %v1250_v9 = vld [vmem:[%s1971_s16 + $0x1a] sm:$0xff] }
  0x32   : > { %v1249_v10 = vld [vmem:[%s1971_s16 + $0x12] sm:$0xff] }
  0x33   : > { %554 = vperm.xlu1 %1718, %v541_v13   ;;  %549 = vperm.xlu0 %1717, %v540_v14   ;;  %v1992_v13 = vld [vmem:[%s2672_s4] ss:$0 sm:$0xff]  ;;  %v1997_v14 = vld [vmem:[%s2672_s4 + $0x1] ss:$0 sm:$0xff] }
  0x37   : > { %564 = vperm.xlu1 %1718, %v543_v15   ;;  %559 = vperm.xlu0 %1717, %v542_v16   ;;  %v1252_v15 = vld [vmem:[%s1971_s16 + $0x2a] sm:$0xff]  ;;  %v1251_v16 = vld [vmem:[%s1971_s16 + $0x22] sm:$0xff] }
  0x3b   : > { %574 = vperm.xlu1 %1718, %v545_v17   ;;  %569 = vperm.xlu0 %1717, %v544_v18  }
  0x3f   : > { %607 = vperm.xlu1 %1718, %v594_v19   ;;  %602 = vperm.xlu0 %1717, %v593_v20  }
  0x43   : > { %617 = vperm.xlu1 %1718, %v596_v21   ;;  %612 = vperm.xlu0 %1717, %v595_v22  }
  0x47   : > { %627 = vperm.xlu1 %1718, %v598_v23   ;;  %622 = vperm.xlu0 %1717, %v597_v24  }
  0x4b   : > { %660 = vperm.xlu1 %1718, %v647_v25   ;;  %655 = vperm.xlu0 %1717, %v646_v26  }
  0x4f   : > { %670 = vperm.xlu1 %1718, %v649_v27   ;;  %665 = vperm.xlu0 %1717, %v648_v28  }
  0x53   : > { %680 = vperm.xlu1 %1718, %v651_v29   ;;  %675 = vperm.xlu0 %1717, %v650_v30  }
  0x57   : > { %713 = vperm.xlu1 %1718, %v700_v31   ;;  %708 = vperm.xlu0 %1717, %v699_v32  }
  0x5b   : > { %723 = vperm.xlu1 %1718, %v702_v33   ;;  %718 = vperm.xlu0 %1717, %v701_v34  }
  0x5f   : > { %733 = vperm.xlu1 %1718, %v704_v35   ;;  %728 = vperm.xlu0 %1717, %v703_v36  }
  0x63   : > { %766 = vperm.xlu1 %1718, %v753_v37   ;;  %761 = vperm.xlu0 %1717, %v752_v38  }
  0x67   : > { %776 = vperm.xlu1 %1718, %v755_v39   ;;  %771 = vperm.xlu0 %1717, %v754_v40   ;;  %v2016_v39 = vld [vmem:[%s2672_s4 + $0x2] ss:$0 sm:$0xff] }
  0x6b   : > { %786 = vperm.xlu1 %1718, %v757_v41   ;;  %781 = vperm.xlu0 %1717, %v756_v42  }
  0x6f   : > { %819 = vperm.xlu1 %1718, %v806_v43   ;;  %814 = vperm.xlu0 %1717, %v805_v44  }
  0x73   : > { %829 = vperm.xlu1 %1718, %v808_v45   ;;  %824 = vperm.xlu0 %1717, %v807_v46  }
  0x77   : > { %839 = vperm.xlu1 %1718, %v810_v47   ;;  %834 = vperm.xlu0 %1717, %v809_v48  }
  0x7b   : > { %872 = vperm.xlu1 %1718, %v859_v49   ;;  %867 = vperm.xlu0 %1717, %v858_v50  }
  0x7f   : > { %882 = vperm.xlu1 %1718, %v861_v51   ;;  %877 = vperm.xlu0 %1717, %v860_v52  }
  0x83   : > { %892 = vperm.xlu1 %1718, %v863_v53   ;;  %887 = vperm.xlu0 %1717, %v862_v54  }
  0x87   : > { %1164 = vperm.xlu1 %1718, %v1152_v55   ;;  %1159 = vperm.xlu0 %1717, %v1151_v56  }
  0x8b   : > { %1174 = vperm.xlu1 %1718, %v1154_v57   ;;  %1169 = vperm.xlu0 %1717, %v1153_v58   ;;  %v2027_v58 = vld [vmem:[%s2672_s4 + $0x3] ss:$0 sm:$0xff] }
  0x8f   : > { %1184 = vperm.xlu1 %1718, %v1156_v59   ;;  %1179 = vperm.xlu0 %1717, %v1155_v60  }
  0x93   : > { %1212 = vperm.xlu1 %1718, %v1200_v61   ;;  %1207 = vperm.xlu0 %1717, %v1199_v62  }
  0x97   : > { %1222 = vperm.xlu1 %1718, %v1202_v63   ;;  %1217 = vperm.xlu0 %1717, %v1201_v0  }
  0x9a   : > { %v460_v3 = vpop.permute.xlu1 %459  ;;  %v450_v4 = vpop.permute.xlu0 %449 }
  0x9b   : > { %1232 = vperm.xlu1 %1718, %v1204_v1   ;;  %1227 = vperm.xlu0 %1717, %v1203_v2   ;;  %v481_v17 = vmul.f32 %v1992_v13, %v450_v4  ;;  %v483_v27 = vmul.f32 %v1992_v13, %v460_v3 }
  0x9e   : > { %v465_v7 = vpop.permute.xlu1 %464  ;;  %v455_v8 = vpop.permute.xlu0 %454 }
  0x9f   : > { %1260 = vperm.xlu1 %1718, %v1248_v5   ;;  %1255 = vperm.xlu0 %1717, %v1247_v6   ;;  %v482_v20 = vmul.f32 %v1992_v13, %v455_v8  ;;  %v484_v28 = vmul.f32 %v1992_v13, %v465_v7 }
  0xa2   : > { %v475_v11 = vpop.permute.xlu1 %474  ;;  %v470_v12 = vpop.permute.xlu0 %469 }
  0xa3   : > { %1270 = vperm.xlu1 %1718, %v1250_v9   ;;  %1265 = vperm.xlu0 %1717, %v1249_v10   ;;  %v486_v35 = vmul.f32 %v1992_v13, %v475_v11  ;;  %v485_v36 = vmul.f32 %v1992_v13, %v470_v12 }
  0xa6   : > { %v502_v18 = vpop.permute.xlu1 %501  ;;  %v497_v19 = vpop.permute.xlu0 %496 }
  0xa7   : > { %v529_v21 = vmul.f32 %v1997_v14, %v502_v18  ;;  %v528_v22 = vmul.f32 %v1997_v14, %v497_v19  ;;  %1280 = vperm.xlu1 %1718, %v1252_v15   ;;  %1275 = vperm.xlu0 %1717, %v1251_v16   ;;  %v2038_v15 = vld [vmem:[%s2672_s4 + $0x4] ss:$0 sm:$0xff] }
  0xa9   : > { %v535_v23 = vadd.f32 %v529_v21, %v482_v20  ;;  %v534_v24 = vadd.f32 %v528_v22, %v481_v17 }
  0xaa   : > { %v512_v25 = vpop.permute.xlu1 %511  ;;  %v507_v26 = vpop.permute.xlu0 %506 }
  0xab   : > { %v531_v29 = vmul.f32 %v1997_v14, %v512_v25  ;;  %v530_v30 = vmul.f32 %v1997_v14, %v507_v26 }
  0xad   : > { %v537_v31 = vadd.f32 %v531_v29, %v484_v28  ;;  %v536_v32 = vadd.f32 %v530_v30, %v483_v27 }
  0xae   : > { %v522_v33 = vpop.permute.xlu1 %521  ;;  %v517_v34 = vpop.permute.xlu0 %516 }
  0xaf   : > { %v533_v37 = vmul.f32 %v1997_v14, %v522_v33  ;;  %v532_v38 = vmul.f32 %v1997_v14, %v517_v34 }
  0xb1   : > { %v539_v40 = vadd.f32 %v533_v37, %v486_v35  ;;  %v538_v41 = vadd.f32 %v532_v38, %v485_v36 }
  0xb2   : > { %v555_v42 = vpop.permute.xlu1 %554  ;;  %v550_v43 = vpop.permute.xlu0 %549 }
  0xb3   : > { %v582_v44 = vmul.f32 %v2016_v39, %v555_v42  ;;  %v581_v45 = vmul.f32 %v2016_v39, %v550_v43 }
  0xb5   : > { %v588_v46 = vadd.f32 %v582_v44, %v535_v23  ;;  %v587_v47 = vadd.f32 %v581_v45, %v534_v24 }
  0xb6   : > { %v565_v48 = vpop.permute.xlu1 %564  ;;  %v560_v49 = vpop.permute.xlu0 %559 }
  0xb7   : > { %v584_v50 = vmul.f32 %v2016_v39, %v565_v48  ;;  %v583_v51 = vmul.f32 %v2016_v39, %v560_v49 }
  0xb9   : > { %v590_v52 = vadd.f32 %v584_v50, %v537_v31  ;;  %v589_v53 = vadd.f32 %v583_v51, %v536_v32  ;;  %v2065_v51 = vld [vmem:[%s2672_s4 + $0x5] ss:$0 sm:$0xff] }
  0xba   : > { %v575_v54 = vpop.permute.xlu1 %574  ;;  %v570_v55 = vpop.permute.xlu0 %569 }
  0xbb   : > { %v586_v56 = vmul.f32 %v2016_v39, %v575_v54  ;;  %v585_v57 = vmul.f32 %v2016_v39, %v570_v55 }
  0xbd   : > { %v592_v59 = vadd.f32 %v586_v56, %v539_v40  ;;  %v591_v60 = vadd.f32 %v585_v57, %v538_v41 }
  0xbe   : > { %v608_v61 = vpop.permute.xlu1 %607  ;;  %v603_v62 = vpop.permute.xlu0 %602 }
  0xbf   : > { %v635_v63 = vmul.f32 %v2027_v58, %v608_v61  ;;  %v634_v0 = vmul.f32 %v2027_v58, %v603_v62  ;;  %v1086_v18 = vmul.f32 %v1992_v13, %v608_v61  ;;  %v1085_v19 = vmul.f32 %v1992_v13, %v603_v62 }
  0xc1   : > { %v641_v1 = vadd.f32 %v635_v63, %v588_v46  ;;  %v640_v2 = vadd.f32 %v634_v0, %v587_v47 }
  0xc2   : > { %v618_v3 = vpop.permute.xlu1 %617  ;;  %v613_v4 = vpop.permute.xlu0 %612 }
  0xc3   : > { %v637_v5 = vmul.f32 %v2027_v58, %v618_v3  ;;  %v636_v6 = vmul.f32 %v2027_v58, %v613_v4  ;;  %v1088_v30 = vmul.f32 %v1992_v13, %v618_v3  ;;  %v1087_v31 = vmul.f32 %v1992_v13, %v613_v4 }
  0xc5   : > { %v643_v7 = vadd.f32 %v637_v5, %v590_v52  ;;  %v642_v8 = vadd.f32 %v636_v6, %v589_v53 }
  0xc6   : > { %v628_v9 = vpop.permute.xlu1 %627  ;;  %v623_v10 = vpop.permute.xlu0 %622 }
  0xc7   : > { %v639_v11 = vmul.f32 %v2027_v58, %v628_v9  ;;  %v638_v12 = vmul.f32 %v2027_v58, %v623_v10  ;;  %v1090_v43 = vmul.f32 %v1992_v13, %v628_v9  ;;  %v1089_v44 = vmul.f32 %v1992_v13, %v623_v10 }
  0xc9   : > { %v645_v16 = vadd.f32 %v639_v11, %v592_v59  ;;  %v644_v17 = vadd.f32 %v638_v12, %v591_v60 }
  0xca   : > { %v661_v20 = vpop.permute.xlu1 %660  ;;  %v656_v21 = vpop.permute.xlu0 %655 }
  0xcb   : > { %v688_v22 = vmul.f32 %v2038_v15, %v661_v20  ;;  %v1092_v23 = vmul.f32 %v1997_v14, %v661_v20  ;;  %v687_v24 = vmul.f32 %v2038_v15, %v656_v21  ;;  %v1091_v25 = vmul.f32 %v1997_v14, %v656_v21 }
  0xcd   : > { %v694_v26 = vadd.f32 %v688_v22, %v641_v1  ;;  %v2046_v27 = vadd.f32 %v1092_v23, %v1086_v18  ;;  %v693_v28 = vadd.f32 %v687_v24, %v640_v2  ;;  %v2048_v29 = vadd.f32 %v1091_v25, %v1085_v19  ;;  %v2096_v22 = vld [vmem:[%s2672_s4 + $0x6] ss:$0 sm:$0xff] }
  0xce   : > { %v671_v32 = vpop.permute.xlu1 %670  ;;  %v666_v33 = vpop.permute.xlu0 %665 }
  0xcf   : > { %v690_v34 = vmul.f32 %v2038_v15, %v671_v32  ;;  %v1094_v35 = vmul.f32 %v1997_v14, %v671_v32  ;;  %v689_v36 = vmul.f32 %v2038_v15, %v666_v33  ;;  %v1093_v37 = vmul.f32 %v1997_v14, %v666_v33 }
  0xd1   : > { %v696_v38 = vadd.f32 %v690_v34, %v643_v7  ;;  %v1100_v40 = vadd.f32 %v1094_v35, %v1088_v30  ;;  %v695_v41 = vadd.f32 %v689_v36, %v642_v8  ;;  %v1099_v42 = vadd.f32 %v1093_v37, %v1087_v31 }
  0xd2   : > { %v681_v45 = vpop.permute.xlu1 %680  ;;  %v676_v46 = vpop.permute.xlu0 %675 }
  0xd3   : > { %v692_v47 = vmul.f32 %v2038_v15, %v681_v45  ;;  %v1096_v48 = vmul.f32 %v1997_v14, %v681_v45  ;;  %v691_v49 = vmul.f32 %v2038_v15, %v676_v46  ;;  %v1095_v50 = vmul.f32 %v1997_v14, %v676_v46 }
  0xd5   : > { %v698_v52 = vadd.f32 %v692_v47, %v645_v16  ;;  %v1102_v53 = vadd.f32 %v1096_v48, %v1090_v43  ;;  %v697_v54 = vadd.f32 %v691_v49, %v644_v17  ;;  %v1101_v55 = vadd.f32 %v1095_v50, %v1089_v44  ;;  %v2144_v49 = vld [vmem:[%s2672_s4 + $0x8] ss:$0 sm:$0xff] }
  0xd6   : > { %v2067_v13 = vpop.permute.xlu1 %713  ;;  %v2069_v56 = vpop.permute.xlu0 %708 }
  0xd7   : > { %v741_v57 = vmul.f32 %v2065_v51, %v2067_v13  ;;  %v740_v59 = vmul.f32 %v2065_v51, %v2069_v56 }
  0xd9   : > { %v747_v14 = vadd.f32 %v741_v57, %v694_v26  ;;  %v746_v60 = vadd.f32 %v740_v59, %v693_v28 }
  0xda   : > { %v724_v61 = vpop.permute.xlu1 %723  ;;  %v719_v62 = vpop.permute.xlu0 %718 }
  0xdb   : > { %v743_v63 = vmul.f32 %v2065_v51, %v724_v61  ;;  %v1106_v0 = vmul.f32 %v2016_v39, %v724_v61  ;;  %v742_v1 = vmul.f32 %v2065_v51, %v719_v62  ;;  %v1105_v2 = vmul.f32 %v2016_v39, %v719_v62 }
  0xdd   : > { %v749_v3 = vadd.f32 %v743_v63, %v696_v38  ;;  %v2079_v4 = vadd.f32 %v1106_v0, %v1100_v40  ;;  %v748_v5 = vadd.f32 %v742_v1, %v695_v41  ;;  %v2081_v6 = vadd.f32 %v1105_v2, %v1099_v42  ;;  %v2127_v42 = vld [vmem:[%s2672_s4 + $0x7] ss:$0 sm:$0xff] }
  0xde   : > { %v734_v7 = vpop.permute.xlu1 %733  ;;  %v729_v8 = vpop.permute.xlu0 %728 }
  0xdf   : > { %v745_v9 = vmul.f32 %v2065_v51, %v734_v7  ;;  %v1108_v10 = vmul.f32 %v2016_v39, %v734_v7  ;;  %v744_v11 = vmul.f32 %v2065_v51, %v729_v8  ;;  %v1107_v12 = vmul.f32 %v2016_v39, %v729_v8 }
  0xe1   : > { %v751_v16 = vadd.f32 %v745_v9, %v698_v52  ;;  %v1114_v17 = vadd.f32 %v1108_v10, %v1102_v53  ;;  %v750_v18 = vadd.f32 %v744_v11, %v697_v54  ;;  %v2087_v19 = vadd.f32 %v1107_v12, %v1101_v55 }
  0xe2   : > { %v2089_v20 = vpop.permute.xlu1 %766  ;;  %v2091_v21 = vpop.permute.xlu0 %761 }
  0xe3   : > { %v794_v43 = vmul.f32 %v2096_v22, %v2089_v20  ;;  %v793_v44 = vmul.f32 %v2096_v22, %v2091_v21 }
  0xe5   : > { %v800_v50 = vadd.f32 %v794_v43, %v747_v14  ;;  %v799_v52 = vadd.f32 %v793_v44, %v746_v60  ;;  %v2163_v60 = vld [vmem:[%s2673_s5] ss:$0 sm:$0xff] }
  0xe6   : > { %v2098_v23 = vpop.permute.xlu1 %776  ;;  %v2100_v24 = vpop.permute.xlu0 %771 }
  0xe7   : > { %v796_v25 = vmul.f32 %v2096_v22, %v2098_v23  ;;  %v795_v53 = vmul.f32 %v2096_v22, %v2100_v24 }
  0xe9   : > { %v802_v26 = vadd.f32 %v796_v25, %v749_v3  ;;  %v801_v2 = vadd.f32 %v795_v53, %v748_v5 }
  0xea   : > { %v787_v28 = vpop.permute.xlu1 %786  ;;  %v2104_v30 = vpop.permute.xlu0 %781 }
  0xeb   : > { %v798_v31 = vmul.f32 %v2096_v22, %v787_v28  ;;  %v1120_v32 = vmul.f32 %v2027_v58, %v787_v28  ;;  %v797_v33 = vmul.f32 %v2096_v22, %v2104_v30 }
  0xed   : > { %v2110_v34 = vadd.f32 %v798_v31, %v751_v16  ;;  %v2112_v35 = vadd.f32 %v1120_v32, %v1114_v17  ;;  %v2114_v36 = vadd.f32 %v797_v33, %v750_v18 }
  0xee   : > { %v2116_v37 = vpop.permute.xlu1 %819  ;;  %v2118_v38 = vpop.permute.xlu0 %814 }
  0xef   : > { %v847_v47 = vmul.f32 %v2127_v42, %v2116_v37  ;;  %v846_v48 = vmul.f32 %v2127_v42, %v2118_v38 }
  0xf1   : > { %v853_v57 = vadd.f32 %v847_v47, %v800_v50  ;;  %v852_v59 = vadd.f32 %v846_v48, %v799_v52 }
  0xf2   : > { %v2120_v40 = vpop.permute.xlu1 %829  ;;  %v2122_v41 = vpop.permute.xlu0 %824 }
  0xf3   : > { %v849_v63 = vmul.f32 %v2127_v42, %v2120_v40  ;;  %v848_v14 = vmul.f32 %v2127_v42, %v2122_v41 }
  0xf5   : > { %v855_v11 = vadd.f32 %v849_v63, %v802_v26  ;;  %v854_v12 = vadd.f32 %v848_v14, %v801_v2  ;;  %v1104_v63 = vmul.f32 %v2016_v39, %v2067_v13 }
  0xf6   : > { %v2133_v45 = vpop.permute.xlu1 %839  ;;  %v2135_v46 = vpop.permute.xlu0 %834 }
  0xf7   : > { %v851_v2 = vmul.f32 %v2127_v42, %v2133_v45 }
  0xfa   : > { %v2148_v54 = vpop.permute.xlu1 %872  ;;  %v2150_v55 = vpop.permute.xlu0 %867 }
  0xfb   : > { %v900_v61 = vmul.f32 %v2144_v49, %v2148_v54  ;;  %v899_v62 = vmul.f32 %v2144_v49, %v2150_v55 }
  0xfd   : > { %v906_v0 = vadd.f32 %v900_v61, %v853_v57  ;;  %v905_v1 = vadd.f32 %v899_v62, %v852_v59 }
  0xfe   : > { %v2165_v3 = vpop.permute.xlu1 %882  ;;  %v2167_v7 = vpop.permute.xlu0 %877 }
  0xff   : > { %v2170_v8 = vadd.f32 %v2163_v60, %v906_v0  ;;  %v2173_v9 = vadd.f32 %v2163_v60, %v905_v1  ;;  %v902_v10 = vmul.f32 %v2144_v49, %v2165_v3  ;;  %v901_v16 = vmul.f32 %v2144_v49, %v2167_v7 }
 0x101   : > { %v2180_v5 = vmul.f32 0.70710677, %v2170_v8  ;;  %v2183_v17 = vmul.f32 0.70710677, %v2173_v9  ;;  %v908_v18 = vadd.f32 %v902_v10, %v855_v11  ;;  %v907_v25 = vadd.f32 %v901_v16, %v854_v12 }
 0x102   : > { %v2185_v28 = vpop.permute.xlu1 %892  ;;  %v2187_v31 = vpop.permute.xlu0 %887  ;;  %v1103_v11 = vmul.f32 %v2016_v39, %v2069_v56  ;;  %v1116_v12 = vmul.f32 %v2027_v58, %v2089_v20  ;;  %v1110_v16 = vadd.f32 %v1104_v63, %v2046_v27  ;;  %v857_v39 = vadd.f32 %v851_v2, %v2110_v34 }
 0x103   : > { %v2190_v32 = vand.u32 2147483647, %v2180_v5  ;;  %v2193_v26 = vand.u32 2147483647, %v2183_v17  ;;  %v2196_v33 = vadd.f32 %v2163_v60, %v908_v18  ;;  %v2199_v43 = vadd.f32 %v2163_v60, %v907_v25 }
 0x104   : > { %v904_v13 = vmul.f32 %v2144_v49, %v2185_v28  ;;  %v1115_v18 = vmul.f32 %v2027_v58, %v2091_v21  ;;  %v1118_v25 = vmul.f32 %v2027_v58, %v2098_v23  ;;  %v850_v56 = vmul.f32 %v2127_v42, %v2135_v46 }
 0x105   : > { %v954_v44 = vmul.f32 0.3275911, %v2190_v32  ;;  %v953_v47 = vmul.f32 0.3275911, %v2193_v26  ;;  %v2204_v48 = vmul.f32 0.70710677, %v2196_v33  ;;  %v1122_v27 = vadd.f32 %v1116_v12, %v1110_v16 }
 0x106   : > { %v2207_v50 = vmul.f32 0.70710677, %v2199_v43  ;;  %v2209_v52 = vpop.permute.xlu1 %1164  ;;  %v2211_v53 = vpop.permute.xlu0 %1159  ;;  %v1117_v21 = vmul.f32 %v2027_v58, %v2100_v24  ;;  %v1119_v23 = vmul.f32 %v2027_v58, %v2104_v30  ;;  %v1128_v63 = vmul.f32 %v2038_v15, %v2116_v37 }
 0x107   : > { %v960_v57 = vadd.f32 1.0, %v954_v44  ;;  %v959_v59 = vadd.f32 1.0, %v953_v47  ;;  %v2214_v61 = vand.u32 2147483647, %v2204_v48  ;;  %v903_v34 = vmul.f32 %v2144_v49, %v2187_v31 }
 0x108   : > { %v2217_v62 = vand.u32 2147483647, %v2207_v50  ;;  %v1130_v58 = vmul.f32 %v2038_v15, %v2120_v40  ;;  %v1129_v30 = vmul.f32 %v2038_v15, %v2122_v41  ;;  %v856_v37 = vadd.f32 %v850_v56, %v2114_v36 }
 0x109   : > { %1719 = vrcp.f32 %v960_v57  ;;  %v956_v14 = vmul.f32 0.3275911, %v2214_v61  ;;  %v1125_v40 = vadd.f32 %v1119_v23, %v2087_v19  ;;  %v1032_v56 = vsub.f32 0.0, %v2190_v32 }
 0x10a   : > { %1721 = vrcp.f32 %v959_v59  ;;  %v2222_v0 = vpop.permute.xlu1 %1174  ;;  %v2224_v1 = vpop.permute.xlu0 %1169  ;;  %v955_v10 = vmul.f32 0.3275911, %v2217_v62  ;;  %v1109_v59 = vadd.f32 %v1103_v11, %v2048_v29  ;;  %v1127_v29 = vmul.f32 %v2038_v15, %v2118_v38 }
 0x10b   : > { %v962_v44 = vadd.f32 1.0, %v956_v14  ;;  %v910_v14 = vadd.f32 %v904_v13, %v857_v39  ;;  %v1132_v38 = vmul.f32 %v2038_v15, %v2133_v45  ;;  %v1131_v13 = vmul.f32 %v2038_v15, %v2135_v46 }
 0x10c   : > { %v961_v20 = vadd.f32 1.0, %v955_v10  ;;  %v1121_v2 = vadd.f32 %v1115_v18, %v1109_v59  ;;  %v1134_v18 = vadd.f32 %v1128_v63, %v1122_v27  ;;  %v909_v36 = vadd.f32 %v903_v34, %v856_v37 }
 0x10d   : > { %1723 = vrcp.f32 %v962_v44  ;;  %v2278_v41 = vadd.f32 %v2163_v60, %v910_v14  ;;  %v1140_v44 = vmul.f32 %v2065_v51, %v2148_v54  ;;  %v1139_v45 = vmul.f32 %v2065_v51, %v2150_v55 }
 0x10e   : > { %v2240_v47 = vpop.permute.xlu1 %1184  ;;  %v2242_v57 = vpop.permute.xlu0 %1179  ;;  %1725 = vrcp.f32 %v961_v20  ;;  %v1142_v20 = vmul.f32 %v2065_v51, %v2165_v3  ;;  %v2293_v59 = vadd.f32 %v1132_v38, %v2112_v35  ;;  %v2295_v54 = vadd.f32 %v1131_v13, %v1125_v40 }
 0x10f   : > { %2675 = vst [vmem:[#allocation2_spill] sm:$0xff] %v2242_v57  ;;  %v1124_v57 = vadd.f32 %v1118_v25, %v2079_v4  ;;  %v1123_v4 = vadd.f32 %v1117_v21, %v2081_v6  ;;  %v1133_v25 = vadd.f32 %v1127_v29, %v1121_v2  ;;  %vm936_vm0 = vcmp.ge.f32.partialorder %v2180_v5, 0.0 }
 0x110   : > { %vm935_vm1 = vcmp.ge.f32.partialorder %v2183_v17, 0.0  ;;  %v1031_v55 = vsub.f32 0.0, %v2193_v26  ;;  %v2304_v21 = vadd.f32 %v2163_v60, %v909_v36  ;;  %v1146_v23 = vadd.f32 %v1140_v44, %v1134_v18 }
 0x111   : > { %v1136_v46 = vadd.f32 %v1130_v58, %v1124_v57  ;;  %v1135_v19 = vadd.f32 %v1129_v30, %v1123_v4  ;;  %v2301_v57 = vmul.f32 0.70710677, %v2278_v41  ;;  %v1145_v63 = vadd.f32 %v1139_v45, %v1133_v25 }
 0x112   : > { %v1213_v10 = vpop.permute.xlu1 %1212  ;;  %v2259_v11 = vpop.permute.xlu0 %1207  ;;  %v1141_v35 = vmul.f32 %v2065_v51, %v2167_v7  ;;  %v2311_v34 = vmul.f32 0.5, %v2170_v8  ;;  %v1038_v2 = vmul.f32 %v1032_v56, %v2190_v32  ;;  %v2315_v29 = vmul.f32 0.5, %v2173_v9 }
 0x113   : > { %v2261_v24 = vpop.eup %1719  ;;  %v2317_v58 = vadd.f32 %v1142_v20, %v1136_v46  ;;  %v1808_v37 = vmov -1.0   ;;  %v1188_v9 = vmul.f32 %v2096_v22, %v2209_v52  ;;  %v1037_v13 = vmul.f32 %v1031_v55, %v2193_v26 }
 0x114   : > { %v2268_v12 = vpop.eup %1721  ;;  %v978_v16 = vmul.f32 1.0614054, %v2261_v24  ;;  %v2324_v4 = vsel %vm936_vm0, 1.0, %v1808_v37  ;;  %v2330_v8 = vsel %vm935_vm1, 1.0, %v1808_v37  ;;  %v2340_v5 = vmul.f32 0.5, %v2196_v33 }
 0x115   : > { %v977_v6 = vmul.f32 1.0614054, %v2268_v12  ;;  %v2346_v40 = vmul.f32 0.70710677, %v2304_v21  ;;  %vm938_vm2 = vcmp.ge.f32.partialorder %v2204_v48, 0.0  ;;  %v2351_v52 = vmul.f32 0.5, %v2199_v43 }
 0x116   : > { %v2285_v39 = vpop.permute.xlu1 %1222  ;;  %v2287_v15 = vpop.permute.xlu0 %1217  ;;  %v984_v27 = vadd.f32 -1.4531521, %v978_v16  ;;  %v2343_v16 = vand.u32 2147483647, %v2301_v57  ;;  %v1236_v18 = vmul.f32 %v2127_v42, %v1213_v10  ;;  %v1045_v36 = vmul.f32 1.442695, %v1038_v2 }
 0x117   : > { %v983_v3 = vadd.f32 -1.4531521, %v977_v6  ;;  %v2319_v30 = vpop.eup %1723  ;;  %v1034_v33 = vsub.f32 0.0, %v2214_v61  ;;  %vm937_vm3 = vcmp.ge.f32.partialorder %v2207_v50, 0.0  ;;  %v1194_v45 = vadd.f32 %v1188_v9, %v1146_v23 }
 0x118   : > { %v990_v7 = vmul.f32 %v2261_v24, %v984_v27  ;;  %v2336_v38 = vpop.eup %1725  ;;  %v980_v26 = vmul.f32 1.0614054, %v2319_v30  ;;  %v1187_v46 = vmul.f32 %v2096_v22, %v2211_v53  ;;  %v1043_v56 = vmul.f32 1.442695, %v1037_v13 }
 0x119   : > { %v989_v17 = vmul.f32 %v2268_v12, %v983_v3  ;;  %v979_v6 = vmul.f32 1.0614054, %v2336_v38  ;;  %v2360_v43 = vadd.f32 %v1141_v35, %v1135_v19  ;;  %v958_v10 = vmul.f32 0.3275911, %v2343_v16 }
 0x11a   : > { %v2308_v14 = vpop.permute.xlu1 %1232  ;;  %v2334_v32 = vpop.permute.xlu0 %1227  ;;  %v996_v44 = vadd.f32 1.4214138, %v990_v7  ;;  %v2364_v20 = vand.u32 2147483647, %v2346_v40  ;;  %v1242_v55 = vadd.f32 %v1236_v18, %v1194_v45  ;;  %v1235_v3 = vmul.f32 %v2127_v42, %v2259_v11 }
 0x11b   : > { %v995_v27 = vadd.f32 1.4214138, %v989_v17  ;;  %v2372_v53 = vsel %vm938_vm2, 1.0, %v1808_v37  ;;  %v986_v19 = vadd.f32 -1.4531521, %v980_v26  ;;  %v1040_v23 = vmul.f32 %v1034_v33, %v2214_v61 }
 0x11c   : > { %v1033_v35 = vsub.f32 0.0, %v2217_v62  ;;  %v1002_v9 = vmul.f32 %v2261_v24, %v996_v44  ;;  %v985_v13 = vadd.f32 -1.4531521, %v979_v6  ;;  %v1193_v17 = vadd.f32 %v1187_v46, %v1145_v63 }
 0x11d   : > { %v2380_v11 = vsel %vm937_vm3, 1.0, %v1808_v37  ;;  %v1144_v48 = vmul.f32 %v2065_v51, %v2185_v28  ;;  %v1001_v61 = vmul.f32 %v2268_v12, %v995_v27  ;;  %v957_v33 = vmul.f32 0.3275911, %v2364_v20 }
 0x11e   : > { %v1261_v25 = vpop.permute.xlu1 %1260  ;;  %v1256_v7 = vpop.permute.xlu0 %1255  ;;  %v1241_v45 = vadd.f32 %v1235_v3, %v1193_v17  ;;  %1727 = vpow2.f32 %v1045_v36  ;;  %v992_v63 = vmul.f32 %v2319_v30, %v986_v19  ;;  %v1049_v50 = vmul.f32 1.442695, %v1040_v23 }
 0x11f   : > { %v1284_v2 = vmul.f32 %v2144_v49, %v1261_v25  ;;  %v964_v25 = vadd.f32 1.0, %v958_v10  ;;  %v1283_v26 = vmul.f32 %v2144_v49, %v1256_v7  ;;  %v1039_v6 = vmul.f32 %v1033_v35, %v2217_v62 }
 0x120   : > { %v1008_v46 = vadd.f32 -0.28449672, %v1002_v9  ;;  %v991_v10 = vmul.f32 %v2336_v38, %v985_v13  ;;  %v1036_v28 = vsub.f32 0.0, %v2343_v16  ;;  %v1143_v27 = vmul.f32 %v2065_v51, %v2187_v31 }
 0x121   : > { %v1290_v18 = vadd.f32 %v1284_v2, %v1242_v55  ;;  %v1289_v55 = vadd.f32 %v1283_v26, %v1241_v45  ;;  %1729 = vrcp.f32 %v964_v25  ;;  %v1190_v3 = vmul.f32 %v2096_v22, %v2222_v0 }
 0x122   : > { %v1007_v2 = vadd.f32 -0.28449672, %v1001_v61  ;;  %1731 = vpow2.f32 %v1043_v56  ;;  %v1150_v62 = vadd.f32 %v1144_v48, %v2293_v59  ;;  %v963_v7 = vadd.f32 1.0, %v957_v33  ;;  %v1271_v19 = vpop.permute.xlu1 %1270 }
 0x123   : > { %v2388_v44 = vadd.f32 %v2163_v60, %v1290_v18  ;;  %v998_v23 = vadd.f32 1.4214138, %v992_v63  ;;  %1733 = vpow2.f32 %v1049_v50  ;;  %v1047_v35 = vmul.f32 1.442695, %v1039_v6 }
 0x124   : > { %v1238_v9 = vmul.f32 %v2127_v42, %v2285_v39  ;;  %v1014_v51 = vmul.f32 %v2261_v24, %v1008_v46  ;;  %v997_v31 = vadd.f32 1.4214138, %v991_v10  ;;  %v1042_v0 = vmul.f32 %v1036_v28, %v2343_v16 }
 0x125   : > { %v2399_v36 = vmul.f32 0.70710677, %v2388_v44  ;;  %v2407_v13 = vadd.f32 %v2163_v60, %v1289_v55  ;;  %v1149_v56 = vadd.f32 %v1143_v27, %v2295_v54  ;;  %v1196_v59 = vadd.f32 %v1190_v3, %v2317_v58  ;;  %v2676_v55 = vld [vmem:[#allocation2_spill] sm:$0xff]  ;;  %v1266_v3 = vpop.permute.xlu0 %1265 }
 0x126   : > { %v1286_v18 = vmul.f32 %v2144_v49, %v1271_v19  ;;  %v1013_v25 = vmul.f32 %v2268_v12, %v1007_v2  ;;  %1735 = vrcp.f32 %v963_v7  ;;  %v1035_v39 = vsub.f32 0.0, %v2364_v20  ;;  %v1281_v2 = vpop.permute.xlu1 %1280 }
 0x127   : > { %v2412_v17 = vand.u32 2147483647, %v2399_v36  ;;  %v1189_v16 = vmul.f32 %v2096_v22, %v2224_v1  ;;  %v1004_v48 = vmul.f32 %v2319_v30, %v998_v23  ;;  %v1192_v54 = vmul.f32 %v2096_v22, %v2240_v47 }
 0x128   : > { %v1244_v26 = vadd.f32 %v1238_v9, %v1196_v59  ;;  %v1020_v61 = vadd.f32 0.2548296, %v1014_v51  ;;  %v1003_v33 = vmul.f32 %v2336_v38, %v997_v31  ;;  %v1053_v45 = vmul.f32 1.442695, %v1042_v0  ;;  %v1728_v50 = vpop.eup %1727 }
 0x129   : > { %v1332_v58 = vmul.f32 0.3275911, %v2412_v17  ;;  %v2425_v63 = vmul.f32 0.70710677, %v2407_v13  ;;  %1737 = vpow2.f32 %v1047_v35  ;;  %v1237_v1 = vmul.f32 %v2127_v42, %v2287_v15 }
 0x12a   : > { %v1292_v46 = vadd.f32 %v1286_v18, %v1244_v26  ;;  %v1019_v10 = vadd.f32 0.2548296, %v1013_v25  ;;  %v1041_v47 = vmul.f32 %v1035_v39, %v2364_v20  ;;  %v1195_v28 = vadd.f32 %v1189_v16, %v2360_v43 }
 0x12b   : > { %v1338_v6 = vadd.f32 1.0, %v1332_v58  ;;  %v1191_v27 = vmul.f32 %v2096_v22, %v2676_v55  ;;  %v2433_v7 = vpop.eup %1729  ;;  %v1010_v19 = vadd.f32 -0.28449672, %v1004_v48  ;;  %v1198_v23 = vadd.f32 %v1192_v54, %v1150_v62 }
 0x12c   : > { %v1240_v35 = vmul.f32 %v2127_v42, %v2308_v14  ;;  %v1732_v15 = vpop.eup %1731  ;;  %v1026_v9 = vmul.f32 %v2261_v24, %v1020_v61  ;;  %v1009_v51 = vadd.f32 -0.28449672, %v1003_v33  ;;  %v2439_v43 = vand.u32 2147483647, %v2425_v63 }
 0x12d   : > { %1739 = vrcp.f32 %v1338_v6  ;;  %v1734_v20 = vpop.eup %1733  ;;  %v1243_v22 = vadd.f32 %v1237_v1, %v1195_v28  ;;  %v2442_v31 = vadd.f32 %v2163_v60, %v1292_v46  ;;  %v1285_v0 = vmul.f32 %v2144_v49, %v1266_v3 }
 0x12e   : > { %1741 = vpow2.f32 %v1053_v45  ;;  %v1288_v62 = vmul.f32 %v2144_v49, %v1281_v2  ;;  %v1025_v14 = vmul.f32 %v2268_v12, %v1019_v10  ;;  %v982_v59 = vmul.f32 1.0614054, %v2433_v7 }
 0x12f   : > { %v1051_v18 = vmul.f32 1.442695, %v1041_v47  ;;  %v1331_v24 = vmul.f32 0.3275911, %v2439_v43  ;;  %v1016_v25 = vmul.f32 %v2319_v30, %v1010_v19  ;;  %v1246_v39 = vadd.f32 %v1240_v35, %v1198_v23 }
 0x130   : > { %v2451_v16 = vmul.f32 0.70710677, %v2442_v31  ;;  %v1291_v48 = vadd.f32 %v1285_v0, %v1243_v22  ;;  %v2453_v54 = vpop.eup %1735  ;;  %v1056_v26 = vmul.f32 %v1728_v50, %v1026_v9  ;;  %v1015_v58 = vmul.f32 %v2336_v38, %v1009_v51  ;;  %v1276_v50 = vpop.permute.xlu0 %1275 }
 0x131   : > { %v1239_v12 = vmul.f32 %v2127_v42, %v2334_v32  ;;  %v1337_v61 = vadd.f32 1.0, %v1331_v24  ;;  %v1410_v33 = vsub.f32 0.0, %v2412_v17  ;;  %v1294_v6 = vadd.f32 %v1288_v62, %v1246_v39 }
 0x132   : > { %v2460_v45 = vand.u32 2147483647, %v2451_v16  ;;  %v2463_v1 = vadd.f32 %v2163_v60, %v1291_v48  ;;  %v1055_v46 = vmul.f32 %v1732_v15, %v1025_v14  ;;  %v988_v10 = vadd.f32 -1.4531521, %v982_v59 }
 0x133   : > { %v1197_v47 = vadd.f32 %v1191_v27, %v1149_v56  ;;  %1743 = vrcp.f32 %v1337_v61  ;;  %v1738_v28 = vpop.eup %1737  ;;  %v1022_v55 = vadd.f32 0.2548296, %v1016_v25  ;;  %v981_v3 = vmul.f32 1.0614054, %v2453_v54 }
 0x134   : > { %1745 = vpow2.f32 %v1051_v18  ;;  %v1334_v42 = vmul.f32 0.3275911, %v2460_v45  ;;  %v1062_v32 = vsub.f32 1.0, %v1056_v26  ;;  %v1021_v2 = vadd.f32 0.2548296, %v1015_v58 }
 0x135   : > { %v1245_v19 = vadd.f32 %v1239_v12, %v1197_v47  ;;  %v2468_v23 = vmul.f32 0.70710677, %v2463_v1  ;;  %v1416_v15 = vmul.f32 %v1410_v33, %v2412_v17  ;;  %v2474_v27 = vadd.f32 %v2163_v60, %v1294_v6 }
 0x136   : > { %v1340_v56 = vadd.f32 1.0, %v1334_v42  ;;  %v1287_v9 = vmul.f32 %v2144_v49, %v1276_v50  ;;  %v1061_v22 = vsub.f32 1.0, %v1055_v46  ;;  %v994_v0 = vmul.f32 %v2433_v7, %v988_v10 }
 0x137   : > { %v2470_v35 = vpop.eup %1739  ;;  %v2482_v14 = vand.u32 2147483647, %v2468_v23  ;;  %v1028_v59 = vmul.f32 %v2319_v30, %v1022_v55  ;;  %v987_v18 = vadd.f32 -1.4531521, %v981_v3  ;;  %v2486_v17 = vmul.f32 0.5, %v2388_v44 }
 0x138   : > { %v2477_v51 = vpop.eup %1741  ;;  %v1356_v62 = vmul.f32 1.0614054, %v2470_v35  ;;  %1747 = vrcp.f32 %v1340_v56  ;;  %v1068_v24 = vmul.f32 %v1062_v32, %v2324_v4  ;;  %v1409_v25 = vsub.f32 0.0, %v2439_v43 }
 0x139   : > { %v1333_v39 = vmul.f32 0.3275911, %v2482_v14  ;;  %v1027_v48 = vmul.f32 %v2336_v38, %v1021_v2  ;;  %v1423_v26 = vmul.f32 1.442695, %v1416_v15  ;;  %v2493_v58 = vmul.f32 0.70710677, %v2474_v27 }
 0x13a   : > { %v1362_v49 = vadd.f32 -1.4531521, %v1356_v62  ;;  %v1293_v12 = vadd.f32 %v1287_v9, %v1245_v19  ;;  %v1067_v30 = vmul.f32 %v1061_v22, %v2330_v8  ;;  %v1000_v61 = vadd.f32 1.4214138, %v994_v0 }
 0x13b   : > { %v1339_v33 = vadd.f32 1.0, %v1333_v39  ;;  %v2497_v6 = vmul.f32 %v1734_v20, %v1028_v59  ;;  %v993_v4 = vmul.f32 %v2453_v54, %v987_v18  ;;  %v2501_v46 = vand.u32 2147483647, %v2493_v58 }
 0x13c   : > { %v1368_v44 = vmul.f32 %v2470_v35, %v1362_v49  ;;  %v2504_v38 = vadd.f32 %v2163_v60, %v1293_v12  ;;  %vm1314_vm4 = vcmp.ge.f32.partialorder %v2399_v36, 0.0  ;;  %v1415_v47 = vmul.f32 %v1409_v25, %v2439_v43 }
 0x13d   : > { %v2506_v10 = vpop.eup %1743  ;;  %1749 = vrcp.f32 %v1339_v33  ;;  %v1412_v55 = vsub.f32 0.0, %v2460_v45  ;;  %v1336_v3 = vmul.f32 0.3275911, %v2501_v46  ;;  %v1074_v42 = vadd.f32 1.0, %v1068_v24 }
 0x13e   : > { %v1374_v8 = vadd.f32 1.4214138, %v1368_v44  ;;  %v2510_v50 = vpop.eup %1745  ;;  %1751 = vpow2.f32 %v1423_v26  ;;  %v1355_v20 = vmul.f32 1.0614054, %v2506_v10  ;;  %v1006_v60 = vmul.f32 %v2433_v7, %v1000_v61 }
 0x13f   : > { %v2519_v43 = vmul.f32 0.70710677, %v2504_v38  ;;  %v1073_v32 = vadd.f32 1.0, %v1067_v30  ;;  %v1320_v2 = vsel %vm1314_vm4, 1.0, %v1808_v37  ;;  %v1342_v15 = vadd.f32 1.0, %v1336_v3 }
 0x140   : > { %v1380_v36 = vmul.f32 %v2470_v35, %v1374_v8  ;;  %v1361_v19 = vadd.f32 -1.4531521, %v1355_v20  ;;  %v2522_v56 = vmul.f32 %v1738_v28, %v1027_v48  ;;  %v1421_v22 = vmul.f32 1.442695, %v1415_v47 }
 0x141   : > { %v2525_v0 = vand.u32 2147483647, %v2519_v43  ;;  %v999_v59 = vadd.f32 1.4214138, %v993_v4  ;;  %v1418_v24 = vmul.f32 %v1412_v55, %v2460_v45  ;;  %1753 = vrcp.f32 %v1342_v15 }
 0x142   : > { %v1386_v9 = vadd.f32 -0.28449672, %v1380_v36  ;;  %v2527_v62 = vpop.eup %1747  ;;  %v1367_v18 = vmul.f32 %v2506_v10, %v1361_v19  ;;  %v1411_v25 = vsub.f32 0.0, %v2482_v14  ;;  %v2541_v48 = vmul.f32 %v1074_v42, %v2311_v34 }
 0x143   : > { %v1358_v49 = vmul.f32 1.0614054, %v2527_v62  ;;  %v1335_v39 = vmul.f32 0.3275911, %v2525_v0  ;;  %v1064_v26 = vsub.f32 1.0, %v2497_v6  ;;  %1755 = vpow2.f32 %v1421_v22 }
 0x144   : > { %v1392_v28 = vmul.f32 %v2470_v35, %v1386_v9  ;;  %v1012_v45 = vadd.f32 -0.28449672, %v1006_v60  ;;  %v1373_v12 = vadd.f32 1.4214138, %v1367_v18  ;;  %v1063_v33 = vsub.f32 1.0, %v2522_v56 }
 0x145   : > { %v1364_v61 = vadd.f32 -1.4531521, %v1358_v49  ;;  %v1341_v44 = vadd.f32 1.0, %v1335_v39  ;;  %v1005_v4 = vmul.f32 %v2453_v54, %v999_v59  ;;  %v1427_v47 = vmul.f32 1.442695, %v1418_v24 }
 0x146   : > { %v1398_v30 = vadd.f32 0.2548296, %v1392_v28  ;;  %v1379_v8 = vmul.f32 %v2506_v10, %v1373_v12  ;;  %v1417_v55 = vmul.f32 %v1411_v25, %v2482_v14  ;;  %v2555_v42 = vmul.f32 0.5, %v2407_v13 }
 0x147   : > { %v2548_v20 = vpop.eup %1749  ;;  %v1370_v6 = vmul.f32 %v2527_v62, %v1364_v61  ;;  %1757 = vrcp.f32 %v1341_v44  ;;  %v1414_v19 = vsub.f32 0.0, %v2501_v46  ;;  %v2560_v15 = vmul.f32 %v1073_v32, %v2315_v29 }
 0x148   : > { %v1404_v34 = vmul.f32 %v2470_v35, %v1398_v30  ;;  %v1752_v3 = vpop.eup %1751  ;;  %v1385_v60 = vadd.f32 -0.28449672, %v1379_v8  ;;  %v1357_v36 = vmul.f32 1.0614054, %v2548_v20  ;;  %v1018_v9 = vmul.f32 %v2433_v7, %v1012_v45 }
 0x149   : > { %v1376_v22 = vadd.f32 1.4214138, %v1370_v6  ;;  %v1011_v59 = vadd.f32 -0.28449672, %v1005_v4  ;;  %1759 = vpow2.f32 %v1427_v47  ;;  %v2565_v13 = vmul.f32 %v1064_v26, %v2372_v53 }
 0x14a   : > { %v1434_v35 = vmul.f32 %v1752_v3, %v1404_v34  ;;  %v1391_v14 = vmul.f32 %v2506_v10, %v1385_v60  ;;  %v1363_v18 = vadd.f32 -1.4531521, %v1357_v36  ;;  %v1425_v49 = vmul.f32 1.442695, %v1417_v55 }
 0x14b   : > { %v1382_v28 = vmul.f32 %v2527_v62, %v1376_v22  ;;  %v2568_v25 = vpop.eup %1753  ;;  %vm1313_vm6 = vcmp.ge.f32.partialorder %v2425_v63, 0.0  ;;  %v1420_v39 = vmul.f32 %v1414_v19, %v2501_v46  ;;  %v1413_v26 = vsub.f32 0.0, %v2525_v0 }
 0x14c   : > { %v1440_v24 = vsub.f32 1.0, %v1434_v35  ;;  %v1397_v29 = vadd.f32 0.2548296, %v1391_v14  ;;  %v1369_v32 = vmul.f32 %v2548_v20, %v1363_v18  ;;  %v1360_v53 = vmul.f32 1.0614054, %v2568_v25 }
 0x14d   : > { %v1388_v12 = vadd.f32 -0.28449672, %v1382_v28  ;;  %v1024_v30 = vadd.f32 0.2548296, %v1018_v9  ;;  %v1017_v61 = vmul.f32 %v2453_v54, %v1011_v59  ;;  %v1756_v8 = vpop.eup %1755  ;;  %1761 = vpow2.f32 %v1425_v49 }
 0x14e   : > { %v1446_v45 = vmul.f32 %v1440_v24, %v1320_v2  ;;  %v1403_v44 = vmul.f32 %v2506_v10, %v1397_v29  ;;  %v1375_v4 = vadd.f32 1.4214138, %v1369_v32  ;;  %v1366_v6 = vadd.f32 -1.4531521, %v1360_v53 }
 0x14f   : > { %v1394_v34 = vmul.f32 %v2527_v62, %v1388_v12  ;;  %v1319_v46 = vsel %vm1313_vm6, 1.0, %v1808_v37  ;;  %v1431_v3 = vmul.f32 1.442695, %v1420_v39  ;;  %vm940_vm7 = vcmp.ge.f32.partialorder %v2301_v57, 0.0 }
 0x150   : > { %v1452_v47 = vadd.f32 1.0, %v1446_v45  ;;  %v1433_v2 = vmul.f32 %v1756_v8, %v1403_v44  ;;  %v1381_v55 = vmul.f32 %v2548_v20, %v1375_v4  ;;  %v1372_v19 = vmul.f32 %v2568_v25, %v1366_v6 }
 0x151   : > { %v2585_v60 = vpop.eup %1757  ;;  %v1400_v36 = vadd.f32 0.2548296, %v1394_v34  ;;  %v1419_v9 = vmul.f32 %v1413_v26, %v2525_v0  ;;  %v1030_v35 = vmul.f32 %v2433_v7, %v1024_v30  ;;  %v1023_v14 = vadd.f32 0.2548296, %v1017_v61 }
 0x152   : > { %v1458_v10 = vmul.f32 %v1452_v47, %v2486_v17  ;;  %v1439_v63 = vsub.f32 1.0, %v1433_v2  ;;  %v1387_v22 = vadd.f32 -0.28449672, %v1381_v55  ;;  %v1359_v59 = vmul.f32 1.0614054, %v2585_v60 }
 0x153   : > { %v1406_v18 = vmul.f32 %v2527_v62, %v1400_v36  ;;  %v1378_v24 = vadd.f32 1.4214138, %v1372_v19  ;;  %v1760_v28 = vpop.eup %1759  ;;  %1763 = vpow2.f32 %v1431_v3  ;;  %vm1316_vm8 = vcmp.ge.f32.partialorder %v2451_v16, 0.0 }
 0x154   : > { %v1464_v17 = vmax.f32 %v2541_v48, %v1458_v10  ;;  %v1445_v0 = vmul.f32 %v1439_v63, %v1319_v46  ;;  %v1393_v7 = vmul.f32 %v2548_v20, %v1387_v22  ;;  %v1365_v49 = vadd.f32 -1.4531521, %v1359_v59 }
 0x155   : > { %v1436_v29 = vmul.f32 %v1760_v28, %v1406_v18  ;;  %v1384_v32 = vmul.f32 %v2568_v25, %v1378_v24  ;;  %v1429_v39 = vmul.f32 1.442695, %v1419_v9  ;;  %v1069_v48 = vmul.f32 %v1063_v33, %v2380_v11 }
 0x156   : > { %1471 = vst.msk [vmem:[%s2595_s8 + $0x8] sm:$0xff] %vm1469_vm5, %v1464_v17  ;;  %v1451_v62 = vadd.f32 1.0, %v1445_v0  ;;  %v1399_v45 = vadd.f32 0.2548296, %v1393_v7  ;;  %v1371_v12 = vmul.f32 %v2585_v60, %v1365_v49  ;;  %v1060_v53 = vmul.f32 %v2477_v51, %v1030_v35 }
 0x157   : > { %v1029_v26 = vmul.f32 %v2453_v54, %v1023_v14  ;;  %v1442_v30 = vsub.f32 1.0, %v1436_v29  ;;  %v1390_v61 = vadd.f32 -0.28449672, %v1384_v32  ;;  %v1322_v44 = vsel %vm1316_vm8, 1.0, %v1808_v37  ;;  %v1762_v56 = vpop.eup %1761 }
 0x158   : > { %v1457_v16 = vmul.f32 %v1451_v62, %v2555_v42  ;;  %v1405_v4 = vmul.f32 %v2548_v20, %v1399_v45  ;;  %v1377_v8 = vadd.f32 1.4214138, %v1371_v12  ;;  %v1076_v11 = vadd.f32 1.0, %v2565_v13 }
 0x159   : > { %v1448_v33 = vmul.f32 %v1442_v30, %v1322_v44  ;;  %v1396_v47 = vmul.f32 %v2568_v25, %v1390_v61  ;;  %1765 = vpow2.f32 %v1429_v39  ;;  %vm1315_vm9 = vcmp.ge.f32.partialorder %v2468_v23, 0.0 }
 0x15a   : > { %v1463_v51 = vmax.f32 %v2560_v15, %v1457_v16  ;;  %v1435_v54 = vmul.f32 %v1762_v56, %v1405_v4  ;;  %v1383_v42 = vmul.f32 %v2585_v60, %v1377_v8  ;;  %v1066_v34 = vsub.f32 1.0, %v1060_v53 }
 0x15b   : > { %v1304_v6 = vmul.f32 0.5, %v2442_v31  ;;  %v1454_v20 = vadd.f32 1.0, %v1448_v33  ;;  %v1402_v46 = vadd.f32 0.2548296, %v1396_v47  ;;  %v946_v13 = vsel %vm940_vm7, 1.0, %v1808_v37 }
 0x15c   : > { %v1059_v2 = vmul.f32 %v2510_v50, %v1029_v26  ;;  %1470 = vst.msk [vmem:[%s2595_s8] sm:$0xff] %vm1469_vm5, %v1463_v51  ;;  %v1441_v55 = vsub.f32 1.0, %v1435_v54  ;;  %v1389_v15 = vadd.f32 -0.28449672, %v1383_v42  ;;  %v1082_v23 = vmul.f32 %v1076_v11, %v2340_v5 }
 0x15d   : > { %v1460_v3 = vmul.f32 %v1454_v20, %v1304_v6  ;;  %v1321_v10 = vsel %vm1315_vm9, 1.0, %v1808_v37  ;;  %v1408_v31 = vmul.f32 %v2568_v25, %v1402_v46  ;;  %v1764_v36 = vpop.eup %1763  ;;  %v1075_v19 = vadd.f32 1.0, %v1069_v48 }
 0x15e   : > { %vm939_vm10 = vcmp.ge.f32.partialorder %v2346_v40, 0.0  ;;  %v1447_v57 = vmul.f32 %v1441_v55, %v1321_v10  ;;  %v1395_v9 = vmul.f32 %v2585_v60, %v1389_v15  ;;  %v1072_v50 = vmul.f32 %v1066_v34, %v946_v13 }
 0x15f   : > { %v1466_v35 = vmax.f32 %v1082_v23, %v1460_v3  ;;  %vm1318_vm11 = vcmp.ge.f32.partialorder %v2493_v58, 0.0  ;;  %v1438_v63 = vmul.f32 %v1764_v36, %v1408_v31  ;;  %v1065_v22 = vsub.f32 1.0, %v1059_v2 }
 0x160   : > { %v1303_v5 = vmul.f32 0.5, %v2463_v1  ;;  %v1453_v59 = vadd.f32 1.0, %v1447_v57  ;;  %v1401_v14 = vadd.f32 0.2548296, %v1395_v9  ;;  %v1081_v17 = vmul.f32 %v1075_v19, %v2351_v52 }
 0x161   : > { %1473 = vst.msk [vmem:[%s2595_s8 + $0x18] sm:$0xff] %vm1469_vm5, %v1466_v35  ;;  %v1444_v25 = vsub.f32 1.0, %v1438_v63  ;;  %v1324_v24 = vsel %vm1318_vm11, 1.0, %v1808_v37  ;;  %v1078_v7 = vadd.f32 1.0, %v1072_v50  ;;  %v945_v58 = vsel %vm939_vm10, 1.0, %v1808_v37 }
 0x162   : > { %v1459_v18 = vmul.f32 %v1453_v59, %v1303_v5  ;;  %v1407_v28 = vmul.f32 %v2585_v60, %v1401_v14  ;;  %v1071_v49 = vmul.f32 %v1065_v22, %v945_v58  ;;  %vm1317_vm12 = vcmp.ge.f32.partialorder %v2519_v43, 0.0 }
 0x163   : > { %v1766_v0 = vpop.eup %1765  ;;  %v1450_v1 = vmul.f32 %v1444_v25, %v1324_v24  ;;  %v928_v52 = vmul.f32 0.5, %v2278_v41  ;;  %v1306_v39 = vmul.f32 0.5, %v2474_v27  ;;  %v1323_v40 = vsel %vm1317_vm12, 1.0, %v1808_v37 }
 0x164   : > { %v1465_v29 = vmax.f32 %v1081_v17, %v1459_v18  ;;  %v1437_v32 = vmul.f32 %v1766_v0, %v1407_v28  ;;  %v1077_v12 = vadd.f32 1.0, %v1071_v49  ;;  %v927_v43 = vmul.f32 0.5, %v2304_v21 }
 0x165   : > { %v1456_v48 = vadd.f32 1.0, %v1450_v1  ;;  %v1084_v62 = vmul.f32 %v1078_v7, %v928_v52  ;;  %v1305_v30 = vmul.f32 0.5, %v2504_v38 }
 0x166   : > { %1472 = vst.msk [vmem:[%s2595_s8 + $0x10] sm:$0xff] %vm1469_vm5, %v1465_v29  ;;  %v1443_v60 = vsub.f32 1.0, %v1437_v32  ;;  %v1083_v41 = vmul.f32 %v1077_v12, %v927_v43 }
 0x167   : > { %v1462_v45 = vmul.f32 %v1456_v48, %v1306_v39 }
 0x168   : > { %v1449_v53 = vmul.f32 %v1443_v60, %v1323_v40 }
 0x169   : > { %v1468_v26 = vmax.f32 %v1084_v62, %v1462_v45 }
 0x16a   : > { %v1455_v61 = vadd.f32 1.0, %v1449_v53 }
 0x16b   : > { %1475 = vst.msk [vmem:[%s2595_s8 + $0x28] sm:$0xff] %vm1469_vm5, %v1468_v26 }
 0x16c   : > { %v1461_v27 = vmul.f32 %v1455_v61, %v1305_v30 }
 0x16e   : > { %v1467_v16 = vmax.f32 %v1083_v41, %v1461_v27 }
 0x170   : > { %1474 = vst.msk [vmem:[%s2595_s8 + $0x20] sm:$0xff] %vm1469_vm5, %v1467_v16 }
 0x171 PF: > { %s16_s25 = sadd.s32 1, %s1805_s25   ;;  %s2677_s21 = smov %s1797_s23 }
 0x172   : > { %p13_p11 = scmp.ge.s32.totalorder %s16_s25, 26   ;;  %s2678_s22 = smov %s1801_s24 }
 0x173   : > { %s2679_s23 = smov %s2682_s26  ;;  %s2680_s24 = smov %s2686_s27 }
 0x174   :  { %15 = sbr.rel (!%p13_p11) target bundleno = 3 (0x3), region = 83 }

// kernel: forward.13
= control target key start
LH: loop header
LB: loop body
LE: loop exit
PB: predicated region body
PF: predicated region fallthrough
CT: control target
= control target key end

     0   :  { %s3035_s21 = smov 0   ;;  %s3037_s22 = smov 0   ;;  %s3583_s0 = inlined_call_operand.vmem [shape: f32[2,14,26,16], index: 0, kind: input, shape index: {}, may-alias: {0,1,2,3}]   ;;  %s3584_s1 = inlined_call_operand.vmem [shape: f32[2,14,26,16], index: 1, kind: input, shape index: {}, may-alias: {0,1,2,3}]   ;;  %s3585_s2 = inlined_call_operand.vmem [shape: f32[2,14,26,16], index: 2, kind: input, shape index: {}, may-alias: {0,1,2,3}]   ;;  %s3586_s3 = inlined_call_operand.vmem [shape: f32[2,14,26,16], index: 3, kind: input, shape index: {}, may-alias: {0,1,2,3}]   ;;  %s3587_s4 = inlined_call_operand.vmem [shape: f32[144,32], index: 4, kind: input, shape index: {}]   ;;  %s3588_s5 = inlined_call_operand.vmem [shape: f32[1,32], index: 5, kind: input, shape index: {}]   ;;  %s3589_s6 = inlined_call_operand.vmem [shape: f32[2,6,24,32], index: 6, kind: output, shape index: {}]  }
   0x1   :  { %s3039_s23 = smov 0   ;;  %s3041_s24 = smov 0  }
   0x2   :  { %s3043_s25 = smov 0  }
   0x3 LB: > { %s25_s26 = sadd.s32 1, %s2986_s23  ;;  %s28_s27 = sadd.s32 1, %s2990_s24  ;;  %s2994_s25 = sphi %s3043_s25, %s16_s25   ;;  %s2990_s24 = sphi %s3041_s24, %s3594_s24   ;;  %s2986_s23 = sphi %s3039_s23, %s3593_s23   ;;  %s2982_s22 = sphi %s3037_s22, %s3592_s22   ;;  %s2978_s21 = sphi %s3035_s21, %s3591_s21  }
   0x4   : > { %p26_p0 = scmp.ge.s32.totalorder %s25_s26, 6  ;;  %p2436_p1 = scmp.ge.s32.totalorder %s2994_s25, 1 }
   0x5   : > { %p308_p2 = scmp.lt.s32.totalorder %s2994_s25, 13 }
   0x6   : > { %s3596_s26 = smov (%p26_p0, %s25_s26), 0  ;;  %s3598_s27 = smov (!%p26_p0, %s28_s27), %s2990_s24 }
   0x7   : > { %p309_p3 = pnand %p2436_p1, %p308_p2  ;;  %p30_p4 = scmp.ge.s32.totalorder %s3598_s27, 2 }
   0x8   : > { %v448_v0 = vld [vmem:[%s3587_s4 + $0x10] sm:$0xff] (!%p309_p3)  ;;  %v449_v1 = vld [vmem:[%s3587_s4 + $0x18] sm:$0xff] (!%p309_p3)  ;;  %v443_v2 = vld [vmem:[%s3587_s4] sm:$0xff] (!%p309_p3)  ;;  %v2996_v3 = vmov (!%p309_p3), 0.0|0.0   ;;  %s3086_s12 = sshll.u32 (!%p309_p3), %s2978_s21, 1  ;;  %p381_p5 = scmp.lt.s32.totalorder (!%p309_p3), %s2982_s22, 1 }
   0x9   : > { %s3600_s27 = smov (%p30_p4, %s3598_s27), 0  ;;  %312 = sbr.rel (%p309_p3) target bundleno = 396 (0x18c), region = 44 }
   0xa   : > { %2831 = vmatprep.subr.bf16.mxu0 (!%p309_p3), %v2996_v3  ;;  %v3079_v4 = vpack.c.bf16 (!%p309_p3), %v449_v1, %v448_v0  ;;  %2834 = vmatprep.subr.bf16.mxu1 (!%p309_p3), %v2996_v3  ;;  %v444_v5 = vld [vmem:[%s3587_s4 + $0x8] sm:$0xff] (!%p309_p3)  ;;  %vm2997_vm0 = vmmov (!%p309_p3), 0   ;;  %v2998_v7 = vmov (!%p309_p3), 0.0   ;;  %p383_p6 = scmp.lt.s32.totalorder (!%p309_p3), %s3086_s12, 13  ;;  %s392_s13 = sadd.s32 (!%p309_p3), 1, %s3086_s12  ;;  %v632_v8 = vld [vmem:[%s3587_s4 + $0x20] sm:$0xff] (!%p309_p3) }
   0xb   : > { %v3089_v6 = vpack.c.bf16 (!%p309_p3), %v444_v5, %v443_v2  ;;  %2601 = vmatprep.mubr.msk.f32.mxu0 (!%p309_p3), %vm2997_vm0, %v2998_v7  ;;  %2614 = vmatprep.mubr.msk.f32.mxu1 (!%p309_p3), %vm2997_vm0, %v2998_v7  ;;  %v633_v9 = vld [vmem:[%s3587_s4 + $0x28] sm:$0xff] (!%p309_p3)  ;;  %v729_v10 = vld [vmem:[%s3587_s4 + $0x30] sm:$0xff] (!%p309_p3)  ;;  %v730_v11 = vld [vmem:[%s3587_s4 + $0x38] sm:$0xff] (!%p309_p3)  ;;  %p395_p7 = scmp.lt.s32.totalorder (!%p309_p3), %s392_s13, 13  ;;  %vm450_vm1 = vcmask (!%p309_p3), 130048   ;;  %s418_s16 = sadd.s32 (!%p309_p3), 3, %s3086_s12 }
   0xc   : > { %2833 = vmatpush3.bf16.msra.mxu0 (!%p309_p3), %v3079_v4  ;;  %v3121_v12 = vpack.c.bf16 (!%p309_p3), %v633_v9, %v632_v8  ;;  %v3123_v13 = vpack.c.bf16 (!%p309_p3), %v730_v11, %v729_v10  ;;  %p3144_p8 = scmp.lt.s32.totalorder (!%p309_p3), %s418_s16, 13  ;;  %v826_v20 = vld [vmem:[%s3587_s4 + $0x40] sm:$0xff] (!%p309_p3)  ;;  %v827_v21 = vld [vmem:[%s3587_s4 + $0x48] sm:$0xff] (!%p309_p3)  ;;  %v923_v22 = vld [vmem:[%s3587_s4 + $0x50] sm:$0xff] (!%p309_p3)  ;;  %p432_p10 = scmp.lt.s32.totalorder (!%p309_p3), %s2978_s21, 5  ;;  %vm2262_vm7 = vcmask (!%p309_p3), 261120  }
   0xd   : > { %2836 = vmatpush3.bf16.msra.mxu1 (!%p309_p3), %v3089_v6  ;;  %2837 = vmatprep.subr.bf16.mxu0 (!%p309_p3), %v2996_v3  ;;  %v924_v23 = vld [vmem:[%s3587_s4 + $0x58] sm:$0xff] (!%p309_p3)  ;;  %v3184_v25 = vpack.c.bf16 (!%p309_p3), %v827_v21, %v826_v20  ;;  %v1020_v32 = vld [vmem:[%s3587_s4 + $0x60] sm:$0xff] (!%p309_p3)  ;;  %v1021_v33 = vld [vmem:[%s3587_s4 + $0x68] sm:$0xff] (!%p309_p3) }
   0xe   : > { %2840 = vmatprep.subr.bf16.mxu1 (!%p309_p3), %v2996_v3  ;;  %v3189_v27 = vpack.c.bf16 (!%p309_p3), %v924_v23, %v923_v22  ;;  %v1117_v34 = vld [vmem:[%s3587_s4 + $0x70] sm:$0xff] (!%p309_p3)  ;;  %v1118_v35 = vld [vmem:[%s3587_s4 + $0x78] sm:$0xff] (!%p309_p3)  ;;  %v3241_v37 = vpack.c.bf16 (!%p309_p3), %v1021_v33, %v1020_v32  ;;  %v1214_v44 = vld [vmem:[%s3587_s4 + $0x80] sm:$0xff] (!%p309_p3) }
   0xf   : > { %v3246_v39 = vpack.c.bf16 (!%p309_p3), %v1118_v35, %v1117_v34  ;;  %v1215_v45 = vld [vmem:[%s3587_s4 + $0x88] sm:$0xff] (!%p309_p3) }
  0x10   : > { %s3602_s22 = smov (!%p381_p5, %s2982_s22), 1  ;;  %s3604_s13 = smov (!%p395_p7, %s392_s13), 13  ;;  %v3294_v47 = vpack.c.bf16 %v1215_v45, %v1214_v44 }
  0x11   : > { %s384_s14 = scalar_select %p383_p6, %s3086_s12, 13 }
  0x12   : > { %s3108_s17 = smul.u32 56, %s3602_s22  ;;  %s3606_s16 = smov (!%p3144_p8, %s418_s16), 13 }
  0x13   : > { %s2438_s7 = sshll.u32 %s384_s14, 2  ;;  %s2441_s14 = sshll.u32 %s3604_s13, 2 }
  0x14   : > { %s387_s8 = sadd.s32 %s3108_s17, %s2438_s7  ;;  %s399_s18 = sadd.s32 %s3108_s17, %s2441_s14 }
  0x15   : > { %s2439_s9 = sshll.u32 %s387_s8, 3  ;;  %s2442_s20 = sshll.u32 %s399_s18, 3 }
  0x16   : > { %s3128_s15 = scalar_lea.vmem %s3583_s0, %s2439_s9  ;;  %s3164_s7 = scalar_lea.vmem %s3584_s1, %s2442_s20 }
  0x17   : > { %v445_v14 = vld [vmem:[%s3128_s15 + $0x1] sm:$0xff]  ;;  %v446_v16 = vld [vmem:[%s3128_s15 + $0x9] sm:$0xff]  ;;  %v447_v18 = vld [vmem:[%s3128_s15 + $0x11] sm:$0xff]  ;;  %s2447_s20 = sshll.u32 %s3606_s16, 2  ;;  %s405_s13 = sadd.s32 2, %s3086_s12 }
  0x18   : > { %v440_v15 = vld [vmem:[%s3128_s15] sm:$0xff]  ;;  %2602 = vmatmul.mubr.msk.f32.vlgmr.msra.gmra.mrb[0].mxu0 %vm450_vm1, %v445_v14  ;;  %v441_v17 = vld [vmem:[%s3128_s15 + $0x8] sm:$0xff]  ;;  %v442_v19 = vld [vmem:[%s3128_s15 + $0x10] sm:$0xff]  ;;  %s3192_s19 = sadd.s32 %s3108_s17, %s2447_s20  ;;  %p408_p9 = scmp.lt.s32.totalorder %s405_s13, 13 }
  0x19   : > { %2615 = vmatmul.mubr.msk.f32.vlgmr.msra.gmra.mrb[0].mxu1 %vm450_vm1, %v440_v15  ;;  %2839 = vmatpush3.bf16.msra.mxu0 %v3121_v12  ;;  %v629_v24 = vld [vmem:[%s3128_s15 + $0x2] sm:$0xff]  ;;  %v630_v28 = vld [vmem:[%s3128_s15 + $0xa] sm:$0xff]  ;;  %v631_v30 = vld [vmem:[%s3128_s15 + $0x12] sm:$0xff]  ;;  %s3610_s21 = smov (!%p432_p10, %s2978_s21), 5  ;;  %s2887_s9 = smul.u32 18, %s3602_s22 }
  0x1a   : > { %2842 = vmatpush3.bf16.msra.mxu1 %v3123_v13  ;;  %2604 = vmatprep.mubr.msk.f32.mxu0 %vm2997_vm0, %v2998_v7  ;;  %v3187_v26 = vld [vmem:[%s3164_s7] sm:$0xff]  ;;  %v3202_v29 = vld [vmem:[%s3164_s7 + $0x8] sm:$0xff]  ;;  %v3219_v31 = vld [vmem:[%s3164_s7 + $0x10] sm:$0xff]  ;;  %s3608_s13 = smov (!%p408_p9, %s405_s13), 13 }
  0x1b   : > { %2617 = vmatprep.mubr.msk.f32.mxu1 %vm2997_vm0, %v2998_v7  ;;  %2843 = vmatprep.subr.bf16.mxu0 %v2996_v3  ;;  %v823_v36 = vld [vmem:[%s3164_s7 + $0x1] sm:$0xff]  ;;  %s2444_s10 = sshll.u32 %s3608_s13, 2  ;;  %v824_v40 = vld [vmem:[%s3164_s7 + $0x9] sm:$0xff]  ;;  %v825_v42 = vld [vmem:[%s3164_s7 + $0x11] sm:$0xff] }
  0x1c   : > { %2846 = vmatprep.subr.bf16.mxu1 %v2996_v3  ;;  %2605 = vmatmul.mubr.msk.f32.gmra.mrb[2].mxu0 %vm450_vm1, %v446_v16  ;;  %v3244_v38 = vld [vmem:[%s3164_s7 + $0x2] sm:$0xff]  ;;  %s412_s11 = sadd.s32 %s3108_s17, %s2444_s10  ;;  %v3256_v41 = vld [vmem:[%s3164_s7 + $0xa] sm:$0xff]  ;;  %v3273_v43 = vld [vmem:[%s3164_s7 + $0x12] sm:$0xff]  ;;  %s2448_s7 = sshll.u32 %s3192_s19, 3 }
  0x1d   : > { %2618 = vmatmul.mubr.msk.f32.gmra.mrb[2].mxu1 %vm450_vm1, %v441_v17  ;;  %2607 = vmatprep.mubr.msk.f32.mxu0 %vm2997_vm0, %v2998_v7  ;;  %s2445_s14 = sshll.u32 %s412_s11, 3  ;;  %s3396_s8 = scalar_lea.vmem %s3586_s3, %s2448_s7 }
  0x1e   : > { %2620 = vmatprep.mubr.msk.f32.mxu1 %vm2997_vm0, %v2998_v7  ;;  %s3278_s20 = scalar_lea.vmem %s3585_s2, %s2445_s14  ;;  %v1890_v56 = vld [vmem:[%s3396_s8] sm:$0xff]  ;;  %v1891_v57 = vld [vmem:[%s3396_s8 + $0x8] sm:$0xff]  ;;  %v1892_v58 = vld [vmem:[%s3396_s8 + $0x10] sm:$0xff]  ;;  %s2886_s10 = smul.u32 3, %s3610_s21 }
  0x1f   : > { %v1017_v46 = vld [vmem:[%s3278_s20] sm:$0xff]  ;;  %v1018_v49 = vld [vmem:[%s3278_s20 + $0x8] sm:$0xff]  ;;  %v1019_v51 = vld [vmem:[%s3278_s20 + $0x10] sm:$0xff] }
  0x20   : > { %2608 = vmatmul.mubr.msk.f32.gmra.mrb[4].mxu0 %vm450_vm1, %v447_v18  ;;  %v1114_v48 = vld [vmem:[%s3278_s20 + $0x1] sm:$0xff]  ;;  %v1115_v50 = vld [vmem:[%s3278_s20 + $0x9] sm:$0xff]  ;;  %v1116_v52 = vld [vmem:[%s3278_s20 + $0x11] sm:$0xff]  ;;  %s436_s22 = sadd.s32 %s2887_s9, %s2886_s10 }
  0x21   : > { %2621 = vmatmul.mubr.msk.f32.gmra.mrb[4].mxu1 %vm450_vm1, %v442_v19  ;;  %2627 = vmatprep.mubr.msk.f32.mxu0 %vm2997_vm0, %v2998_v7  ;;  %v1211_v53 = vld [vmem:[%s3278_s20 + $0x2] sm:$0xff]  ;;  %v1212_v54 = vld [vmem:[%s3278_s20 + $0xa] sm:$0xff]  ;;  %v1213_v55 = vld [vmem:[%s3278_s20 + $0x12] sm:$0xff]  ;;  %s2449_s21 = sshll.u32 %s436_s22, 3 }
  0x22   : > { %2640 = vmatprep.mubr.msk.f32.mxu1 %vm2997_vm0, %v2998_v7  ;;  %v1985_v59 = vld [vmem:[%s3396_s8 + $0x1] sm:$0xff]  ;;  %v1986_v61 = vld [vmem:[%s3396_s8 + $0x9] sm:$0xff]  ;;  %v1987_v63 = vld [vmem:[%s3396_s8 + $0x11] sm:$0xff]  ;;  %s438_s17 = scalar_lea.vmem %s3589_s6, %s2449_s21 }
  0x23   : > { %v2080_v60 = vld [vmem:[%s3396_s8 + $0x2] sm:$0xff]  ;;  %v2081_v62 = vld [vmem:[%s3396_s8 + $0xa] sm:$0xff]  ;;  %v2082_v0 = vld [vmem:[%s3396_s8 + $0x12] sm:$0xff] }
  0x24   : > { %2628 = vmatmul.mubr.msk.f32.vlgmr.msra.gmra.mrb[6].mxu0 %vm450_vm1, %v629_v24 }
  0x25   : > { %2641 = vmatmul.mubr.msk.f32.vlgmr.msra.gmra.mrb[6].mxu1 %vm450_vm1, %v3187_v26  ;;  %2845 = vmatpush3.bf16.msra.mxu0 %v3184_v25 }
  0x26   : > { %2848 = vmatpush3.bf16.msra.mxu1 %v3189_v27  ;;  %2630 = vmatprep.mubr.msk.f32.mxu0 %vm2997_vm0, %v2998_v7 }
  0x27   : > { %2643 = vmatprep.mubr.msk.f32.mxu1 %vm2997_vm0, %v2998_v7  ;;  %2849 = vmatprep.subr.bf16.mxu0 %v2996_v3 }
  0x28   : > { %2852 = vmatprep.subr.bf16.mxu1 %v2996_v3  ;;  %2631 = vmatmul.mubr.msk.f32.gmra.mrb[8].mxu0 %vm450_vm1, %v630_v28 }
  0x29   : > { %2644 = vmatmul.mubr.msk.f32.gmra.mrb[8].mxu1 %vm450_vm1, %v3202_v29  ;;  %2633 = vmatprep.mubr.msk.f32.mxu0 %vm2997_vm0, %v2998_v7 }
  0x2a   : > { %2646 = vmatprep.mubr.msk.f32.mxu1 %vm2997_vm0, %v2998_v7 }
  0x2c   : > { %2634 = vmatmul.mubr.msk.f32.gmra.mrb[10].mxu0 %vm450_vm1, %v631_v30 }
  0x2d   : > { %2647 = vmatmul.mubr.msk.f32.gmra.mrb[10].mxu1 %vm450_vm1, %v3219_v31  ;;  %2653 = vmatprep.mubr.msk.f32.mxu0 %vm2997_vm0, %v2998_v7 }
  0x2e   : > { %2666 = vmatprep.mubr.msk.f32.mxu1 %vm2997_vm0, %v2998_v7 }
  0x30   : > { %2654 = vmatmul.mubr.msk.f32.vlgmr.msra.gmra.mrb[12].mxu0 %vm450_vm1, %v823_v36 }
  0x31   : > { %2667 = vmatmul.mubr.msk.f32.vlgmr.msra.gmra.mrb[12].mxu1 %vm450_vm1, %v3244_v38  ;;  %2851 = vmatpush3.bf16.msra.mxu0 %v3241_v37 }
  0x32   : > { %2854 = vmatpush3.bf16.msra.mxu1 %v3246_v39  ;;  %2656 = vmatprep.mubr.msk.f32.mxu0 %vm2997_vm0, %v2998_v7 }
  0x33   : > { %2669 = vmatprep.mubr.msk.f32.mxu1 %vm2997_vm0, %v2998_v7  ;;  %2855 = vmatprep.subr.bf16.mxu0 %v2996_v3 }
  0x34   : > { %2858 = vmatprep.subr.bf16.mxu1 %v2996_v3  ;;  %2657 = vmatmul.mubr.msk.f32.gmra.mrb[14].mxu0 %vm450_vm1, %v824_v40 }
  0x35   : > { %2670 = vmatmul.mubr.msk.f32.gmra.mrb[14].mxu1 %vm450_vm1, %v3256_v41  ;;  %2659 = vmatprep.mubr.msk.f32.mxu0 %vm2997_vm0, %v2998_v7 }
  0x36   : > { %2672 = vmatprep.mubr.msk.f32.mxu1 %vm2997_vm0, %v2998_v7 }
  0x38   : > { %2660 = vmatmul.mubr.msk.f32.gmra.mrb[16].mxu0 %vm450_vm1, %v825_v42 }
  0x39   : > { %2673 = vmatmul.mubr.msk.f32.gmra.mrb[16].mxu1 %vm450_vm1, %v3273_v43  ;;  %2679 = vmatprep.mubr.msk.f32.mxu0 %vm2997_vm0, %v2998_v7 }
  0x3a   : > { %2692 = vmatprep.mubr.msk.f32.mxu1 %vm2997_vm0, %v2998_v7 }
  0x3c   : > { %2680 = vmatmul.mubr.msk.f32.vlgmr.msra.gmra.mrb[18].mxu0 %vm450_vm1, %v1017_v46 }
  0x3d   : > { %2693 = vmatmul.mubr.msk.f32.vlgmr.msra.gmra.mrb[18].mxu1 %vm450_vm1, %v1114_v48  ;;  %2857 = vmatpush3.bf16.msra.mxu0 %v3294_v47 }
  0x3e   : > { %2860 = vmatpush3.bf16.msra.mxu1 %v3079_v4  ;;  %2682 = vmatprep.mubr.msk.f32.mxu0 %vm2997_vm0, %v2998_v7 }
  0x3f   : > { %2695 = vmatprep.mubr.msk.f32.mxu1 %vm2997_vm0, %v2998_v7  ;;  %2861 = vmatprep.subr.bf16.mxu0 %v2996_v3 }
  0x40   : > { %2864 = vmatprep.subr.bf16.mxu1 %v2996_v3  ;;  %2683 = vmatmul.mubr.msk.f32.gmra.mrb[20].mxu0 %vm450_vm1, %v1018_v49 }
  0x41   : > { %2696 = vmatmul.mubr.msk.f32.gmra.mrb[20].mxu1 %vm450_vm1, %v1115_v50  ;;  %2685 = vmatprep.mubr.msk.f32.mxu0 %vm2997_vm0, %v2998_v7 }
  0x42   : > { %2698 = vmatprep.mubr.msk.f32.mxu1 %vm2997_vm0, %v2998_v7 }
  0x44   : > { %2686 = vmatmul.mubr.msk.f32.gmra.mrb[22].mxu0 %vm450_vm1, %v1019_v51 }
  0x45   : > { %2699 = vmatmul.mubr.msk.f32.gmra.mrb[22].mxu1 %vm450_vm1, %v1116_v52  ;;  %2705 = vmatprep.mubr.msk.f32.mxu0 %vm2997_vm0, %v2998_v7 }
  0x46   : > { %2718 = vmatprep.mubr.msk.f32.mxu1 %vm2997_vm0, %v2998_v7 }
  0x48   : > { %2706 = vmatmul.mubr.msk.f32.vlgmr.msra.gmra.mrb[24].mxu0 %vm450_vm1, %v1211_v53 }
  0x49   : > { %2719 = vmatmul.mubr.msk.f32.vlgmr.msra.gmra.mrb[24].mxu1 %vm450_vm1, %v823_v36  ;;  %2863 = vmatpush3.bf16.msra.mxu0 %v3089_v6 }
  0x4a   : > { %2866 = vmatpush3.bf16.msra.mxu1 %v3121_v12  ;;  %2708 = vmatprep.mubr.msk.f32.mxu0 %vm2997_vm0, %v2998_v7 }
  0x4b   : > { %2721 = vmatprep.mubr.msk.f32.mxu1 %vm2997_vm0, %v2998_v7  ;;  %2867 = vmatprep.subr.bf16.mxu0 %v2996_v3 }
  0x4c   : > { %2870 = vmatprep.subr.bf16.mxu1 %v2996_v3  ;;  %2709 = vmatmul.mubr.msk.f32.gmra.mrb[26].mxu0 %vm450_vm1, %v1212_v54 }
  0x4d   : > { %2722 = vmatmul.mubr.msk.f32.gmra.mrb[26].mxu1 %vm450_vm1, %v824_v40  ;;  %2711 = vmatprep.mubr.msk.f32.mxu0 %vm2997_vm0, %v2998_v7 }
  0x4e   : > { %2724 = vmatprep.mubr.msk.f32.mxu1 %vm2997_vm0, %v2998_v7 }
  0x50   : > { %2712 = vmatmul.mubr.msk.f32.gmra.mrb[28].mxu0 %vm450_vm1, %v1213_v55 }
  0x51   : > { %2725 = vmatmul.mubr.msk.f32.gmra.mrb[28].mxu1 %vm450_vm1, %v825_v42  ;;  %2731 = vmatprep.mubr.msk.f32.mxu0 %vm2997_vm0, %v2998_v7 }
  0x52   : > { %2744 = vmatprep.mubr.msk.f32.mxu1 %vm2997_vm0, %v2998_v7 }
  0x54   : > { %2732 = vmatmul.mubr.msk.f32.vlgmr.msra.gmra.mrb[30].mxu0 %vm450_vm1, %v3187_v26 }
  0x55   : > { %2745 = vmatmul.mubr.msk.f32.vlgmr.msra.gmra.mrb[30].mxu1 %vm450_vm1, %v3244_v38  ;;  %2869 = vmatpush3.bf16.msra.mxu0 %v3123_v13 }
  0x56   : > { %2872 = vmatpush3.bf16.msra.mxu1 %v3184_v25  ;;  %2734 = vmatprep.mubr.msk.f32.mxu0 %vm2997_vm0, %v2998_v7 }
  0x57   : > { %2747 = vmatprep.mubr.msk.f32.mxu1 %vm2997_vm0, %v2998_v7  ;;  %2873 = vmatprep.subr.bf16.mxu0 %v2996_v3 }
  0x58   : > { %2876 = vmatprep.subr.bf16.mxu1 %v2996_v3  ;;  %2735 = vmatmul.mubr.msk.f32.gmra.mrb[32].mxu0 %vm450_vm1, %v3202_v29 }
  0x59   : > { %2748 = vmatmul.mubr.msk.f32.gmra.mrb[32].mxu1 %vm450_vm1, %v3256_v41  ;;  %2737 = vmatprep.mubr.msk.f32.mxu0 %vm2997_vm0, %v2998_v7 }
  0x5a   : > { %2750 = vmatprep.mubr.msk.f32.mxu1 %vm2997_vm0, %v2998_v7 }
  0x5c   : > { %2738 = vmatmul.mubr.msk.f32.gmra.mrb[34].mxu0 %vm450_vm1, %v3219_v31 }
  0x5d   : > { %2751 = vmatmul.mubr.msk.f32.gmra.mrb[34].mxu1 %vm450_vm1, %v3273_v43  ;;  %2757 = vmatprep.mubr.msk.f32.mxu0 %vm2997_vm0, %v2998_v7 }
  0x5e   : > { %2770 = vmatprep.mubr.msk.f32.mxu1 %vm2997_vm0, %v2998_v7 }
  0x60   : > { %2758 = vmatmul.mubr.msk.f32.vlgmr.msra.gmra.mrb[36].mxu0 %vm450_vm1, %v1017_v46 }
  0x61   : > { %2771 = vmatmul.mubr.msk.f32.vlgmr.msra.gmra.mrb[36].mxu1 %vm450_vm1, %v1114_v48  ;;  %2875 = vmatpush3.bf16.msra.mxu0 %v3189_v27 }
  0x62   : > { %2878 = vmatpush3.bf16.msra.mxu1 %v3241_v37  ;;  %2760 = vmatprep.mubr.msk.f32.mxu0 %vm2997_vm0, %v2998_v7 }
  0x63   : > { %2773 = vmatprep.mubr.msk.f32.mxu1 %vm2997_vm0, %v2998_v7  ;;  %2879 = vmatprep.subr.bf16.mxu0 %v2996_v3 }
  0x64   : > { %2882 = vmatprep.subr.bf16.mxu1 %v2996_v3  ;;  %2761 = vmatmul.mubr.msk.f32.gmra.mrb[38].mxu0 %vm450_vm1, %v1018_v49 }
  0x65   : > { %2774 = vmatmul.mubr.msk.f32.gmra.mrb[38].mxu1 %vm450_vm1, %v1115_v50  ;;  %2763 = vmatprep.mubr.msk.f32.mxu0 %vm2997_vm0, %v2998_v7 }
  0x66   : > { %2776 = vmatprep.mubr.msk.f32.mxu1 %vm2997_vm0, %v2998_v7 }
  0x68   : > { %2764 = vmatmul.mubr.msk.f32.gmra.mrb[40].mxu0 %vm450_vm1, %v1019_v51 }
  0x69   : > { %2777 = vmatmul.mubr.msk.f32.gmra.mrb[40].mxu1 %vm450_vm1, %v1116_v52  ;;  %2783 = vmatprep.mubr.msk.f32.mxu0 %vm2997_vm0, %v2998_v7 }
  0x6a   : > { %2796 = vmatprep.mubr.msk.f32.mxu1 %vm2997_vm0, %v2998_v7 }
  0x6c   : > { %2784 = vmatmul.mubr.msk.f32.vlgmr.msra.gmra.mrb[42].mxu0 %vm450_vm1, %v1211_v53 }
  0x6d   : > { %2797 = vmatmul.mubr.msk.f32.vlgmr.msra.gmra.mrb[42].mxu1 %vm450_vm1, %v1890_v56  ;;  %2881 = vmatpush3.bf16.msra.mxu0 %v3246_v39 }
  0x6e   : > { %2884 = vmatpush3.bf16.msra.mxu1 %v3294_v47  ;;  %2786 = vmatprep.mubr.msk.f32.mxu0 %vm2997_vm0, %v2998_v7 }
  0x6f   : > { %2799 = vmatprep.mubr.msk.f32.mxu1 %vm2997_vm0, %v2998_v7 }
  0x70   : > { %2787 = vmatmul.mubr.msk.f32.gmra.mrb[44].mxu0 %vm450_vm1, %v1212_v54 }
  0x71   : > { %2800 = vmatmul.mubr.msk.f32.gmra.mrb[44].mxu1 %vm450_vm1, %v1891_v57  ;;  %2789 = vmatprep.mubr.msk.f32.mxu0 %vm2997_vm0, %v2998_v7 }
  0x72   : > { %2802 = vmatprep.mubr.msk.f32.mxu1 %vm2997_vm0, %v2998_v7 }
  0x74   : > { %2790 = vmatmul.mubr.msk.f32.gmra.mrb[46].mxu0 %vm450_vm1, %v1213_v55 }
  0x75   : > { %2803 = vmatmul.mubr.msk.f32.gmra.mrb[46].mxu1 %vm450_vm1, %v1892_v58  ;;  %2809 = vmatprep.mubr.msk.f32.mxu0 %vm2997_vm0, %v2998_v7 }
  0x76   : > { %2822 = vmatprep.mubr.msk.f32.mxu1 %vm2997_vm0, %v2998_v7 }
  0x78   : > { %2810 = vmatmul.mubr.msk.f32.vlgmr.msra.gmra.mrb[48].mxu0 %vm450_vm1, %v1985_v59 }
  0x79   : > { %2823 = vmatmul.mubr.msk.f32.vlgmr.msra.gmra.mrb[48].mxu1 %vm450_vm1, %v2080_v60  ;;  %2812 = vmatprep.mubr.msk.f32.mxu0 %vm2997_vm0, %v2998_v7 }
  0x7a   : > { %2825 = vmatprep.mubr.msk.f32.mxu1 %vm2997_vm0, %v2998_v7 }
  0x7c   : > { %2813 = vmatmul.mubr.msk.f32.gmra.mrb[50].mxu0 %vm450_vm1, %v1986_v61 }
  0x7d   : > { %2826 = vmatmul.mubr.msk.f32.gmra.mrb[50].mxu1 %vm450_vm1, %v2081_v62  ;;  %2815 = vmatprep.mubr.msk.f32.mxu0 %vm2997_vm0, %v2998_v7 }
  0x7e   : > { %2828 = vmatprep.mubr.msk.f32.mxu1 %vm2997_vm0, %v2998_v7 }
  0x80   : > { %2816 = vmatmul.mubr.msk.f32.gmra.mrb[52].mxu0 %vm450_vm1, %v1987_v63 }
  0x81   : > { %2829 = vmatmul.mubr.msk.f32.gmra.mrb[52].mxu1 %vm450_vm1, %v2082_v0 }
  0xeb   : > { %v526_v1 = vpop.f32.mrb[0].mxu0 }
  0xec   : > { %v615_v2 = vpop.f32.mrb[0].mxu1  ;;  %v2603_v4 = vpop.f32.mrb[1].mxu0 }
  0xed   : > { %v616_v3 = vadd.f32 %v615_v2, %v526_v1  ;;  %v2616_v5 = vpop.f32.mrb[1].mxu1 }
  0xef   : > { %v531_v6 = vpop.f32.mrb[2].mxu0 }
  0xf0   : > { %v620_v8 = vpop.f32.mrb[2].mxu1  ;;  %v2606_v10 = vpop.f32.mrb[3].mxu0 }
  0xf1   : > { %v621_v9 = vadd.f32 %v620_v8, %v531_v6  ;;  %v2619_v11 = vpop.f32.mrb[3].mxu1 }
  0xf3   : > { %v536_v12 = vpop.f32.mrb[4].mxu0 }
  0xf4   : > { %v625_v13 = vpop.f32.mrb[4].mxu1  ;;  %v2609_v15 = vpop.f32.mrb[5].mxu0 }
  0xf5   : > { %v626_v14 = vadd.f32 %v625_v13, %v536_v12  ;;  %v2622_v7 = vpop.f32.mrb[5].mxu1 }
  0xf7   : > { %v709_v16 = vpop.f32.mrb[6].mxu0 }
  0xf8   : > { %v806_v17 = vpop.f32.mrb[6].mxu1  ;;  %v723_v18 = vadd.f32 %v709_v16, %v616_v3  ;;  %v2629_v19 = vpop.f32.mrb[7].mxu0 }
  0xf9   : > { %v2642_v20 = vpop.f32.mrb[7].mxu1 }
  0xfa   : > { %v820_v21 = vadd.f32 %v806_v17, %v723_v18 }
  0xfb   : > { %v714_v22 = vpop.f32.mrb[8].mxu0 }
  0xfc   : > { %v811_v23 = vpop.f32.mrb[8].mxu1  ;;  %v724_v24 = vadd.f32 %v714_v22, %v621_v9  ;;  %v2632_v25 = vpop.f32.mrb[9].mxu0 }
  0xfd   : > { %v2645_v26 = vpop.f32.mrb[9].mxu1 }
  0xfe   : > { %v821_v27 = vadd.f32 %v811_v23, %v724_v24 }
  0xff   : > { %v719_v28 = vpop.f32.mrb[10].mxu0 }
 0x100   : > { %v816_v29 = vpop.f32.mrb[10].mxu1  ;;  %v725_v30 = vadd.f32 %v719_v28, %v626_v14  ;;  %v2635_v31 = vpop.f32.mrb[11].mxu0 }
 0x101   : > { %v2648_v32 = vpop.f32.mrb[11].mxu1 }
 0x102   : > { %v822_v33 = vadd.f32 %v816_v29, %v725_v30 }
 0x103   : > { %v903_v34 = vpop.f32.mrb[12].mxu0 }
 0x104   : > { %v1000_v35 = vpop.f32.mrb[12].mxu1  ;;  %v917_v36 = vadd.f32 %v903_v34, %v820_v21  ;;  %v2655_v37 = vpop.f32.mrb[13].mxu0  ;;  %v3450_v21 = vld [vmem:[%s3588_s5] ss:$0 sm:$0xff] }
 0x105   : > { %v2668_v38 = vpop.f32.mrb[13].mxu1 }
 0x106   : > { %v1014_v39 = vadd.f32 %v1000_v35, %v917_v36 }
 0x107   : > { %v908_v40 = vpop.f32.mrb[14].mxu0 }
 0x108   : > { %v1005_v41 = vpop.f32.mrb[14].mxu1  ;;  %v918_v42 = vadd.f32 %v908_v40, %v821_v27  ;;  %v2658_v43 = vpop.f32.mrb[15].mxu0 }
 0x109   : > { %v2671_v44 = vpop.f32.mrb[15].mxu1 }
 0x10a   : > { %v1015_v45 = vadd.f32 %v1005_v41, %v918_v42 }
 0x10b   : > { %v913_v46 = vpop.f32.mrb[16].mxu0 }
 0x10c   : > { %v1010_v47 = vpop.f32.mrb[16].mxu1  ;;  %v919_v48 = vadd.f32 %v913_v46, %v822_v33  ;;  %v2661_v49 = vpop.f32.mrb[17].mxu0 }
 0x10d   : > { %v2674_v50 = vpop.f32.mrb[17].mxu1 }
 0x10e   : > { %v1016_v51 = vadd.f32 %v1010_v47, %v919_v48 }
 0x10f   : > { %v1097_v52 = vpop.f32.mrb[18].mxu0 }
 0x110   : > { %v1194_v53 = vpop.f32.mrb[18].mxu1  ;;  %v1111_v54 = vadd.f32 %v1097_v52, %v1014_v39  ;;  %v2681_v55 = vpop.f32.mrb[19].mxu0 }
 0x111   : > { %v2694_v56 = vpop.f32.mrb[19].mxu1 }
 0x112   : > { %v1208_v57 = vadd.f32 %v1194_v53, %v1111_v54 }
 0x113   : > { %v1102_v58 = vpop.f32.mrb[20].mxu0 }
 0x114   : > { %v1199_v59 = vpop.f32.mrb[20].mxu1  ;;  %v1112_v60 = vadd.f32 %v1102_v58, %v1015_v45  ;;  %v2684_v61 = vpop.f32.mrb[21].mxu0 }
 0x115   : > { %v2697_v62 = vpop.f32.mrb[21].mxu1 }
 0x116   : > { %v1209_v63 = vadd.f32 %v1199_v59, %v1112_v60 }
 0x117   : > { %v1107_v0 = vpop.f32.mrb[22].mxu0 }
 0x118   : > { %v1204_v1 = vpop.f32.mrb[22].mxu1  ;;  %v1113_v2 = vadd.f32 %v1107_v0, %v1016_v51  ;;  %v2687_v3 = vpop.f32.mrb[23].mxu0 }
 0x119   : > { %v2700_v4 = vpop.f32.mrb[23].mxu1 }
 0x11a   : > { %v1210_v5 = vadd.f32 %v1204_v1, %v1113_v2 }
 0x11b   : > { %v1291_v6 = vpop.f32.mrb[24].mxu0 }
 0x11c   : > { %v1464_v8 = vpop.f32.mrb[24].mxu1  ;;  %v1305_v9 = vadd.f32 %v1291_v6, %v1208_v57  ;;  %v2707_v10 = vpop.f32.mrb[25].mxu0 }
 0x11d   : > { %v2720_v11 = vpop.f32.mrb[25].mxu1 }
 0x11e   : > { %v3453_v27 = vadd.f32 %v3450_v21, %v1305_v9 }
 0x11f   : > { %v1296_v12 = vpop.f32.mrb[26].mxu0 }
 0x120   : > { %v1469_v13 = vpop.f32.mrb[26].mxu1  ;;  %v1306_v14 = vadd.f32 %v1296_v12, %v1209_v63  ;;  %v2710_v15 = vpop.f32.mrb[27].mxu0  ;;  %v3456_v34 = vmul.f32 0.70710677, %v3453_v27 }
 0x121   : > { %v2723_v7 = vpop.f32.mrb[27].mxu1 }
 0x122   : > { %v3459_v35 = vadd.f32 %v3450_v21, %v1306_v14  ;;  %v3462_v42 = vand.u32 2147483647, %v3456_v34  ;;  %vm1323_vm2 = vcmp.ge.f32.partialorder %v3456_v34, 0.0 }
 0x123   : > { %v1301_v16 = vpop.f32.mrb[28].mxu0 }
 0x124   : > { %v1474_v17 = vpop.f32.mrb[28].mxu1  ;;  %v1307_v18 = vadd.f32 %v1301_v16, %v1210_v5  ;;  %v2713_v19 = vpop.f32.mrb[29].mxu0  ;;  %v3465_v43 = vmul.f32 0.70710677, %v3459_v35  ;;  %v1332_v51 = vmul.f32 0.3275911, %v3462_v42 }
 0x125   : > { %v2726_v20 = vpop.f32.mrb[29].mxu1 }
 0x126   : > { %v3468_v45 = vadd.f32 %v3450_v21, %v1307_v18  ;;  %v3472_v52 = vand.u32 2147483647, %v3465_v43  ;;  %v1335_v60 = vadd.f32 1.0, %v1332_v51  ;;  %vm1324_vm3 = vcmp.ge.f32.partialorder %v3465_v43, 0.0 }
 0x127   : > { %v1544_v22 = vpop.f32.mrb[30].mxu0 }
 0x128   : > { %v1624_v23 = vpop.f32.mrb[30].mxu1  ;;  %v2733_v24 = vpop.f32.mrb[31].mxu0  ;;  %v1545_v25 = vadd.f32 %v1544_v22, %v1464_v8  ;;  %v3475_v54 = vmul.f32 0.70710677, %v3468_v45  ;;  %v1333_v61 = vmul.f32 0.3275911, %v3472_v52  ;;  %2932 = vrcp.f32 %v1335_v60 }
 0x129   : > { %v2746_v26 = vpop.f32.mrb[31].mxu1 }
 0x12a   : > { %v1638_v28 = vadd.f32 %v1624_v23, %v1545_v25  ;;  %v3479_v63 = vand.u32 2147483647, %v3475_v54  ;;  %v1336_v5 = vadd.f32 1.0, %v1333_v61  ;;  %vm1325_vm5 = vcmp.ge.f32.partialorder %v3475_v54, 0.0 }
 0x12b   : > { %v1549_v29 = vpop.f32.mrb[32].mxu0 }
 0x12c   : > { %v1629_v30 = vpop.f32.mrb[32].mxu1  ;;  %v1550_v31 = vadd.f32 %v1549_v29, %v1469_v13  ;;  %v2736_v32 = vpop.f32.mrb[33].mxu0  ;;  %v1334_v8 = vmul.f32 0.3275911, %v3479_v63  ;;  %2934 = vrcp.f32 %v1336_v5 }
 0x12d   : > { %v2749_v33 = vpop.f32.mrb[33].mxu1 }
 0x12e   : > { %v1639_v36 = vadd.f32 %v1629_v30, %v1550_v31  ;;  %v1337_v15 = vadd.f32 1.0, %v1334_v8 }
 0x12f   : > { %v1554_v37 = vpop.f32.mrb[34].mxu0 }
 0x130   : > { %v1634_v38 = vpop.f32.mrb[34].mxu1  ;;  %v1555_v39 = vadd.f32 %v1554_v37, %v1474_v17  ;;  %v2739_v40 = vpop.f32.mrb[35].mxu0  ;;  %2936 = vrcp.f32 %v1337_v15 }
 0x131   : > { %v2752_v41 = vpop.f32.mrb[35].mxu1 }
 0x132   : > { %v1640_v44 = vadd.f32 %v1634_v38, %v1555_v39  ;;  %v3482_v24 = vpop.eup %2932 }
 0x133   : > { %v1707_v46 = vpop.f32.mrb[36].mxu0  ;;  %v1344_v30 = vmul.f32 1.0614054, %v3482_v24 }
 0x134   : > { %v1790_v47 = vpop.f32.mrb[36].mxu1  ;;  %v1721_v48 = vadd.f32 %v1707_v46, %v1638_v28  ;;  %v2759_v49 = vpop.f32.mrb[37].mxu0 }
 0x135   : > { %v2772_v50 = vpop.f32.mrb[37].mxu1  ;;  %v1347_v40 = vadd.f32 -1.4531521, %v1344_v30 }
 0x136   : > { %v1804_v53 = vadd.f32 %v1790_v47, %v1721_v48  ;;  %v3485_v33 = vpop.eup %2934 }
 0x137   : > { %v1712_v55 = vpop.f32.mrb[38].mxu0  ;;  %v1345_v41 = vmul.f32 1.0614054, %v3485_v33 }
 0x138   : > { %v1795_v56 = vpop.f32.mrb[38].mxu1  ;;  %v1722_v57 = vadd.f32 %v1712_v55, %v1639_v36  ;;  %v2762_v58 = vpop.f32.mrb[39].mxu0 }
 0x139   : > { %v2775_v59 = vpop.f32.mrb[39].mxu1 }
 0x13a   : > { %v1805_v62 = vadd.f32 %v1795_v56, %v1722_v57  ;;  %v3491_v51 = vpop.eup %2936  ;;  %v1350_v56 = vmul.f32 %v3482_v24, %v1347_v40  ;;  %v1348_v57 = vadd.f32 -1.4531521, %v1345_v41 }
 0x13b   : > { %v1717_v0 = vpop.f32.mrb[40].mxu0  ;;  %v1346_v60 = vmul.f32 1.0614054, %v3491_v51 }
 0x13c   : > { %v1800_v1 = vpop.f32.mrb[40].mxu1  ;;  %v1723_v2 = vadd.f32 %v1717_v0, %v1640_v44  ;;  %v2765_v3 = vpop.f32.mrb[41].mxu0  ;;  %v1351_v5 = vmul.f32 %v3485_v33, %v1348_v57 }
 0x13d   : > { %v2778_v4 = vpop.f32.mrb[41].mxu1 }
 0x13e   : > { %v1806_v6 = vadd.f32 %v1800_v1, %v1723_v2  ;;  %v1353_v4 = vadd.f32 1.4214138, %v1350_v56  ;;  %v1354_v15 = vadd.f32 1.4214138, %v1351_v5 }
 0x13f   : > { %v1873_v9 = vpop.f32.mrb[42].mxu0 }
 0x140   : > { %v1968_v10 = vpop.f32.mrb[42].mxu1  ;;  %v1887_v11 = vadd.f32 %v1873_v9, %v1804_v53  ;;  %v2785_v12 = vpop.f32.mrb[43].mxu0  ;;  %v1371_v9 = vsub.f32 0.0, %v3462_v42 }
 0x141   : > { %v2798_v13 = vpop.f32.mrb[43].mxu1 }
 0x142   : > { %v1982_v14 = vadd.f32 %v1968_v10, %v1887_v11  ;;  %v1349_v10 = vadd.f32 -1.4531521, %v1346_v60 }
 0x143   : > { %v1878_v7 = vpop.f32.mrb[44].mxu0 }
 0x144   : > { %v1973_v16 = vpop.f32.mrb[44].mxu1  ;;  %v1888_v17 = vadd.f32 %v1878_v7, %v1805_v62  ;;  %v2788_v18 = vpop.f32.mrb[45].mxu0 }
 0x145   : > { %v2801_v19 = vpop.f32.mrb[45].mxu1  ;;  %v1372_v18 = vsub.f32 0.0, %v3472_v52 }
 0x146   : > { %v1983_v20 = vadd.f32 %v1973_v16, %v1888_v17  ;;  %v1374_v17 = vmul.f32 %v1371_v9, %v3462_v42  ;;  %v1352_v19 = vmul.f32 %v3491_v51, %v1349_v10 }
 0x147   : > { %v1883_v22 = vpop.f32.mrb[46].mxu0 }
 0x148   : > { %v1978_v23 = vpop.f32.mrb[46].mxu1  ;;  %v1889_v25 = vadd.f32 %v1883_v22, %v1806_v6  ;;  %v2791_v26 = vpop.f32.mrb[47].mxu0 }
 0x149   : > { %v2804_v28 = vpop.f32.mrb[47].mxu1  ;;  %v1377_v26 = vmul.f32 1.442695, %v1374_v17 }
 0x14a   : > { %v1984_v29 = vadd.f32 %v1978_v23, %v1889_v25  ;;  %v1375_v28 = vmul.f32 %v1372_v18, %v3472_v52 }
 0x14b   : > { %v2063_v31 = vpop.f32.mrb[48].mxu0 }
 0x14c   : > { %v2158_v32 = vpop.f32.mrb[48].mxu1  ;;  %v2077_v36 = vadd.f32 %v2063_v31, %v1982_v14  ;;  %v2811_v37 = vpop.f32.mrb[49].mxu0  ;;  %v1356_v14 = vmul.f32 %v3482_v24, %v1353_v4  ;;  %v1373_v31 = vsub.f32 0.0, %v3479_v63 }
 0x14d   : > { %v2824_v38 = vpop.f32.mrb[49].mxu1 }
 0x14e   : > { %v2172_v39 = vadd.f32 %v2158_v32, %v2077_v36  ;;  %v1359_v23 = vadd.f32 -0.28449672, %v1356_v14  ;;  %v1379_v38 = vmul.f32 1.442695, %v1375_v28  ;;  %v1376_v41 = vmul.f32 %v1373_v31, %v3479_v63 }
 0x14f   : > { %v2068_v44 = vpop.f32.mrb[50].mxu0 }
 0x150   : > { %v2163_v46 = vpop.f32.mrb[50].mxu1  ;;  %v3489_v47 = vadd.f32 %v3450_v21, %v2172_v39  ;;  %v2078_v48 = vadd.f32 %v2068_v44, %v1983_v20  ;;  %v2814_v49 = vpop.f32.mrb[51].mxu0  ;;  %v1362_v32 = vmul.f32 %v3482_v24, %v1359_v23  ;;  %v1381_v57 = vmul.f32 1.442695, %v1376_v41 }
 0x151   : > { %v2827_v50 = vpop.f32.mrb[51].mxu1 }
 0x152   : > { %v3494_v53 = vmul.f32 0.70710677, %v3489_v47  ;;  %v2173_v55 = vadd.f32 %v2163_v46, %v2078_v48  ;;  %v1365_v52 = vadd.f32 0.2548296, %v1362_v32  ;;  %v2999_v32 = vmov -1.0  }
 0x153   : > { %v2073_v58 = vpop.f32.mrb[52].mxu0 }
 0x154   : > { %v2168_v59 = vpop.f32.mrb[52].mxu1  ;;  %v2190_v61 = vand.u32 2147483647, %v3494_v53  ;;  %v3500_v62 = vadd.f32 %v3450_v21, %v2173_v55  ;;  %v2817_v0 = vpop.f32.mrb[53].mxu0  ;;  %v2079_v2 = vadd.f32 %v2073_v58, %v1984_v29  ;;  %v1355_v29 = vadd.f32 1.4214138, %v1352_v19 }
 0x155   : > { %v2830_v1 = vpop.f32.mrb[53].mxu1  ;;  %v1368_v63 = vmul.f32 %v3482_v24, %v1365_v52  ;;  %vm2184_vm4 = vcmp.ge.f32.partialorder %v3494_v53, 0.0 }
 0x156   : > { %v2193_v3 = vmul.f32 0.3275911, %v2190_v61  ;;  %v3504_v6 = vmul.f32 0.70710677, %v3500_v62  ;;  %v2174_v8 = vadd.f32 %v2168_v59, %v2079_v2  ;;  %v2232_v30 = vsub.f32 0.0, %v2190_v61 }
 0x157   : > { %v1358_v39 = vmul.f32 %v3491_v51, %v1355_v29 }
 0x158   : > { %v2196_v11 = vadd.f32 1.0, %v2193_v3  ;;  %v2191_v12 = vand.u32 2147483647, %v3504_v6  ;;  %v3509_v13 = vadd.f32 %v3450_v21, %v2174_v8  ;;  %v1357_v21 = vmul.f32 %v3485_v33, %v1354_v15 }
 0x159   : > { %v2235_v40 = vmul.f32 %v2232_v30, %v2190_v61  ;;  %v1361_v50 = vadd.f32 -0.28449672, %v1358_v39  ;;  %vm2185_vm6 = vcmp.ge.f32.partialorder %v3504_v6, 0.0 }
 0x15a   : > { %2938 = vrcp.f32 %v2196_v11  ;;  %v2194_v7 = vmul.f32 0.3275911, %v2191_v12  ;;  %v3513_v16 = vmul.f32 0.70710677, %v3509_v13  ;;  %v1360_v36 = vadd.f32 -0.28449672, %v1357_v21 }
 0x15b   : > { %v2233_v46 = vsub.f32 0.0, %v2191_v12  ;;  %v2238_v55 = vmul.f32 1.442695, %v2235_v40  ;;  %v1364_v2 = vmul.f32 %v3491_v51, %v1361_v50 }
 0x15c   : > { %v2197_v20 = vadd.f32 1.0, %v2194_v7  ;;  %v2192_v22 = vand.u32 2147483647, %v3513_v16  ;;  %v1363_v48 = vmul.f32 %v3485_v33, %v1360_v36  ;;  %v1326_v36 = vsel %vm1323_vm2, 1.0, %v2999_v32 }
 0x15d   : > { %v2236_v59 = vmul.f32 %v2233_v46, %v2191_v12  ;;  %v1367_v7 = vadd.f32 0.2548296, %v1364_v2  ;;  %vm2186_vm8 = vcmp.ge.f32.partialorder %v3513_v16, 0.0  ;;  %v2180_v16 = vmul.f32 0.5, %v3509_v13 }
 0x15e   : > { %2940 = vrcp.f32 %v2197_v20  ;;  %v2195_v25 = vmul.f32 0.3275911, %v2192_v22  ;;  %v2234_v60 = vsub.f32 0.0, %v2192_v22  ;;  %v1366_v0 = vadd.f32 0.2548296, %v1363_v48 }
 0x15f   : > { %v2240_v8 = vmul.f32 1.442695, %v2236_v59  ;;  %v1370_v28 = vmul.f32 %v3491_v51, %v1367_v7  ;;  %v1327_v48 = vsel %vm1324_vm3, 1.0, %v2999_v32 }
 0x160   : > { %v2198_v42 = vadd.f32 1.0, %v2195_v25  ;;  %v2237_v9 = vmul.f32 %v2234_v60, %v2192_v22  ;;  %v1369_v14 = vmul.f32 %v3485_v33, %v1366_v0  ;;  %v2178_v0 = vmul.f32 0.5, %v3489_v47 }
 0x162   : > { %2942 = vrcp.f32 %v2198_v42  ;;  %v2242_v20 = vmul.f32 1.442695, %v2237_v9 }
 0x163   : > { %2944 = vpow2.f32 %v1377_v26 }
 0x164   : > { %v2939_v37 = vpop.eup %2938  ;;  %2946 = vpow2.f32 %v1379_v38 }
 0x165   : > { %v2205_v44 = vmul.f32 1.0614054, %v2939_v37  ;;  %2948 = vpow2.f32 %v2238_v55 }
 0x166   : > { %2950 = vpow2.f32 %v1381_v57 }
 0x167   : > { %v2208_v49 = vadd.f32 -1.4531521, %v2205_v44  ;;  %2952 = vpow2.f32 %v2240_v8 }
 0x168   : > { %v3526_v56 = vpop.eup %2940  ;;  %2954 = vpow2.f32 %v2242_v20  ;;  %v1319_v20 = vmul.f32 0.5, %v3468_v45 }
 0x169   : > { %v2211_v58 = vmul.f32 %v2939_v37, %v2208_v49  ;;  %v2206_v61 = vmul.f32 1.0614054, %v3526_v56  ;;  %v2187_v49 = vsel %vm2184_vm4, 1.0, %v2999_v32 }
 0x16b   : > { %v2214_v1 = vadd.f32 1.4214138, %v2211_v58  ;;  %v2209_v3 = vadd.f32 -1.4531521, %v2206_v61 }
 0x16c   : > { %v3531_v4 = vpop.eup %2942 }
 0x16d   : > { %v2217_v5 = vmul.f32 %v2939_v37, %v2214_v1  ;;  %v2945_v10 = vpop.eup %2944  ;;  %v2212_v11 = vmul.f32 %v3526_v56, %v2209_v3  ;;  %v2207_v12 = vmul.f32 1.0614054, %v3531_v4 }
 0x16e   : > { %v1383_v24 = vmul.f32 %v2945_v10, %v1368_v63  ;;  %v2947_v23 = vpop.eup %2946  ;;  %v1317_v63 = vmul.f32 0.5, %v3453_v27  ;;  %v2188_v10 = vsel %vm2185_vm6, 1.0, %v2999_v32 }
 0x16f   : > { %v2220_v15 = vadd.f32 -0.28449672, %v2217_v5  ;;  %v2215_v17 = vadd.f32 1.4214138, %v2212_v11  ;;  %v2210_v18 = vadd.f32 -1.4531521, %v2207_v12  ;;  %v1384_v33 = vmul.f32 %v2947_v23, %v1369_v14  ;;  %v2949_v42 = vpop.eup %2948 }
 0x170   : > { %v1386_v25 = vsub.f32 1.0, %v1383_v24  ;;  %v2951_v39 = vpop.eup %2950  ;;  %v1318_v12 = vmul.f32 0.5, %v3459_v35  ;;  %v2179_v24 = vmul.f32 0.5, %v3500_v62 }
 0x171   : > { %v2223_v19 = vmul.f32 %v2939_v37, %v2220_v15  ;;  %v2218_v22 = vmul.f32 %v3526_v56, %v2215_v17  ;;  %v2213_v21 = vmul.f32 %v3531_v4, %v2210_v18  ;;  %v1387_v41 = vsub.f32 1.0, %v1384_v33  ;;  %v2953_v55 = vpop.eup %2952 }
 0x172   : > { %v1389_v40 = vmul.f32 %v1386_v25, %v1326_v36  ;;  %v1385_v44 = vmul.f32 %v2951_v39, %v1370_v28  ;;  %v2955_v5 = vpop.eup %2954  ;;  %v2189_v15 = vsel %vm2186_vm8, 1.0, %v2999_v32 }
 0x173   : > { %v2226_v26 = vadd.f32 0.2548296, %v2223_v19  ;;  %v2221_v29 = vadd.f32 -0.28449672, %v2218_v22  ;;  %v2216_v30 = vadd.f32 1.4214138, %v2213_v21  ;;  %v1390_v58 = vmul.f32 %v1387_v41, %v1327_v48 }
 0x174   : > { %v1392_v57 = vadd.f32 1.0, %v1389_v40  ;;  %v1388_v60 = vsub.f32 1.0, %v1385_v44 }
 0x175   : > { %v2229_v31 = vmul.f32 %v2939_v37, %v2226_v26  ;;  %v2224_v38 = vmul.f32 %v3526_v56, %v2221_v29  ;;  %v2219_v34 = vmul.f32 %v3531_v4, %v2216_v30  ;;  %v1393_v54 = vadd.f32 1.0, %v1390_v58 }
 0x176   : > { %v1395_v8 = vmul.f32 %v1392_v57, %v1317_v63 }
 0x177   : > { %v2244_v51 = vmul.f32 %v2949_v42, %v2229_v31  ;;  %v2227_v46 = vadd.f32 0.2548296, %v2224_v38  ;;  %v2222_v37 = vadd.f32 -0.28449672, %v2219_v34  ;;  %v1396_v7 = vmul.f32 %v1393_v54, %v1318_v12 }
 0x179   : > { %v2247_v52 = vsub.f32 1.0, %v2244_v51  ;;  %v2230_v43 = vmul.f32 %v3526_v56, %v2227_v46  ;;  %v2225_v50 = vmul.f32 %v3531_v4, %v2222_v37  ;;  %v1328_v56 = vsel %vm1325_vm5, 1.0, %v2999_v32 }
 0x17a   : > { %v1391_v11 = vmul.f32 %v1388_v60, %v1328_v56 }
 0x17b   : > { %v2250_v59 = vmul.f32 %v2247_v52, %v2187_v49  ;;  %v2245_v53 = vmul.f32 %v2953_v55, %v2230_v43  ;;  %v2228_v61 = vadd.f32 0.2548296, %v2225_v50 }
 0x17c   : > { %v1394_v17 = vadd.f32 1.0, %v1391_v11 }
 0x17d   : > { %v2253_v1 = vadd.f32 1.0, %v2250_v59  ;;  %v2248_v2 = vsub.f32 1.0, %v2245_v53  ;;  %v2231_v3 = vmul.f32 %v3531_v4, %v2228_v61 }
 0x17e   : > { %v1397_v21 = vmul.f32 %v1394_v17, %v1319_v20 }
 0x17f   : > { %v2256_v9 = vmul.f32 %v2253_v1, %v2178_v0  ;;  %v2251_v27 = vmul.f32 %v2248_v2, %v2188_v10  ;;  %v2246_v47 = vmul.f32 %v2955_v5, %v2231_v3 }
 0x181   : > { %v2259_v6 = vmax.f32 %v1395_v8, %v2256_v9  ;;  %v2254_v4 = vadd.f32 1.0, %v2251_v27  ;;  %v2249_v14 = vsub.f32 1.0, %v2246_v47 }
 0x183   : > { %2263 = vst.msk [vmem:[%s438_s17] sm:$0xff] %vm2262_vm7, %v2259_v6  ;;  %v2257_v18 = vmul.f32 %v2254_v4, %v2179_v24  ;;  %v2252_v19 = vmul.f32 %v2249_v14, %v2189_v15 }
 0x185   : > { %v2260_v23 = vmax.f32 %v1396_v7, %v2257_v18  ;;  %v2255_v22 = vadd.f32 1.0, %v2252_v19 }
 0x187   : > { %2264 = vst.msk [vmem:[%s438_s17 + $0x8] sm:$0xff] %vm2262_vm7, %v2260_v23  ;;  %v2258_v35 = vmul.f32 %v2255_v22, %v2180_v16 }
 0x189   : > { %v2261_v62 = vmax.f32 %v1397_v21, %v2258_v35 }
 0x18b   : > { %2265 = vst.msk [vmem:[%s438_s17 + $0x10] sm:$0xff] %vm2262_vm7, %v2261_v62 }
 0x18c PF: > { %s16_s25 = sadd.s32 1, %s2994_s25   ;;  %s3591_s21 = smov %s2986_s23 }
 0x18d   : > { %p13_p11 = scmp.ge.s32.totalorder %s16_s25, 14   ;;  %s3592_s22 = smov %s2990_s24 }
 0x18e   : > { %s3593_s23 = smov %s3596_s26  ;;  %s3594_s24 = smov %s3600_s27 }
 0x18f   :  { %15 = sbr.rel (!%p13_p11) target bundleno = 3 (0x3), region = 83 }

// kernel: forward.14
= control target key start
LH: loop header
LB: loop body
LE: loop exit
PB: predicated region body
PF: predicated region fallthrough
CT: control target
= control target key end

     0   :  { %s2918_s21 = smov 0   ;;  %s2920_s22 = smov 0   ;;  %s3220_s0 = inlined_call_operand.vmem [shape: f32[2,8,14,32], index: 0, kind: input, shape index: {}, may-alias: {0,1,2,3}]   ;;  %s3221_s1 = inlined_call_operand.vmem [shape: f32[2,8,14,32], index: 1, kind: input, shape index: {}, may-alias: {0,1,2,3}]   ;;  %s3222_s2 = inlined_call_operand.vmem [shape: f32[2,8,14,32], index: 2, kind: input, shape index: {}, may-alias: {0,1,2,3}]   ;;  %s3223_s3 = inlined_call_operand.vmem [shape: f32[2,8,14,32], index: 3, kind: input, shape index: {}, may-alias: {0,1,2,3}]   ;;  %s3224_s4 = inlined_call_operand.vmem [shape: f32[288,32], index: 4, kind: input, shape index: {}]   ;;  %s3225_s5 = inlined_call_operand.vmem [shape: f32[1,32], index: 5, kind: input, shape index: {}]   ;;  %s3226_s6 = inlined_call_operand.vmem [shape: f32[2,3,12,32], index: 6, kind: output, shape index: {}]  }
   0x1   :  { %s2922_s23 = smov 0   ;;  %s2924_s24 = smov 0  }
   0x2   :  { %s2926_s25 = smov 0  }
   0x3 LB: > { %s25_s26 = sadd.s32 1, %s2872_s23  ;;  %s28_s27 = sadd.s32 1, %s2876_s24  ;;  %s2880_s25 = sphi %s2926_s25, %s16_s25   ;;  %s2876_s24 = sphi %s2924_s24, %s3230_s24   ;;  %s2872_s23 = sphi %s2922_s23, %s3229_s23   ;;  %s2868_s22 = sphi %s2920_s22, %s3228_s22   ;;  %s2864_s21 = sphi %s2918_s21, %s3227_s21  }
   0x4   : > { %p26_p0 = scmp.ge.s32.totalorder %s25_s26, 3  ;;  %p2244_p1 = scmp.ge.s32.totalorder %s2880_s25, 1 }
   0x5   : > { %p308_p2 = scmp.lt.s32.totalorder %s2880_s25, 7 }
   0x6   : > { %s3232_s26 = smov (%p26_p0, %s25_s26), 0  ;;  %s3234_s27 = smov (!%p26_p0, %s28_s27), %s2876_s24 }
   0x7   : > { %p309_p3 = pnand %p2244_p1, %p308_p2  ;;  %p30_p4 = scmp.ge.s32.totalorder %s3234_s27, 2 }
   0x8   : > { %v448_v0 = vld [vmem:[%s3224_s4 + $0x20] sm:$0xff] (!%p309_p3)  ;;  %v449_v1 = vld [vmem:[%s3224_s4 + $0x28] sm:$0xff] (!%p309_p3)  ;;  %v450_v2 = vld [vmem:[%s3224_s4 + $0x30] sm:$0xff] (!%p309_p3)  ;;  %s2960_s10 = sshll.u32 (!%p309_p3), %s2864_s21, 1  ;;  %p381_p5 = scmp.lt.s32.totalorder (!%p309_p3), %s2868_s22, 1  ;;  %vm452_vm0 = vcmask (!%p309_p3), 261120  }
   0x9   : > { %s3236_s27 = smov (%p30_p4, %s3234_s27), 0  ;;  %312 = sbr.rel (%p309_p3) target bundleno = 357 (0x165), region = 44 }
   0xa   : > { %v2608_v3 = vpack.c.bf16 (!%p309_p3), %v449_v1, %v448_v0  ;;  %v451_v4 = vld [vmem:[%s3224_s4 + $0x38] sm:$0xff] (!%p309_p3)  ;;  %p383_p6 = scmp.lt.s32.totalorder (!%p309_p3), %s2960_s10, 7  ;;  %s392_s13 = sadd.s32 (!%p309_p3), 1, %s2960_s10  ;;  %v442_v6 = vld [vmem:[%s3224_s4] sm:$0xff] (!%p309_p3)  ;;  %v443_v7 = vld [vmem:[%s3224_s4 + $0x8] sm:$0xff] (!%p309_p3)  ;;  %vm2072_vm5 = vcmask (!%p309_p3), 257024  }
   0xb   : > { %v2612_v5 = vpack.c.bf16 (!%p309_p3), %v451_v4, %v450_v2  ;;  %v2616_v8 = vpack.c.bf16 (!%p309_p3), %v443_v7, %v442_v6  ;;  %p395_p7 = scmp.lt.s32.totalorder (!%p309_p3), %s392_s13, 7  ;;  %v444_v9 = vld [vmem:[%s3224_s4 + $0x10] sm:$0xff] (!%p309_p3)  ;;  %v445_v10 = vld [vmem:[%s3224_s4 + $0x18] sm:$0xff] (!%p309_p3)  ;;  %s405_s15 = sadd.s32 (!%p309_p3), 2, %s2960_s10  ;;  %v617_v15 = vld [vmem:[%s3224_s4 + $0x40] sm:$0xff] (!%p309_p3) }
   0xc   : > { %2609 = vmatprep.subr.bf16.mxu0 (!%p309_p3), %v2608_v3  ;;  %2681 = vmatprep.subr.bf16.mxu1 (!%p309_p3), %v2608_v3  ;;  %v2620_v13 = vpack.c.bf16 (!%p309_p3), %v445_v10, %v444_v9  ;;  %v618_v16 = vld [vmem:[%s3224_s4 + $0x48] sm:$0xff] (!%p309_p3)  ;;  %p408_p8 = scmp.lt.s32.totalorder (!%p309_p3), %s405_s15, 7  ;;  %v619_v18 = vld [vmem:[%s3224_s4 + $0x50] sm:$0xff] (!%p309_p3)  ;;  %v620_v19 = vld [vmem:[%s3224_s4 + $0x58] sm:$0xff] (!%p309_p3)  ;;  %s418_s11 = sadd.s32 (!%p309_p3), 3, %s2960_s10 }
   0xd   : > { %2611 = vmatpush3.bf16.msra.mxu0 (!%p309_p3), %v2608_v3  ;;  %2683 = vmatpush3.bf16.msra.mxu1 (!%p309_p3), %v2608_v3  ;;  %v2624_v17 = vpack.c.bf16 (!%p309_p3), %v618_v16, %v617_v15  ;;  %v2628_v24 = vpack.c.bf16 (!%p309_p3), %v620_v19, %v619_v18  ;;  %v706_v26 = vld [vmem:[%s3224_s4 + $0x60] sm:$0xff] (!%p309_p3)  ;;  %v707_v27 = vld [vmem:[%s3224_s4 + $0x68] sm:$0xff] (!%p309_p3)  ;;  %v708_v30 = vld [vmem:[%s3224_s4 + $0x70] sm:$0xff] (!%p309_p3)  ;;  %p421_p9 = scmp.lt.s32.totalorder (!%p309_p3), %s418_s11, 7  ;;  %p432_p10 = scmp.lt.s32.totalorder (!%p309_p3), %s2864_s21, 2 }
   0xe   : > { %2613 = vmatprep.subr.bf16.mxu0 (!%p309_p3), %v2612_v5  ;;  %2685 = vmatprep.subr.bf16.mxu1 (!%p309_p3), %v2612_v5  ;;  %v2632_v28 = vpack.c.bf16 (!%p309_p3), %v707_v27, %v706_v26  ;;  %v709_v31 = vld [vmem:[%s3224_s4 + $0x78] sm:$0xff] (!%p309_p3)  ;;  %v795_v35 = vld [vmem:[%s3224_s4 + $0x80] sm:$0xff] (!%p309_p3)  ;;  %v796_v36 = vld [vmem:[%s3224_s4 + $0x88] sm:$0xff] (!%p309_p3) }
   0xf   : > { %v2636_v34 = vpack.c.bf16 (!%p309_p3), %v709_v31, %v708_v30  ;;  %v2640_v37 = vpack.c.bf16 (!%p309_p3), %v796_v36, %v795_v35  ;;  %v797_v39 = vld [vmem:[%s3224_s4 + $0x90] sm:$0xff] (!%p309_p3)  ;;  %v798_v40 = vld [vmem:[%s3224_s4 + $0x98] sm:$0xff] (!%p309_p3)  ;;  %v884_v43 = vld [vmem:[%s3224_s4 + $0xa0] sm:$0xff] (!%p309_p3) }
  0x10   : > { %s3238_s22 = smov (!%p381_p5, %s2868_s22), 1  ;;  %s3240_s13 = smov (!%p395_p7, %s392_s13), 7  ;;  %v2644_v42 = vpack.c.bf16 %v798_v40, %v797_v39  ;;  %v885_v44 = vld [vmem:[%s3224_s4 + $0xa8] sm:$0xff]  ;;  %v886_v47 = vld [vmem:[%s3224_s4 + $0xb0] sm:$0xff]  ;;  %v887_v48 = vld [vmem:[%s3224_s4 + $0xb8] sm:$0xff] }
  0x11   : > { %s384_s18 = scalar_select %p383_p6, %s2960_s10, 7  ;;  %2615 = vmatpush3.bf16.msra.mxu0 %v2612_v5  ;;  %2687 = vmatpush3.bf16.msra.mxu1 %v2612_v5  ;;  %v2648_v45 = vpack.c.bf16 %v885_v44, %v884_v43  ;;  %v2652_v50 = vpack.c.bf16 %v887_v48, %v886_v47  ;;  %v973_v51 = vld [vmem:[%s3224_s4 + $0xc0] sm:$0xff]  ;;  %v974_v52 = vld [vmem:[%s3224_s4 + $0xc8] sm:$0xff]  ;;  %v975_v55 = vld [vmem:[%s3224_s4 + $0xd0] sm:$0xff] }
  0x12   : > { %s2977_s19 = sshll.u32 %s3238_s22, 4  ;;  %2617 = vmatprep.subr.bf16.mxu0 %v2616_v8  ;;  %2689 = vmatprep.subr.bf16.mxu1 %v2616_v8  ;;  %s3242_s15 = smov (!%p408_p8, %s405_s15), 7  ;;  %v2656_v53 = vpack.c.bf16 %v974_v52, %v973_v51  ;;  %v976_v56 = vld [vmem:[%s3224_s4 + $0xd8] sm:$0xff]  ;;  %v1062_v59 = vld [vmem:[%s3224_s4 + $0xe0] sm:$0xff]  ;;  %v1063_v60 = vld [vmem:[%s3224_s4 + $0xe8] sm:$0xff] }
  0x13   : > { %s2246_s20 = sshll.u32 %s384_s18, 1  ;;  %s3244_s11 = smov (!%p421_p9, %s418_s11), 7  ;;  %v2660_v58 = vpack.c.bf16 %v976_v56, %v975_v55  ;;  %v2664_v61 = vpack.c.bf16 %v1063_v60, %v1062_v59  ;;  %v1064_v63 = vld [vmem:[%s3224_s4 + $0xf0] sm:$0xff]  ;;  %v1065_v0 = vld [vmem:[%s3224_s4 + $0xf8] sm:$0xff]  ;;  %v1151_v3 = vld [vmem:[%s3224_s4 + $0x100] sm:$0xff] }
  0x14   : > { %s387_s28 = sadd.s32 %s2977_s19, %s2246_s20  ;;  %s2258_s7 = sshll.u32 %s3244_s11, 1  ;;  %v2668_v2 = vpack.c.bf16 %v1065_v0, %v1064_v63  ;;  %v1152_v4 = vld [vmem:[%s3224_s4 + $0x108] sm:$0xff]  ;;  %v1153_v7 = vld [vmem:[%s3224_s4 + $0x110] sm:$0xff] }
  0x15   : > { %s2248_s9 = sshll.u32 %s387_s28, 3  ;;  %s2250_s28 = sshll.u32 %s3240_s13, 1  ;;  %v2672_v5 = vpack.c.bf16 %v1152_v4, %v1151_v3 }
  0x16   : > { %s2989_s14 = scalar_lea.vmem %s3220_s0, %s2248_s9  ;;  %s399_s29 = sadd.s32 %s2250_s28, %s2977_s19 }
  0x17   : > { %v446_v11 = vld [vmem:[%s2989_s14 + $0x1] sm:$0xff]  ;;  %v447_v12 = vld [vmem:[%s2989_s14 + $0x9] sm:$0xf]  ;;  %s2252_s30 = sshll.u32 %s399_s29, 3  ;;  %s2254_s29 = sshll.u32 %s3242_s15, 1 }
  0x18   : > { %v440_v14 = vld [vmem:[%s2989_s14] sm:$0xff]  ;;  %2418 = vmatprep.mubr.msk.f32.mxu0 %vm452_vm0, %v446_v11  ;;  %s3008_s9 = scalar_lea.vmem %s3221_s1, %s2252_s30  ;;  %v441_v23 = vld [vmem:[%s2989_s14 + $0x8] sm:$0xf]  ;;  %s412_s12 = sadd.s32 %s2254_s29, %s2977_s19 }
  0x19   : > { %2419 = vmatmul.mubr.msk.f32.vlgmr.msra.gmra.mrb[0].mxu0 %vm452_vm0, %v447_v12  ;;  %v3017_v20 = vld [vmem:[%s3008_s9 + $0x1] sm:$0xff]  ;;  %v3020_v21 = vld [vmem:[%s3008_s9 + $0x9] sm:$0xf]  ;;  %s2256_s15 = sshll.u32 %s412_s12, 3  ;;  %s425_s13 = sadd.s32 %s2258_s7, %s2977_s19 }
  0x1a   : > { %2619 = vmatpush3.bf16.msra.mxu0 %v2616_v8  ;;  %2429 = vmatprep.mubr.msk.f32.mxu0 %vm452_vm0, %v440_v14  ;;  %v704_v22 = vld [vmem:[%s3008_s9] sm:$0xff]  ;;  %v705_v29 = vld [vmem:[%s3008_s9 + $0x8] sm:$0xf]  ;;  %s3061_s28 = scalar_lea.vmem %s3222_s2, %s2256_s15  ;;  %s2260_s11 = sshll.u32 %s425_s13, 3 }
  0x1b   : > { %2621 = vmatprep.subr.bf16.mxu0 %v2620_v13  ;;  %2517 = vmatprep.mubr.msk.f32.mxu1 %vm452_vm0, %v3017_v20  ;;  %v615_v25 = vld [vmem:[%s2989_s14 + $0x2] sm:$0xff]  ;;  %v616_v33 = vld [vmem:[%s2989_s14 + $0xa] sm:$0xf]  ;;  %s3124_s20 = scalar_lea.vmem %s3223_s3, %s2260_s11  ;;  %v2281_v14 = vld [vmem:[%s3225_s5] ss:$0 sm:$0xff]  ;;  %s3246_s21 = smov (!%p432_p10, %s2864_s21), 2 }
  0x1c   : > { %2518 = vmatmul.mubr.msk.f32.vlgmr.msra.gmra.mrb[0].mxu1 %vm452_vm0, %v3020_v21  ;;  %v882_v32 = vld [vmem:[%s3008_s9 + $0x2] sm:$0xff]  ;;  %v883_v38 = vld [vmem:[%s3008_s9 + $0xa] sm:$0xf]  ;;  %s2784_s19 = smul.u32 6, %s3238_s22  ;;  %s2261_s14 = sshll.u32 %s3246_s21, 1 }
  0x1d   : > { %2691 = vmatpush3.bf16.msra.mxu1 %v2616_v8  ;;  %2528 = vmatprep.mubr.msk.f32.mxu1 %vm452_vm0, %v704_v22  ;;  %v971_v41 = vld [vmem:[%s3061_s28] sm:$0xff]  ;;  %v972_v46 = vld [vmem:[%s3061_s28 + $0x8] sm:$0xf]  ;;  %v1154_v8 = vld [vmem:[%s3224_s4 + $0x118] sm:$0xff] }
  0x1e   : > { %2623 = vmatpush3.bf16.msra.mxu0 %v2620_v13  ;;  %2693 = vmatprep.subr.bf16.mxu1 %v2620_v13  ;;  %v1060_v49 = vld [vmem:[%s3061_s28 + $0x1] sm:$0xff]  ;;  %v1061_v54 = vld [vmem:[%s3061_s28 + $0x9] sm:$0xf]  ;;  %v2676_v10 = vpack.c.bf16 %v1154_v8, %v1153_v7 }
  0x1f   : > { %2625 = vmatprep.subr.bf16.mxu0 %v2624_v17  ;;  %v1149_v57 = vld [vmem:[%s3061_s28 + $0x2] sm:$0xff]  ;;  %v1150_v62 = vld [vmem:[%s3061_s28 + $0xa] sm:$0xf] }
  0x20   : > { %v1758_v1 = vld [vmem:[%s3124_s20] sm:$0xff]  ;;  %v1759_v6 = vld [vmem:[%s3124_s20 + $0x8] sm:$0xf] }
  0x21   : > { %2430 = vmatmul.mubr.msk.f32.vlgmr.msra.gmra.mrb[0].mxu0 %vm452_vm0, %v441_v23  ;;  %2695 = vmatpush3.bf16.msra.mxu1 %v2620_v13  ;;  %v1843_v9 = vld [vmem:[%s3124_s20 + $0x1] sm:$0xff]  ;;  %v1844_v11 = vld [vmem:[%s3124_s20 + $0x9] sm:$0xf] }
  0x22   : > { %2627 = vmatpush3.bf16.msra.mxu0 %v2624_v17  ;;  %2440 = vmatprep.mubr.msk.f32.mxu0 %vm452_vm0, %v615_v25  ;;  %v1928_v12 = vld [vmem:[%s3124_s20 + $0x2] sm:$0xff]  ;;  %v1929_v13 = vld [vmem:[%s3124_s20 + $0xa] sm:$0xf]  ;;  %s436_s20 = sadd.s32 %s2784_s19, %s2261_s14 }
  0x23   : > { %2629 = vmatprep.subr.bf16.mxu0 %v2628_v24  ;;  %2697 = vmatprep.subr.bf16.mxu1 %v2624_v17  ;;  %s2262_s21 = sshll.u32 %s436_s20, 3 }
  0x24   : > { %2529 = vmatmul.mubr.msk.f32.vlgmr.msra.gmra.mrb[0].mxu1 %vm452_vm0, %v705_v29  ;;  %s438_s30 = scalar_lea.vmem %s3226_s6, %s2262_s21 }
  0x25   : > { %2699 = vmatpush3.bf16.msra.mxu1 %v2624_v17  ;;  %2539 = vmatprep.mubr.msk.f32.mxu1 %vm452_vm0, %v882_v32 }
  0x26   : > { %2631 = vmatpush3.bf16.msra.mxu0 %v2628_v24  ;;  %2701 = vmatprep.subr.bf16.mxu1 %v2628_v24 }
  0x27   : > { %2633 = vmatprep.subr.bf16.mxu0 %v2632_v28 }
  0x29   : > { %2441 = vmatmul.mubr.msk.f32.vlgmr.msra.gmra.mrb[0].mxu0 %vm452_vm0, %v616_v33  ;;  %2703 = vmatpush3.bf16.msra.mxu1 %v2628_v24 }
  0x2a   : > { %2635 = vmatpush3.bf16.msra.mxu0 %v2632_v28  ;;  %2451 = vmatprep.mubr.msk.f32.mxu0 %vm452_vm0, %v704_v22 }
  0x2b   : > { %2637 = vmatprep.subr.bf16.mxu0 %v2636_v34  ;;  %2705 = vmatprep.subr.bf16.mxu1 %v2632_v28 }
  0x2c   : > { %2540 = vmatmul.mubr.msk.f32.vlgmr.msra.gmra.mrb[0].mxu1 %vm452_vm0, %v883_v38 }
  0x2d   : > { %2707 = vmatpush3.bf16.msra.mxu1 %v2632_v28  ;;  %2550 = vmatprep.mubr.msk.f32.mxu1 %vm452_vm0, %v971_v41 }
  0x2e   : > { %2639 = vmatpush3.bf16.msra.mxu0 %v2636_v34  ;;  %2709 = vmatprep.subr.bf16.mxu1 %v2636_v34 }
  0x2f   : > { %2641 = vmatprep.subr.bf16.mxu0 %v2640_v37 }
  0x31   : > { %2452 = vmatmul.mubr.msk.f32.vlgmr.msra.gmra.mrb[0].mxu0 %vm452_vm0, %v705_v29  ;;  %2711 = vmatpush3.bf16.msra.mxu1 %v2636_v34 }
  0x32   : > { %2643 = vmatpush3.bf16.msra.mxu0 %v2640_v37  ;;  %2462 = vmatprep.mubr.msk.f32.mxu0 %vm452_vm0, %v3017_v20 }
  0x33   : > { %2645 = vmatprep.subr.bf16.mxu0 %v2644_v42  ;;  %2713 = vmatprep.subr.bf16.mxu1 %v2640_v37 }
  0x34   : > { %2551 = vmatmul.mubr.msk.f32.vlgmr.msra.gmra.mrb[0].mxu1 %vm452_vm0, %v972_v46 }
  0x35   : > { %2715 = vmatpush3.bf16.msra.mxu1 %v2640_v37  ;;  %2561 = vmatprep.mubr.msk.f32.mxu1 %vm452_vm0, %v1060_v49 }
  0x36   : > { %2647 = vmatpush3.bf16.msra.mxu0 %v2644_v42  ;;  %2717 = vmatprep.subr.bf16.mxu1 %v2644_v42 }
  0x37   : > { %2649 = vmatprep.subr.bf16.mxu0 %v2648_v45 }
  0x39   : > { %2463 = vmatmul.mubr.msk.f32.vlgmr.msra.gmra.mrb[0].mxu0 %vm452_vm0, %v3020_v21  ;;  %2719 = vmatpush3.bf16.msra.mxu1 %v2644_v42 }
  0x3a   : > { %2651 = vmatpush3.bf16.msra.mxu0 %v2648_v45  ;;  %2473 = vmatprep.mubr.msk.f32.mxu0 %vm452_vm0, %v882_v32 }
  0x3b   : > { %2653 = vmatprep.subr.bf16.mxu0 %v2652_v50  ;;  %2721 = vmatprep.subr.bf16.mxu1 %v2648_v45 }
  0x3c   : > { %2562 = vmatmul.mubr.msk.f32.vlgmr.msra.gmra.mrb[0].mxu1 %vm452_vm0, %v1061_v54 }
  0x3d   : > { %2723 = vmatpush3.bf16.msra.mxu1 %v2648_v45  ;;  %2572 = vmatprep.mubr.msk.f32.mxu1 %vm452_vm0, %v1149_v57 }
  0x3e   : > { %2655 = vmatpush3.bf16.msra.mxu0 %v2652_v50  ;;  %2725 = vmatprep.subr.bf16.mxu1 %v2652_v50 }
  0x3f   : > { %2657 = vmatprep.subr.bf16.mxu0 %v2656_v53 }
  0x41   : > { %2474 = vmatmul.mubr.msk.f32.vlgmr.msra.gmra.mrb[0].mxu0 %vm452_vm0, %v883_v38  ;;  %2727 = vmatpush3.bf16.msra.mxu1 %v2652_v50 }
  0x42   : > { %2659 = vmatpush3.bf16.msra.mxu0 %v2656_v53  ;;  %2484 = vmatprep.mubr.msk.f32.mxu0 %vm452_vm0, %v971_v41 }
  0x43   : > { %2661 = vmatprep.subr.bf16.mxu0 %v2660_v58  ;;  %2729 = vmatprep.subr.bf16.mxu1 %v2656_v53 }
  0x44   : > { %2573 = vmatmul.mubr.msk.f32.vlgmr.msra.gmra.mrb[0].mxu1 %vm452_vm0, %v1150_v62 }
  0x45   : > { %2731 = vmatpush3.bf16.msra.mxu1 %v2656_v53  ;;  %2583 = vmatprep.mubr.msk.f32.mxu1 %vm452_vm0, %v1758_v1 }
  0x46   : > { %2663 = vmatpush3.bf16.msra.mxu0 %v2660_v58  ;;  %2733 = vmatprep.subr.bf16.mxu1 %v2660_v58 }
  0x47   : > { %2665 = vmatprep.subr.bf16.mxu0 %v2664_v61 }
  0x49   : > { %2485 = vmatmul.mubr.msk.f32.vlgmr.msra.gmra.mrb[0].mxu0 %vm452_vm0, %v972_v46  ;;  %2735 = vmatpush3.bf16.msra.mxu1 %v2660_v58 }
  0x4a   : > { %2667 = vmatpush3.bf16.msra.mxu0 %v2664_v61  ;;  %2495 = vmatprep.mubr.msk.f32.mxu0 %vm452_vm0, %v1060_v49 }
  0x4b   : > { %2669 = vmatprep.subr.bf16.mxu0 %v2668_v2  ;;  %2737 = vmatprep.subr.bf16.mxu1 %v2664_v61 }
  0x4c   : > { %2584 = vmatmul.mubr.msk.f32.vlgmr.msra.gmra.mrb[0].mxu1 %vm452_vm0, %v1759_v6 }
  0x4d   : > { %2739 = vmatpush3.bf16.msra.mxu1 %v2664_v61  ;;  %2594 = vmatprep.mubr.msk.f32.mxu1 %vm452_vm0, %v1843_v9 }
  0x4e   : > { %2671 = vmatpush3.bf16.msra.mxu0 %v2668_v2  ;;  %2741 = vmatprep.subr.bf16.mxu1 %v2668_v2 }
  0x4f   : > { %2673 = vmatprep.subr.bf16.mxu0 %v2672_v5 }
  0x51   : > { %2496 = vmatmul.mubr.msk.f32.vlgmr.msra.gmra.mrb[0].mxu0 %vm452_vm0, %v1061_v54  ;;  %2743 = vmatpush3.bf16.msra.mxu1 %v2668_v2 }
  0x52   : > { %2675 = vmatpush3.bf16.msra.mxu0 %v2672_v5  ;;  %2506 = vmatprep.mubr.msk.f32.mxu0 %vm452_vm0, %v1149_v57 }
  0x53   : > { %2677 = vmatprep.subr.bf16.mxu0 %v2676_v10  ;;  %2745 = vmatprep.subr.bf16.mxu1 %v2672_v5 }
  0x54   : > { %2595 = vmatmul.mubr.msk.f32.vlgmr.msra.gmra.mrb[0].mxu1 %vm452_vm0, %v1844_v11 }
  0x55   : > { %2747 = vmatpush3.bf16.msra.mxu1 %v2672_v5  ;;  %2605 = vmatprep.mubr.msk.f32.mxu1 %vm452_vm0, %v1928_v12 }
  0x56   : > { %2679 = vmatpush3.bf16.msra.mxu0 %v2676_v10  ;;  %2749 = vmatprep.subr.bf16.mxu1 %v2676_v10 }
  0x59   : > { %2507 = vmatmul.mubr.msk.f32.vlgmr.msra.gmra.mrb[0].mxu0 %vm452_vm0, %v1150_v62  ;;  %2751 = vmatpush3.bf16.msra.mxu1 %v2676_v10 }
  0x5c   : > { %2606 = vmatmul.mubr.msk.f32.vlgmr.msra.gmra.mrb[0].mxu1 %vm452_vm0, %v1929_v13 }
 0x12c   : > { %v2508_v15 = vpop.f32.mrb[0].mxu0 }
 0x12d   : > { %v3166_v16 = vadd.f32 %v2508_v15, %v2281_v14  ;;  %v1227_v17 = vpop.f32.mrb[1].mxu0 }
 0x12e   : > { %v3168_v18 = vadd.f32 %v2281_v14, %v1227_v17 }
 0x12f   : > { %v3171_v19 = vmul.f32 0.70710677, %v3166_v16  ;;  %v2607_v23 = vpop.f32.mrb[0].mxu1 }
 0x130   : > { %v3174_v20 = vmul.f32 0.70710677, %v3168_v18  ;;  %v3178_v25 = vadd.f32 %v2607_v23, %v2281_v14  ;;  %v2002_v26 = vpop.f32.mrb[1].mxu1 }
 0x131   : > { %v1255_v21 = vand.u32 2147483647, %v3171_v19  ;;  %v3180_v28 = vadd.f32 %v2281_v14, %v2002_v26  ;;  %vm1251_vm1 = vcmp.ge.f32.partialorder %v3171_v19, 0.0 }
 0x132   : > { %v1254_v22 = vand.u32 2147483647, %v3174_v20  ;;  %v3183_v30 = vmul.f32 0.70710677, %v3178_v25  ;;  %vm1250_vm2 = vcmp.ge.f32.partialorder %v3174_v20, 0.0 }
 0x133   : > { %v1257_v24 = vmul.f32 0.3275911, %v1255_v21  ;;  %v3186_v32 = vmul.f32 0.70710677, %v3180_v28  ;;  %v1283_v38 = vsub.f32 0.0, %v1255_v21 }
 0x134   : > { %v1256_v27 = vmul.f32 0.3275911, %v1254_v22  ;;  %v2024_v33 = vand.u32 2147483647, %v3183_v30  ;;  %v1282_v39 = vsub.f32 0.0, %v1254_v22  ;;  %vm2020_vm3 = vcmp.ge.f32.partialorder %v3183_v30, 0.0 }
 0x135   : > { %v1259_v29 = vadd.f32 1.0, %v1257_v24  ;;  %v2023_v35 = vand.u32 2147483647, %v3186_v32  ;;  %v1285_v42 = vmul.f32 %v1283_v38, %v1255_v21  ;;  %vm2019_vm4 = vcmp.ge.f32.partialorder %v3186_v32, 0.0 }
 0x136   : > { %v1258_v31 = vadd.f32 1.0, %v1256_v27  ;;  %v2026_v34 = vmul.f32 0.3275911, %v2024_v33  ;;  %v1284_v45 = vmul.f32 %v1282_v39, %v1254_v22  ;;  %v2052_v47 = vsub.f32 0.0, %v2024_v33 }
 0x137   : > { %2826 = vrcp.f32 %v1259_v29  ;;  %v2025_v37 = vmul.f32 0.3275911, %v2023_v35  ;;  %v1288_v49 = vmul.f32 1.442695, %v1285_v42  ;;  %v2051_v53 = vsub.f32 0.0, %v2023_v35 }
 0x138   : > { %2828 = vrcp.f32 %v1258_v31  ;;  %v2028_v36 = vadd.f32 1.0, %v2026_v34  ;;  %v1286_v52 = vmul.f32 1.442695, %v1284_v45  ;;  %v2054_v56 = vmul.f32 %v2052_v47, %v2024_v33 }
 0x139   : > { %v2027_v40 = vadd.f32 1.0, %v2025_v37  ;;  %v2053_v63 = vmul.f32 %v2051_v53, %v2023_v35  ;;  %v2016_v30 = vmul.f32 0.5, %v3178_v25 }
 0x13a   : > { %2830 = vrcp.f32 %v2028_v36  ;;  %v2057_v1 = vmul.f32 1.442695, %v2054_v56  ;;  %v2882_v36 = vmov -1.0  }
 0x13b   : > { %2832 = vrcp.f32 %v2027_v40  ;;  %v2055_v9 = vmul.f32 1.442695, %v2053_v63  ;;  %v1253_v37 = vsel %vm1251_vm1, 1.0, %v2882_v36  ;;  %v1252_v19 = vsel %vm1250_vm2, 1.0, %v2882_v36 }
 0x13c   : > { %2834 = vpow2.f32 %v1288_v49 }
 0x13d   : > { %2836 = vpow2.f32 %v1286_v52 }
 0x13e   : > { %2838 = vpow2.f32 %v2057_v1 }
 0x13f   : > { %2840 = vpow2.f32 %v2055_v9 }
 0x141   : > { %v2827_v41 = vpop.eup %2826 }
 0x142   : > { %v2829_v43 = vpop.eup %2828  ;;  %v1265_v44 = vmul.f32 1.0614054, %v2827_v41 }
 0x143   : > { %v1264_v46 = vmul.f32 1.0614054, %v2829_v43 }
 0x144   : > { %v1267_v48 = vadd.f32 -1.4531521, %v1265_v44  ;;  %v2831_v54 = vpop.eup %2830 }
 0x145   : > { %v1266_v50 = vadd.f32 -1.4531521, %v1264_v46  ;;  %v2034_v58 = vmul.f32 1.0614054, %v2831_v54  ;;  %v2833_v60 = vpop.eup %2832 }
 0x146   : > { %v1269_v51 = vmul.f32 %v2827_v41, %v1267_v48  ;;  %v2033_v2 = vmul.f32 1.0614054, %v2833_v60  ;;  %v2835_v22 = vpop.eup %2834 }
 0x147   : > { %v1268_v55 = vmul.f32 %v2829_v43, %v1266_v50  ;;  %v2036_v62 = vadd.f32 -1.4531521, %v2034_v58  ;;  %v2837_v26 = vpop.eup %2836  ;;  %v2022_v50 = vsel %vm2020_vm3, 1.0, %v2882_v36  ;;  %v1246_v58 = vmul.f32 0.5, %v3168_v18 }
 0x148   : > { %v1271_v57 = vadd.f32 1.4214138, %v1269_v51  ;;  %v2035_v6 = vadd.f32 -1.4531521, %v2033_v2  ;;  %v2839_v42 = vpop.eup %2838  ;;  %v1247_v51 = vmul.f32 0.5, %v3166_v16  ;;  %v2015_v16 = vmul.f32 0.5, %v3180_v28 }
 0x149   : > { %v1270_v59 = vadd.f32 1.4214138, %v1268_v55  ;;  %v2038_v4 = vmul.f32 %v2831_v54, %v2036_v62  ;;  %v2841_v47 = vpop.eup %2840 }
 0x14a   : > { %v1273_v61 = vmul.f32 %v2827_v41, %v1271_v57  ;;  %v2037_v11 = vmul.f32 %v2833_v60, %v2035_v6  ;;  %v2021_v57 = vsel %vm2019_vm4, 1.0, %v2882_v36 }
 0x14b   : > { %v1272_v0 = vmul.f32 %v2829_v43, %v1270_v59  ;;  %v2040_v8 = vadd.f32 1.4214138, %v2038_v4 }
 0x14c   : > { %v1275_v3 = vadd.f32 -0.28449672, %v1273_v61  ;;  %v2039_v15 = vadd.f32 1.4214138, %v2037_v11 }
 0x14d   : > { %v1274_v5 = vadd.f32 -0.28449672, %v1272_v0  ;;  %v2042_v13 = vmul.f32 %v2831_v54, %v2040_v8 }
 0x14e   : > { %v1277_v7 = vmul.f32 %v2827_v41, %v1275_v3  ;;  %v2041_v24 = vmul.f32 %v2833_v60, %v2039_v15 }
 0x14f   : > { %v1276_v10 = vmul.f32 %v2829_v43, %v1274_v5  ;;  %v2044_v21 = vadd.f32 -0.28449672, %v2042_v13 }
 0x150   : > { %v1279_v12 = vadd.f32 0.2548296, %v1277_v7  ;;  %v2043_v33 = vadd.f32 -0.28449672, %v2041_v24 }
 0x151   : > { %v1278_v14 = vadd.f32 0.2548296, %v1276_v10  ;;  %v2046_v29 = vmul.f32 %v2831_v54, %v2044_v21 }
 0x152   : > { %v1281_v17 = vmul.f32 %v2827_v41, %v1279_v12  ;;  %v2045_v39 = vmul.f32 %v2833_v60, %v2043_v33 }
 0x153   : > { %v1280_v23 = vmul.f32 %v2829_v43, %v1278_v14  ;;  %v2048_v35 = vadd.f32 0.2548296, %v2046_v29 }
 0x154   : > { %v1291_v27 = vmul.f32 %v2835_v22, %v1281_v17  ;;  %v2047_v43 = vadd.f32 0.2548296, %v2045_v39 }
 0x155   : > { %v1290_v31 = vmul.f32 %v2837_v26, %v1280_v23  ;;  %v2050_v41 = vmul.f32 %v2831_v54, %v2048_v35 }
 0x156   : > { %v1293_v34 = vsub.f32 1.0, %v1291_v27  ;;  %v2049_v46 = vmul.f32 %v2833_v60, %v2047_v43 }
 0x157   : > { %v1292_v38 = vsub.f32 1.0, %v1290_v31  ;;  %v2060_v44 = vmul.f32 %v2839_v42, %v2050_v41 }
 0x158   : > { %v1295_v40 = vmul.f32 %v1293_v34, %v1253_v37  ;;  %v2059_v20 = vmul.f32 %v2841_v47, %v2049_v46 }
 0x159   : > { %v1294_v45 = vmul.f32 %v1292_v38, %v1252_v19  ;;  %v2062_v49 = vsub.f32 1.0, %v2060_v44 }
 0x15a   : > { %v1297_v48 = vadd.f32 1.0, %v1295_v40  ;;  %v2061_v54 = vsub.f32 1.0, %v2059_v20 }
 0x15b   : > { %v2064_v52 = vmul.f32 %v2062_v49, %v2022_v50  ;;  %v1296_v53 = vadd.f32 1.0, %v1294_v45 }
 0x15c   : > { %v1299_v55 = vmul.f32 %v1297_v48, %v1247_v51  ;;  %v2063_v59 = vmul.f32 %v2061_v54, %v2021_v57 }
 0x15d   : > { %v2066_v56 = vadd.f32 1.0, %v2064_v52  ;;  %v1298_v61 = vmul.f32 %v1296_v53, %v1246_v58 }
 0x15e   : > { %v2065_v32 = vadd.f32 1.0, %v2063_v59 }
 0x15f   : > { %v2068_v60 = vmul.f32 %v2066_v56, %v2016_v30 }
 0x160   : > { %v2067_v63 = vmul.f32 %v2065_v32, %v2015_v16 }
 0x161   : > { %v2070_v62 = vmax.f32 %v1299_v55, %v2068_v60 }
 0x162   : > { %v2069_v0 = vmax.f32 %v1298_v61, %v2067_v63 }
 0x163   : > { %2073 = vst.msk [vmem:[%s438_s30 + $0x8] sm:$0xf] %vm2072_vm5, %v2070_v62 }
 0x164   : > { %2071 = vst.msk [vmem:[%s438_s30] sm:$0xff] %vm452_vm0, %v2069_v0 }
 0x165 PF: > { %s16_s25 = sadd.s32 1, %s2880_s25   ;;  %s3227_s21 = smov %s2872_s23 }
 0x166   : > { %p13_p11 = scmp.ge.s32.totalorder %s16_s25, 8   ;;  %s3228_s22 = smov %s2876_s24 }
 0x167   : > { %s3229_s23 = smov %s3232_s26  ;;  %s3230_s24 = smov %s3236_s27 }
 0x168   :  { %15 = sbr.rel (!%p13_p11) target bundleno = 3 (0x3), region = 83 }

// kernel: forward.15
= control target key start
LH: loop header
LB: loop body
LE: loop exit
PB: predicated region body
PF: predicated region fallthrough
CT: control target
= control target key end

     0   :  { %v538_v3 = vmov 0.0   ;;  %v539_v48 = vmov 1983009808   ;;  %v100_v50 = vlaneseq  ;;  %vm541_vm0 = vmmov 0   ;;  %s792_s1 = inlined_call_operand.vmem [shape: f32[576,128], index: 1, kind: input, shape index: {}]   ;;  %s793_s0 = inlined_call_operand.vmem [shape: f32[2,576], index: 0, kind: input, shape index: {}]   ;;  %s794_s2 = inlined_call_operand.vmem [shape: f32[1,128], index: 2, kind: input, shape index: {}]   ;;  %s795_s3 = inlined_call_operand.vmem [shape: f32[2,128], index: 3, kind: output, shape index: {}]  }
   0x1   :  { %v38_v0 = vld [vmem:[%s792_s1 + $0x80] sm:$0xff]  ;;  %v39_v1 = vld [vmem:[%s792_s1 + $0x88] sm:$0xff]  ;;  %18 = vst [vmem:[#allocation2] sm:$0x3] %v538_v3  ;;  %v40_v12 = vld [vmem:[%s792_s1 + $0x90] sm:$0xff]  ;;  %v98_v49 = vunpack.c.l.s4 %v539_v48  ;;  %vm124_vm1 = vcmask 523264  }
   0x2   :  { %v70_v2 = vld [vmem:[%s792_s1 + $0x180] sm:$0xff]  ;;  %v457_v4 = vpack.c.bf16 %v39_v1, %v38_v0  ;;  %v71_v5 = vld [vmem:[%s792_s1 + $0x188] sm:$0xff]  ;;  %v41_v14 = vld [vmem:[%s792_s1 + $0x98] sm:$0xff]  ;;  %v101_v1 = vshrl.u32 %v100_v50, 7 }
   0x3   :  { %v22_v6 = vld [vmem:[%s792_s1] sm:$0xff]  ;;  %v23_v7 = vld [vmem:[%s792_s1 + $0x8] sm:$0xff]  ;;  %v489_v8 = vpack.c.bf16 %v71_v5, %v70_v2  ;;  %v72_v15 = vld [vmem:[%s792_s1 + $0x190] sm:$0xff]  ;;  %v461_v17 = vpack.c.bf16 %v41_v14, %v40_v12  ;;  %v99_v0 = vunpack.c.0.s8 %v98_v49  ;;  %v540_v49 = vmov 0.0|0.0  }
   0x4   :  { %v459_v9 = vpack.c.bf16 %v23_v7, %v22_v6  ;;  %v54_v10 = vld [vmem:[%s792_s1 + $0x100] sm:$0xff]  ;;  %v55_v11 = vld [vmem:[%s792_s1 + $0x108] sm:$0xff]  ;;  %458 = vmatprep.subr.bf16.mxu0 %v457_v4  ;;  %v73_v16 = vld [vmem:[%s792_s1 + $0x198] sm:$0xff] }
   0x5   :  { %v491_v13 = vpack.c.bf16 %v55_v11, %v54_v10  ;;  %490 = vmatprep.subr.bf16.mxu1 %v489_v8  ;;  %v493_v18 = vpack.c.bf16 %v73_v16, %v72_v15  ;;  %v24_v19 = vld [vmem:[%s792_s1 + $0x10] sm:$0xff]  ;;  %v25_v20 = vld [vmem:[%s792_s1 + $0x18] sm:$0xff]  ;;  %v42_v24 = vld [vmem:[%s792_s1 + $0xa0] sm:$0xff]  ;;  %v102_v15 = vsub.s32 %v99_v0, %v101_v1 }
   0x6   :  { %460 = vmatpush3.bf16.msra.mxu0 %v459_v9  ;;  %v56_v21 = vld [vmem:[%s792_s1 + $0x110] sm:$0xff]  ;;  %v463_v22 = vpack.c.bf16 %v25_v20, %v24_v19  ;;  %v57_v23 = vld [vmem:[%s792_s1 + $0x118] sm:$0xff]  ;;  %v43_v25 = vld [vmem:[%s792_s1 + $0xa8] sm:$0xff] }
   0x7   :  { %492 = vmatpush3.bf16.msra.mxu1 %v491_v13  ;;  %462 = vmatprep.subr.bf16.mxu0 %v461_v17  ;;  %v495_v26 = vpack.c.bf16 %v57_v23, %v56_v21  ;;  %v465_v27 = vpack.c.bf16 %v43_v25, %v42_v24  ;;  %v74_v28 = vld [vmem:[%s792_s1 + $0x1a0] sm:$0xff]  ;;  %v75_v29 = vld [vmem:[%s792_s1 + $0x1a8] sm:$0xff]  ;;  %v44_v36 = vld [vmem:[%s792_s1 + $0xb0] sm:$0xff] }
   0x8   :  { %494 = vmatprep.subr.bf16.mxu1 %v493_v18  ;;  %v26_v30 = vld [vmem:[%s792_s1 + $0x20] sm:$0xff]  ;;  %v497_v31 = vpack.c.bf16 %v75_v29, %v74_v28  ;;  %v27_v32 = vld [vmem:[%s792_s1 + $0x28] sm:$0xff]  ;;  %v45_v37 = vld [vmem:[%s792_s1 + $0xb8] sm:$0xff] }
   0x9   :  { %v58_v33 = vld [vmem:[%s792_s1 + $0x120] sm:$0xff]  ;;  %v59_v34 = vld [vmem:[%s792_s1 + $0x128] sm:$0xff]  ;;  %v467_v35 = vpack.c.bf16 %v27_v32, %v26_v30  ;;  %v76_v38 = vld [vmem:[%s792_s1 + $0x1b0] sm:$0xff]  ;;  %v469_v40 = vpack.c.bf16 %v45_v37, %v44_v36 }
   0xa   :  { %464 = vmatpush3.bf16.msra.mxu0 %v463_v22  ;;  %v499_v39 = vpack.c.bf16 %v59_v34, %v58_v33  ;;  %v77_v41 = vld [vmem:[%s792_s1 + $0x1b8] sm:$0xff]  ;;  %v28_v42 = vld [vmem:[%s792_s1 + $0x30] sm:$0xff]  ;;  %v46_v47 = vld [vmem:[%s792_s1 + $0xc0] sm:$0xff] }
   0xb   :  { %496 = vmatpush3.bf16.msra.mxu1 %v495_v26  ;;  %466 = vmatprep.subr.bf16.mxu0 %v465_v27  ;;  %v29_v43 = vld [vmem:[%s792_s1 + $0x38] sm:$0xff]  ;;  %v501_v44 = vpack.c.bf16 %v77_v41, %v76_v38  ;;  %v60_v45 = vld [vmem:[%s792_s1 + $0x130] sm:$0xff]  ;;  %v47_v51 = vld [vmem:[%s792_s1 + $0xc8] sm:$0xff] }
   0xc   :  { %498 = vmatprep.subr.bf16.mxu1 %v497_v31  ;;  %v61_v46 = vld [vmem:[%s792_s1 + $0x138] sm:$0xff]  ;;  %v78_v52 = vld [vmem:[%s792_s1 + $0x1c0] sm:$0xff]  ;;  %v79_v53 = vld [vmem:[%s792_s1 + $0x1c8] sm:$0xff]  ;;  %v471_v54 = vpack.c.bf16 %v29_v43, %v28_v42  ;;  %v473_v56 = vpack.c.bf16 %v47_v51, %v46_v47 }
   0xd   :  { %v503_v55 = vpack.c.bf16 %v61_v46, %v60_v45  ;;  %v30_v57 = vld [vmem:[%s792_s1 + $0x40] sm:$0xff]  ;;  %v31_v58 = vld [vmem:[%s792_s1 + $0x48] sm:$0xff]  ;;  %v505_v60 = vpack.c.bf16 %v79_v53, %v78_v52  ;;  %v48_v62 = vld [vmem:[%s792_s1 + $0xd0] sm:$0xff] }
   0xe   :  { %468 = vmatpush3.bf16.msra.mxu0 %v467_v35  ;;  %v62_v59 = vld [vmem:[%s792_s1 + $0x140] sm:$0xff]  ;;  %v63_v61 = vld [vmem:[%s792_s1 + $0x148] sm:$0xff]  ;;  %v49_v63 = vld [vmem:[%s792_s1 + $0xd8] sm:$0xff]  ;;  %v475_v5 = vpack.c.bf16 %v31_v58, %v30_v57 }
   0xf   :  { %500 = vmatpush3.bf16.msra.mxu1 %v499_v39  ;;  %470 = vmatprep.subr.bf16.mxu0 %v469_v40  ;;  %v80_v2 = vld [vmem:[%s792_s1 + $0x1d0] sm:$0xff]  ;;  %v81_v4 = vld [vmem:[%s792_s1 + $0x1d8] sm:$0xff]  ;;  %v507_v6 = vpack.c.bf16 %v63_v61, %v62_v59  ;;  %v477_v7 = vpack.c.bf16 %v49_v63, %v48_v62  ;;  %v50_v13 = vld [vmem:[%s792_s1 + $0xe0] sm:$0xff] }
  0x10   :  { %502 = vmatprep.subr.bf16.mxu1 %v501_v44  ;;  %v32_v8 = vld [vmem:[%s792_s1 + $0x50] sm:$0xff]  ;;  %v33_v9 = vld [vmem:[%s792_s1 + $0x58] sm:$0xff]  ;;  %v509_v11 = vpack.c.bf16 %v81_v4, %v80_v2  ;;  %v51_v14 = vld [vmem:[%s792_s1 + $0xe8] sm:$0xff] }
  0x11   :  { %v64_v10 = vld [vmem:[%s792_s1 + $0x150] sm:$0xff]  ;;  %v65_v12 = vld [vmem:[%s792_s1 + $0x158] sm:$0xff]  ;;  %v82_v16 = vld [vmem:[%s792_s1 + $0x1e0] sm:$0xff]  ;;  %v479_v18 = vpack.c.bf16 %v33_v9, %v32_v8  ;;  %v481_v21 = vpack.c.bf16 %v51_v14, %v50_v13 }
  0x12   :  { %472 = vmatpush3.bf16.msra.mxu0 %v471_v54  ;;  %v83_v17 = vld [vmem:[%s792_s1 + $0x1e8] sm:$0xff]  ;;  %v34_v19 = vld [vmem:[%s792_s1 + $0x60] sm:$0xff]  ;;  %v511_v20 = vpack.c.bf16 %v65_v12, %v64_v10  ;;  %v52_v27 = vld [vmem:[%s792_s1 + $0xf0] sm:$0xff] }
  0x13   :  { %504 = vmatpush3.bf16.msra.mxu1 %v503_v55  ;;  %474 = vmatprep.subr.bf16.mxu0 %v473_v56  ;;  %v35_v22 = vld [vmem:[%s792_s1 + $0x68] sm:$0xff]  ;;  %v66_v23 = vld [vmem:[%s792_s1 + $0x160] sm:$0xff]  ;;  %v513_v25 = vpack.c.bf16 %v83_v17, %v82_v16  ;;  %v53_v28 = vld [vmem:[%s792_s1 + $0xf8] sm:$0xff] }
  0x14   :  { %506 = vmatprep.subr.bf16.mxu1 %v505_v60  ;;  %v20_v24 = vld [vmem:[%s793_s0] sm:$0xff]  ;;  %v67_v26 = vld [vmem:[%s792_s1 + $0x168] sm:$0xff]  ;;  %v84_v31 = vld [vmem:[%s792_s1 + $0x1f0] sm:$0xff]  ;;  %v483_v33 = vpack.c.bf16 %v35_v22, %v34_v19  ;;  %v485_v37 = vpack.c.bf16 %v53_v28, %v52_v27 }
  0x15   :  { %v103_v29 = vrot.slane %v20_v24, %v102_v15  ;;  %v96_v30 = vcombine.high %v20_v24, %v20_v24  ;;  %v85_v32 = vld [vmem:[%s792_s1 + $0x1f8] sm:$0xff]  ;;  %v515_v36 = vpack.c.bf16 %v67_v26, %v66_v23  ;;  %v36_v38 = vld [vmem:[%s792_s1 + $0x70] sm:$0xff]  ;;  %v86_v46 = vld [vmem:[%s792_s1 + $0x200] sm:$0xff] }
  0x16   :  { %476 = vmatpush3.bf16.msra.mxu0 %v475_v5  ;;  %v37_v39 = vld [vmem:[%s792_s1 + $0x78] sm:$0xff]  ;;  %v517_v40 = vpack.c.bf16 %v85_v32, %v84_v31  ;;  %v68_v41 = vld [vmem:[%s792_s1 + $0x170] sm:$0xff]  ;;  %v87_v47 = vld [vmem:[%s792_s1 + $0x208] sm:$0xff] }
  0x17   :  { %508 = vmatpush3.bf16.msra.mxu1 %v507_v6  ;;  %478 = vmatprep.subr.bf16.mxu0 %v477_v7  ;;  %v111_v34 = vcombine.high %v103_v29, %v103_v29  ;;  %v110_v35 = vrot.slane %v96_v30, %v102_v15  ;;  %v69_v42 = vld [vmem:[%s792_s1 + $0x178] sm:$0xff]  ;;  %v487_v44 = vpack.c.bf16 %v37_v39, %v36_v38  ;;  %v88_v50 = vld [vmem:[%s792_s1 + $0x210] sm:$0xff]  ;;  %v90_v53 = vld [vmem:[%s792_s1 + $0x220] sm:$0xff] }
  0x18   :  { %510 = vmatprep.subr.bf16.mxu1 %v509_v11  ;;  %v519_v45 = vpack.c.bf16 %v69_v42, %v68_v41  ;;  %v522_v48 = vpack.c.bf16 %v87_v47, %v86_v46  ;;  %v89_v51 = vld [vmem:[%s792_s1 + $0x218] sm:$0xff]  ;;  %v91_v54 = vld [vmem:[%s792_s1 + $0x228] sm:$0xff]  ;;  %v92_v56 = vld [vmem:[%s792_s1 + $0x230] sm:$0xff] }
  0x19   :  { %191 = vmatprep.mubr.f32.mxu0 %v111_v34  ;;  %v112_v43 = vcombine.high %v110_v35, %v110_v35  ;;  %v525_v52 = vpack.c.bf16 %v89_v51, %v88_v50  ;;  %v528_v55 = vpack.c.bf16 %v91_v54, %v90_v53  ;;  %v93_v57 = vld [vmem:[%s792_s1 + $0x238] sm:$0xff]  ;;  %v356_v59 = vld.sshfl [vmem:[%s793_s0 + $0x8] sm:$0x3 pattern:$0x76325410] }
  0x1a   :  { %480 = vmatpush3.bf16.msra.mxu0 %v479_v18  ;;  %v531_v58 = vpack.c.bf16 %v93_v57, %v92_v56  ;;  %v19_v2 = vld [vmem:[#allocation2] sm:$0x3] }
  0x1b   :  { %512 = vmatpush3.bf16.msra.mxu1 %v511_v20  ;;  %482 = vmatprep.subr.bf16.mxu0 %v481_v21  ;;  %v358_v8 = vld [vmem:[%s794_s2] ss:$0 sm:$0xff] }
  0x1c   :  { %514 = vmatprep.subr.bf16.mxu1 %v513_v25  ;;  %261 = vmatprep.mubr.f32.mxu1 %v112_v43 }
  0x1e   :  { %484 = vmatpush3.bf16.msra.mxu0 %v483_v33 }
  0x1f   :  { %516 = vmatpush3.bf16.msra.mxu1 %v515_v36  ;;  %486 = vmatprep.subr.bf16.mxu0 %v485_v37 }
  0x20   :  { %518 = vmatprep.subr.bf16.mxu1 %v517_v40 }
  0x22   :  { %488 = vmatpush3.bf16.msra.mxu0 %v487_v44 }
  0x23   :  { %520 = vmatpush3.bf16.msra.mxu1 %v519_v45  ;;  %521 = vmatprep.subr.bf16.mxu0 %v540_v49 }
  0x25   :  { %192 = vmatmul.mubr.f32.vlgmr.msra.gmra.mrb[0].mxu0 %v103_v29 }
  0x26   :  { %262 = vmatmul.mubr.f32.vlgmr.msra.gmra.mrb[0].mxu1 %v110_v35  ;;  %523 = vmatpush3.bf16.msra.mxu0 %v522_v48 }
  0x27   :  { %524 = vmatprep.subr.bf16.mxu0 %v540_v49  ;;  %454 = vmatprep.mubr.msk.f32.mxu0 %vm541_vm0, %v538_v3 }
  0x2a   :  { %526 = vmatpush3.bf16.msra.mxu0 %v525_v52 }
  0x2b   :  { %527 = vmatprep.subr.bf16.mxu0 %v540_v49 }
  0x2e   :  { %529 = vmatpush3.bf16.msra.mxu0 %v528_v55 }
  0x2f   :  { %530 = vmatprep.subr.bf16.mxu0 %v540_v49 }
  0x32   :  { %532 = vmatpush3.bf16.msra.mxu0 %v531_v58 }
  0x35   :  { %455 = vmatmul.mubr.msk.f32.vlgmr.msra.gmra.mrb[2].mxu0 %vm124_vm1, %v356_v59 }
  0xf8   :  { %v391_v3 = vpop.f32.mrb[0].mxu0 }
  0xf9   :  { %v426_v60 = vpop.f32.mrb[0].mxu1  ;;  %v392_v61 = vpop.f32.mrb[1].mxu0 }
  0xfa   :  { %v393_v62 = vadd.f32 %v392_v61, %v391_v3  ;;  %v427_v63 = vpop.f32.mrb[1].mxu1 }
  0xfb   :  { %v428_v0 = vadd.f32 %v427_v63, %v426_v60 }
  0xfd   :  { %v264_v1 = vadd.f32 %v428_v0, %v393_v62 }
 0x108   :  { %v333_v4 = vpop.f32.mrb[2].mxu0 }
 0x109   :  { %v334_v5 = vadd.f32 %v333_v4, %v264_v1  ;;  %v456_v6 = vpop.f32.mrb[3].mxu0 }
 0x10b   :  { %v337_v7 = vadd.f32 %v334_v5, %v19_v2 }
 0x10d   :  { %338 = vst [vmem:[#allocation2] sm:$0x3] %v337_v7 }
 0x114   :  { %v342_v9 = vld [vmem:[#allocation2] sm:$0x3] }
 0x115   :  { %v350_v10 = vadd.f32 %v358_v8, %v342_v9 }
 0x117   :  { %351 = vst [vmem:[%s795_s3] sm:$0x3] %v350_v10 }

// kernel: forward.17
= control target key start
LH: loop header
LB: loop body
LE: loop exit
PB: predicated region body
PF: predicated region fallthrough
CT: control target
= control target key end

     0   :  { %v160_v0 = vmov 0.0|0.0   ;;  %v161_v4 = vmov 0.0   ;;  %vm162_vm0 = vmmov 0   ;;  %vm29_vm1 = vcmask 523264   ;;  %s216_s1 = inlined_call_operand.vmem [shape: f32[64,128], index: 1, kind: input, shape index: {}]   ;;  %s217_s0 = inlined_call_operand.vmem [shape: f32[1,64], index: 0, kind: input, shape index: {}]   ;;  %s218_s2 = inlined_call_operand.vmem [shape: f32[1,128], index: 2, kind: input, shape index: {}]   ;;  %s219_s3 = inlined_call_operand.vmem [shape: f32[1,128], index: 3, kind: output, shape index: {}]  }
   0x1   :  { %145 = vmatprep.subr.bf16.mxu0 %v160_v0  ;;  %v21_v1 = vld [vmem:[%s216_s1] sm:$0xff]  ;;  %v22_v2 = vld [vmem:[%s216_s1 + $0x8] sm:$0xff]  ;;  %v23_v3 = vld [vmem:[%s216_s1 + $0x10] sm:$0xff]  ;;  %18 = vst [vmem:[#allocation2] sm:$0x1] %v161_v4  ;;  %142 = vmatprep.mubr.msk.f32.mxu0 %vm162_vm0, %v161_v4 }
   0x2   :  { %v146_v5 = vpack.c.bf16 %v22_v2, %v21_v1  ;;  %v24_v6 = vld [vmem:[%s216_s1 + $0x18] sm:$0xff]  ;;  %v25_v8 = vld [vmem:[%s216_s1 + $0x20] sm:$0xff]  ;;  %v26_v9 = vld [vmem:[%s216_s1 + $0x28] sm:$0xff] }
   0x3   :  { %v149_v7 = vpack.c.bf16 %v24_v6, %v23_v3  ;;  %v152_v10 = vpack.c.bf16 %v26_v9, %v25_v8  ;;  %v27_v11 = vld [vmem:[%s216_s1 + $0x30] sm:$0xff]  ;;  %v28_v12 = vld [vmem:[%s216_s1 + $0x38] sm:$0xff]  ;;  %v20_v14 = vld [vmem:[%s217_s0] sm:$0x1] }
   0x4   :  { %147 = vmatpush3.bf16.msra.mxu0 %v146_v5  ;;  %v155_v13 = vpack.c.bf16 %v28_v12, %v27_v11  ;;  %v109_v19 = vld [vmem:[%s218_s2] sm:$0x1] }
   0x5   :  { %148 = vmatprep.subr.bf16.mxu0 %v160_v0 }
   0x8   :  { %150 = vmatpush3.bf16.msra.mxu0 %v149_v7  ;;  %v19_v15 = vld [vmem:[#allocation2] sm:$0x1] }
   0x9   :  { %151 = vmatprep.subr.bf16.mxu0 %v160_v0 }
   0xc   :  { %153 = vmatpush3.bf16.msra.mxu0 %v152_v10 }
   0xd   :  { %154 = vmatprep.subr.bf16.mxu0 %v160_v0 }
  0x10   :  { %156 = vmatpush3.bf16.msra.mxu0 %v155_v13 }
  0x13   :  { %143 = vmatmul.mubr.msk.f32.vlgmr.msra.gmra.mrb[0].mxu0 %vm29_vm1, %v20_v14 }
  0xe6   :  { %v99_v16 = vpop.f32.mrb[0].mxu0 }
  0xe7   :  { %v103_v17 = vadd.f32 %v99_v16, %v19_v15  ;;  %v144_v18 = vpop.f32.mrb[1].mxu0 }
  0xe9   :  { %104 = vst [vmem:[#allocation2] sm:$0x1] %v103_v17 }
  0xf0   :  { %v108_v20 = vld [vmem:[#allocation2] sm:$0x1] }
  0xf1   :  { %v110_v21 = vadd.f32 %v109_v19, %v108_v20 }
  0xf3   :  { %111 = vst [vmem:[%s219_s3] sm:$0x1] %v110_v21 }

// kernel: forward.16
= control target key start
LH: loop header
LB: loop body
LE: loop exit
PB: predicated region body
PF: predicated region fallthrough
CT: control target
= control target key end

     0   :  { %vm26_vm0 = vcmask 1042432   ;;  %vm22_vm1 = vcmask 23552   ;;  %v156_v0 = vmov 0.0   ;;  %vm157_vm2 = vmmov 0   ;;  %s191_s1 = inlined_call_operand.vmem [shape: f32[3,128], index: 1, kind: input, shape index: {}]   ;;  %s192_s0 = inlined_call_operand.vmem [shape: f32[1,3], index: 0, kind: input, shape index: {}]   ;;  %s193_s2 = inlined_call_operand.vmem [shape: f32[1,128], index: 2, kind: input, shape index: {}]   ;;  %s194_s3 = inlined_call_operand.vmem [shape: f32[1,128], index: 3, kind: output, shape index: {}]  }
   0x1   :  { %18 = vst [vmem:[#allocation2] sm:$0x1] %v156_v0  ;;  %144 = vmatprep.subr.mxu0 %v156_v0  ;;  %v21_v1 = vld [vmem:[%s191_s1] sm:$0x7]  ;;  %146 = vmatprep.mubr.msk.f32.mxu0 %vm157_vm2, %v156_v0  ;;  %v158_v30 = vmov -1.0  }
   0x2   :  { %v20_v2 = vld [vmem:[%s192_s0] sm:$0x1]  ;;  %145 = vmatpush3.msk.msra.mxu0 %vm26_vm0, %v21_v1 }
   0x3   :  { %147 = vmatmul.mubr.msk.f32.vlgmr.msra.gmra.mrb[0].mxu0 %vm22_vm1, %v20_v2  ;;  %v106_v7 = vld [vmem:[%s193_s2] sm:$0x1] }
   0x8   :  { %v19_v3 = vld [vmem:[#allocation2] sm:$0x1] }
  0xd6   :  { %v96_v4 = vpop.f32.mrb[0].mxu0 }
  0xd7   :  { %v100_v5 = vadd.f32 %v96_v4, %v19_v3  ;;  %v148_v6 = vpop.f32.mrb[1].mxu0 }
  0xd9   :  { %101 = vst [vmem:[#allocation2] sm:$0x1] %v100_v5 }
  0xe0   :  { %v105_v8 = vld [vmem:[#allocation2] sm:$0x1] }
  0xe1   :  { %v107_v9 = vadd.f32 %v106_v7, %v105_v8 }
  0xe3   :  { %v109_v10 = vmul.f32 0.70710677, %v107_v9  ;;  %v108_v33 = vmul.f32 0.5, %v107_v9 }
  0xe5   :  { %v112_v11 = vand.u32 2147483647, %v109_v10  ;;  %vm110_vm3 = vcmp.ge.f32.partialorder %v109_v10, 0.0 }
  0xe6   :  { %v111_v31 = vsel %vm110_vm3, 1.0, %v158_v30 }
  0xe7   :  { %v113_v12 = vmul.f32 0.3275911, %v112_v11  ;;  %v126_v14 = vsub.f32 0.0, %v112_v11 }
  0xe9   :  { %v114_v13 = vadd.f32 1.0, %v113_v12  ;;  %v127_v16 = vmul.f32 %v126_v14, %v112_v11 }
  0xeb   :  { %152 = vrcp.f32 %v114_v13  ;;  %v128_v19 = vmul.f32 1.442695, %v127_v16 }
  0xed   :  { %154 = vpow2.f32 %v128_v19 }
  0xf5   :  { %v153_v15 = vpop.eup %152 }
  0xf6   :  { %v117_v17 = vmul.f32 1.0614054, %v153_v15 }
  0xf7   :  { %v155_v27 = vpop.eup %154 }
  0xf8   :  { %v118_v18 = vadd.f32 -1.4531521, %v117_v17 }
  0xfa   :  { %v119_v20 = vmul.f32 %v153_v15, %v118_v18 }
  0xfc   :  { %v120_v21 = vadd.f32 1.4214138, %v119_v20 }
  0xfe   :  { %v121_v22 = vmul.f32 %v153_v15, %v120_v21 }
 0x100   :  { %v122_v23 = vadd.f32 -0.28449672, %v121_v22 }
 0x102   :  { %v123_v24 = vmul.f32 %v153_v15, %v122_v23 }
 0x104   :  { %v124_v25 = vadd.f32 0.2548296, %v123_v24 }
 0x106   :  { %v125_v26 = vmul.f32 %v153_v15, %v124_v25 }
 0x108   :  { %v130_v28 = vmul.f32 %v155_v27, %v125_v26 }
 0x10a   :  { %v131_v29 = vsub.f32 1.0, %v130_v28 }
 0x10c   :  { %v132_v32 = vmul.f32 %v131_v29, %v111_v31 }
 0x10e   :  { %v133_v34 = vadd.f32 1.0, %v132_v32 }
 0x110   :  { %v134_v35 = vmul.f32 %v133_v34, %v108_v33 }
 0x112   :  { %135 = vst [vmem:[%s194_s3] sm:$0x1] %v134_v35 }

// kernel: forward.18
= control target key start
LH: loop header
LB: loop body
LE: loop exit
PB: predicated region body
PF: predicated region fallthrough
CT: control target
= control target key end

     0   :  { %vm26_vm0 = vcmask 1042432   ;;  %vm22_vm1 = vcmask 23552   ;;  %v163_v0 = vmov 0.0   ;;  %vm164_vm2 = vmmov 0   ;;  %s198_s1 = inlined_call_operand.vmem [shape: f32[3,128], index: 1, kind: input, shape index: {}]   ;;  %s199_s0 = inlined_call_operand.vmem [shape: f32[2,3], index: 0, kind: input, shape index: {}]   ;;  %s200_s2 = inlined_call_operand.vmem [shape: f32[1,128], index: 2, kind: input, shape index: {}]   ;;  %s201_s3 = inlined_call_operand.vmem [shape: f32[2,128], index: 3, kind: output, shape index: {}]  }
   0x1   :  { %18 = vst [vmem:[#allocation2] sm:$0x3] %v163_v0  ;;  %151 = vmatprep.subr.mxu0 %v163_v0  ;;  %v21_v1 = vld [vmem:[%s198_s1] sm:$0x7]  ;;  %153 = vmatprep.mubr.msk.f32.mxu0 %vm164_vm2, %v163_v0  ;;  %v165_v30 = vmov -1.0  }
   0x2   :  { %v20_v2 = vld [vmem:[%s199_s0] sm:$0x3]  ;;  %152 = vmatpush3.msk.msra.mxu0 %vm26_vm0, %v21_v1 }
   0x3   :  { %154 = vmatmul.mubr.msk.f32.vlgmr.msra.gmra.mrb[0].mxu0 %vm22_vm1, %v20_v2  ;;  %v148_v7 = vld [vmem:[%s200_s2] ss:$0 sm:$0xff] }
   0x8   :  { %v19_v3 = vld [vmem:[#allocation2] sm:$0x3] }
  0xd6   :  { %v96_v4 = vpop.f32.mrb[0].mxu0 }
  0xd7   :  { %v100_v5 = vadd.f32 %v96_v4, %v19_v3  ;;  %v155_v6 = vpop.f32.mrb[1].mxu0 }
  0xd9   :  { %101 = vst [vmem:[#allocation2] sm:$0x3] %v100_v5 }
  0xe0   :  { %v105_v8 = vld [vmem:[#allocation2] sm:$0x3] }
  0xe1   :  { %v113_v9 = vadd.f32 %v148_v7, %v105_v8 }
  0xe3   :  { %v115_v10 = vmul.f32 0.70710677, %v113_v9  ;;  %v114_v33 = vmul.f32 0.5, %v113_v9 }
  0xe5   :  { %v118_v11 = vand.u32 2147483647, %v115_v10  ;;  %vm116_vm3 = vcmp.ge.f32.partialorder %v115_v10, 0.0 }
  0xe6   :  { %v117_v31 = vsel %vm116_vm3, 1.0, %v165_v30 }
  0xe7   :  { %v119_v12 = vmul.f32 0.3275911, %v118_v11  ;;  %v132_v14 = vsub.f32 0.0, %v118_v11 }
  0xe9   :  { %v120_v13 = vadd.f32 1.0, %v119_v12  ;;  %v133_v16 = vmul.f32 %v132_v14, %v118_v11 }
  0xeb   :  { %159 = vrcp.f32 %v120_v13  ;;  %v134_v19 = vmul.f32 1.442695, %v133_v16 }
  0xed   :  { %161 = vpow2.f32 %v134_v19 }
  0xf5   :  { %v160_v15 = vpop.eup %159 }
  0xf6   :  { %v123_v17 = vmul.f32 1.0614054, %v160_v15 }
  0xf7   :  { %v162_v27 = vpop.eup %161 }
  0xf8   :  { %v124_v18 = vadd.f32 -1.4531521, %v123_v17 }
  0xfa   :  { %v125_v20 = vmul.f32 %v160_v15, %v124_v18 }
  0xfc   :  { %v126_v21 = vadd.f32 1.4214138, %v125_v20 }
  0xfe   :  { %v127_v22 = vmul.f32 %v160_v15, %v126_v21 }
 0x100   :  { %v128_v23 = vadd.f32 -0.28449672, %v127_v22 }
 0x102   :  { %v129_v24 = vmul.f32 %v160_v15, %v128_v23 }
 0x104   :  { %v130_v25 = vadd.f32 0.2548296, %v129_v24 }
 0x106   :  { %v131_v26 = vmul.f32 %v160_v15, %v130_v25 }
 0x108   :  { %v136_v28 = vmul.f32 %v162_v27, %v131_v26 }
 0x10a   :  { %v137_v29 = vsub.f32 1.0, %v136_v28 }
 0x10c   :  { %v138_v32 = vmul.f32 %v137_v29, %v117_v31 }
 0x10e   :  { %v139_v34 = vadd.f32 1.0, %v138_v32 }
 0x110   :  { %v140_v35 = vmul.f32 %v139_v34, %v114_v33 }
 0x112   :  { %141 = vst [vmem:[%s201_s3] sm:$0x3] %v140_v35 }

// kernel: forward.19
= control target key start
LH: loop header
LB: loop body
LE: loop exit
PB: predicated region body
PF: predicated region fallthrough
CT: control target
= control target key end

     0   :  { %v199_v0 = vmov 0.0|0.0   ;;  %v200_v4 = vmov 0.0   ;;  %vm201_vm0 = vmmov 0   ;;  %vm29_vm1 = vcmask 523264   ;;  %s256_s1 = inlined_call_operand.vmem [shape: f32[64,128], index: 1, kind: input, shape index: {}]   ;;  %s257_s0 = inlined_call_operand.vmem [shape: f32[2,64], index: 0, kind: input, shape index: {}]   ;;  %s258_s2 = inlined_call_operand.vmem [shape: f32[1,128], index: 2, kind: input, shape index: {}]   ;;  %s259_s3 = inlined_call_operand.vmem [shape: f32[2,128], index: 3, kind: output, shape index: {}]  }
   0x1   :  { %179 = vmatprep.subr.bf16.mxu0 %v199_v0  ;;  %v21_v1 = vld [vmem:[%s256_s1] sm:$0xff]  ;;  %v22_v2 = vld [vmem:[%s256_s1 + $0x8] sm:$0xff]  ;;  %v23_v3 = vld [vmem:[%s256_s1 + $0x10] sm:$0xff]  ;;  %18 = vst [vmem:[#allocation2] sm:$0x3] %v200_v4  ;;  %176 = vmatprep.mubr.msk.f32.mxu0 %vm201_vm0, %v200_v4  ;;  %v202_v42 = vmov -1.0  }
   0x2   :  { %v180_v5 = vpack.c.bf16 %v22_v2, %v21_v1  ;;  %v24_v6 = vld [vmem:[%s256_s1 + $0x18] sm:$0xff]  ;;  %v25_v8 = vld [vmem:[%s256_s1 + $0x20] sm:$0xff]  ;;  %v26_v9 = vld [vmem:[%s256_s1 + $0x28] sm:$0xff] }
   0x3   :  { %v183_v7 = vpack.c.bf16 %v24_v6, %v23_v3  ;;  %v186_v10 = vpack.c.bf16 %v26_v9, %v25_v8  ;;  %v27_v11 = vld [vmem:[%s256_s1 + $0x30] sm:$0xff]  ;;  %v28_v12 = vld [vmem:[%s256_s1 + $0x38] sm:$0xff]  ;;  %v20_v14 = vld [vmem:[%s257_s0] sm:$0x3] }
   0x4   :  { %181 = vmatpush3.bf16.msra.mxu0 %v180_v5  ;;  %v189_v13 = vpack.c.bf16 %v28_v12, %v27_v11  ;;  %v150_v19 = vld [vmem:[%s258_s2] ss:$0 sm:$0xff] }
   0x5   :  { %182 = vmatprep.subr.bf16.mxu0 %v199_v0 }
   0x8   :  { %184 = vmatpush3.bf16.msra.mxu0 %v183_v7  ;;  %v19_v15 = vld [vmem:[#allocation2] sm:$0x3] }
   0x9   :  { %185 = vmatprep.subr.bf16.mxu0 %v199_v0 }
   0xc   :  { %187 = vmatpush3.bf16.msra.mxu0 %v186_v10 }
   0xd   :  { %188 = vmatprep.subr.bf16.mxu0 %v199_v0 }
  0x10   :  { %190 = vmatpush3.bf16.msra.mxu0 %v189_v13 }
  0x13   :  { %177 = vmatmul.mubr.msk.f32.vlgmr.msra.gmra.mrb[0].mxu0 %vm29_vm1, %v20_v14 }
  0xe6   :  { %v99_v16 = vpop.f32.mrb[0].mxu0 }
  0xe7   :  { %v103_v17 = vadd.f32 %v99_v16, %v19_v15  ;;  %v178_v18 = vpop.f32.mrb[1].mxu0 }
  0xe9   :  { %104 = vst [vmem:[#allocation2] sm:$0x3] %v103_v17 }
  0xf0   :  { %v108_v20 = vld [vmem:[#allocation2] sm:$0x3] }
  0xf1   :  { %v116_v21 = vadd.f32 %v150_v19, %v108_v20 }
  0xf3   :  { %v118_v22 = vmul.f32 0.70710677, %v116_v21  ;;  %v117_v45 = vmul.f32 0.5, %v116_v21 }
  0xf5   :  { %v121_v23 = vand.u32 2147483647, %v118_v22  ;;  %vm119_vm2 = vcmp.ge.f32.partialorder %v118_v22, 0.0 }
  0xf6   :  { %v120_v43 = vsel %vm119_vm2, 1.0, %v202_v42 }
  0xf7   :  { %v122_v24 = vmul.f32 0.3275911, %v121_v23  ;;  %v135_v26 = vsub.f32 0.0, %v121_v23 }
  0xf9   :  { %v123_v25 = vadd.f32 1.0, %v122_v24  ;;  %v136_v28 = vmul.f32 %v135_v26, %v121_v23 }
  0xfb   :  { %195 = vrcp.f32 %v123_v25  ;;  %v137_v31 = vmul.f32 1.442695, %v136_v28 }
  0xfd   :  { %197 = vpow2.f32 %v137_v31 }
 0x105   :  { %v196_v27 = vpop.eup %195 }
 0x106   :  { %v126_v29 = vmul.f32 1.0614054, %v196_v27 }
 0x107   :  { %v198_v39 = vpop.eup %197 }
 0x108   :  { %v127_v30 = vadd.f32 -1.4531521, %v126_v29 }
 0x10a   :  { %v128_v32 = vmul.f32 %v196_v27, %v127_v30 }
 0x10c   :  { %v129_v33 = vadd.f32 1.4214138, %v128_v32 }
 0x10e   :  { %v130_v34 = vmul.f32 %v196_v27, %v129_v33 }
 0x110   :  { %v131_v35 = vadd.f32 -0.28449672, %v130_v34 }
 0x112   :  { %v132_v36 = vmul.f32 %v196_v27, %v131_v35 }
 0x114   :  { %v133_v37 = vadd.f32 0.2548296, %v132_v36 }
 0x116   :  { %v134_v38 = vmul.f32 %v196_v27, %v133_v37 }
 0x118   :  { %v139_v40 = vmul.f32 %v198_v39, %v134_v38 }
 0x11a   :  { %v140_v41 = vsub.f32 1.0, %v139_v40 }
 0x11c   :  { %v141_v44 = vmul.f32 %v140_v41, %v120_v43 }
 0x11e   :  { %v142_v46 = vadd.f32 1.0, %v141_v44 }
 0x120   :  { %v143_v47 = vmul.f32 %v142_v46, %v117_v45 }
 0x122   :  { %144 = vst [vmem:[%s259_s3] sm:$0x3] %v143_v47 }

// kernel: forward.20
= control target key start
LH: loop header
LB: loop body
LE: loop exit
PB: predicated region body
PF: predicated region fallthrough
CT: control target
= control target key end

     0   :  { %v557_v3 = vmov 0.0   ;;  %vm559_vm0 = vmmov 0   ;;  %vm19_vm1 = vcmask 517120   ;;  %s840_s1 = inlined_call_operand.vmem [shape: f32[128,576], index: 1, kind: input, shape index: {}]   ;;  %s841_s0 = inlined_call_operand.vmem [shape: f32[2,128], index: 0, kind: input, shape index: {}]   ;;  %s842_s2 = inlined_call_operand.vmem [shape: f32[1,576], index: 2, kind: input, shape index: {}]   ;;  %s843_s3 = inlined_call_operand.vmem [shape: f32[2,576], index: 3, kind: output, shape index: {}]  }
   0x1   :  { %v25_v0 = vld [vmem:[%s840_s1 + $0x8] sm:$0xff]  ;;  %v30_v1 = vld [vmem:[%s840_s1 + $0x30] sm:$0xff]  ;;  %v27_v2 = vld [vmem:[%s840_s1 + $0x18] sm:$0xff]  ;;  %168 = vmatprep.mubr.f32.mxu0 %v557_v3  ;;  %239 = vmatprep.mubr.f32.mxu1 %v557_v3  ;;  %20 = vst.msk [vmem:[#allocation2 + $0x8] sm:$0x3] %vm19_vm1, %v557_v3 }
   0x2   :  { %v465_v4 = vpack.c.bf16 %v30_v1, %v25_v0  ;;  %v32_v5 = vld [vmem:[%s840_s1 + $0x40] sm:$0xff]  ;;  %v29_v7 = vld [vmem:[%s840_s1 + $0x28] sm:$0xff]  ;;  %v26_v10 = vld [vmem:[%s840_s1 + $0x10] sm:$0xff] }
   0x3   :  { %v24_v6 = vld [vmem:[%s840_s1] sm:$0xff]  ;;  %v497_v8 = vpack.c.bf16 %v32_v5, %v27_v2  ;;  %v31_v11 = vld [vmem:[%s840_s1 + $0x38] sm:$0xff]  ;;  %v37_v15 = vld [vmem:[%s840_s1 + $0x68] sm:$0xff] }
   0x4   :  { %v467_v9 = vpack.c.bf16 %v29_v7, %v24_v6  ;;  %v35_v12 = vld [vmem:[%s840_s1 + $0x58] sm:$0xff]  ;;  %466 = vmatprep.subr.bf16.mxu0 %v465_v4  ;;  %v499_v13 = vpack.c.bf16 %v31_v11, %v26_v10  ;;  %v40_v14 = vld [vmem:[%s840_s1 + $0x80] sm:$0xff]  ;;  %v42_v16 = vld [vmem:[%s840_s1 + $0x90] sm:$0xff] }
   0x5   :  { %498 = vmatprep.subr.bf16.mxu1 %v497_v8  ;;  %v469_v17 = vpack.c.bf16 %v40_v14, %v35_v12  ;;  %v501_v18 = vpack.c.bf16 %v42_v16, %v37_v15  ;;  %v34_v19 = vld [vmem:[%s840_s1 + $0x50] sm:$0xff]  ;;  %v39_v20 = vld [vmem:[%s840_s1 + $0x78] sm:$0xff]  ;;  %v36_v21 = vld [vmem:[%s840_s1 + $0x60] sm:$0xff] }
   0x6   :  { %468 = vmatpush1.bf16.msra.mxu0 %v467_v9  ;;  %500 = vmatpush1.bf16.msra.mxu1 %v499_v13  ;;  %v471_v22 = vpack.c.bf16 %v39_v20, %v34_v19  ;;  %v41_v23 = vld [vmem:[%s840_s1 + $0x88] sm:$0xff]  ;;  %v50_v25 = vld [vmem:[%s840_s1 + $0xd0] sm:$0xff]  ;;  %v47_v28 = vld [vmem:[%s840_s1 + $0xb8] sm:$0xff] }
   0x7   :  { %v45_v24 = vld [vmem:[%s840_s1 + $0xa8] sm:$0xff]  ;;  %470 = vmatprep.subr.bf16.mxu0 %v469_v17  ;;  %502 = vmatprep.subr.bf16.mxu1 %v501_v18  ;;  %v503_v26 = vpack.c.bf16 %v41_v23, %v36_v21  ;;  %v52_v29 = vld [vmem:[%s840_s1 + $0xe0] sm:$0xff]  ;;  %v46_v33 = vld [vmem:[%s840_s1 + $0xb0] sm:$0xff] }
   0x8   :  { %v473_v27 = vpack.c.bf16 %v50_v25, %v45_v24  ;;  %v44_v30 = vld [vmem:[%s840_s1 + $0xa0] sm:$0xff]  ;;  %v505_v31 = vpack.c.bf16 %v52_v29, %v47_v28  ;;  %v49_v32 = vld [vmem:[%s840_s1 + $0xc8] sm:$0xff]  ;;  %v51_v34 = vld [vmem:[%s840_s1 + $0xd8] sm:$0xff] }
   0x9   :  { %v475_v35 = vpack.c.bf16 %v49_v32, %v44_v30  ;;  %v55_v36 = vld [vmem:[%s840_s1 + $0xf8] sm:$0xff]  ;;  %v60_v37 = vld [vmem:[%s840_s1 + $0x120] sm:$0xff]  ;;  %v57_v38 = vld [vmem:[%s840_s1 + $0x108] sm:$0xff]  ;;  %v507_v39 = vpack.c.bf16 %v51_v34, %v46_v33 }
   0xa   :  { %472 = vmatpush1.bf16.msra.mxu0 %v471_v22  ;;  %504 = vmatpush1.bf16.msra.mxu1 %v503_v26  ;;  %v477_v40 = vpack.c.bf16 %v60_v37, %v55_v36  ;;  %v62_v41 = vld [vmem:[%s840_s1 + $0x130] sm:$0xff]  ;;  %v59_v43 = vld [vmem:[%s840_s1 + $0x118] sm:$0xff]  ;;  %v56_v45 = vld [vmem:[%s840_s1 + $0x100] sm:$0xff] }
   0xb   :  { %474 = vmatprep.subr.bf16.mxu0 %v473_v27  ;;  %v54_v42 = vld [vmem:[%s840_s1 + $0xf0] sm:$0xff]  ;;  %506 = vmatprep.subr.bf16.mxu1 %v505_v31  ;;  %v509_v44 = vpack.c.bf16 %v62_v41, %v57_v38  ;;  %v61_v46 = vld [vmem:[%s840_s1 + $0x128] sm:$0xff]  ;;  %v67_v49 = vld [vmem:[%s840_s1 + $0x158] sm:$0xff]  ;;  %v558_v38 = vmov 0.0|0.0  }
   0xc   :  { %v65_v47 = vld [vmem:[%s840_s1 + $0x148] sm:$0xff]  ;;  %v70_v48 = vld [vmem:[%s840_s1 + $0x170] sm:$0xff]  ;;  %v72_v50 = vld [vmem:[%s840_s1 + $0x180] sm:$0xff]  ;;  %v479_v51 = vpack.c.bf16 %v59_v43, %v54_v42  ;;  %v511_v52 = vpack.c.bf16 %v61_v46, %v56_v45 }
   0xd   :  { %v481_v53 = vpack.c.bf16 %v70_v48, %v65_v47  ;;  %v64_v54 = vld [vmem:[%s840_s1 + $0x140] sm:$0xff]  ;;  %v69_v55 = vld [vmem:[%s840_s1 + $0x168] sm:$0xff]  ;;  %v66_v56 = vld [vmem:[%s840_s1 + $0x150] sm:$0xff]  ;;  %v513_v57 = vpack.c.bf16 %v72_v50, %v67_v49 }
   0xe   :  { %476 = vmatpush1.bf16.msra.mxu0 %v475_v35  ;;  %508 = vmatpush1.bf16.msra.mxu1 %v507_v39  ;;  %v71_v58 = vld [vmem:[%s840_s1 + $0x178] sm:$0xff]  ;;  %v80_v60 = vld [vmem:[%s840_s1 + $0x1c0] sm:$0xff]  ;;  %v77_v61 = vld [vmem:[%s840_s1 + $0x1a8] sm:$0xff]  ;;  %v483_v63 = vpack.c.bf16 %v69_v55, %v64_v54 }
   0xf   :  { %478 = vmatprep.subr.bf16.mxu0 %v477_v40  ;;  %510 = vmatprep.subr.bf16.mxu1 %v509_v44  ;;  %v75_v59 = vld [vmem:[%s840_s1 + $0x198] sm:$0xff]  ;;  %v82_v62 = vld [vmem:[%s840_s1 + $0x1d0] sm:$0xff]  ;;  %v515_v0 = vpack.c.bf16 %v71_v58, %v66_v56  ;;  %v76_v5 = vld [vmem:[%s840_s1 + $0x1a0] sm:$0xff] }
  0x10   :  { %v485_v1 = vpack.c.bf16 %v80_v60, %v75_v59  ;;  %v74_v2 = vld [vmem:[%s840_s1 + $0x190] sm:$0xff]  ;;  %v79_v4 = vld [vmem:[%s840_s1 + $0x1b8] sm:$0xff]  ;;  %v517_v6 = vpack.c.bf16 %v82_v62, %v77_v61  ;;  %v81_v7 = vld [vmem:[%s840_s1 + $0x1c8] sm:$0xff]  ;;  %v326_v60 = vlaneseq }
  0x11   :  { %v85_v8 = vld [vmem:[%s840_s1 + $0x1e8] sm:$0xff]  ;;  %v90_v9 = vld [vmem:[%s840_s1 + $0x210] sm:$0xff]  ;;  %v87_v10 = vld [vmem:[%s840_s1 + $0x1f8] sm:$0xff]  ;;  %v487_v12 = vpack.c.bf16 %v79_v4, %v74_v2  ;;  %v519_v13 = vpack.c.bf16 %v81_v7, %v76_v5  ;;  %v560_v2 = vmov 1983009808  }
  0x12   :  { %480 = vmatpush1.bf16.msra.mxu0 %v479_v51  ;;  %512 = vmatpush1.bf16.msra.mxu1 %v511_v52  ;;  %v92_v11 = vld [vmem:[%s840_s1 + $0x220] sm:$0xff]  ;;  %v489_v14 = vpack.c.bf16 %v90_v9, %v85_v8  ;;  %v89_v16 = vld [vmem:[%s840_s1 + $0x208] sm:$0xff]  ;;  %v86_v17 = vld [vmem:[%s840_s1 + $0x1f0] sm:$0xff]  ;;  %v327_v61 = vshrl.u32 %v326_v60, 7  ;;  %v324_v4 = vunpack.c.l.s4 %v560_v2 }
  0x13   :  { %482 = vmatprep.subr.bf16.mxu0 %v481_v53  ;;  %514 = vmatprep.subr.bf16.mxu1 %v513_v57  ;;  %v84_v15 = vld [vmem:[%s840_s1 + $0x1e0] sm:$0xff]  ;;  %v521_v18 = vpack.c.bf16 %v92_v11, %v87_v10  ;;  %v91_v19 = vld [vmem:[%s840_s1 + $0x218] sm:$0xff]  ;;  %v97_v22 = vld [vmem:[%s840_s1 + $0x248] sm:$0xff] }
  0x14   :  { %v95_v20 = vld [vmem:[%s840_s1 + $0x238] sm:$0xff]  ;;  %v100_v21 = vld [vmem:[%s840_s1 + $0x260] sm:$0xff]  ;;  %v102_v23 = vld [vmem:[%s840_s1 + $0x270] sm:$0xff]  ;;  %v491_v24 = vpack.c.bf16 %v89_v16, %v84_v15  ;;  %v523_v25 = vpack.c.bf16 %v91_v19, %v86_v17  ;;  %v361_v62 = vsub.s32 0, %v327_v61  ;;  %v325_v10 = vunpack.c.0.s8 %v324_v4 }
  0x15   :  { %v493_v26 = vpack.c.bf16 %v100_v21, %v95_v20  ;;  %v94_v27 = vld [vmem:[%s840_s1 + $0x230] sm:$0xff]  ;;  %v99_v28 = vld [vmem:[%s840_s1 + $0x258] sm:$0xff]  ;;  %v525_v29 = vpack.c.bf16 %v102_v23, %v97_v22  ;;  %v96_v30 = vld [vmem:[%s840_s1 + $0x240] sm:$0xff] }
  0x16   :  { %484 = vmatpush1.bf16.msra.mxu0 %v483_v63  ;;  %516 = vmatpush1.bf16.msra.mxu1 %v515_v0  ;;  %v101_v31 = vld [vmem:[%s840_s1 + $0x268] sm:$0xff]  ;;  %v495_v32 = vpack.c.bf16 %v99_v28, %v94_v27  ;;  %v28_v34 = vld [vmem:[%s840_s1 + $0x20] sm:$0xff]  ;;  %v38_v39 = vld [vmem:[%s840_s1 + $0x70] sm:$0xff]  ;;  %v365_v63 = vsub.s32 1, %v327_v61  ;;  %v369_v0 = vsub.s32 2, %v327_v61 }
  0x17   :  { %486 = vmatprep.subr.bf16.mxu0 %v485_v1  ;;  %518 = vmatprep.subr.bf16.mxu1 %v517_v6  ;;  %v527_v33 = vpack.c.bf16 %v101_v31, %v96_v30  ;;  %v33_v35 = vld [vmem:[%s840_s1 + $0x48] sm:$0xff]  ;;  %v23_v36 = vld [vmem:[%s841_s0] sm:$0x3]  ;;  %v43_v40 = vld [vmem:[%s840_s1 + $0x98] sm:$0xff]  ;;  %v373_v1 = vsub.s32 3, %v327_v61 }
  0x18   :  { %v530_v37 = vpack.c.bf16 %v33_v35, %v28_v34  ;;  %v533_v41 = vpack.c.bf16 %v43_v40, %v38_v39  ;;  %v48_v42 = vld [vmem:[%s840_s1 + $0xc0] sm:$0xff]  ;;  %v53_v43 = vld [vmem:[%s840_s1 + $0xe8] sm:$0xff]  ;;  %v58_v45 = vld [vmem:[%s840_s1 + $0x110] sm:$0xff] }
  0x19   :  { %v536_v44 = vpack.c.bf16 %v53_v43, %v48_v42  ;;  %v63_v46 = vld [vmem:[%s840_s1 + $0x138] sm:$0xff]  ;;  %v68_v48 = vld [vmem:[%s840_s1 + $0x160] sm:$0xff]  ;;  %v73_v49 = vld [vmem:[%s840_s1 + $0x188] sm:$0xff] }
  0x1a   :  { %488 = vmatpush1.bf16.msra.mxu0 %v487_v12  ;;  %520 = vmatpush1.bf16.msra.mxu1 %v519_v13  ;;  %v539_v47 = vpack.c.bf16 %v63_v46, %v58_v45  ;;  %v542_v50 = vpack.c.bf16 %v73_v49, %v68_v48  ;;  %v78_v51 = vld [vmem:[%s840_s1 + $0x1b0] sm:$0xff]  ;;  %v83_v52 = vld [vmem:[%s840_s1 + $0x1d8] sm:$0xff]  ;;  %v88_v54 = vld [vmem:[%s840_s1 + $0x200] sm:$0xff]  ;;  %v328_v13 = vsub.s32 %v325_v10, %v327_v61 }
  0x1b   :  { %490 = vmatprep.subr.bf16.mxu0 %v489_v14  ;;  %522 = vmatprep.subr.bf16.mxu1 %v521_v18  ;;  %v545_v53 = vpack.c.bf16 %v83_v52, %v78_v51  ;;  %v93_v55 = vld [vmem:[%s840_s1 + $0x228] sm:$0xff]  ;;  %v98_v57 = vld [vmem:[%s840_s1 + $0x250] sm:$0xff]  ;;  %v103_v58 = vld [vmem:[%s840_s1 + $0x278] sm:$0xff] }
  0x1c   :  { %v548_v56 = vpack.c.bf16 %v93_v55, %v88_v54  ;;  %v551_v59 = vpack.c.bf16 %v103_v58, %v98_v57  ;;  %v357_v5 = vld [vmem:[%s842_s2] sm:$0x1f] }
  0x1d   :  { %v362_v6 = vrot.slane %v357_v5, %v361_v62  ;;  %v366_v7 = vrot.slane %v357_v5, %v365_v63  ;;  %v370_v8 = vrot.slane %v357_v5, %v369_v0  ;;  %v374_v9 = vrot.slane %v357_v5, %v373_v1 }
  0x1e   :  { %492 = vmatpush1.bf16.msra.mxu0 %v491_v24  ;;  %524 = vmatpush1.bf16.msra.mxu1 %v523_v25 }
  0x1f   :  { %494 = vmatprep.subr.bf16.mxu0 %v493_v26  ;;  %526 = vmatprep.subr.bf16.mxu1 %v525_v29  ;;  %v379_v11 = vcombine.low %v362_v6, %v366_v7  ;;  %v380_v12 = vcombine.low %v370_v8, %v374_v9  ;;  %v22_v26 = vld [vmem:[#allocation2 + $0x8] sm:$0x3]  ;;  %v377_v29 = vsub.s32 4, %v327_v61 }
  0x21   :  { %v387_v19 = vrot.slane %v379_v11, %v328_v13  ;;  %v394_v20 = vrot.slane %v380_v12, %v328_v13 }
  0x22   :  { %496 = vmatpush1.bf16.msra.mxu0 %v495_v32  ;;  %528 = vmatpush1.bf16.msra.mxu1 %v527_v33  ;;  %v378_v32 = vrot.slane %v357_v5, %v377_v29 }
  0x23   :  { %529 = vmatprep.subr.bf16.mxu0 %v558_v38  ;;  %v395_v24 = vcombine.low %v387_v19, %v394_v20 }
  0x24   :  { %v402_v33 = vrot.slane %v378_v32, %v328_v13 }
  0x25   :  { %169 = vmatmul.mubr.f32.vlgmr.msra.gmra.mrb[0].mxu0 %v23_v36  ;;  %240 = vmatmul.mubr.f32.vlgmr.msra.gmra.mrb[0].mxu1 %v23_v36 }
  0x26   :  { %531 = vmatpush3.bf16.msra.mxu0 %v530_v37  ;;  %462 = vmatprep.mubr.msk.f32.mxu0 %vm559_vm0, %v557_v3 }
  0x27   :  { %532 = vmatprep.subr.bf16.mxu0 %v558_v38 }
  0x2a   :  { %534 = vmatpush3.bf16.msra.mxu0 %v533_v41 }
  0x2b   :  { %535 = vmatprep.subr.bf16.mxu0 %v558_v38 }
  0x2e   :  { %537 = vmatpush3.bf16.msra.mxu0 %v536_v44 }
  0x2f   :  { %538 = vmatprep.subr.bf16.mxu0 %v558_v38 }
  0x32   :  { %540 = vmatpush3.bf16.msra.mxu0 %v539_v47 }
  0x33   :  { %541 = vmatprep.subr.bf16.mxu0 %v558_v38 }
  0x36   :  { %543 = vmatpush3.bf16.msra.mxu0 %v542_v50 }
  0x37   :  { %544 = vmatprep.subr.bf16.mxu0 %v558_v38 }
  0x3a   :  { %546 = vmatpush3.bf16.msra.mxu0 %v545_v53 }
  0x3b   :  { %547 = vmatprep.subr.bf16.mxu0 %v558_v38 }
  0x3e   :  { %549 = vmatpush3.bf16.msra.mxu0 %v548_v56 }
  0x3f   :  { %550 = vmatprep.subr.bf16.mxu0 %v558_v38 }
  0x42   :  { %552 = vmatpush3.bf16.msra.mxu0 %v551_v59 }
  0x45   :  { %463 = vmatmul.mubr.f32.vlgmr.msra.gmra.mrb[2].mxu0 %v23_v36 }
  0xf8   :  { %v170_v3 = vpop.f32.mrb[0].mxu0  ;;  %v241_v14 = vpop.f32.mrb[0].mxu1 }
  0xf9   :  { %v172_v15 = vpop.f32.mrb[1].mxu0  ;;  %v243_v17 = vpop.f32.mrb[1].mxu1 }
  0xfa   :  { %v321_v16 = vcombine.low %v170_v3, %v172_v15  ;;  %v322_v18 = vcombine.low %v241_v14, %v243_v17 }
  0xfc   :  { %v329_v21 = vrot.slane %v321_v16, %v328_v13  ;;  %v336_v22 = vrot.slane %v322_v18, %v328_v13 }
  0xfe   :  { %v337_v23 = vcombine.low %v329_v21, %v336_v22 }
 0x100   :  { %v405_v25 = vadd.f32 %v395_v24, %v337_v23 }
 0x102   :  { %407 = vst [vmem:[%s843_s3] sm:$0xff] %v405_v25 }
 0x118   :  { %v312_v27 = vpop.f32.mrb[2].mxu0 }
 0x119   :  { %v344_v28 = vrot.slane %v312_v27, %v328_v13  ;;  %v464_v30 = vpop.f32.mrb[3].mxu0 }
 0x11b   :  { %v348_v31 = vadd.f32 %v344_v28, %v22_v26 }
 0x11d   :  { %351 = vst.msk [vmem:[#allocation2 + $0x8] sm:$0x3] %vm19_vm1, %v348_v31 }
 0x124   :  { %v356_v34 = vld [vmem:[#allocation2 + $0x8] sm:$0x3] }
 0x125   :  { %v406_v35 = vadd.f32 %v402_v33, %v356_v34 }
 0x127   :  { %408 = vst.msk [vmem:[%s843_s3 + $0x8] sm:$0x3] %vm19_vm1, %v406_v35 }

// kernel: forward.21
= control target key start
LH: loop header
LB: loop body
LE: loop exit
PB: predicated region body
PF: predicated region fallthrough
CT: control target
= control target key end

     0   :  { %s1743_s18 = smov 0   ;;  %s1745_s19 = smov 0   ;;  %s1997_s0 = inlined_call_operand.vmem [shape: f32[2,8,14,32], index: 0, kind: input, shape index: {}, may-alias: {0,1,2}]   ;;  %s1998_s1 = inlined_call_operand.vmem [shape: f32[2,8,14,32], index: 1, kind: input, shape index: {}, may-alias: {0,1,2}]   ;;  %s1999_s2 = inlined_call_operand.vmem [shape: f32[2,8,14,32], index: 2, kind: input, shape index: {}, may-alias: {0,1,2}]   ;;  %s2000_s3 = inlined_call_operand.vmem [shape: f32[288,32], index: 3, kind: input, shape index: {}]   ;;  %s2001_s4 = inlined_call_operand.vmem [shape: f32[1,32], index: 4, kind: input, shape index: {}]   ;;  %s2002_s5 = inlined_call_operand.vmem [shape: f32[2,6,12,32], index: 5, kind: output, shape index: {}]  }
   0x1   :  { %s1747_s20 = smov 0   ;;  %s1749_s21 = smov 0  }
   0x2   :  { %s1751_s22 = smov 0  }
   0x3 LB: > { %s24_s23 = sadd.s32 1, %s1702_s20  ;;  %s27_s24 = sadd.s32 1, %s1706_s21  ;;  %s1710_s22 = sphi %s1751_s22, %s15_s22   ;;  %s1706_s21 = sphi %s1749_s21, %s2008_s21   ;;  %s1702_s20 = sphi %s1747_s20, %s2007_s20   ;;  %s1698_s19 = sphi %s1745_s19, %s2006_s19   ;;  %s1694_s18 = sphi %s1743_s18, %s2005_s18  }
   0x4   : > { %p25_p0 = scmp.ge.s32.totalorder %s24_s23, 6  ;;  %p1348_p1 = scmp.ge.s32.totalorder %s1710_s22, 1 }
   0x5   : > { %p247_p2 = scmp.lt.s32.totalorder %s1710_s22, 13 }
   0x6   : > { %s2010_s23 = smov (%p25_p0, %s24_s23), 0  ;;  %s2012_s24 = smov (!%p25_p0, %s27_s24), %s1706_s21 }
   0x7   : > { %p248_p3 = pnand %p1348_p1, %p247_p2  ;;  %p29_p4 = scmp.ge.s32.totalorder %s2012_s24, 2 }
   0x8   : > { %v352_v0 = vld [vmem:[%s2000_s3 + $0x20] sm:$0xff] (!%p248_p3)  ;;  %v353_v1 = vld [vmem:[%s2000_s3 + $0x28] sm:$0xff] (!%p248_p3)  ;;  %p303_p5 = scmp.lt.s32.totalorder (!%p248_p3), %s1698_s19, 1  ;;  %p305_p6 = scmp.lt.s32.totalorder (!%p248_p3), %s1694_s18, 7  ;;  %v354_v5 = vld [vmem:[%s2000_s3 + $0x30] sm:$0xff] (!%p248_p3)  ;;  %vm356_vm0 = vcmask (!%p248_p3), 261120  }
   0x9   : > { %s2014_s24 = smov (%p29_p4, %s2012_s24), 0  ;;  %251 = sbr.rel (%p248_p3) target bundleno = 325 (0x145), region = 40 }
   0xa   : > { %v699_v2 = vld [vmem:[%s2000_s3 + $0x80] sm:$0xff] (!%p248_p3)  ;;  %v1534_v3 = vpack.c.bf16 (!%p248_p3), %v353_v1, %v352_v0  ;;  %v700_v4 = vld [vmem:[%s2000_s3 + $0x88] sm:$0xff] (!%p248_p3)  ;;  %v355_v6 = vld [vmem:[%s2000_s3 + $0x38] sm:$0xff] (!%p248_p3)  ;;  %s312_s12 = sadd.s32 (!%p248_p3), 1, %s1694_s18  ;;  %s323_s13 = sadd.s32 (!%p248_p3), 2, %s1694_s18  ;;  %vm1205_vm3 = vcmask (!%p248_p3), 257024  }
   0xb   : > { %v1566_v7 = vpack.c.bf16 (!%p248_p3), %v700_v4, %v699_v2  ;;  %v1538_v8 = vpack.c.bf16 (!%p248_p3), %v355_v6, %v354_v5  ;;  %v701_v9 = vld [vmem:[%s2000_s3 + $0x90] sm:$0xff] (!%p248_p3)  ;;  %v702_v10 = vld [vmem:[%s2000_s3 + $0x98] sm:$0xff] (!%p248_p3)  ;;  %v346_v11 = vld [vmem:[%s2000_s3] sm:$0xff] (!%p248_p3)  ;;  %p1828_p7 = scmp.lt.s32.totalorder (!%p248_p3), %s312_s12, 7  ;;  %p1841_p8 = scmp.lt.s32.totalorder (!%p248_p3), %s323_s13, 7 }
   0xc   : > { %1535 = vmatprep.subr.bf16.mxu1 (!%p248_p3), %v1534_v3  ;;  %v1570_v12 = vpack.c.bf16 (!%p248_p3), %v702_v10, %v701_v9  ;;  %v347_v13 = vld [vmem:[%s2000_s3 + $0x8] sm:$0xff] (!%p248_p3)  ;;  %v788_v14 = vld [vmem:[%s2000_s3 + $0xa0] sm:$0xff] (!%p248_p3)  ;;  %v348_v18 = vld [vmem:[%s2000_s3 + $0x10] sm:$0xff] (!%p248_p3)  ;;  %p336_p9 = scmp.lt.s32.totalorder (!%p248_p3), %s1694_s18, 5 }
   0xd   : > { %v789_v15 = vld [vmem:[%s2000_s3 + $0xa8] sm:$0xff] (!%p248_p3)  ;;  %1567 = vmatprep.subr.bf16.mxu0 (!%p248_p3), %v1566_v7  ;;  %1537 = vmatpush3.bf16.msra.mxu1 (!%p248_p3), %v1534_v3  ;;  %v1542_v16 = vpack.c.bf16 (!%p248_p3), %v347_v13, %v346_v11  ;;  %v349_v19 = vld [vmem:[%s2000_s3 + $0x18] sm:$0xff] (!%p248_p3)  ;;  %v521_v24 = vld [vmem:[%s2000_s3 + $0x40] sm:$0xff] (!%p248_p3) }
   0xe   : > { %1569 = vmatpush3.bf16.msra.mxu0 (!%p248_p3), %v1566_v7  ;;  %1539 = vmatprep.subr.bf16.mxu1 (!%p248_p3), %v1538_v8  ;;  %v1574_v17 = vpack.c.bf16 (!%p248_p3), %v789_v15, %v788_v14  ;;  %v1546_v22 = vpack.c.bf16 (!%p248_p3), %v349_v19, %v348_v18  ;;  %v522_v25 = vld [vmem:[%s2000_s3 + $0x48] sm:$0xff] (!%p248_p3)  ;;  %v790_v26 = vld [vmem:[%s2000_s3 + $0xb0] sm:$0xff] (!%p248_p3)  ;;  %v791_v27 = vld [vmem:[%s2000_s3 + $0xb8] sm:$0xff] (!%p248_p3) }
   0xf   : > { %1571 = vmatprep.subr.bf16.mxu0 (!%p248_p3), %v1570_v12  ;;  %v1550_v28 = vpack.c.bf16 (!%p248_p3), %v522_v25, %v521_v24  ;;  %v523_v29 = vld [vmem:[%s2000_s3 + $0x50] sm:$0xff] (!%p248_p3)  ;;  %v524_v30 = vld [vmem:[%s2000_s3 + $0x58] sm:$0xff] (!%p248_p3)  ;;  %v1578_v33 = vpack.c.bf16 (!%p248_p3), %v791_v27, %v790_v26  ;;  %v877_v36 = vld [vmem:[%s2000_s3 + $0xc0] sm:$0xff] (!%p248_p3) }
  0x10   : > { %s2016_s19 = smov (!%p303_p5, %s1698_s19), 1  ;;  %s2018_s12 = smov (!%p1828_p7, %s312_s12), 7  ;;  %v878_v37 = vld [vmem:[%s2000_s3 + $0xc8] sm:$0xff]  ;;  %v1554_v38 = vpack.c.bf16 %v524_v30, %v523_v29  ;;  %v610_v40 = vld [vmem:[%s2000_s3 + $0x60] sm:$0xff]  ;;  %v879_v43 = vld [vmem:[%s2000_s3 + $0xd0] sm:$0xff] }
  0x11   : > { %s306_s27 = scalar_select %p305_p6, %s1694_s18, 7  ;;  %1541 = vmatpush3.bf16.msra.mxu1 %v1538_v8  ;;  %v611_v41 = vld [vmem:[%s2000_s3 + $0x68] sm:$0xff]  ;;  %v1582_v42 = vpack.c.bf16 %v878_v37, %v877_v36  ;;  %v880_v44 = vld [vmem:[%s2000_s3 + $0xd8] sm:$0xff]  ;;  %v612_v47 = vld [vmem:[%s2000_s3 + $0x70] sm:$0xff] }
  0x12   : > { %s1824_s9 = sshll.u32 %s2016_s19, 4  ;;  %1573 = vmatpush3.bf16.msra.mxu0 %v1570_v12  ;;  %1543 = vmatprep.subr.bf16.mxu1 %v1542_v16  ;;  %s2020_s13 = smov (!%p1841_p8, %s323_s13), 7  ;;  %v1558_v45 = vpack.c.bf16 %v611_v41, %v610_v40  ;;  %v613_v48 = vld [vmem:[%s2000_s3 + $0x78] sm:$0xff]  ;;  %v1586_v49 = vpack.c.bf16 %v880_v44, %v879_v43  ;;  %v966_v52 = vld [vmem:[%s2000_s3 + $0xe0] sm:$0xff]  ;;  %v967_v53 = vld [vmem:[%s2000_s3 + $0xe8] sm:$0xff] }
  0x13   : > { %s1349_s10 = sshll.u32 %s306_s27, 1  ;;  %1575 = vmatprep.subr.bf16.mxu0 %v1574_v17  ;;  %s1352_s11 = sshll.u32 %s2018_s12, 1  ;;  %v1562_v54 = vpack.c.bf16 %v613_v48, %v612_v47  ;;  %v1590_v56 = vpack.c.bf16 %v967_v53, %v966_v52  ;;  %v968_v57 = vld [vmem:[%s2000_s3 + $0xf0] sm:$0xff]  ;;  %v969_v58 = vld [vmem:[%s2000_s3 + $0xf8] sm:$0xff]  ;;  %v1055_v63 = vld [vmem:[%s2000_s3 + $0x100] sm:$0xff] }
  0x14   : > { %s309_s14 = sadd.s32 %s1824_s9, %s1349_s10  ;;  %v1594_v60 = vpack.c.bf16 %v969_v58, %v968_v57  ;;  %v1056_v0 = vld [vmem:[%s2000_s3 + $0x108] sm:$0xff]  ;;  %v1057_v2 = vld [vmem:[%s2000_s3 + $0x110] sm:$0xff]  ;;  %v1058_v3 = vld [vmem:[%s2000_s3 + $0x118] sm:$0xff]  ;;  %s2022_s18 = smov (!%p336_p9, %s1694_s18), 5 }
  0x15   : > { %s1351_s27 = sshll.u32 %s309_s14, 3  ;;  %s319_s14 = sadd.s32 %s1352_s11, %s1824_s9  ;;  %v1598_v1 = vpack.c.bf16 %v1056_v0, %v1055_v63  ;;  %v1602_v5 = vpack.c.bf16 %v1058_v3, %v1057_v2  ;;  %v1378_v10 = vld [vmem:[%s2001_s4] ss:$0 sm:$0xff] }
  0x16   : > { %s1848_s30 = scalar_lea.vmem %s1997_s0, %s1351_s27  ;;  %s1355_s27 = sshll.u32 %s2020_s13, 1 }
  0x17   : > { %v350_v20 = vld [vmem:[%s1848_s30 + $0x1] sm:$0xff]  ;;  %v351_v21 = vld [vmem:[%s1848_s30 + $0x9] sm:$0xf]  ;;  %s1354_s26 = sshll.u32 %s319_s14, 3  ;;  %s330_s13 = sadd.s32 %s1355_s27, %s1824_s9 }
  0x18   : > { %v344_v23 = vld [vmem:[%s1848_s30] sm:$0xff]  ;;  %1443 = vmatprep.mubr.msk.f32.mxu1 %vm356_vm0, %v350_v20  ;;  %s1880_s29 = scalar_lea.vmem %s1998_s1, %s1354_s26  ;;  %v345_v35 = vld [vmem:[%s1848_s30 + $0x8] sm:$0xf]  ;;  %s1357_s9 = sshll.u32 %s330_s13, 3 }
  0x19   : > { %1444 = vmatmul.mubr.msk.f32.vlgmr.msra.gmra.mrb[0].mxu1 %vm356_vm0, %v351_v21  ;;  %v697_v31 = vld [vmem:[%s1880_s29 + $0x1] sm:$0xff]  ;;  %v698_v32 = vld [vmem:[%s1880_s29 + $0x9] sm:$0xf]  ;;  %s1920_s13 = scalar_lea.vmem %s1999_s2, %s1357_s9  ;;  %s1358_s17 = sshll.u32 %s2022_s18, 1 }
  0x1a   : > { %1545 = vmatpush3.bf16.msra.mxu1 %v1542_v16  ;;  %1454 = vmatprep.mubr.msk.f32.mxu1 %vm356_vm0, %v344_v23  ;;  %v786_v34 = vld [vmem:[%s1880_s29 + $0x2] sm:$0xff]  ;;  %v787_v46 = vld [vmem:[%s1880_s29 + $0xa] sm:$0xf] }
  0x1b   : > { %1547 = vmatprep.subr.bf16.mxu1 %v1546_v22  ;;  %1487 = vmatprep.mubr.msk.f32.mxu0 %vm356_vm0, %v697_v31  ;;  %v519_v39 = vld [vmem:[%s1848_s30 + $0x2] sm:$0xff]  ;;  %v520_v51 = vld [vmem:[%s1848_s30 + $0xa] sm:$0xf] }
  0x1c   : > { %1488 = vmatmul.mubr.msk.f32.vlgmr.msra.gmra.mrb[0].mxu0 %vm356_vm0, %v698_v32  ;;  %v875_v50 = vld [vmem:[%s1920_s13] sm:$0xff]  ;;  %v876_v59 = vld [vmem:[%s1920_s13 + $0x8] sm:$0xf] }
  0x1d   : > { %1577 = vmatpush3.bf16.msra.mxu0 %v1574_v17  ;;  %1498 = vmatprep.mubr.msk.f32.mxu0 %vm356_vm0, %v786_v34  ;;  %v608_v55 = vld [vmem:[%s1880_s29] sm:$0xff]  ;;  %v609_v62 = vld [vmem:[%s1880_s29 + $0x8] sm:$0xf] }
  0x1e   : > { %1549 = vmatpush3.bf16.msra.mxu1 %v1546_v22  ;;  %1579 = vmatprep.subr.bf16.mxu0 %v1578_v33  ;;  %v964_v61 = vld [vmem:[%s1920_s13 + $0x1] sm:$0xff]  ;;  %v965_v4 = vld [vmem:[%s1920_s13 + $0x9] sm:$0xf] }
  0x1f   : > { %1551 = vmatprep.subr.bf16.mxu1 %v1550_v28  ;;  %v1053_v6 = vld [vmem:[%s1920_s13 + $0x2] sm:$0xff]  ;;  %v1054_v7 = vld [vmem:[%s1920_s13 + $0xa] sm:$0xf]  ;;  %s1622_s13 = smul.u32 12, %s2016_s19 }
  0x21   : > { %1455 = vmatmul.mubr.msk.f32.vlgmr.msra.gmra.mrb[0].mxu1 %vm356_vm0, %v345_v35  ;;  %1581 = vmatpush3.bf16.msra.mxu0 %v1578_v33  ;;  %s340_s25 = sadd.s32 %s1622_s13, %s1358_s17 }
  0x22   : > { %1553 = vmatpush3.bf16.msra.mxu1 %v1550_v28  ;;  %1465 = vmatprep.mubr.msk.f32.mxu1 %vm356_vm0, %v519_v39  ;;  %s1359_s27 = sshll.u32 %s340_s25, 3 }
  0x23   : > { %1555 = vmatprep.subr.bf16.mxu1 %v1554_v38  ;;  %1583 = vmatprep.subr.bf16.mxu0 %v1582_v42  ;;  %s342_s30 = scalar_lea.vmem %s2002_s5, %s1359_s27 }
  0x24   : > { %1499 = vmatmul.mubr.msk.f32.vlgmr.msra.gmra.mrb[0].mxu0 %vm356_vm0, %v787_v46 }
  0x25   : > { %1585 = vmatpush3.bf16.msra.mxu0 %v1582_v42  ;;  %1509 = vmatprep.mubr.msk.f32.mxu0 %vm356_vm0, %v875_v50 }
  0x26   : > { %1557 = vmatpush3.bf16.msra.mxu1 %v1554_v38  ;;  %1587 = vmatprep.subr.bf16.mxu0 %v1586_v49 }
  0x27   : > { %1559 = vmatprep.subr.bf16.mxu1 %v1558_v45 }
  0x29   : > { %1466 = vmatmul.mubr.msk.f32.vlgmr.msra.gmra.mrb[0].mxu1 %vm356_vm0, %v520_v51  ;;  %1589 = vmatpush3.bf16.msra.mxu0 %v1586_v49 }
  0x2a   : > { %1561 = vmatpush3.bf16.msra.mxu1 %v1558_v45  ;;  %1476 = vmatprep.mubr.msk.f32.mxu1 %vm356_vm0, %v608_v55 }
  0x2b   : > { %1563 = vmatprep.subr.bf16.mxu1 %v1562_v54  ;;  %1591 = vmatprep.subr.bf16.mxu0 %v1590_v56 }
  0x2c   : > { %1510 = vmatmul.mubr.msk.f32.vlgmr.msra.gmra.mrb[0].mxu0 %vm356_vm0, %v876_v59 }
  0x2d   : > { %1593 = vmatpush3.bf16.msra.mxu0 %v1590_v56  ;;  %1520 = vmatprep.mubr.msk.f32.mxu0 %vm356_vm0, %v964_v61  ;;  %v1712_v56 = vmov -1.0  }
  0x2e   : > { %1565 = vmatpush3.bf16.msra.mxu1 %v1562_v54  ;;  %1595 = vmatprep.subr.bf16.mxu0 %v1594_v60 }
  0x31   : > { %1477 = vmatmul.mubr.msk.f32.vlgmr.msra.gmra.mrb[0].mxu1 %vm356_vm0, %v609_v62  ;;  %1597 = vmatpush3.bf16.msra.mxu0 %v1594_v60 }
  0x32   : > { %1599 = vmatprep.subr.bf16.mxu0 %v1598_v1 }
  0x34   : > { %1521 = vmatmul.mubr.msk.f32.vlgmr.msra.gmra.mrb[0].mxu0 %vm356_vm0, %v965_v4 }
  0x35   : > { %1601 = vmatpush3.bf16.msra.mxu0 %v1598_v1  ;;  %1531 = vmatprep.mubr.msk.f32.mxu0 %vm356_vm0, %v1053_v6 }
  0x36   : > { %1603 = vmatprep.subr.bf16.mxu0 %v1602_v5 }
  0x39   : > { %1605 = vmatpush3.bf16.msra.mxu0 %v1602_v5 }
  0x3c   : > { %1532 = vmatmul.mubr.msk.f32.vlgmr.msra.gmra.mrb[0].mxu0 %vm356_vm0, %v1054_v7 }
 0x104   : > { %v1478_v8 = vpop.f32.mrb[0].mxu1 }
 0x105   : > { %v686_v9 = vpop.f32.mrb[1].mxu1 }
 0x10f   : > { %v1533_v11 = vpop.f32.mrb[0].mxu0 }
 0x110   : > { %v1606_v12 = vadd.f32 %v1533_v11, %v1478_v8  ;;  %v1131_v13 = vpop.f32.mrb[1].mxu0 }
 0x111   : > { %v1607_v14 = vadd.f32 %v1131_v13, %v686_v9 }
 0x112   : > { %v1149_v15 = vadd.f32 %v1606_v12, %v1378_v10 }
 0x113   : > { %v1148_v16 = vadd.f32 %v1607_v14, %v1378_v10 }
 0x114   : > { %v1153_v17 = vmul.f32 0.70710677, %v1149_v15  ;;  %v1151_v62 = vmul.f32 0.5, %v1149_v15 }
 0x115   : > { %v1152_v18 = vmul.f32 0.70710677, %v1148_v16  ;;  %v1150_v0 = vmul.f32 0.5, %v1148_v16 }
 0x116   : > { %v1159_v19 = vand.u32 2147483647, %v1153_v17  ;;  %vm1155_vm1 = vcmp.ge.f32.partialorder %v1153_v17, 0.0 }
 0x117   : > { %v1158_v20 = vand.u32 2147483647, %v1152_v18  ;;  %vm1154_vm2 = vcmp.ge.f32.partialorder %v1152_v18, 0.0  ;;  %v1157_v57 = vsel %vm1155_vm1, 1.0, %v1712_v56 }
 0x118   : > { %v1161_v21 = vmul.f32 0.3275911, %v1159_v19  ;;  %v1187_v25 = vsub.f32 0.0, %v1159_v19  ;;  %v1156_v60 = vsel %vm1154_vm2, 1.0, %v1712_v56 }
 0x119   : > { %v1160_v22 = vmul.f32 0.3275911, %v1158_v20  ;;  %v1186_v26 = vsub.f32 0.0, %v1158_v20 }
 0x11a   : > { %v1163_v23 = vadd.f32 1.0, %v1161_v21  ;;  %v1189_v28 = vmul.f32 %v1187_v25, %v1159_v19 }
 0x11b   : > { %v1162_v24 = vadd.f32 1.0, %v1160_v22  ;;  %v1188_v31 = vmul.f32 %v1186_v26, %v1158_v20 }
 0x11c   : > { %1664 = vrcp.f32 %v1163_v23  ;;  %v1192_v34 = vmul.f32 1.442695, %v1189_v28 }
 0x11d   : > { %1666 = vrcp.f32 %v1162_v24  ;;  %v1190_v37 = vmul.f32 1.442695, %v1188_v31 }
 0x11e   : > { %1668 = vpow2.f32 %v1192_v34 }
 0x11f   : > { %1670 = vpow2.f32 %v1190_v37 }
 0x126   : > { %v1665_v27 = vpop.eup %1664 }
 0x127   : > { %v1667_v29 = vpop.eup %1666  ;;  %v1169_v30 = vmul.f32 1.0614054, %v1665_v27 }
 0x128   : > { %v1168_v32 = vmul.f32 1.0614054, %v1667_v29  ;;  %v1669_v50 = vpop.eup %1668 }
 0x129   : > { %v1171_v33 = vadd.f32 -1.4531521, %v1169_v30  ;;  %v1671_v52 = vpop.eup %1670 }
 0x12a   : > { %v1170_v35 = vadd.f32 -1.4531521, %v1168_v32 }
 0x12b   : > { %v1173_v36 = vmul.f32 %v1665_v27, %v1171_v33 }
 0x12c   : > { %v1172_v38 = vmul.f32 %v1667_v29, %v1170_v35 }
 0x12d   : > { %v1175_v39 = vadd.f32 1.4214138, %v1173_v36 }
 0x12e   : > { %v1174_v40 = vadd.f32 1.4214138, %v1172_v38 }
 0x12f   : > { %v1177_v41 = vmul.f32 %v1665_v27, %v1175_v39 }
 0x130   : > { %v1176_v42 = vmul.f32 %v1667_v29, %v1174_v40 }
 0x131   : > { %v1179_v43 = vadd.f32 -0.28449672, %v1177_v41 }
 0x132   : > { %v1178_v44 = vadd.f32 -0.28449672, %v1176_v42 }
 0x133   : > { %v1181_v45 = vmul.f32 %v1665_v27, %v1179_v43 }
 0x134   : > { %v1180_v46 = vmul.f32 %v1667_v29, %v1178_v44 }
 0x135   : > { %v1183_v47 = vadd.f32 0.2548296, %v1181_v45 }
 0x136   : > { %v1182_v48 = vadd.f32 0.2548296, %v1180_v46 }
 0x137   : > { %v1185_v49 = vmul.f32 %v1665_v27, %v1183_v47 }
 0x138   : > { %v1184_v51 = vmul.f32 %v1667_v29, %v1182_v48 }
 0x139   : > { %v1195_v53 = vmul.f32 %v1669_v50, %v1185_v49 }
 0x13a   : > { %v1194_v54 = vmul.f32 %v1671_v52, %v1184_v51 }
 0x13b   : > { %v1197_v55 = vsub.f32 1.0, %v1195_v53 }
 0x13c   : > { %v1196_v58 = vsub.f32 1.0, %v1194_v54 }
 0x13d   : > { %v1199_v59 = vmul.f32 %v1197_v55, %v1157_v57 }
 0x13e   : > { %v1198_v61 = vmul.f32 %v1196_v58, %v1156_v60 }
 0x13f   : > { %v1201_v63 = vadd.f32 1.0, %v1199_v59 }
 0x140   : > { %v1200_v1 = vadd.f32 1.0, %v1198_v61 }
 0x141   : > { %v1203_v2 = vmul.f32 %v1201_v63, %v1151_v62 }
 0x142   : > { %v1202_v3 = vmul.f32 %v1200_v1, %v1150_v0 }
 0x143   : > { %1206 = vst.msk [vmem:[%s342_s30 + $0x8] sm:$0xf] %vm1205_vm3, %v1203_v2 }
 0x144   : > { %1204 = vst.msk [vmem:[%s342_s30] sm:$0xff] %vm356_vm0, %v1202_v3 }
 0x145 PF: > { %s15_s22 = sadd.s32 1, %s1710_s22   ;;  %s2005_s18 = smov %s1702_s20 }
 0x146   : > { %p12_p10 = scmp.ge.s32.totalorder %s15_s22, 14   ;;  %s2006_s19 = smov %s1706_s21 }
 0x147   : > { %s2007_s20 = smov %s2010_s23  ;;  %s2008_s21 = smov %s2014_s24 }
 0x148   :  { %14 = sbr.rel (!%p12_p10) target bundleno = 3 (0x3), region = 76 }

// kernel: forward.22
= control target key start
LH: loop header
LB: loop body
LE: loop exit
PB: predicated region body
PF: predicated region fallthrough
CT: control target
= control target key end

     0   :  { %s1910_s18 = smov 0   ;;  %s1912_s19 = smov 0   ;;  %s2266_s0 = inlined_call_operand.vmem [shape: f32[2,14,26,32], index: 0, kind: input, shape index: {}, may-alias: {0,1,2}]   ;;  %s2267_s1 = inlined_call_operand.vmem [shape: f32[2,14,26,32], index: 1, kind: input, shape index: {}, may-alias: {0,1,2}]   ;;  %s2268_s2 = inlined_call_operand.vmem [shape: f32[2,14,26,32], index: 2, kind: input, shape index: {}, may-alias: {0,1,2}]   ;;  %s2269_s3 = inlined_call_operand.vmem [shape: f32[288,16], index: 3, kind: input, shape index: {}]   ;;  %s2270_s4 = inlined_call_operand.vmem [shape: f32[1,16], index: 4, kind: input, shape index: {}]   ;;  %s2271_s5 = inlined_call_operand.vmem [shape: f32[2,12,24,16], index: 5, kind: output, shape index: {}]  }
   0x1   :  { %s1914_s20 = smov 0   ;;  %s1916_s21 = smov 0  }
   0x2   :  { %s1918_s22 = smov 0  }
   0x3 LB: > { %s24_s23 = sadd.s32 1, %s1866_s20  ;;  %s27_s24 = sadd.s32 1, %s1870_s21  ;;  %s1874_s22 = sphi %s1918_s22, %s15_s22   ;;  %s1870_s21 = sphi %s1916_s21, %s2276_s21   ;;  %s1866_s20 = sphi %s1914_s20, %s2275_s20   ;;  %s1862_s19 = sphi %s1912_s19, %s2274_s19   ;;  %s1858_s18 = sphi %s1910_s18, %s2273_s18  }
   0x4   : > { %p25_p0 = scmp.ge.s32.totalorder %s24_s23, 12  ;;  %p1465_p1 = scmp.ge.s32.totalorder %s1874_s22, 1 }
   0x5   : > { %p247_p2 = scmp.lt.s32.totalorder %s1874_s22, 25 }
   0x6   : > { %s2278_s23 = smov (%p25_p0, %s24_s23), 0  ;;  %s2280_s24 = smov (!%p25_p0, %s27_s24), %s1870_s21 }
   0x7   : > { %p248_p3 = pnand %p1465_p1, %p247_p2  ;;  %p29_p4 = scmp.ge.s32.totalorder %s2280_s24, 2 }
   0x8   : > { %v354_v0 = vld [vmem:[%s2269_s3 + $0x20] sm:$0xff] (!%p248_p3)  ;;  %v355_v1 = vld [vmem:[%s2269_s3 + $0x28] sm:$0xff] (!%p248_p3)  ;;  %v356_v2 = vld [vmem:[%s2269_s3 + $0x30] sm:$0xff] (!%p248_p3)  ;;  %v1876_v3 = vmov (!%p248_p3), 0.0|0.0   ;;  %p303_p5 = scmp.lt.s32.totalorder (!%p248_p3), %s1862_s19, 1  ;;  %p305_p6 = scmp.lt.s32.totalorder (!%p248_p3), %s1858_s18, 13 }
   0x9   : > { %s2282_s24 = smov (%p29_p4, %s2280_s24), 0  ;;  %251 = sbr.rel (%p248_p3) target bundleno = 342 (0x156), region = 40 }
   0xa   : > { %1773 = vmatprep.subr.bf16.mxu1 (!%p248_p3), %v1876_v3  ;;  %v1720_v4 = vpack.c.bf16 (!%p248_p3), %v355_v1, %v354_v0  ;;  %1719 = vmatprep.subr.bf16.mxu0 (!%p248_p3), %v1876_v3  ;;  %v357_v5 = vld [vmem:[%s2269_s3 + $0x38] sm:$0xff] (!%p248_p3)  ;;  %vm1877_vm0 = vmmov (!%p248_p3), 0   ;;  %v1878_v6 = vmov (!%p248_p3), 0.0   ;;  %v347_v8 = vld [vmem:[%s2269_s3] sm:$0xff] (!%p248_p3)  ;;  %v348_v9 = vld [vmem:[%s2269_s3 + $0x8] sm:$0xff] (!%p248_p3)  ;;  %s312_s25 = sadd.s32 (!%p248_p3), 1, %s1858_s18 }
   0xb   : > { %1580 = vmatprep.mubr.msk.f32.mxu1 (!%p248_p3), %vm1877_vm0, %v1878_v6  ;;  %1574 = vmatprep.mubr.msk.f32.mxu0 (!%p248_p3), %vm1877_vm0, %v1878_v6  ;;  %v1723_v7 = vpack.c.bf16 (!%p248_p3), %v357_v5, %v356_v2  ;;  %v540_v10 = vld [vmem:[%s2269_s3 + $0x40] sm:$0xff] (!%p248_p3)  ;;  %v541_v11 = vld [vmem:[%s2269_s3 + $0x48] sm:$0xff] (!%p248_p3)  ;;  %vm358_vm1 = vcmask (!%p248_p3), 261120   ;;  %v1726_v12 = vpack.c.bf16 (!%p248_p3), %v348_v9, %v347_v8  ;;  %v349_v14 = vld [vmem:[%s2269_s3 + $0x10] sm:$0xff] (!%p248_p3)  ;;  %p1992_p7 = scmp.lt.s32.totalorder (!%p248_p3), %s312_s25, 13  ;;  %s323_s15 = sadd.s32 (!%p248_p3), 2, %s1858_s18 }
   0xc   : > { %1775 = vmatpush3.bf16.msra.mxu1 (!%p248_p3), %v1720_v4  ;;  %1721 = vmatpush3.bf16.msra.mxu0 (!%p248_p3), %v1720_v4  ;;  %v1732_v13 = vpack.c.bf16 (!%p248_p3), %v541_v11, %v540_v10  ;;  %v350_v15 = vld [vmem:[%s2269_s3 + $0x18] sm:$0xff] (!%p248_p3)  ;;  %v542_v16 = vld [vmem:[%s2269_s3 + $0x50] sm:$0xff] (!%p248_p3)  ;;  %v639_v23 = vld [vmem:[%s2269_s3 + $0x60] sm:$0xff] (!%p248_p3)  ;;  %p326_p8 = scmp.lt.s32.totalorder (!%p248_p3), %s323_s15, 13  ;;  %p336_p9 = scmp.lt.s32.totalorder (!%p248_p3), %s1858_s18, 11  ;;  %vm1320_vm4 = vcmask (!%p248_p3), 130048  }
   0xd   : > { %1774 = vmatprep.subr.bf16.mxu1 (!%p248_p3), %v1876_v3  ;;  %1722 = vmatprep.subr.bf16.mxu0 (!%p248_p3), %v1876_v3  ;;  %v543_v17 = vld [vmem:[%s2269_s3 + $0x58] sm:$0xff] (!%p248_p3)  ;;  %v1729_v20 = vpack.c.bf16 (!%p248_p3), %v350_v15, %v349_v14  ;;  %v640_v24 = vld [vmem:[%s2269_s3 + $0x68] sm:$0xff] (!%p248_p3)  ;;  %v738_v25 = vld [vmem:[%s2269_s3 + $0x80] sm:$0xff] (!%p248_p3) }
   0xe   : > { %v1735_v22 = vpack.c.bf16 (!%p248_p3), %v543_v17, %v542_v16  ;;  %v739_v26 = vld [vmem:[%s2269_s3 + $0x88] sm:$0xff] (!%p248_p3)  ;;  %v1738_v28 = vpack.c.bf16 (!%p248_p3), %v640_v24, %v639_v23  ;;  %v641_v31 = vld [vmem:[%s2269_s3 + $0x70] sm:$0xff] (!%p248_p3)  ;;  %v642_v32 = vld [vmem:[%s2269_s3 + $0x78] sm:$0xff] (!%p248_p3) }
   0xf   : > { %v1744_v30 = vpack.c.bf16 (!%p248_p3), %v739_v26, %v738_v25  ;;  %v740_v33 = vld [vmem:[%s2269_s3 + $0x90] sm:$0xff] (!%p248_p3)  ;;  %v741_v34 = vld [vmem:[%s2269_s3 + $0x98] sm:$0xff] (!%p248_p3)  ;;  %v1741_v37 = vpack.c.bf16 (!%p248_p3), %v642_v32, %v641_v31  ;;  %v837_v41 = vld [vmem:[%s2269_s3 + $0xa0] sm:$0xff] (!%p248_p3) }
  0x10   : > { %s2284_s19 = smov (!%p303_p5, %s1862_s19), 1  ;;  %1776 = vmatpush3.bf16.msra.mxu1 %v1723_v7  ;;  %1724 = vmatpush3.bf16.msra.mxu0 %v1723_v7  ;;  %s2286_s25 = smov (!%p1992_p7, %s312_s25), 13  ;;  %v1747_v38 = vpack.c.bf16 %v741_v34, %v740_v33  ;;  %v838_v42 = vld [vmem:[%s2269_s3 + $0xa8] sm:$0xff]  ;;  %v936_v43 = vld [vmem:[%s2269_s3 + $0xc0] sm:$0xff]  ;;  %v839_v49 = vld [vmem:[%s2269_s3 + $0xb0] sm:$0xff] }
  0x11   : > { %s306_s8 = scalar_select %p305_p6, %s1858_s18, 13  ;;  %1725 = vmatprep.subr.bf16.mxu1 %v1876_v3  ;;  %1731 = vmatprep.subr.bf16.mxu0 %v1876_v3  ;;  %v937_v44 = vld [vmem:[%s2269_s3 + $0xc8] sm:$0xff]  ;;  %v1750_v46 = vpack.c.bf16 %v838_v42, %v837_v41  ;;  %v840_v50 = vld [vmem:[%s2269_s3 + $0xb8] sm:$0xff]  ;;  %v938_v51 = vld [vmem:[%s2269_s3 + $0xd0] sm:$0xff] }
  0x12   : > { %s1974_s11 = smul.u32 56, %s2284_s19  ;;  %s2288_s15 = smov (!%p326_p8, %s323_s15), 13  ;;  %v1756_v48 = vpack.c.bf16 %v937_v44, %v936_v43  ;;  %v939_v52 = vld [vmem:[%s2269_s3 + $0xd8] sm:$0xff]  ;;  %v1753_v55 = vpack.c.bf16 %v840_v50, %v839_v49  ;;  %v1035_v59 = vld [vmem:[%s2269_s3 + $0xe0] sm:$0xff]  ;;  %v1036_v60 = vld [vmem:[%s2269_s3 + $0xe8] sm:$0xff] }
  0x13   : > { %s1466_s26 = sshll.u32 %s306_s8, 2  ;;  %s1468_s8 = sshll.u32 %s2286_s25, 2  ;;  %v1759_v56 = vpack.c.bf16 %v939_v52, %v938_v51  ;;  %v1134_v61 = vld [vmem:[%s2269_s3 + $0x100] sm:$0xff]  ;;  %v1135_v62 = vld [vmem:[%s2269_s3 + $0x108] sm:$0xff]  ;;  %v1762_v0 = vpack.c.bf16 %v1036_v60, %v1035_v59  ;;  %v1037_v4 = vld [vmem:[%s2269_s3 + $0xf0] sm:$0xff] }
  0x14   : > { %s309_s27 = sadd.s32 %s1974_s11, %s1466_s26  ;;  %s1470_s25 = sshll.u32 %s2288_s15, 2  ;;  %v1768_v2 = vpack.c.bf16 %v1135_v62, %v1134_v61  ;;  %v1038_v5 = vld [vmem:[%s2269_s3 + $0xf8] sm:$0xff]  ;;  %v1136_v7 = vld [vmem:[%s2269_s3 + $0x110] sm:$0xff] }
  0x15   : > { %s1467_s28 = sshll.u32 %s309_s27, 3  ;;  %s319_s27 = sadd.s32 %s1974_s11, %s1468_s8  ;;  %v1137_v8 = vld [vmem:[%s2269_s3 + $0x118] sm:$0xff]  ;;  %v1765_v11 = vpack.c.bf16 %v1038_v5, %v1037_v4 }
  0x16   : > { %s1999_s9 = scalar_lea.vmem %s2266_s0, %s1467_s28  ;;  %s1469_s28 = sshll.u32 %s319_s27, 3 }
  0x17   : > { %v353_v18 = vld [vmem:[%s1999_s9 + $0x11] sm:$0xff]  ;;  %v351_v19 = vld [vmem:[%s1999_s9 + $0x1] sm:$0xff]  ;;  %v352_v21 = vld [vmem:[%s1999_s9 + $0x9] sm:$0xff]  ;;  %s2077_s6 = scalar_lea.vmem %s2267_s1, %s1469_s28  ;;  %s330_s15 = sadd.s32 %s1974_s11, %s1470_s25 }
  0x18   : > { %1581 = vmatmul.mubr.msk.f32.vlgmr.msra.gmra.mrb[0].mxu1 %vm358_vm1, %v353_v18  ;;  %1575 = vmatmul.mubr.msk.f32.vlgmr.msra.gmra.mrb[0].mxu0 %vm358_vm1, %v351_v19  ;;  %v344_v27 = vld [vmem:[%s1999_s9] sm:$0xff]  ;;  %v345_v35 = vld [vmem:[%s1999_s9 + $0x8] sm:$0xff]  ;;  %v346_v39 = vld [vmem:[%s1999_s9 + $0x10] sm:$0xff]  ;;  %s1471_s10 = sshll.u32 %s330_s15, 3  ;;  %s2290_s18 = smov (!%p336_p9, %s1858_s18), 11 }
  0x19   : > { %1727 = vmatpush3.bf16.msra.mxu1 %v1726_v12  ;;  %1733 = vmatpush3.bf16.msra.mxu0 %v1732_v13  ;;  %v537_v29 = vld [vmem:[%s1999_s9 + $0x2] sm:$0xff]  ;;  %v538_v36 = vld [vmem:[%s1999_s9 + $0xa] sm:$0xff]  ;;  %v539_v40 = vld [vmem:[%s1999_s9 + $0x12] sm:$0xff]  ;;  %s2141_s25 = scalar_lea.vmem %s2268_s2, %s1471_s10  ;;  %v1771_v12 = vpack.c.bf16 %v1137_v8, %v1136_v7  ;;  %s1779_s13 = smul.u32 36, %s2284_s19 }
  0x1a   : > { %1728 = vmatprep.subr.bf16.mxu1 %v1876_v3  ;;  %1577 = vmatprep.mubr.msk.f32.mxu0 %vm1877_vm0, %v1878_v6  ;;  %v636_v45 = vld [vmem:[%s2077_s6] sm:$0xff]  ;;  %v637_v53 = vld [vmem:[%s2077_s6 + $0x8] sm:$0xff]  ;;  %v638_v57 = vld [vmem:[%s2077_s6 + $0x10] sm:$0xff]  ;;  %s1778_s14 = smul.u32 3, %s2290_s18 }
  0x1b   : > { %1734 = vmatprep.subr.bf16.mxu0 %v1876_v3  ;;  %1591 = vmatprep.mubr.msk.f32.mxu1 %vm1877_vm0, %v1878_v6  ;;  %v735_v47 = vld [vmem:[%s2077_s6 + $0x1] sm:$0xff]  ;;  %v736_v54 = vld [vmem:[%s2077_s6 + $0x9] sm:$0xff]  ;;  %v737_v58 = vld [vmem:[%s2077_s6 + $0x11] sm:$0xff] }
  0x1c   : > { %1578 = vmatmul.mubr.msk.f32.gmra.mrb[2].mxu0 %vm358_vm1, %v352_v21  ;;  %v834_v63 = vld [vmem:[%s2077_s6 + $0x2] sm:$0xff]  ;;  %v835_v9 = vld [vmem:[%s2077_s6 + $0xa] sm:$0xff]  ;;  %v836_v13 = vld [vmem:[%s2077_s6 + $0x12] sm:$0xff]  ;;  %s340_s16 = sadd.s32 %s1779_s13, %s1778_s14 }
  0x1d   : > { %1730 = vmatpush3.bf16.msra.mxu1 %v1729_v20  ;;  %1736 = vmatpush3.bf16.msra.mxu0 %v1735_v22  ;;  %v933_v1 = vld [vmem:[%s2141_s25] sm:$0xff]  ;;  %v934_v10 = vld [vmem:[%s2141_s25 + $0x8] sm:$0xff]  ;;  %v935_v14 = vld [vmem:[%s2141_s25 + $0x10] sm:$0xff]  ;;  %s1472_s19 = sshll.u32 %s340_s16, 3 }
  0x1e   : > { %1737 = vmatprep.subr.bf16.mxu1 %v1876_v3  ;;  %1608 = vmatprep.mubr.msk.f32.mxu0 %vm1877_vm0, %v1878_v6  ;;  %v1131_v15 = vld [vmem:[%s2141_s25 + $0x2] sm:$0xff]  ;;  %v1132_v17 = vld [vmem:[%s2141_s25 + $0xa] sm:$0xff]  ;;  %v1133_v19 = vld [vmem:[%s2141_s25 + $0x12] sm:$0xff]  ;;  %s342_s17 = scalar_lea.vmem %s2271_s5, %s1472_s19 }
  0x1f   : > { %1743 = vmatprep.subr.bf16.mxu0 %v1876_v3  ;;  %v1033_v16 = vld [vmem:[%s2141_s25 + $0x9] sm:$0xff]  ;;  %v1034_v18 = vld [vmem:[%s2141_s25 + $0x11] sm:$0xff] }
  0x20   : > { %1592 = vmatmul.mubr.msk.f32.vlgmr.msra.gmra.mrb[2].mxu1 %vm358_vm1, %v344_v27  ;;  %1609 = vmatmul.mubr.msk.f32.vlgmr.msra.gmra.mrb[4].mxu0 %vm358_vm1, %v537_v29 }
  0x21   : > { %1739 = vmatpush3.bf16.msra.mxu1 %v1738_v28  ;;  %1594 = vmatprep.mubr.msk.f32.mxu1 %vm1877_vm0, %v1878_v6 }
  0x22   : > { %1745 = vmatpush3.bf16.msra.mxu0 %v1744_v30  ;;  %1611 = vmatprep.mubr.msk.f32.mxu0 %vm1877_vm0, %v1878_v6 }
  0x23   : > { %1740 = vmatprep.subr.bf16.mxu1 %v1876_v3  ;;  %1746 = vmatprep.subr.bf16.mxu0 %v1876_v3 }
  0x24   : > { %1595 = vmatmul.mubr.msk.f32.gmra.mrb[4].mxu1 %vm358_vm1, %v345_v35  ;;  %1612 = vmatmul.mubr.msk.f32.gmra.mrb[6].mxu0 %vm358_vm1, %v538_v36 }
  0x25   : > { %1597 = vmatprep.mubr.msk.f32.mxu1 %vm1877_vm0, %v1878_v6  ;;  %1742 = vmatpush3.bf16.msra.mxu1 %v1741_v37 }
  0x26   : > { %1614 = vmatprep.mubr.msk.f32.mxu0 %vm1877_vm0, %v1878_v6  ;;  %1748 = vmatpush3.bf16.msra.mxu0 %v1747_v38 }
  0x27   : > { %1749 = vmatprep.subr.bf16.mxu1 %v1876_v3  ;;  %1755 = vmatprep.subr.bf16.mxu0 %v1876_v3 }
  0x28   : > { %1598 = vmatmul.mubr.msk.f32.gmra.mrb[6].mxu1 %vm358_vm1, %v346_v39  ;;  %1615 = vmatmul.mubr.msk.f32.gmra.mrb[8].mxu0 %vm358_vm1, %v539_v40 }
  0x29   : > { %1625 = vmatprep.mubr.msk.f32.mxu1 %vm1877_vm0, %v1878_v6  ;;  %1642 = vmatprep.mubr.msk.f32.mxu0 %vm1877_vm0, %v1878_v6 }
  0x2c   : > { %1626 = vmatmul.mubr.msk.f32.vlgmr.msra.gmra.mrb[8].mxu1 %vm358_vm1, %v636_v45  ;;  %1643 = vmatmul.mubr.msk.f32.vlgmr.msra.gmra.mrb[10].mxu0 %vm358_vm1, %v735_v47 }
  0x2d   : > { %1751 = vmatpush3.bf16.msra.mxu1 %v1750_v46  ;;  %1628 = vmatprep.mubr.msk.f32.mxu1 %vm1877_vm0, %v1878_v6 }
  0x2e   : > { %1757 = vmatpush3.bf16.msra.mxu0 %v1756_v48  ;;  %1645 = vmatprep.mubr.msk.f32.mxu0 %vm1877_vm0, %v1878_v6 }
  0x2f   : > { %1752 = vmatprep.subr.bf16.mxu1 %v1876_v3  ;;  %1758 = vmatprep.subr.bf16.mxu0 %v1876_v3 }
  0x30   : > { %1629 = vmatmul.mubr.msk.f32.gmra.mrb[10].mxu1 %vm358_vm1, %v637_v53  ;;  %1646 = vmatmul.mubr.msk.f32.gmra.mrb[12].mxu0 %vm358_vm1, %v736_v54 }
  0x31   : > { %1631 = vmatprep.mubr.msk.f32.mxu1 %vm1877_vm0, %v1878_v6  ;;  %1754 = vmatpush3.bf16.msra.mxu1 %v1753_v55 }
  0x32   : > { %1648 = vmatprep.mubr.msk.f32.mxu0 %vm1877_vm0, %v1878_v6  ;;  %1760 = vmatpush3.bf16.msra.mxu0 %v1759_v56 }
  0x33   : > { %1761 = vmatprep.subr.bf16.mxu1 %v1876_v3  ;;  %1767 = vmatprep.subr.bf16.mxu0 %v1876_v3 }
  0x34   : > { %1632 = vmatmul.mubr.msk.f32.gmra.mrb[12].mxu1 %vm358_vm1, %v638_v57  ;;  %1649 = vmatmul.mubr.msk.f32.gmra.mrb[14].mxu0 %vm358_vm1, %v737_v58 }
  0x35   : > { %1659 = vmatprep.mubr.msk.f32.mxu1 %vm1877_vm0, %v1878_v6  ;;  %1676 = vmatprep.mubr.msk.f32.mxu0 %vm1877_vm0, %v1878_v6 }
  0x38   : > { %1660 = vmatmul.mubr.msk.f32.vlgmr.msra.gmra.mrb[14].mxu1 %vm358_vm1, %v834_v63  ;;  %1677 = vmatmul.mubr.msk.f32.vlgmr.msra.gmra.mrb[16].mxu0 %vm358_vm1, %v933_v1 }
  0x39   : > { %1763 = vmatpush3.bf16.msra.mxu1 %v1762_v0  ;;  %1662 = vmatprep.mubr.msk.f32.mxu1 %vm1877_vm0, %v1878_v6 }
  0x3a   : > { %1769 = vmatpush3.bf16.msra.mxu0 %v1768_v2  ;;  %1679 = vmatprep.mubr.msk.f32.mxu0 %vm1877_vm0, %v1878_v6 }
  0x3b   : > { %1764 = vmatprep.subr.bf16.mxu1 %v1876_v3  ;;  %1770 = vmatprep.subr.bf16.mxu0 %v1876_v3  ;;  %v1032_v3 = vld [vmem:[%s2141_s25 + $0x1] sm:$0xff] }
  0x3c   : > { %1663 = vmatmul.mubr.msk.f32.gmra.mrb[16].mxu1 %vm358_vm1, %v835_v9  ;;  %1680 = vmatmul.mubr.msk.f32.gmra.mrb[18].mxu0 %vm358_vm1, %v934_v10 }
  0x3d   : > { %1665 = vmatprep.mubr.msk.f32.mxu1 %vm1877_vm0, %v1878_v6  ;;  %1766 = vmatpush3.bf16.msra.mxu1 %v1765_v11 }
  0x3e   : > { %1682 = vmatprep.mubr.msk.f32.mxu0 %vm1877_vm0, %v1878_v6  ;;  %1772 = vmatpush3.bf16.msra.mxu0 %v1771_v12 }
  0x40   : > { %1666 = vmatmul.mubr.msk.f32.gmra.mrb[18].mxu1 %vm358_vm1, %v836_v13  ;;  %1683 = vmatmul.mubr.msk.f32.gmra.mrb[20].mxu0 %vm358_vm1, %v935_v14 }
  0x41   : > { %1693 = vmatprep.mubr.msk.f32.mxu1 %vm1877_vm0, %v1878_v6  ;;  %1710 = vmatprep.mubr.msk.f32.mxu0 %vm1877_vm0, %v1878_v6 }
  0x44   : > { %1694 = vmatmul.mubr.msk.f32.vlgmr.msra.gmra.mrb[20].mxu1 %vm358_vm1, %v1032_v3  ;;  %1711 = vmatmul.mubr.msk.f32.vlgmr.msra.gmra.mrb[22].mxu0 %vm358_vm1, %v1131_v15 }
  0x45   : > { %1696 = vmatprep.mubr.msk.f32.mxu1 %vm1877_vm0, %v1878_v6  ;;  %1713 = vmatprep.mubr.msk.f32.mxu0 %vm1877_vm0, %v1878_v6 }
  0x48   : > { %1697 = vmatmul.mubr.msk.f32.gmra.mrb[22].mxu1 %vm358_vm1, %v1033_v16  ;;  %1714 = vmatmul.mubr.msk.f32.gmra.mrb[24].mxu0 %vm358_vm1, %v1132_v17 }
  0x49   : > { %1699 = vmatprep.mubr.msk.f32.mxu1 %vm1877_vm0, %v1878_v6  ;;  %1716 = vmatprep.mubr.msk.f32.mxu0 %vm1877_vm0, %v1878_v6 }
  0x4c   : > { %1700 = vmatmul.mubr.msk.f32.gmra.mrb[24].mxu1 %vm358_vm1, %v1034_v18  ;;  %1717 = vmatmul.mubr.msk.f32.gmra.mrb[26].mxu0 %vm358_vm1, %v1133_v19 }
  0xeb   : > { %v444_v20 = vpop.f32.mrb[0].mxu1  ;;  %v434_v21 = vpop.f32.mrb[0].mxu0 }
  0xec   : > { %v1582_v22 = vpop.f32.mrb[1].mxu1  ;;  %v1576_v23 = vpop.f32.mrb[1].mxu0 }
  0xef   : > { %v439_v24 = vpop.f32.mrb[2].mxu0 }
  0xf0   : > { %v1579_v25 = vpop.f32.mrb[3].mxu0 }
  0xf3   : > { %v523_v26 = vpop.f32.mrb[2].mxu1  ;;  %v619_v27 = vpop.f32.mrb[4].mxu0 }
  0xf4   : > { %v524_v28 = vadd.f32 %v523_v26, %v434_v21  ;;  %v1593_v29 = vpop.f32.mrb[3].mxu1  ;;  %v1610_v30 = vpop.f32.mrb[5].mxu0  ;;  %v1500_v21 = vld [vmem:[%s2270_s4] ss:$0 sm:$0xff] }
  0xf6   : > { %v633_v31 = vadd.f32 %v619_v27, %v524_v28 }
  0xf7   : > { %v528_v32 = vpop.f32.mrb[4].mxu1  ;;  %v624_v33 = vpop.f32.mrb[6].mxu0 }
  0xf8   : > { %v529_v6 = vadd.f32 %v528_v32, %v439_v24  ;;  %v1596_v34 = vpop.f32.mrb[5].mxu1  ;;  %v1613_v35 = vpop.f32.mrb[7].mxu0 }
  0xfa   : > { %v634_v36 = vadd.f32 %v624_v33, %v529_v6 }
  0xfb   : > { %v533_v37 = vpop.f32.mrb[6].mxu1  ;;  %v629_v38 = vpop.f32.mrb[8].mxu0 }
  0xfc   : > { %v534_v39 = vadd.f32 %v533_v37, %v444_v20  ;;  %v1599_v40 = vpop.f32.mrb[7].mxu1  ;;  %v1616_v41 = vpop.f32.mrb[9].mxu0 }
  0xfe   : > { %v635_v42 = vadd.f32 %v629_v38, %v534_v39 }
  0xff   : > { %v718_v43 = vpop.f32.mrb[8].mxu1  ;;  %v817_v44 = vpop.f32.mrb[10].mxu0 }
 0x100   : > { %v732_v45 = vadd.f32 %v718_v43, %v633_v31  ;;  %v1627_v46 = vpop.f32.mrb[9].mxu1  ;;  %v1644_v47 = vpop.f32.mrb[11].mxu0 }
 0x102   : > { %v831_v48 = vadd.f32 %v817_v44, %v732_v45 }
 0x103   : > { %v723_v49 = vpop.f32.mrb[10].mxu1  ;;  %v822_v50 = vpop.f32.mrb[12].mxu0 }
 0x104   : > { %v733_v51 = vadd.f32 %v723_v49, %v634_v36  ;;  %v1630_v52 = vpop.f32.mrb[11].mxu1  ;;  %v1647_v53 = vpop.f32.mrb[13].mxu0 }
 0x106   : > { %v832_v54 = vadd.f32 %v822_v50, %v733_v51 }
 0x107   : > { %v728_v55 = vpop.f32.mrb[12].mxu1  ;;  %v827_v56 = vpop.f32.mrb[14].mxu0 }
 0x108   : > { %v734_v57 = vadd.f32 %v728_v55, %v635_v42  ;;  %v1633_v58 = vpop.f32.mrb[13].mxu1  ;;  %v1650_v59 = vpop.f32.mrb[15].mxu0 }
 0x10a   : > { %v833_v60 = vadd.f32 %v827_v56, %v734_v57 }
 0x10b   : > { %v916_v61 = vpop.f32.mrb[14].mxu1  ;;  %v1015_v62 = vpop.f32.mrb[16].mxu0 }
 0x10c   : > { %v930_v63 = vadd.f32 %v916_v61, %v831_v48  ;;  %v1661_v0 = vpop.f32.mrb[15].mxu1  ;;  %v1678_v1 = vpop.f32.mrb[17].mxu0 }
 0x10e   : > { %v1029_v2 = vadd.f32 %v1015_v62, %v930_v63 }
 0x10f   : > { %v921_v4 = vpop.f32.mrb[16].mxu1  ;;  %v1020_v5 = vpop.f32.mrb[18].mxu0 }
 0x110   : > { %v931_v7 = vadd.f32 %v921_v4, %v832_v54  ;;  %v1664_v8 = vpop.f32.mrb[17].mxu1  ;;  %v1681_v9 = vpop.f32.mrb[19].mxu0 }
 0x112   : > { %v1030_v10 = vadd.f32 %v1020_v5, %v931_v7 }
 0x113   : > { %v926_v11 = vpop.f32.mrb[18].mxu1  ;;  %v1025_v12 = vpop.f32.mrb[20].mxu0 }
 0x114   : > { %v932_v13 = vadd.f32 %v926_v11, %v833_v60  ;;  %v1667_v14 = vpop.f32.mrb[19].mxu1  ;;  %v1684_v3 = vpop.f32.mrb[21].mxu0 }
 0x116   : > { %v1031_v15 = vadd.f32 %v1025_v12, %v932_v13 }
 0x117   : > { %v1114_v16 = vpop.f32.mrb[20].mxu1  ;;  %v1213_v17 = vpop.f32.mrb[22].mxu0 }
 0x118   : > { %v1128_v18 = vadd.f32 %v1114_v16, %v1029_v2  ;;  %v1695_v19 = vpop.f32.mrb[21].mxu1  ;;  %v1712_v20 = vpop.f32.mrb[23].mxu0 }
 0x11a   : > { %v1227_v22 = vadd.f32 %v1213_v17, %v1128_v18 }
 0x11b   : > { %v1119_v23 = vpop.f32.mrb[22].mxu1  ;;  %v1218_v24 = vpop.f32.mrb[24].mxu0 }
 0x11c   : > { %v2218_v25 = vadd.f32 %v1500_v21, %v1227_v22  ;;  %v1129_v26 = vadd.f32 %v1119_v23, %v1030_v10  ;;  %v1698_v27 = vpop.f32.mrb[23].mxu1  ;;  %v1715_v28 = vpop.f32.mrb[25].mxu0 }
 0x11d   : > { %v1879_v27 = vmov -1.0  }
 0x11e   : > { %v2221_v29 = vmul.f32 0.70710677, %v2218_v25  ;;  %v1228_v30 = vadd.f32 %v1218_v24, %v1129_v26 }
 0x11f   : > { %v1124_v31 = vpop.f32.mrb[24].mxu1  ;;  %v1223_v32 = vpop.f32.mrb[26].mxu0 }
 0x120   : > { %v1251_v33 = vand.u32 2147483647, %v2221_v29  ;;  %v2224_v6 = vadd.f32 %v1500_v21, %v1228_v30  ;;  %v1130_v34 = vadd.f32 %v1124_v31, %v1031_v15  ;;  %v1701_v35 = vpop.f32.mrb[25].mxu1  ;;  %v1718_v36 = vpop.f32.mrb[27].mxu0  ;;  %vm1245_vm2 = vcmp.ge.f32.partialorder %v2221_v29, 0.0 }
 0x121   : > { %v1248_v28 = vsel %vm1245_vm2, 1.0, %v1879_v27 }
 0x122   : > { %v1254_v37 = vmul.f32 0.3275911, %v1251_v33  ;;  %v2227_v38 = vmul.f32 0.70710677, %v2224_v6  ;;  %v1229_v39 = vadd.f32 %v1223_v32, %v1130_v34  ;;  %v1293_v48 = vsub.f32 0.0, %v1251_v33 }
 0x123   : > { %v1239_v34 = vmul.f32 0.5, %v2218_v25 }
 0x124   : > { %v1257_v40 = vadd.f32 1.0, %v1254_v37  ;;  %v1252_v41 = vand.u32 2147483647, %v2227_v38  ;;  %v2230_v42 = vadd.f32 %v1500_v21, %v1229_v39  ;;  %v1296_v51 = vmul.f32 %v1293_v48, %v1251_v33 }
 0x125   : > { %vm1246_vm3 = vcmp.ge.f32.partialorder %v2227_v38, 0.0  ;;  %v1240_v38 = vmul.f32 0.5, %v2224_v6 }
 0x126   : > { %1824 = vrcp.f32 %v1257_v40  ;;  %v1255_v43 = vmul.f32 0.3275911, %v1252_v41  ;;  %v2233_v44 = vmul.f32 0.70710677, %v2230_v42  ;;  %v1294_v52 = vsub.f32 0.0, %v1252_v41 }
 0x127   : > { %v1299_v56 = vmul.f32 1.442695, %v1296_v51  ;;  %v1249_v36 = vsel %vm1246_vm3, 1.0, %v1879_v27 }
 0x128   : > { %v1258_v45 = vadd.f32 1.0, %v1255_v43  ;;  %v1253_v46 = vand.u32 2147483647, %v2233_v44  ;;  %v1297_v57 = vmul.f32 %v1294_v52, %v1252_v41  ;;  %vm1247_vm5 = vcmp.ge.f32.partialorder %v2233_v44, 0.0 }
 0x12a   : > { %1826 = vrcp.f32 %v1258_v45  ;;  %v1256_v47 = vmul.f32 0.3275911, %v1253_v46  ;;  %v1295_v60 = vsub.f32 0.0, %v1253_v46  ;;  %v1301_v63 = vmul.f32 1.442695, %v1297_v57 }
 0x12c   : > { %v1259_v49 = vadd.f32 1.0, %v1256_v47  ;;  %v1298_v4 = vmul.f32 %v1295_v60, %v1253_v46  ;;  %v1250_v47 = vsel %vm1247_vm5, 1.0, %v1879_v27 }
 0x12e   : > { %1828 = vrcp.f32 %v1259_v49  ;;  %v1303_v12 = vmul.f32 1.442695, %v1298_v4  ;;  %v1241_v49 = vmul.f32 0.5, %v2230_v42 }
 0x12f   : > { %1830 = vpow2.f32 %v1299_v56 }
 0x130   : > { %v1825_v50 = vpop.eup %1824  ;;  %1832 = vpow2.f32 %v1301_v63 }
 0x131   : > { %v1266_v53 = vmul.f32 1.0614054, %v1825_v50  ;;  %1834 = vpow2.f32 %v1303_v12 }
 0x133   : > { %v1269_v54 = vadd.f32 -1.4531521, %v1266_v53 }
 0x134   : > { %v1827_v55 = vpop.eup %1826 }
 0x135   : > { %v1272_v58 = vmul.f32 %v1825_v50, %v1269_v54  ;;  %v1267_v59 = vmul.f32 1.0614054, %v1827_v55 }
 0x137   : > { %v1275_v61 = vadd.f32 1.4214138, %v1272_v58  ;;  %v1270_v62 = vadd.f32 -1.4531521, %v1267_v59 }
 0x138   : > { %v1829_v0 = vpop.eup %1828 }
 0x139   : > { %v1278_v1 = vmul.f32 %v1825_v50, %v1275_v61  ;;  %v1273_v2 = vmul.f32 %v1827_v55, %v1270_v62  ;;  %v1268_v5 = vmul.f32 1.0614054, %v1829_v0  ;;  %v1831_v18 = vpop.eup %1830 }
 0x13a   : > { %v1833_v26 = vpop.eup %1832 }
 0x13b   : > { %v1281_v7 = vadd.f32 -0.28449672, %v1278_v1  ;;  %v1276_v8 = vadd.f32 1.4214138, %v1273_v2  ;;  %v1271_v9 = vadd.f32 -1.4531521, %v1268_v5  ;;  %v1835_v39 = vpop.eup %1834 }
 0x13d   : > { %v1284_v10 = vmul.f32 %v1825_v50, %v1281_v7  ;;  %v1279_v11 = vmul.f32 %v1827_v55, %v1276_v8  ;;  %v1274_v13 = vmul.f32 %v1829_v0, %v1271_v9 }
 0x13f   : > { %v1287_v14 = vadd.f32 0.2548296, %v1284_v10  ;;  %v1282_v3 = vadd.f32 -0.28449672, %v1279_v11  ;;  %v1277_v15 = vadd.f32 1.4214138, %v1274_v13 }
 0x141   : > { %v1290_v16 = vmul.f32 %v1825_v50, %v1287_v14  ;;  %v1285_v17 = vmul.f32 %v1827_v55, %v1282_v3  ;;  %v1280_v19 = vmul.f32 %v1829_v0, %v1277_v15 }
 0x143   : > { %v1305_v20 = vmul.f32 %v1831_v18, %v1290_v16  ;;  %v1288_v21 = vadd.f32 0.2548296, %v1285_v17  ;;  %v1283_v22 = vadd.f32 -0.28449672, %v1280_v19 }
 0x145   : > { %v1308_v23 = vsub.f32 1.0, %v1305_v20  ;;  %v1291_v24 = vmul.f32 %v1827_v55, %v1288_v21  ;;  %v1286_v30 = vmul.f32 %v1829_v0, %v1283_v22 }
 0x147   : > { %v1311_v31 = vmul.f32 %v1308_v23, %v1248_v28  ;;  %v1306_v32 = vmul.f32 %v1833_v26, %v1291_v24  ;;  %v1289_v33 = vadd.f32 0.2548296, %v1286_v30 }
 0x149   : > { %v1314_v35 = vadd.f32 1.0, %v1311_v31  ;;  %v1309_v29 = vsub.f32 1.0, %v1306_v32  ;;  %v1292_v37 = vmul.f32 %v1829_v0, %v1289_v33 }
 0x14b   : > { %v1317_v40 = vmul.f32 %v1314_v35, %v1239_v34  ;;  %v1312_v41 = vmul.f32 %v1309_v29, %v1249_v36  ;;  %v1307_v43 = vmul.f32 %v1835_v39, %v1292_v37 }
 0x14d   : > { %1321 = vst.msk [vmem:[%s342_s17] sm:$0xff] %vm1320_vm4, %v1317_v40  ;;  %v1315_v25 = vadd.f32 1.0, %v1312_v41  ;;  %v1310_v45 = vsub.f32 1.0, %v1307_v43 }
 0x14f   : > { %v1318_v46 = vmul.f32 %v1315_v25, %v1240_v38  ;;  %v1313_v48 = vmul.f32 %v1310_v45, %v1250_v47 }
 0x151   : > { %1322 = vst.msk [vmem:[%s342_s17 + $0x8] sm:$0xff] %vm1320_vm4, %v1318_v46  ;;  %v1316_v50 = vadd.f32 1.0, %v1313_v48 }
 0x153   : > { %v1319_v51 = vmul.f32 %v1316_v50, %v1241_v49 }
 0x155   : > { %1323 = vst.msk [vmem:[%s342_s17 + $0x10] sm:$0xff] %vm1320_vm4, %v1319_v51 }
 0x156 PF: > { %s15_s22 = sadd.s32 1, %s1874_s22   ;;  %s2273_s18 = smov %s1866_s20 }
 0x157   : > { %p12_p10 = scmp.ge.s32.totalorder %s15_s22, 26   ;;  %s2274_s19 = smov %s1870_s21 }
 0x158   : > { %s2275_s20 = smov %s2278_s23  ;;  %s2276_s21 = smov %s2282_s24 }
 0x159   :  { %14 = sbr.rel (!%p12_p10) target bundleno = 3 (0x3), region = 76 }

// kernel: forward.23
= control target key start
LH: loop header
LB: loop body
LE: loop exit
PB: predicated region body
PF: predicated region fallthrough
CT: control target
= control target key end

     0   :  { %s2089_s18 = smov 0   ;;  %s2091_s19 = smov 0   ;;  %s2352_s0 = inlined_call_operand.vmem [shape: f32[2,26,50,16], index: 0, kind: input, shape index: {}, may-alias: {0,1,2}]   ;;  %s2353_s1 = inlined_call_operand.vmem [shape: f32[2,26,50,16], index: 1, kind: input, shape index: {}, may-alias: {0,1,2}]   ;;  %s2354_s2 = inlined_call_operand.vmem [shape: f32[2,26,50,16], index: 2, kind: input, shape index: {}, may-alias: {0,1,2}]   ;;  %s2355_s3 = inlined_call_operand.vmem [shape: f32[144,128], index: 3, kind: input, shape index: {}]   ;;  %s2356_s4 = inlined_call_operand.vmem [shape: f32[1,128], index: 4, kind: input, shape index: {}]   ;;  %s2357_s5 = inlined_call_operand.vmem [shape: f32[2,24,48,1], index: 5, kind: output, shape index: {}]  }
   0x1   :  { %s2093_s20 = smov 0   ;;  %s2095_s21 = smov 0  }
   0x2   :  { %s2097_s22 = smov 0  }
   0x3 LB: > { %s24_s23 = sadd.s32 1, %s2049_s20  ;;  %s27_s24 = sadd.s32 1, %s2053_s21  ;;  %s2057_s22 = sphi %s2097_s22, %s15_s22   ;;  %s2053_s21 = sphi %s2095_s21, %s2362_s21   ;;  %s2049_s20 = sphi %s2093_s20, %s2361_s20   ;;  %s2045_s19 = sphi %s2091_s19, %s2360_s19   ;;  %s2041_s18 = sphi %s2089_s18, %s2359_s18  }
   0x4   : > { %p25_p0 = scmp.ge.s32.totalorder %s24_s23, 24  ;;  %p1636_p1 = scmp.ge.s32.totalorder %s2057_s22, 1 }
   0x5   : > { %p247_p2 = scmp.lt.s32.totalorder %s2057_s22, 49 }
   0x6   : > { %s2364_s23 = smov (%p25_p0, %s24_s23), 0  ;;  %s2366_s24 = smov (!%p25_p0, %s27_s24), %s2053_s21 }
   0x7   : > { %p248_p3 = pnand %p1636_p1, %p247_p2  ;;  %p29_p4 = scmp.ge.s32.totalorder %s2366_s24, 2 }
   0x8   : > { %v358_v0 = vld [vmem:[%s2355_s3 + $0x10] sm:$0xff] (!%p248_p3)  ;;  %v359_v1 = vld [vmem:[%s2355_s3 + $0x18] sm:$0xff] (!%p248_p3)  ;;  %v847_v2 = vld [vmem:[%s2355_s3 + $0x40] sm:$0xff] (!%p248_p3)  ;;  %p303_p5 = scmp.lt.s32.totalorder (!%p248_p3), %s2045_s19, 1  ;;  %p305_p6 = scmp.lt.s32.totalorder (!%p248_p3), %s2041_s18, 25  ;;  %vm360_vm0 = vcmask (!%p248_p3), 130048  }
   0x9   : > { %s2368_s24 = smov (%p29_p4, %s2366_s24), 0  ;;  %251 = sbr.rel (%p248_p3) target bundleno = 298 (0x12a), region = 40 }
   0xa   : > { %v1887_v3 = vpack.c.bf16 (!%p248_p3), %v359_v1, %v358_v0  ;;  %v848_v4 = vld [vmem:[%s2355_s3 + $0x48] sm:$0xff] (!%p248_p3)  ;;  %v350_v5 = vld [vmem:[%s2355_s3] sm:$0xff] (!%p248_p3)  ;;  %s312_s12 = sadd.s32 (!%p248_p3), 1, %s2041_s18  ;;  %v974_v9 = vld [vmem:[%s2355_s3 + $0x50] sm:$0xff] (!%p248_p3)  ;;  %s323_s27 = sadd.s32 (!%p248_p3), 2, %s2041_s18  ;;  %vm1488_vm1 = vcmask (!%p248_p3), 7168  }
   0xb   : > { %v351_v6 = vld [vmem:[%s2355_s3 + $0x8] sm:$0xff] (!%p248_p3)  ;;  %v2141_v7 = vpack.c.bf16 (!%p248_p3), %v848_v4, %v847_v2  ;;  %v975_v10 = vld [vmem:[%s2355_s3 + $0x58] sm:$0xff] (!%p248_p3)  ;;  %p315_p7 = scmp.lt.s32.totalorder (!%p248_p3), %s312_s12, 25  ;;  %v593_v12 = vld [vmem:[%s2355_s3 + $0x20] sm:$0xff] (!%p248_p3)  ;;  %p2170_p8 = scmp.lt.s32.totalorder (!%p248_p3), %s323_s27, 25 }
   0xc   : > { %v1891_v8 = vpack.c.bf16 (!%p248_p3), %v351_v6, %v350_v5  ;;  %1888 = vmatprep.subr.bf16.mxu1 (!%p248_p3), %v1887_v3  ;;  %v1907_v11 = vpack.c.bf16 (!%p248_p3), %v975_v10, %v974_v9  ;;  %v594_v13 = vld [vmem:[%s2355_s3 + $0x28] sm:$0xff] (!%p248_p3)  ;;  %v1101_v18 = vld [vmem:[%s2355_s3 + $0x60] sm:$0xff] (!%p248_p3)  ;;  %v1228_v28 = vld [vmem:[%s2355_s3 + $0x70] sm:$0xff] (!%p248_p3)  ;;  %p336_p9 = scmp.lt.s32.totalorder (!%p248_p3), %s2041_s18, 23 }
   0xd   : > { %1904 = vmatprep.subr.bf16.mxu0 (!%p248_p3), %v2141_v7  ;;  %1890 = vmatpush3.bf16.msra.mxu1 (!%p248_p3), %v1887_v3  ;;  %v1895_v17 = vpack.c.bf16 (!%p248_p3), %v594_v13, %v593_v12  ;;  %v1102_v19 = vld [vmem:[%s2355_s3 + $0x68] sm:$0xff] (!%p248_p3)  ;;  %v1229_v29 = vld [vmem:[%s2355_s3 + $0x78] sm:$0xff] (!%p248_p3)  ;;  %v720_v31 = vld [vmem:[%s2355_s3 + $0x30] sm:$0xff] (!%p248_p3) }
   0xe   : > { %1906 = vmatpush3.bf16.msra.mxu0 (!%p248_p3), %v2141_v7  ;;  %1892 = vmatprep.subr.bf16.mxu1 (!%p248_p3), %v1891_v8  ;;  %v1911_v25 = vpack.c.bf16 (!%p248_p3), %v1102_v19, %v1101_v18  ;;  %v721_v32 = vld [vmem:[%s2355_s3 + $0x38] sm:$0xff] (!%p248_p3)  ;;  %v1915_v35 = vpack.c.bf16 (!%p248_p3), %v1229_v29, %v1228_v28  ;;  %v1355_v46 = vld [vmem:[%s2355_s3 + $0x80] sm:$0xff] (!%p248_p3)  ;;  %v1356_v47 = vld [vmem:[%s2355_s3 + $0x88] sm:$0xff] (!%p248_p3) }
   0xf   : > { %1908 = vmatprep.subr.bf16.mxu0 (!%p248_p3), %v1907_v11  ;;  %v1899_v37 = vpack.c.bf16 (!%p248_p3), %v721_v32, %v720_v31  ;;  %v1919_v51 = vpack.c.bf16 (!%p248_p3), %v1356_v47, %v1355_v46  ;;  %v1695_v19 = vld [vmem:[%s2356_s4] ss:$0 sm:$0xff] (!%p248_p3) }
  0x10   : > { %s2370_s19 = smov (!%p303_p5, %s2045_s19), 1  ;;  %s2372_s12 = smov (!%p315_p7, %s312_s12), 25 }
  0x11   : > { %s306_s17 = scalar_select %p305_p6, %s2041_s18, 25 }
  0x12   : > { %s2154_s25 = smul.u32 182, %s2370_s19  ;;  %s2374_s27 = smov (!%p2170_p8, %s323_s27), 25 }
  0x13   : > { %s1973_s26 = smul.u32 7, %s306_s17  ;;  %s2376_s18 = smov (!%p336_p9, %s2041_s18), 23 }
  0x14   : > { %s1975_s9 = smul.u32 7, %s2372_s12 }
  0x15   : > { %s309_s28 = sadd.s32 %s2154_s25, %s1973_s26  ;;  %s1976_s7 = smul.u32 7, %s2374_s27 }
  0x16   : > { %s1637_s8 = sshll.u32 %s309_s28, 3  ;;  %s319_s15 = sadd.s32 %s1975_s9, %s2154_s25 }
  0x17   : > { %s2168_s13 = scalar_lea.vmem %s2352_s0, %s1637_s8  ;;  %s1638_s12 = sshll.u32 %s319_s15, 3 }
  0x18   : > { %v352_v14 = vld [vmem:[%s2168_s13 + $0x1] sm:$0xff]  ;;  %v353_v15 = vld [vmem:[%s2168_s13 + $0x9] sm:$0xff]  ;;  %v354_v16 = vld [vmem:[%s2168_s13 + $0x11] sm:$0xff]  ;;  %s2189_s6 = scalar_lea.vmem %s2353_s1, %s1638_s12  ;;  %s330_s27 = sadd.s32 %s1976_s7, %s2154_s25 }
  0x19   : > { %1774 = vmatprep.mubr.msk.f32.mxu1 %vm360_vm0, %v352_v14  ;;  %v841_v20 = vld [vmem:[%s2189_s6 + $0x1] sm:$0xff]  ;;  %v842_v21 = vld [vmem:[%s2189_s6 + $0x9] sm:$0xff]  ;;  %v355_v22 = vld [vmem:[%s2168_s13 + $0x19] sm:$0xff]  ;;  %s1639_s25 = sshll.u32 %s330_s27, 3  ;;  %s1977_s9 = smul.u32 6, %s2376_s18 }
  0x1a   : > { %1775 = vmatmul.mubr.msk.f32.vlgmr.msra.gmra.mrb[0].mxu1 %vm360_vm0, %v353_v15  ;;  %1826 = vmatprep.mubr.msk.f32.mxu0 %vm360_vm0, %v841_v20  ;;  %v356_v23 = vld [vmem:[%s2168_s13 + $0x21] sm:$0xff]  ;;  %v357_v26 = vld [vmem:[%s2168_s13 + $0x29] sm:$0xff]  ;;  %v970_v34 = vld [vmem:[%s2189_s6 + $0x12] sm:$0xff]  ;;  %s2236_s28 = scalar_lea.vmem %s2354_s2, %s1639_s25 }
  0x1b   : > { %1894 = vmatpush3.bf16.msra.mxu1 %v1891_v8  ;;  %1777 = vmatprep.mubr.msk.f32.mxu1 %vm360_vm0, %v354_v16  ;;  %v968_v24 = vld [vmem:[%s2189_s6 + $0x2] sm:$0xff]  ;;  %v969_v30 = vld [vmem:[%s2189_s6 + $0xa] sm:$0xff]  ;;  %v971_v38 = vld [vmem:[%s2189_s6 + $0x1a] sm:$0xff] }
  0x1c   : > { %1896 = vmatprep.subr.bf16.mxu1 %v1895_v17  ;;  %1827 = vmatmul.mubr.msk.f32.vlgmr.msra.gmra.mrb[0].mxu0 %vm360_vm0, %v842_v21  ;;  %v344_v27 = vld [vmem:[%s2168_s13] sm:$0xff]  ;;  %v345_v33 = vld [vmem:[%s2168_s13 + $0x8] sm:$0xff]  ;;  %v346_v36 = vld [vmem:[%s2168_s13 + $0x10] sm:$0xff] }
  0x1d   : > { %1910 = vmatpush3.bf16.msra.mxu0 %v1907_v11  ;;  %1839 = vmatprep.mubr.msk.f32.mxu0 %vm360_vm0, %v968_v24  ;;  %v347_v39 = vld [vmem:[%s2168_s13 + $0x18] sm:$0xff]  ;;  %v972_v40 = vld [vmem:[%s2189_s6 + $0x22] sm:$0xff]  ;;  %v973_v42 = vld [vmem:[%s2189_s6 + $0x2a] sm:$0xff] }
  0x1e   : > { %1778 = vmatmul.mubr.msk.f32.gmra.mrb[2].mxu1 %vm360_vm0, %v355_v22  ;;  %1912 = vmatprep.subr.bf16.mxu0 %v1911_v25  ;;  %v348_v41 = vld [vmem:[%s2168_s13 + $0x20] sm:$0xff]  ;;  %v349_v43 = vld [vmem:[%s2168_s13 + $0x28] sm:$0xff]  ;;  %v1097_v50 = vld [vmem:[%s2236_s28 + $0x10] sm:$0xff] }
  0x1f   : > { %1780 = vmatprep.mubr.msk.f32.mxu1 %vm360_vm0, %v356_v23  ;;  %v1095_v44 = vld [vmem:[%s2236_s28] sm:$0xff]  ;;  %v1096_v48 = vld [vmem:[%s2236_s28 + $0x8] sm:$0xff]  ;;  %v589_v52 = vld [vmem:[%s2168_s13 + $0x12] sm:$0xff] }
  0x20   : > { %v587_v45 = vld [vmem:[%s2168_s13 + $0x2] sm:$0xff]  ;;  %v588_v49 = vld [vmem:[%s2168_s13 + $0xa] sm:$0xff]  ;;  %v1098_v53 = vld [vmem:[%s2236_s28 + $0x18] sm:$0xff] }
  0x21   : > { %v590_v54 = vld [vmem:[%s2168_s13 + $0x1a] sm:$0xff]  ;;  %v591_v56 = vld [vmem:[%s2168_s13 + $0x22] sm:$0xff]  ;;  %v592_v58 = vld [vmem:[%s2168_s13 + $0x2a] sm:$0xff]  ;;  %s1978_s13 = smul.u32 144, %s2370_s19 }
  0x22   : > { %1781 = vmatmul.mubr.msk.f32.gmra.mrb[4].mxu1 %vm360_vm0, %v357_v26  ;;  %v1099_v55 = vld [vmem:[%s2236_s28 + $0x20] sm:$0xff]  ;;  %v1100_v57 = vld [vmem:[%s2236_s28 + $0x28] sm:$0xff]  ;;  %v1224_v63 = vld [vmem:[%s2236_s28 + $0x11] sm:$0xff] }
  0x23   : > { %1787 = vmatprep.mubr.msk.f32.mxu1 %vm360_vm0, %v344_v27  ;;  %v1222_v59 = vld [vmem:[%s2236_s28 + $0x1] sm:$0xff]  ;;  %v1223_v61 = vld [vmem:[%s2236_s28 + $0x9] sm:$0xff]  ;;  %v1225_v1 = vld [vmem:[%s2236_s28 + $0x19] sm:$0xff]  ;;  %s340_s10 = sadd.s32 %s1978_s13, %s1977_s9 }
  0x24   : > { %1840 = vmatmul.mubr.msk.f32.vlgmr.msra.gmra.mrb[0].mxu0 %vm360_vm0, %v969_v30  ;;  %v714_v60 = vld [vmem:[%s2189_s6] sm:$0xff]  ;;  %v715_v62 = vld [vmem:[%s2189_s6 + $0x8] sm:$0xff]  ;;  %v716_v0 = vld [vmem:[%s2189_s6 + $0x10] sm:$0xff]  ;;  %s1640_s11 = sshll.u32 %s340_s10, 3 }
  0x25   : > { %1914 = vmatpush3.bf16.msra.mxu0 %v1911_v25  ;;  %1842 = vmatprep.mubr.msk.f32.mxu0 %vm360_vm0, %v970_v34  ;;  %v717_v2 = vld [vmem:[%s2189_s6 + $0x18] sm:$0xff]  ;;  %v1226_v3 = vld [vmem:[%s2236_s28 + $0x21] sm:$0xff]  ;;  %v1227_v5 = vld [vmem:[%s2236_s28 + $0x29] sm:$0xff]  ;;  %s342_s12 = scalar_lea.vmem %s2357_s5, %s1640_s11 }
  0x26   : > { %1788 = vmatmul.mubr.msk.f32.vlgmr.msra.gmra.mrb[0].mxu1 %vm360_vm0, %v345_v33  ;;  %1916 = vmatprep.subr.bf16.mxu0 %v1915_v35  ;;  %v718_v4 = vld [vmem:[%s2189_s6 + $0x20] sm:$0xff]  ;;  %v719_v6 = vld [vmem:[%s2189_s6 + $0x28] sm:$0xff]  ;;  %v843_v8 = vld [vmem:[%s2189_s6 + $0x11] sm:$0xff] }
  0x27   : > { %1898 = vmatpush3.bf16.msra.mxu1 %v1895_v17  ;;  %1790 = vmatprep.mubr.msk.f32.mxu1 %vm360_vm0, %v346_v36  ;;  %v1350_v9 = vld [vmem:[%s2236_s28 + $0xa] sm:$0xff]  ;;  %v844_v10 = vld [vmem:[%s2189_s6 + $0x19] sm:$0xff]  ;;  %v845_v12 = vld [vmem:[%s2189_s6 + $0x21] sm:$0xff] }
  0x28   : > { %1843 = vmatmul.mubr.msk.f32.gmra.mrb[2].mxu0 %vm360_vm0, %v971_v38  ;;  %1900 = vmatprep.subr.bf16.mxu1 %v1899_v37  ;;  %v1351_v11 = vld [vmem:[%s2236_s28 + $0x12] sm:$0xff]  ;;  %v1352_v13 = vld [vmem:[%s2236_s28 + $0x1a] sm:$0xff]  ;;  %v846_v14 = vld [vmem:[%s2189_s6 + $0x29] sm:$0xff] }
  0x29   : > { %1845 = vmatprep.mubr.msk.f32.mxu0 %vm360_vm0, %v972_v40  ;;  %v1353_v15 = vld [vmem:[%s2236_s28 + $0x22] sm:$0xff]  ;;  %v1354_v16 = vld [vmem:[%s2236_s28 + $0x2a] sm:$0xff] }
  0x2a   : > { %1791 = vmatmul.mubr.msk.f32.gmra.mrb[2].mxu1 %vm360_vm0, %v347_v39 }
  0x2b   : > { %1793 = vmatprep.mubr.msk.f32.mxu1 %vm360_vm0, %v348_v41 }
  0x2c   : > { %1846 = vmatmul.mubr.msk.f32.gmra.mrb[4].mxu0 %vm360_vm0, %v973_v42 }
  0x2d   : > { %1852 = vmatprep.mubr.msk.f32.mxu0 %vm360_vm0, %v1095_v44 }
  0x2e   : > { %1794 = vmatmul.mubr.msk.f32.gmra.mrb[4].mxu1 %vm360_vm0, %v349_v43 }
  0x2f   : > { %1800 = vmatprep.mubr.msk.f32.mxu1 %vm360_vm0, %v587_v45 }
  0x30   : > { %1853 = vmatmul.mubr.msk.f32.vlgmr.msra.gmra.mrb[0].mxu0 %vm360_vm0, %v1096_v48 }
  0x31   : > { %1918 = vmatpush3.bf16.msra.mxu0 %v1915_v35  ;;  %1855 = vmatprep.mubr.msk.f32.mxu0 %vm360_vm0, %v1097_v50 }
  0x32   : > { %1801 = vmatmul.mubr.msk.f32.vlgmr.msra.gmra.mrb[0].mxu1 %vm360_vm0, %v588_v49  ;;  %1920 = vmatprep.subr.bf16.mxu0 %v1919_v51 }
  0x33   : > { %1902 = vmatpush3.bf16.msra.mxu1 %v1899_v37  ;;  %1803 = vmatprep.mubr.msk.f32.mxu1 %vm360_vm0, %v589_v52 }
  0x34   : > { %1856 = vmatmul.mubr.msk.f32.gmra.mrb[2].mxu0 %vm360_vm0, %v1098_v53  ;;  %1923 = vmatprep.subr.bf16.mxu1 %v2141_v7 }
  0x35   : > { %1858 = vmatprep.mubr.msk.f32.mxu0 %vm360_vm0, %v1099_v55 }
  0x36   : > { %1804 = vmatmul.mubr.msk.f32.gmra.mrb[2].mxu1 %vm360_vm0, %v590_v54 }
  0x37   : > { %1806 = vmatprep.mubr.msk.f32.mxu1 %vm360_vm0, %v591_v56 }
  0x38   : > { %1859 = vmatmul.mubr.msk.f32.gmra.mrb[4].mxu0 %vm360_vm0, %v1100_v57 }
  0x39   : > { %1865 = vmatprep.mubr.msk.f32.mxu0 %vm360_vm0, %v1222_v59 }
  0x3a   : > { %1807 = vmatmul.mubr.msk.f32.gmra.mrb[4].mxu1 %vm360_vm0, %v592_v58 }
  0x3b   : > { %1813 = vmatprep.mubr.msk.f32.mxu1 %vm360_vm0, %v714_v60 }
  0x3c   : > { %1866 = vmatmul.mubr.msk.f32.vlgmr.msra.gmra.mrb[0].mxu0 %vm360_vm0, %v1223_v61 }
  0x3d   : > { %1922 = vmatpush3.bf16.msra.mxu0 %v1919_v51  ;;  %1868 = vmatprep.mubr.msk.f32.mxu0 %vm360_vm0, %v1224_v63 }
  0x3e   : > { %1814 = vmatmul.mubr.msk.f32.vlgmr.msra.gmra.mrb[0].mxu1 %vm360_vm0, %v715_v62 }
  0x3f   : > { %1924 = vmatpush3.bf16.msra.mxu1 %v2141_v7  ;;  %1816 = vmatprep.mubr.msk.f32.mxu1 %vm360_vm0, %v716_v0  ;;  %v1349_v7 = vld [vmem:[%s2236_s28 + $0x2] sm:$0xff] }
  0x40   : > { %1869 = vmatmul.mubr.msk.f32.gmra.mrb[2].mxu0 %vm360_vm0, %v1225_v1 }
  0x41   : > { %1871 = vmatprep.mubr.msk.f32.mxu0 %vm360_vm0, %v1226_v3 }
  0x42   : > { %1817 = vmatmul.mubr.msk.f32.gmra.mrb[2].mxu1 %vm360_vm0, %v717_v2 }
  0x43   : > { %1819 = vmatprep.mubr.msk.f32.mxu1 %vm360_vm0, %v718_v4 }
  0x44   : > { %1872 = vmatmul.mubr.msk.f32.gmra.mrb[4].mxu0 %vm360_vm0, %v1227_v5 }
  0x45   : > { %1878 = vmatprep.mubr.msk.f32.mxu0 %vm360_vm0, %v1349_v7 }
  0x46   : > { %1820 = vmatmul.mubr.msk.f32.gmra.mrb[4].mxu1 %vm360_vm0, %v719_v6 }
  0x47   : > { %1829 = vmatprep.mubr.msk.f32.mxu1 %vm360_vm0, %v843_v8 }
  0x48   : > { %1879 = vmatmul.mubr.msk.f32.vlgmr.msra.gmra.mrb[0].mxu0 %vm360_vm0, %v1350_v9 }
  0x49   : > { %1881 = vmatprep.mubr.msk.f32.mxu0 %vm360_vm0, %v1351_v11 }
  0x4a   : > { %1830 = vmatmul.mubr.msk.f32.vlgmr.msra.gmra.mrb[2].mxu1 %vm360_vm0, %v844_v10 }
  0x4b   : > { %1832 = vmatprep.mubr.msk.f32.mxu1 %vm360_vm0, %v845_v12 }
  0x4c   : > { %1882 = vmatmul.mubr.msk.f32.gmra.mrb[2].mxu0 %vm360_vm0, %v1352_v13 }
  0x4d   : > { %1884 = vmatprep.mubr.msk.f32.mxu0 %vm360_vm0, %v1353_v15 }
  0x4e   : > { %1833 = vmatmul.mubr.msk.f32.gmra.mrb[4].mxu1 %vm360_vm0, %v846_v14 }
  0x50   : > { %1885 = vmatmul.mubr.msk.f32.gmra.mrb[4].mxu0 %vm360_vm0, %v1354_v16 }
 0x111   : > { %v1815_v17 = vpop.f32.mrb[0].mxu1 }
 0x112   : > { %v806_v18 = vpop.f32.mrb[1].mxu1 }
 0x11b   : > { %v1880_v20 = vpop.f32.mrb[0].mxu0 }
 0x11c   : > { %v1925_v21 = vadd.f32 %v1880_v20, %v1815_v17  ;;  %v1441_v22 = vpop.f32.mrb[1].mxu0 }
 0x11d   : > { %v1831_v23 = vpop.f32.mrb[2].mxu1  ;;  %v1926_v24 = vadd.f32 %v1441_v22, %v806_v18 }
 0x11e   : > { %v943_v25 = vpop.f32.mrb[3].mxu1  ;;  %v1483_v26 = vadd.f32 %v1925_v21, %v1695_v19 }
 0x11f   : > { %v1482_v27 = vadd.f32 %v1926_v24, %v1695_v19  ;;  %v1883_v28 = vpop.f32.mrb[2].mxu0 }
 0x120   : > { %1490 = vst.msk [vmem:[%s342_s12 + $0x8] sm:$0xff] %vm1488_vm1, %v1483_v26  ;;  %v1927_v29 = vadd.f32 %v1883_v28, %v1831_v23  ;;  %v1451_v30 = vpop.f32.mrb[3].mxu0 }
 0x121   : > { %v1834_v31 = vpop.f32.mrb[4].mxu1  ;;  %1489 = vst.msk [vmem:[%s342_s12] sm:$0xff] %vm1488_vm1, %v1482_v27  ;;  %v1928_v32 = vadd.f32 %v1451_v30, %v943_v25 }
 0x122   : > { %v953_v33 = vpop.f32.mrb[5].mxu1  ;;  %v1485_v34 = vadd.f32 %v1927_v29, %v1695_v19 }
 0x123   : > { %v1484_v35 = vadd.f32 %v1928_v32, %v1695_v19  ;;  %v1886_v36 = vpop.f32.mrb[4].mxu0 }
 0x124   : > { %1492 = vst.msk [vmem:[%s342_s12 + $0x18] sm:$0xff] %vm1488_vm1, %v1485_v34  ;;  %v1929_v37 = vadd.f32 %v1886_v36, %v1834_v31  ;;  %v1461_v38 = vpop.f32.mrb[5].mxu0 }
 0x125   : > { %1491 = vst.msk [vmem:[%s342_s12 + $0x10] sm:$0xff] %vm1488_vm1, %v1484_v35  ;;  %v1930_v39 = vadd.f32 %v1461_v38, %v953_v33 }
 0x126   : > { %v1487_v40 = vadd.f32 %v1929_v37, %v1695_v19 }
 0x127   : > { %v1486_v41 = vadd.f32 %v1930_v39, %v1695_v19 }
 0x128   : > { %1494 = vst.msk [vmem:[%s342_s12 + $0x28] sm:$0xff] %vm1488_vm1, %v1487_v40 }
 0x129   : > { %1493 = vst.msk [vmem:[%s342_s12 + $0x20] sm:$0xff] %vm1488_vm1, %v1486_v41 }
 0x12a PF: > { %s15_s22 = sadd.s32 1, %s2057_s22   ;;  %s2359_s18 = smov %s2049_s20 }
 0x12b   : > { %p12_p10 = scmp.ge.s32.totalorder %s15_s22, 50   ;;  %s2360_s19 = smov %s2053_s21 }
 0x12c   : > { %s2361_s20 = smov %s2364_s23  ;;  %s2362_s21 = smov %s2368_s24 }
 0x12d   :  { %14 = sbr.rel (!%p12_p10) target bundleno = 3 (0x3), region = 76 }

</bundles_post_ra>
